<compile_context>
chip_gen: v7x
topology: tpu7x:2x2x1
jax: 0.10.0
libtpu: 0.0.40
codegen_flags: <defaults>
</compile_context>

<pallas_src>
import math

import jax
import jax.numpy as jnp
from jax.experimental import pallas as pl
from jax.experimental.pallas import tpu as pltpu

D_IN = 192
D_HID = 768
EPS = 1e-5
# tanh-approximation GELU constants (pre-folded): sqrt(2/pi), sqrt(2/pi)*0.044715
_K0 = 0.7978845608028654
_K1 = 0.7978845608028654 * 0.044715


def fused_block_kernel(x_ref, y_ref, w1_ref, b1_ref, w2_ref, b2_ref, o_ref):
    # x72 = x57 + x71 : residual add in f32 (matches the PyTorch module).
    x = x_ref[...] + y_ref[...]                                  # (rows, 192) f32

    # LayerNorm(192) statistics on the MXU: a matmul against a 1/D splat matrix
    # gives every column equal to the row mean, avoiding XLU lane-reduction chains
    # and any narrow/broadcast intermediates.
    inv_d = jnp.full((D_IN, D_IN), 1.0 / D_IN, dtype=jnp.float32)  # splat constant
    mean = jnp.dot(x, inv_d, preferred_element_type=jnp.float32)       # row mean, all cols
    msq = jnp.dot(x * x, inv_d, preferred_element_type=jnp.float32)    # row E[x^2]
    var = msq - mean * mean
    xhat = (x - mean) * jax.lax.rsqrt(var + EPS)
    # LN affine (gamma, beta) is folded into W1/b1 at parameter-prep time.

    # Linear 192 -> 768 (+ folded bias): bf16 operands on the MXU, f32 accumulate.
    h = jnp.dot(xhat.astype(jnp.bfloat16), w1_ref[...],
                preferred_element_type=jnp.float32) + b1_ref[...]

    # GELU (tanh form; tanh goes to the EUP, constants pre-folded, h*h reused).
    h2 = h * h
    t = jnp.tanh(h * (_K0 + _K1 * h2))
    g = (0.5 * h) * (1.0 + t)

    # Dropout(p=0.0) -> identity.

    # Linear 768 -> 192 (+bias): bf16 operands on the MXU, f32 accumulate.
    out = jnp.dot(g.astype(jnp.bfloat16), w2_ref[...],
                  preferred_element_type=jnp.float32) + b2_ref[...]

    # Dropout(p=0.0) -> identity.
    o_ref[...] = out.astype(o_ref.dtype)


def prepare_params(gamma, beta, w1, b1, w2, b2):
    """One-time parameter preparation (cache the result across calls).

    * Folds the LayerNorm affine into the first Linear:
        W1' = diag(gamma) @ W1 ,  b1' = beta @ W1 + b1
    * Casts the weight matrices to bf16 once (halves their HBM traffic), so no
      per-call conversion launches are needed.
    """
    gamma = gamma.astype(jnp.float32)
    beta = beta.astype(jnp.float32)
    w1 = w1.astype(jnp.float32)
    w1f = gamma[:, None] * w1
    b1f = beta @ w1 + b1.astype(jnp.float32)
    return (w1f.astype(jnp.bfloat16),
            b1f.reshape(1, D_HID).astype(jnp.float32),
            w2.astype(jnp.bfloat16),
            b2.reshape(1, D_IN).astype(jnp.float32))


def fused_mlp_block(x57, x71, w1b, b1f, w2b, b2f, *, num_row_tiles=2):
    """(x57 + x71) -> LayerNorm -> Linear -> GELU -> Dropout(0) -> Linear -> Dropout(0)."""
    orig_shape = x57.shape
    rows = math.prod(orig_shape[:-1])
    d_in = orig_shape[-1]
    d_hid = w1b.shape[1]

    # 2 row tiles by default: pipelines the input DMA on single-TC parts and splits
    # the work across both TensorCores on v7x.  Fall back to a single full tile if
    # the rows do not split into sublane-aligned tiles.
    if rows % num_row_tiles != 0 or (rows // num_row_tiles) % 8 != 0:
        num_row_tiles = 1
    tile_rows = rows // num_row_tiles

    x2d = x57.reshape(rows, d_in)      # f32: no wrapper-side dtype casts
    y2d = x71.reshape(rows, d_in)

    out = pl.pallas_call(
        fused_block_kernel,
        out_shape=jax.ShapeDtypeStruct((rows, d_in), jnp.float32),
        grid_spec=pltpu.PrefetchScalarGridSpec(
            num_scalar_prefetch=0,
            grid=(num_row_tiles,),
            in_specs=[
                pl.BlockSpec((tile_rows, d_in), lambda i: (i, 0)),   # x57 tile (f32)
                pl.BlockSpec((tile_rows, d_in), lambda i: (i, 0)),   # x71 tile (f32)
                pl.BlockSpec((d_in, d_hid), lambda i: (0, 0)),       # W1' (bf16, LN-folded)
                pl.BlockSpec((1, d_hid), lambda i: (0, 0)),          # b1' (f32, LN-folded)
                pl.BlockSpec((d_hid, d_in), lambda i: (0, 0)),       # W2  (bf16)
                pl.BlockSpec((1, d_in), lambda i: (0, 0)),           # b2  (f32)
            ],
            out_specs=pl.BlockSpec((tile_rows, d_in), lambda i: (i, 0)),
        ),
        compiler_params=pltpu.CompilerParams(
            dimension_semantics=("parallel",),
            vmem_limit_bytes=32 * 1024 * 1024,
        ),
    )(x2d, y2d, w1b, b1f, w2b, b2f)

    return out.reshape(orig_shape)


def reference_exact(x57, x71, gamma, beta, w1, b1, w2, b2):
    """f32 / exact-erf GELU reference matching the PyTorch module semantics."""
    x = x57 + x71
    mean = jnp.mean(x, axis=-1, keepdims=True)
    var = jnp.mean((x - mean) ** 2, axis=-1, keepdims=True)
    xn = (x - mean) * jax.lax.rsqrt(var + EPS) * gamma + beta
    h = xn @ w1 + b1
    h = 0.5 * h * (1.0 + jax.lax.erf(h * (1.0 / math.sqrt(2.0))))
    return h @ w2 + b2


if __name__ == "__main__":
    key = jax.random.PRNGKey(0)
    k1, k2, k3, k4, k5, k6, k7, k8 = jax.random.split(key, 8)

    # Inputs: same shapes as the PyTorch module's sample tensors.
    x57 = jax.random.normal(k1, (1, 28, 28, D_IN), dtype=jnp.float32)
    x71 = jax.random.normal(k2, (1, 28, 28, D_IN), dtype=jnp.float32)

    # Deterministic parameters (PyTorch Linear-like uniform ranges).  LN affine is
    # perturbed away from identity so the gamma/beta folding path is exercised.
    gamma = 1.0 + 0.1 * jax.random.normal(k3, (D_IN,), dtype=jnp.float32)
    beta = 0.1 * jax.random.normal(k4, (D_IN,), dtype=jnp.float32)
    lim1 = 1.0 / math.sqrt(D_IN)
    lim2 = 1.0 / math.sqrt(D_HID)
    w1 = jax.random.uniform(k5, (D_IN, D_HID), jnp.float32, -lim1, lim1)
    b1 = jax.random.uniform(k6, (D_HID,), jnp.float32, -lim1, lim1)
    w2 = jax.random.uniform(k7, (D_HID, D_IN), jnp.float32, -lim2, lim2)
    b2 = jax.random.uniform(k8, (D_IN,), jnp.float32, -lim2, lim2)

    # One-time parameter prep (would be cached alongside the model weights).
    params = prepare_params(gamma, beta, w1, b1, w2, b2)

    out = fused_mlp_block(x57, x71, *params)
    out = jax.block_until_ready(out)
    assert out.shape == (1, 28, 28, D_IN)
    assert out.dtype == jnp.float32

    # Check against the module's f32 / exact-erf semantics.  Tolerance covers the
    # bf16 MXU operands + tanh-form GELU (observed deviation is ~1e-3).
    ref = reference_exact(x57, x71, gamma, beta, w1, b1, w2, b2)
    assert jnp.allclose(out, ref, atol=2.5e-2, rtol=2.5e-2), \
        float(jnp.max(jnp.abs(out - ref)))

    print("KERNEL_OK")
</pallas_src>

<mosaic_0001>
module attributes {stable_mosaic.version = 11 : i64} {
  func.func @fused_block_kernel(%arg0: i32, %arg1: memref<392x192xf32, #tpu.memory_space<vmem>>, %arg2: memref<392x192xf32, #tpu.memory_space<vmem>>, %arg3: memref<192x768xbf16, #tpu.memory_space<vmem>>, %arg4: memref<1x768xf32, #tpu.memory_space<vmem>>, %arg5: memref<768x192xbf16, #tpu.memory_space<vmem>>, %arg6: memref<1x192xf32, #tpu.memory_space<vmem>>, %arg7: memref<392x192xf32, #tpu.memory_space<vmem>>) attributes {dimension_semantics = [#tpu.dimension_semantics<parallel>], iteration_bounds = array<i64: 2>, scalar_prefetch = 0 : i64, scratch_operands = 0 : i64, tpu.core_type = #tpu.core_type<tc>, window_params = [{transform_indices = @transform_0, window_bounds = array<i64: 392, 192>}, {transform_indices = @transform_1, window_bounds = array<i64: 392, 192>}, {pipeline_mode = #tpu.pipeline_mode<synchronous>, transform_indices = @transform_2, window_bounds = array<i64: 192, 768>}, {pipeline_mode = #tpu.pipeline_mode<synchronous>, transform_indices = @transform_3, window_bounds = array<i64: 1, 768>}, {pipeline_mode = #tpu.pipeline_mode<synchronous>, transform_indices = @transform_4, window_bounds = array<i64: 768, 192>}, {pipeline_mode = #tpu.pipeline_mode<synchronous>, transform_indices = @transform_5, window_bounds = array<i64: 1, 192>}, {transform_indices = @transform_6, window_bounds = array<i64: 392, 192>}]} {
    %c0 = arith.constant 0 : index
    %c0_0 = arith.constant 0 : index
    %0 = vector.load %arg1[%c0, %c0_0] : memref<392x192xf32, #tpu.memory_space<vmem>>, vector<392x192xf32>
    %c0_1 = arith.constant 0 : index
    %c0_2 = arith.constant 0 : index
    %1 = vector.load %arg2[%c0_1, %c0_2] : memref<392x192xf32, #tpu.memory_space<vmem>>, vector<392x192xf32>
    %2 = arith.addf %0, %1 : vector<392x192xf32>
    %cst = arith.constant 0.00520833349 : f32
    %3 = vector.broadcast %cst : f32 to vector<192x192xf32>
    %cst_3 = arith.constant dense<0.000000e+00> : vector<392x192xf32>
    %4 = tpu.matmul %2, %3, %cst_3 {dimension_numbers = #tpu.dot_dimension_numbers<[1], [0], [0], [1], [0, 0, 1, 1], [], []>} : vector<392x192xf32>, vector<192x192xf32>, vector<392x192xf32> -> vector<392x192xf32>
    %5 = arith.mulf %2, %2 : vector<392x192xf32>
    %cst_4 = arith.constant dense<0.000000e+00> : vector<392x192xf32>
    %6 = tpu.matmul %5, %3, %cst_4 {dimension_numbers = #tpu.dot_dimension_numbers<[1], [0], [0], [1], [0, 0, 1, 1], [], []>} : vector<392x192xf32>, vector<192x192xf32>, vector<392x192xf32> -> vector<392x192xf32>
    %7 = arith.mulf %4, %4 : vector<392x192xf32>
    %8 = arith.subf %6, %7 : vector<392x192xf32>
    %9 = arith.subf %2, %4 : vector<392x192xf32>
    %cst_5 = arith.constant 9.99999974E-6 : f32
    %10 = vector.broadcast %cst_5 : f32 to vector<392x192xf32>
    %11 = arith.addf %8, %10 : vector<392x192xf32>
    %12 = math.rsqrt %11 : vector<392x192xf32>
    %13 = arith.mulf %9, %12 : vector<392x192xf32>
    %14 = arith.truncf %13 : vector<392x192xf32> to vector<392x192xbf16>
    %c0_6 = arith.constant 0 : index
    %c0_7 = arith.constant 0 : index
    %15 = vector.load %arg3[%c0_6, %c0_7] : memref<192x768xbf16, #tpu.memory_space<vmem>>, vector<192x768xbf16>
    %cst_8 = arith.constant dense<0.000000e+00> : vector<392x768xf32>
    %16 = tpu.matmul %14, %15, %cst_8 {dimension_numbers = #tpu.dot_dimension_numbers<[1], [0], [0], [1], [0, 0, 1, 1], [], []>} : vector<392x192xbf16>, vector<192x768xbf16>, vector<392x768xf32> -> vector<392x768xf32>
    %c0_9 = arith.constant 0 : index
    %c0_10 = arith.constant 0 : index
    %17 = vector.load %arg4[%c0_9, %c0_10] : memref<1x768xf32, #tpu.memory_space<vmem>>, vector<1x768xf32>
    %18 = vector.broadcast %17 : vector<1x768xf32> to vector<392x768xf32>
    %19 = arith.addf %16, %18 : vector<392x768xf32>
    %20 = arith.mulf %19, %19 : vector<392x768xf32>
    %cst_11 = arith.constant 0.0356774069 : f32
    %21 = vector.broadcast %cst_11 : f32 to vector<392x768xf32>
    %22 = arith.mulf %21, %20 : vector<392x768xf32>
    %cst_12 = arith.constant 0.797884583 : f32
    %23 = vector.broadcast %cst_12 : f32 to vector<392x768xf32>
    %24 = arith.addf %23, %22 : vector<392x768xf32>
    %25 = arith.mulf %19, %24 : vector<392x768xf32>
    %26 = math.tanh %25 : vector<392x768xf32>
    %cst_13 = arith.constant 5.000000e-01 : f32
    %27 = vector.broadcast %cst_13 : f32 to vector<392x768xf32>
    %28 = arith.mulf %27, %19 : vector<392x768xf32>
    %cst_14 = arith.constant 1.000000e+00 : f32
    %29 = vector.broadcast %cst_14 : f32 to vector<392x768xf32>
    %30 = arith.addf %29, %26 : vector<392x768xf32>
    %31 = arith.mulf %28, %30 : vector<392x768xf32>
    %32 = arith.truncf %31 : vector<392x768xf32> to vector<392x768xbf16>
    %c0_15 = arith.constant 0 : index
    %c0_16 = arith.constant 0 : index
    %33 = vector.load %arg5[%c0_15, %c0_16] : memref<768x192xbf16, #tpu.memory_space<vmem>>, vector<768x192xbf16>
    %cst_17 = arith.constant dense<0.000000e+00> : vector<392x192xf32>
    %34 = tpu.matmul %32, %33, %cst_17 {dimension_numbers = #tpu.dot_dimension_numbers<[1], [0], [0], [1], [0, 0, 1, 1], [], []>} : vector<392x768xbf16>, vector<768x192xbf16>, vector<392x192xf32> -> vector<392x192xf32>
    %c0_18 = arith.constant 0 : index
    %c0_19 = arith.constant 0 : index
    %35 = vector.load %arg6[%c0_18, %c0_19] : memref<1x192xf32, #tpu.memory_space<vmem>>, vector<1x192xf32>
    %36 = vector.broadcast %35 : vector<1x192xf32> to vector<392x192xf32>
    %37 = arith.addf %34, %36 : vector<392x192xf32>
    %c0_20 = arith.constant 0 : index
    %c0_21 = arith.constant 0 : index
    %38 = vector.load %arg7[%c0_20, %c0_21] : memref<392x192xf32, #tpu.memory_space<vmem>>, vector<392x192xf32>
    tpu.vector_store %arg7[%c0_20, %c0_21], %37 {strides = array<i32>} : memref<392x192xf32, #tpu.memory_space<vmem>>, vector<392x192xf32>,
    return
  }
  func.func @transform_0(%arg0: i32) -> (i32, i32) {
    %c0_i32 = arith.constant 0 : i32
    %c0_i32_0 = arith.constant 0 : i32
    return %arg0, %c0_i32 : i32, i32
  }
  func.func @transform_1(%arg0: i32) -> (i32, i32) {
    %c0_i32 = arith.constant 0 : i32
    %c0_i32_0 = arith.constant 0 : i32
    return %arg0, %c0_i32 : i32, i32
  }
  func.func @transform_2(%arg0: i32) -> (i32, i32) {
    %c0_i32 = arith.constant 0 : i32
    %c0_i32_0 = arith.constant 0 : i32
    %c0_i32_1 = arith.constant 0 : i32
    return %c0_i32, %c0_i32_0 : i32, i32
  }
  func.func @transform_3(%arg0: i32) -> (i32, i32) {
    %c0_i32 = arith.constant 0 : i32
    %c0_i32_0 = arith.constant 0 : i32
    %c0_i32_1 = arith.constant 0 : i32
    return %c0_i32, %c0_i32_0 : i32, i32
  }
  func.func @transform_4(%arg0: i32) -> (i32, i32) {
    %c0_i32 = arith.constant 0 : i32
    %c0_i32_0 = arith.constant 0 : i32
    %c0_i32_1 = arith.constant 0 : i32
    return %c0_i32, %c0_i32_0 : i32, i32
  }
  func.func @transform_5(%arg0: i32) -> (i32, i32) {
    %c0_i32 = arith.constant 0 : i32
    %c0_i32_0 = arith.constant 0 : i32
    %c0_i32_1 = arith.constant 0 : i32
    return %c0_i32, %c0_i32_0 : i32, i32
  }
  func.func @transform_6(%arg0: i32) -> (i32, i32) {
    %c0_i32 = arith.constant 0 : i32
    %c0_i32_0 = arith.constant 0 : i32
    return %arg0, %c0_i32 : i32, i32
  }
}

</mosaic_0001>

<bundles_post_ra>
// kernel: tpu_custom_call.1
= control target key start
LH: loop header
LB: loop body
LE: loop exit
PB: predicated region body
PF: predicated region fallthrough
CT: control target
= control target key end

     0   :  { %s9606_s21 = smov 0   ;;  %s15367_s0 = inlined_call_operand.vmem [shape: f32[784,192], index: 0, kind: input, shape index: {}]   ;;  %s15368_s1 = inlined_call_operand.vmem [shape: f32[784,192], index: 1, kind: input, shape index: {}]   ;;  %s15369_s2 = inlined_call_operand.vmem [shape: bf16[192,768], index: 2, kind: input, shape index: {}]   ;;  %s15370_s3 = inlined_call_operand.vmem [shape: f32[1,768], index: 3, kind: input, shape index: {}]   ;;  %s15371_s4 = inlined_call_operand.vmem [shape: bf16[768,192], index: 4, kind: input, shape index: {}]   ;;  %s15372_s5 = inlined_call_operand.vmem [shape: f32[1,192], index: 5, kind: input, shape index: {}]   ;;  %s15373_s6 = inlined_call_operand.vmem [shape: f32[784,192], index: 6, kind: output, shape index: {}]  }
   0x1 LB: > { %s7812_s22 = sadd.s32 4294967295, %s9568_s21   ;;  %p7816_p0 = scmp.ge.s32.totalorder %s9568_s21, 1  ;;  %s9568_s21 = sphi %s9606_s21, %s16_s21  }
   0x2   : > { %p226_p1 = scmp.lt.s32.totalorder %s9568_s21, 3 }
   0x4   : > { %p227_p2 = pnand %p7816_p0, %p226_p1 }
   0x6   : > { %230 = sbr.rel (%p227_p2) target bundleno = 1455 (0x5af), region = 44 }
   0xd   : > { %s264_s23 = smul.u32 49, %s7812_s22  ;;  %v9570_v0 = vmov 0.005218506|0.005218506   ;;  %vm580_vm0 = vcmask 523264   ;;  %v8526_v15 = vld [vmem:[%s15369_s2 + $0x4] ss:$24 sps:$4 sm:$0xff]  }
   0xe   : > { %8169 = vmatprep.subr.bf16.mxu0 %v9570_v0  ;;  %8193 = vmatprep.subr.bf16.mxu1 %v9570_v0  ;;  %v8524_v24 = vld [vmem:[%s15369_s2] ss:$24 sps:$4 sm:$0xff]   ;;  %v8529_v25 = vld [vmem:[%s15369_s2 + $0x34] ss:$24 sps:$4 sm:$0xff]   ;;  %v8527_v34 = vld [vmem:[%s15369_s2 + $0x30] ss:$24 sps:$4 sm:$0xff]  }
   0xf   : > { %8170 = vmatpush1.bf16.msra.mxu0 %v9570_v0  ;;  %8194 = vmatpush1.bf16.msra.mxu1 %v9570_v0  ;;  %p265_p3 = scmp.lt.s32.totalorder %s264_s23, 97  ;;  %v8532_v35 = vld [vmem:[%s15369_s2 + $0x64] ss:$24 sps:$4 sm:$0xff]   ;;  %v8530_v44 = vld [vmem:[%s15369_s2 + $0x60] ss:$24 sps:$4 sm:$0xff]  }
  0x10   : > { %8171 = vmatprep.subr.bf16.mxu0 %v9570_v0  ;;  %8195 = vmatprep.subr.bf16.mxu1 %v9570_v0  ;;  %v8535_v47 = vld [vmem:[%s15369_s2 + $0x94] ss:$24 sps:$4 sm:$0xff]   ;;  %v8533_v52 = vld [vmem:[%s15369_s2 + $0x90] ss:$24 sps:$4 sm:$0xff]   ;;  %v8538_v56 = vld [vmem:[%s15369_s2 + $0xc4] ss:$24 sps:$4 sm:$0xff]  }
  0x11   : > { %s15870_s23 = smov (!%p265_p3, %s264_s23), 97 }
  0x12   : > { %s9622_s24 = sshll.u32 %s15870_s23, 4 }
  0x13   : > { %8172 = vmatpush1.bf16.msra.mxu0 %v9570_v0  ;;  %8196 = vmatpush1.bf16.msra.mxu1 %v9570_v0  ;;  %s9630_s27 = scalar_lea.vmem %s15367_s0, %s9622_s24  ;;  %s9636_s30 = scalar_lea.vmem %s15368_s1, %s9622_s24 }
  0x14   : > { %8173 = vmatprep.subr.bf16.mxu0 %v9570_v0  ;;  %8197 = vmatprep.subr.bf16.mxu1 %v9570_v0  ;;  %v287_v1 = vld [vmem:[%s9630_s27 + $0x8] sm:$0xff]  ;;  %v286_v5 = vld [vmem:[%s9630_s27] sm:$0xff]  ;;  %v289_v7 = vld [vmem:[%s9630_s27 + $0x18] sm:$0xff] }
  0x15   : > { %v385_v2 = vld [vmem:[%s9636_s30 + $0x8] sm:$0xff]  ;;  %v384_v6 = vld [vmem:[%s9636_s30] sm:$0xff]  ;;  %v387_v8 = vld [vmem:[%s9636_s30 + $0x18] sm:$0xff] }
  0x16   : > { %v9640_v3 = vadd.f32 %v385_v2, %v287_v1  ;;  %v9683_v9 = vadd.f32 %v384_v6, %v286_v5  ;;  %v9687_v10 = vadd.f32 %v387_v8, %v289_v7  ;;  %v288_v11 = vld [vmem:[%s9630_s27 + $0x10] sm:$0xff]  ;;  %v291_v13 = vld [vmem:[%s9630_s27 + $0x28] sm:$0xff]  ;;  %v290_v20 = vld [vmem:[%s9630_s27 + $0x20] sm:$0xff] }
  0x17   : > { %8174 = vmatpush1.bf16.msra.mxu0 %v9570_v0  ;;  %8198 = vmatpush1.bf16.msra.mxu1 %v9570_v0  ;;  %v386_v12 = vld [vmem:[%s9636_s30 + $0x10] sm:$0xff]  ;;  %v389_v14 = vld [vmem:[%s9636_s30 + $0x28] sm:$0xff]  ;;  %v388_v21 = vld [vmem:[%s9636_s30 + $0x20] sm:$0xff] }
  0x18   : > { %8175 = vmatprep.subr.bf16.mxu0 %v9570_v0  ;;  %8199 = vmatprep.subr.bf16.mxu1 %v9570_v0  ;;  %v1088_v4 = vmul.f32 %v9640_v3, %v9640_v3  ;;  %v1087_v16 = vmul.f32 %v9683_v9, %v9683_v9  ;;  %v9700_v17 = vadd.f32 %v386_v12, %v288_v11  ;;  %v293_v22 = vld [vmem:[%s9630_s27 + $0x38] sm:$0xff]  ;;  %v292_v30 = vld [vmem:[%s9630_s27 + $0x30] sm:$0xff]  ;;  %v295_v32 = vld [vmem:[%s9630_s27 + $0x48] sm:$0xff] }
  0x19   : > { %7823 = vmatprep.mubr.msk.f32.mxu0 %vm580_vm0, %v9640_v3  ;;  %v1090_v18 = vmul.f32 %v9687_v10, %v9687_v10  ;;  %v9706_v19 = vadd.f32 %v389_v14, %v291_v13  ;;  %v391_v23 = vld [vmem:[%s9636_s30 + $0x38] sm:$0xff]  ;;  %v9721_v27 = vadd.f32 %v388_v21, %v290_v20  ;;  %v390_v31 = vld [vmem:[%s9636_s30 + $0x30] sm:$0xff]  ;;  %v393_v33 = vld [vmem:[%s9636_s30 + $0x48] sm:$0xff] }
  0x1a   : > { %7872 = vmatprep.mubr.msk.f32.mxu1 %vm580_vm0, %v1088_v4  ;;  %v1089_v26 = vmul.f32 %v9700_v17, %v9700_v17  ;;  %v9728_v29 = vadd.f32 %v391_v23, %v293_v22  ;;  %v9743_v37 = vadd.f32 %v390_v31, %v292_v30  ;;  %v9750_v39 = vadd.f32 %v393_v33, %v295_v32  ;;  %v294_v40 = vld [vmem:[%s9630_s27 + $0x40] sm:$0xff]  ;;  %v297_v42 = vld [vmem:[%s9630_s27 + $0x58] sm:$0xff]  ;;  %v296_v45 = vld [vmem:[%s9630_s27 + $0x50] sm:$0xff] }
  0x1b   : > { %8176 = vmatpush1.bf16.msra.mxu0 %v9570_v0  ;;  %8200 = vmatpush1.bf16.msra.mxu1 %v9570_v0  ;;  %v1092_v28 = vmul.f32 %v9706_v19, %v9706_v19  ;;  %v1091_v36 = vmul.f32 %v9721_v27, %v9721_v27  ;;  %v392_v41 = vld [vmem:[%s9636_s30 + $0x40] sm:$0xff]  ;;  %v395_v43 = vld [vmem:[%s9636_s30 + $0x58] sm:$0xff]  ;;  %v394_v46 = vld [vmem:[%s9636_s30 + $0x50] sm:$0xff] }
  0x1c   : > { %8177 = vmatprep.subr.bf16.mxu0 %v9570_v0  ;;  %8201 = vmatprep.subr.bf16.mxu1 %v9570_v0  ;;  %v1094_v38 = vmul.f32 %v9728_v29, %v9728_v29  ;;  %v1093_v48 = vmul.f32 %v9743_v37, %v9743_v37  ;;  %v9767_v49 = vadd.f32 %v392_v41, %v294_v40  ;;  %v299_v50 = vld [vmem:[%s9630_s27 + $0x68] sm:$0xff]  ;;  %v298_v55 = vld [vmem:[%s9630_s27 + $0x60] sm:$0xff]  ;;  %v301_v60 = vld [vmem:[%s9630_s27 + $0x78] sm:$0xff] }
  0x1d   : > { %v397_v51 = vld [vmem:[%s9636_s30 + $0x68] sm:$0xff]  ;;  %v1096_v53 = vmul.f32 %v9750_v39, %v9750_v39  ;;  %v9779_v54 = vadd.f32 %v395_v43, %v297_v42  ;;  %v9788_v58 = vadd.f32 %v394_v46, %v296_v45  ;;  %v396_v59 = vld [vmem:[%s9636_s30 + $0x60] sm:$0xff]  ;;  %v399_v61 = vld [vmem:[%s9636_s30 + $0x78] sm:$0xff] }
  0x1e   : > { %v1095_v57 = vmul.f32 %v9767_v49, %v9767_v49  ;;  %v9798_v63 = vadd.f32 %v397_v51, %v299_v50  ;;  %v300_v1 = vld [vmem:[%s9630_s27 + $0x70] sm:$0xff]  ;;  %v9811_v6 = vadd.f32 %v396_v59, %v298_v55  ;;  %v303_v7 = vld [vmem:[%s9630_s27 + $0x88] sm:$0xff]  ;;  %v9823_v13 = vadd.f32 %v399_v61, %v301_v60  ;;  %v302_v14 = vld [vmem:[%s9630_s27 + $0x80] sm:$0xff] }
  0x1f   : > { %8178 = vmatpush1.bf16.msra.mxu0 %v9570_v0  ;;  %8202 = vmatpush1.bf16.msra.mxu1 %v9570_v0  ;;  %v1098_v62 = vmul.f32 %v9779_v54, %v9779_v54  ;;  %v398_v2 = vld [vmem:[%s9636_s30 + $0x70] sm:$0xff]  ;;  %v1097_v5 = vmul.f32 %v9788_v58, %v9788_v58  ;;  %v401_v8 = vld [vmem:[%s9636_s30 + $0x88] sm:$0xff]  ;;  %v305_v21 = vld [vmem:[%s9630_s27 + $0x98] sm:$0xff] }
  0x20   : > { %8179 = vmatprep.subr.bf16.mxu0 %v9570_v0  ;;  %8203 = vmatprep.subr.bf16.mxu1 %v9570_v0  ;;  %v8541_v4 = vld [vmem:[%s15369_s2 + $0xf4] ss:$24 sps:$4 sm:$0xff]   ;;  %v8539_v11 = vld [vmem:[%s15369_s2 + $0xf0] ss:$24 sps:$4 sm:$0xff]   ;;  %v1100_v12 = vmul.f32 %v9798_v63, %v9798_v63  ;;  %v9833_v20 = vadd.f32 %v398_v2, %v300_v1  ;;  %v403_v22 = vld [vmem:[%s9636_s30 + $0x98] sm:$0xff] }
  0x21   : > { %v8542_v23 = vld [vmem:[%s15369_s2 + $0x120] ss:$24 sps:$4 sm:$0xff]   ;;  %v307_v32 = vld [vmem:[%s9630_s27 + $0xa8] sm:$0xff]  ;;  %v406_v50 = vld [vmem:[%s9636_s30 + $0xb0] sm:$0xff] }
  0x22   : > { %v1101_v30 = vmul.f32 %v9833_v20, %v9833_v20  ;;  %v405_v33 = vld [vmem:[%s9636_s30 + $0xa8] sm:$0xff]  ;;  %v309_v42 = vld [vmem:[%s9630_s27 + $0xb8] sm:$0xff]  ;;  %v310_v59 = vld [vmem:[%s9630_s27 + $0xc0] sm:$0xff] }
  0x23   : > { %8180 = vmatpush1.bf16.msra.mxu0 %v9570_v0  ;;  %8204 = vmatpush1.bf16.msra.mxu1 %v9570_v0  ;;  %v8545_v43 = vld [vmem:[%s15369_s2 + $0x150] ss:$24 sps:$4 sm:$0xff]   ;;  %v9882_v46 = vadd.f32 %v405_v33, %v307_v32  ;;  %v408_v60 = vld [vmem:[%s9636_s30 + $0xc0] sm:$0xff]  ;;  %v411_v1 = vld [vmem:[%s9636_s30 + $0xd8] sm:$0xff] }
  0x24   : > { %8181 = vmatprep.subr.bf16.mxu0 %v9570_v0  ;;  %8205 = vmatprep.subr.bf16.mxu1 %v9570_v0  ;;  %v409_v55 = vld [vmem:[%s9636_s30 + $0xc8] sm:$0xff]  ;;  %v415_v33 = vld [vmem:[%s9636_s30 + $0xf8] sm:$0xff] }
  0x27   : > { %8182 = vmatpush1.bf16.msra.mxu0 %v9570_v0  ;;  %8206 = vmatpush1.bf16.msra.mxu1 %v9570_v0 }
  0x28   : > { %8183 = vmatprep.subr.bf16.mxu0 %v9570_v0  ;;  %8207 = vmatprep.subr.bf16.mxu1 %v9570_v0 }
  0x2b   : > { %8184 = vmatpush1.bf16.msra.mxu0 %v9570_v0  ;;  %8208 = vmatpush1.bf16.msra.mxu1 %v9570_v0 }
  0x2c   : > { %8185 = vmatprep.subr.bf16.mxu0 %v9570_v0  ;;  %8209 = vmatprep.subr.bf16.mxu1 %v9570_v0 }
  0x2f   : > { %8186 = vmatpush1.bf16.msra.mxu0 %v9570_v0  ;;  %8210 = vmatpush1.bf16.msra.mxu1 %v9570_v0 }
  0x30   : > { %8187 = vmatprep.subr.bf16.mxu0 %v9570_v0  ;;  %8211 = vmatprep.subr.bf16.mxu1 %v9570_v0 }
  0x33   : > { %8188 = vmatpush1.bf16.msra.mxu0 %v9570_v0  ;;  %8212 = vmatpush1.bf16.msra.mxu1 %v9570_v0 }
  0x34   : > { %8189 = vmatprep.subr.bf16.mxu0 %v9570_v0  ;;  %8213 = vmatprep.subr.bf16.mxu1 %v9570_v0 }
  0x37   : > { %8190 = vmatpush1.bf16.msra.mxu0 %v9570_v0  ;;  %8214 = vmatpush1.bf16.msra.mxu1 %v9570_v0 }
  0x38   : > { %8191 = vmatprep.subr.bf16.mxu0 %v9570_v0  ;;  %8215 = vmatprep.subr.bf16.mxu1 %v9570_v0 }
  0x3b   : > { %8192 = vmatpush1.bf16.msra.mxu0 %v9570_v0  ;;  %8216 = vmatpush1.bf16.msra.mxu1 %v9570_v0  ;;  %v8536_v0 = vld [vmem:[%s15369_s2 + $0xc0] ss:$24 sps:$4 sm:$0xff]  }
  0x3c   : > { %2868 = vmatprep.subr.bf16.mxu0 %v8526_v15  ;;  %v400_v15 = vld [vmem:[%s9636_s30 + $0x80] sm:$0xff] }
  0x3d   : > { %v9852_v31 = vadd.f32 %v400_v15, %v302_v14  ;;  %v413_v14 = vld [vmem:[%s9636_s30 + $0xe8] sm:$0xff] }
  0x3e   : > { %793 = vmatmul.mubr.f32.vlgmr.msra.gmra.mrb[0].mxu0 %v9683_v9  ;;  %1397 = vmatmul.mubr.f32.vlgmr.msra.gmra.mrb[0].mxu1 %v1087_v16  ;;  %v8544_v16 = vld [vmem:[%s15369_s2 + $0x124] ss:$24 sps:$4 sm:$0xff]  }
  0x3f   : > { %7824 = vmatprep.mubr.msk.f32.mxu0 %vm580_vm0, %v9687_v10  ;;  %7873 = vmatprep.mubr.msk.f32.mxu1 %vm580_vm0, %v1090_v18  ;;  %v1099_v18 = vmul.f32 %v9811_v6, %v9811_v6  ;;  %v1103_v40 = vmul.f32 %v9852_v31, %v9852_v31 }
  0x40   : > { %2869 = vmatpush1.bf16.msra.mxu0 %v8524_v24  ;;  %v1102_v24 = vmul.f32 %v9823_v13, %v9823_v13 }
  0x41   : > { %2870 = vmatprep.subr.bf16.mxu0 %v8529_v25  ;;  %v9845_v25 = vadd.f32 %v401_v8, %v303_v7  ;;  %v410_v7 = vld [vmem:[%s9636_s30 + $0xd0] sm:$0xff] }
  0x42   : > { %799 = vmatmul.mubr.f32.gmra.mrb[2].mxu0 %v9700_v17  ;;  %1403 = vmatmul.mubr.f32.gmra.mrb[2].mxu1 %v1089_v26  ;;  %v304_v26 = vld [vmem:[%s9630_s27 + $0x90] sm:$0xff] }
  0x43   : > { %7825 = vmatprep.mubr.msk.f32.mxu0 %vm580_vm0, %v9706_v19  ;;  %7874 = vmatprep.mubr.msk.f32.mxu1 %vm580_vm0, %v1092_v28  ;;  %v402_v28 = vld [vmem:[%s9636_s30 + $0x90] sm:$0xff] }
  0x44   : > { %2871 = vmatpush1.bf16.msra.mxu0 %v8527_v34  ;;  %v1104_v34 = vmul.f32 %v9845_v25, %v9845_v25  ;;  %v9868_v41 = vadd.f32 %v402_v28, %v304_v26  ;;  %v8548_v26 = vld [vmem:[%s15369_s2 + $0x180] ss:$24 sps:$4 sm:$0xff]   ;;  %v8550_v28 = vld [vmem:[%s15369_s2 + $0x184] ss:$24 sps:$4 sm:$0xff]  }
  0x45   : > { %2872 = vmatprep.subr.bf16.mxu0 %v8532_v35  ;;  %v9861_v35 = vadd.f32 %v403_v22, %v305_v21  ;;  %v412_v21 = vld [vmem:[%s9636_s30 + $0xe0] sm:$0xff] }
  0x46   : > { %805 = vmatmul.mubr.f32.gmra.mrb[4].mxu0 %v9721_v27  ;;  %1409 = vmatmul.mubr.f32.gmra.mrb[4].mxu1 %v1091_v36  ;;  %v306_v36 = vld [vmem:[%s9630_s27 + $0xa0] sm:$0xff]  ;;  %v1105_v51 = vmul.f32 %v9868_v41, %v9868_v41 }
  0x47   : > { %7826 = vmatprep.mubr.msk.f32.mxu0 %vm580_vm0, %v9728_v29  ;;  %7875 = vmatprep.mubr.msk.f32.mxu1 %vm580_vm0, %v1094_v38  ;;  %v404_v38 = vld [vmem:[%s9636_s30 + $0xa0] sm:$0xff]  ;;  %v1106_v45 = vmul.f32 %v9861_v35, %v9861_v35 }
  0x48   : > { %2873 = vmatpush1.bf16.msra.mxu0 %v8530_v44  ;;  %v8547_v44 = vld [vmem:[%s15369_s2 + $0x154] ss:$24 sps:$4 sm:$0xff]  }
  0x49   : > { %2874 = vmatprep.subr.bf16.mxu0 %v8535_v47  ;;  %v407_v47 = vld [vmem:[%s9636_s30 + $0xb8] sm:$0xff] }
  0x4a   : > { %811 = vmatmul.mubr.f32.gmra.mrb[6].mxu0 %v9743_v37  ;;  %1415 = vmatmul.mubr.f32.gmra.mrb[6].mxu1 %v1093_v48  ;;  %v308_v48 = vld [vmem:[%s9630_s27 + $0xb0] sm:$0xff] }
  0x4b   : > { %7827 = vmatprep.mubr.msk.f32.mxu0 %vm580_vm0, %v9750_v39  ;;  %7876 = vmatprep.mubr.msk.f32.mxu1 %vm580_vm0, %v1096_v53  ;;  %v311_v53 = vld [vmem:[%s9630_s27 + $0xc8] sm:$0xff] }
  0x4c   : > { %2875 = vmatpush1.bf16.msra.mxu0 %v8533_v52  ;;  %v9890_v52 = vadd.f32 %v404_v38, %v306_v36  ;;  %v414_v36 = vld [vmem:[%s9636_s30 + $0xf0] sm:$0xff] }
  0x4d   : > { %2876 = vmatprep.subr.bf16.mxu0 %v8538_v56  ;;  %v1108_v56 = vmul.f32 %v9882_v46, %v9882_v46 }
  0x4e   : > { %817 = vmatmul.mubr.f32.gmra.mrb[8].mxu0 %v9767_v49  ;;  %1421 = vmatmul.mubr.f32.gmra.mrb[8].mxu1 %v1095_v57  ;;  %v9899_v57 = vadd.f32 %v407_v47, %v309_v42  ;;  %v1107_v61 = vmul.f32 %v9890_v52, %v9890_v52  ;;  %v319_v42 = vld [vmem:[%s9630_s27 + $0x108] sm:$0xff]  ;;  %v318_v47 = vld [vmem:[%s9630_s27 + $0x100] sm:$0xff] }
  0x4f   : > { %7828 = vmatprep.mubr.msk.f32.mxu0 %vm580_vm0, %v9779_v54  ;;  %7877 = vmatprep.mubr.msk.f32.mxu1 %vm580_vm0, %v1098_v62  ;;  %v9906_v62 = vadd.f32 %v406_v50, %v308_v48  ;;  %v416_v48 = vld [vmem:[%s9636_s30 + $0x100] sm:$0xff] }
  0x50   : > { %2877 = vmatpush1.bf16.msra.mxu0 %v8536_v0  ;;  %v313_v0 = vld [vmem:[%s9630_s27 + $0xd8] sm:$0xff]  ;;  %v1110_v2 = vmul.f32 %v9899_v57, %v9899_v57 }
  0x51   : > { %2878 = vmatprep.subr.bf16.mxu0 %v8541_v4  ;;  %v9915_v4 = vadd.f32 %v409_v55, %v311_v53  ;;  %v1109_v8 = vmul.f32 %v9906_v62, %v9906_v62  ;;  %v321_v53 = vld [vmem:[%s9630_s27 + $0x118] sm:$0xff] }
  0x52   : > { %823 = vmatmul.mubr.f32.gmra.mrb[10].mxu0 %v9788_v58  ;;  %1427 = vmatmul.mubr.f32.gmra.mrb[10].mxu1 %v1097_v5  ;;  %v312_v5 = vld [vmem:[%s9630_s27 + $0xd0] sm:$0xff]  ;;  %v419_v55 = vld [vmem:[%s9636_s30 + $0x118] sm:$0xff] }
  0x53   : > { %7829 = vmatprep.mubr.msk.f32.mxu0 %vm580_vm0, %v9798_v63  ;;  %7878 = vmatprep.mubr.msk.f32.mxu1 %vm580_vm0, %v1100_v12  ;;  %v315_v12 = vld [vmem:[%s9630_s27 + $0xe8] sm:$0xff]  ;;  %v1112_v15 = vmul.f32 %v9915_v4, %v9915_v4 }
  0x54   : > { %2879 = vmatpush1.bf16.msra.mxu0 %v8539_v11  ;;  %v9922_v11 = vadd.f32 %v408_v60, %v310_v59  ;;  %v9952_v32 = vadd.f32 %v413_v14, %v315_v12  ;;  %v320_v60 = vld [vmem:[%s9630_s27 + $0x110] sm:$0xff] }
  0x55   : > { %2880 = vmatprep.subr.bf16.mxu0 %v8544_v16  ;;  %v9931_v16 = vadd.f32 %v411_v1, %v313_v0  ;;  %v9992_v1 = vadd.f32 %v416_v48, %v318_v47  ;;  %v8556_v47 = vld [vmem:[%s15369_s2 + $0x1e4] ss:$24 sps:$4 sm:$0xff]  }
  0x56   : > { %829 = vmatmul.mubr.f32.gmra.mrb[12].mxu0 %v9811_v6  ;;  %1433 = vmatmul.mubr.f32.gmra.mrb[12].mxu1 %v1099_v18  ;;  %v314_v18 = vld [vmem:[%s9630_s27 + $0xe0] sm:$0xff]  ;;  %v1111_v22 = vmul.f32 %v9922_v11, %v9922_v11 }
  0x57   : > { %7830 = vmatprep.mubr.msk.f32.mxu0 %vm580_vm0, %v9823_v13  ;;  %7879 = vmatprep.mubr.msk.f32.mxu1 %vm580_vm0, %v1102_v24  ;;  %v317_v24 = vld [vmem:[%s9630_s27 + $0xf8] sm:$0xff]  ;;  %v1119_v12 = vmul.f32 %v9992_v1, %v9992_v1 }
  0x58   : > { %2881 = vmatpush1.bf16.msra.mxu0 %v8542_v23  ;;  %v9938_v23 = vadd.f32 %v410_v7, %v312_v5  ;;  %v421_v5 = vld [vmem:[%s9636_s30 + $0x128] sm:$0xff] }
  0x59   : > { %2882 = vmatprep.subr.bf16.mxu0 %v8547_v44  ;;  %v1116_v44 = vmul.f32 %v9952_v32, %v9952_v32 }
  0x5a   : > { %835 = vmatmul.mubr.f32.gmra.mrb[14].mxu0 %v9833_v20  ;;  %1439 = vmatmul.mubr.f32.gmra.mrb[14].mxu1 %v1101_v30  ;;  %v1114_v30 = vmul.f32 %v9931_v16, %v9931_v16  ;;  %v1113_v38 = vmul.f32 %v9938_v23, %v9938_v23 }
  0x5b   : > { %7831 = vmatprep.mubr.msk.f32.mxu0 %vm580_vm0, %v9845_v25  ;;  %7880 = vmatprep.mubr.msk.f32.mxu1 %vm580_vm0, %v1104_v34  ;;  %v316_v34 = vld [vmem:[%s9630_s27 + $0xf0] sm:$0xff] }
  0x5c   : > { %2883 = vmatpush1.bf16.msra.mxu0 %v8545_v43  ;;  %v417_v43 = vld [vmem:[%s9636_s30 + $0x108] sm:$0xff] }
  0x5d   : > { %2884 = vmatprep.subr.bf16.mxu0 %v8550_v28  ;;  %v9985_v59 = vadd.f32 %v417_v43, %v319_v42  ;;  %v325_v28 = vld [vmem:[%s9630_s27 + $0x138] sm:$0xff]  ;;  %v327_v42 = vld [vmem:[%s9630_s27 + $0x148] sm:$0xff] }
  0x5e   : > { %841 = vmatmul.mubr.f32.gmra.mrb[16].mxu0 %v9852_v31  ;;  %1445 = vmatmul.mubr.f32.gmra.mrb[16].mxu1 %v1103_v40  ;;  %v9960_v40 = vadd.f32 %v412_v21, %v314_v18  ;;  %v8551_v18 = vld [vmem:[%s15369_s2 + $0x1b0] ss:$24 sps:$4 sm:$0xff]   ;;  %v8553_v21 = vld [vmem:[%s15369_s2 + $0x1b4] ss:$24 sps:$4 sm:$0xff]  }
  0x5f   : > { %7832 = vmatprep.mubr.msk.f32.mxu0 %vm580_vm0, %v9861_v35  ;;  %7881 = vmatprep.mubr.msk.f32.mxu1 %vm580_vm0, %v1106_v45  ;;  %v9969_v45 = vadd.f32 %v415_v33, %v317_v24  ;;  %v1120_v7 = vmul.f32 %v9985_v59, %v9985_v59  ;;  %v324_v33 = vld [vmem:[%s9630_s27 + $0x130] sm:$0xff]  ;;  %v425_v43 = vld [vmem:[%s9636_s30 + $0x148] sm:$0xff] }
  0x60   : > { %2885 = vmatpush1.bf16.msra.mxu0 %v8548_v26  ;;  %v1115_v50 = vmul.f32 %v9960_v40, %v9960_v40  ;;  %v420_v26 = vld [vmem:[%s9636_s30 + $0x120] sm:$0xff] }
  0x61   : > { %2886 = vmatprep.subr.bf16.mxu0 %v8553_v21  ;;  %v331_v21 = vld [vmem:[%s9630_s27 + $0x168] sm:$0xff] }
  0x62   : > { %847 = vmatmul.mubr.f32.gmra.mrb[18].mxu0 %v9868_v41  ;;  %1451 = vmatmul.mubr.f32.gmra.mrb[18].mxu1 %v1105_v51  ;;  %v9976_v51 = vadd.f32 %v414_v36, %v316_v34  ;;  %v422_v34 = vld [vmem:[%s9636_s30 + $0x130] sm:$0xff] }
  0x63   : > { %7833 = vmatprep.mubr.msk.f32.mxu0 %vm580_vm0, %v9882_v46  ;;  %7882 = vmatprep.mubr.msk.f32.mxu1 %vm580_vm0, %v1108_v56  ;;  %v1118_v56 = vmul.f32 %v9969_v45, %v9969_v45 }
  0x64   : > { %v1117_v0 = vmul.f32 %v9976_v51, %v9976_v51  ;;  %2887 = vmatpush1.bf16.msra.mxu0 %v8551_v18 }
  0x65   : > { %2888 = vmatprep.subr.bf16.mxu0 %v8556_v47 }
  0x66   : > { %853 = vmatmul.mubr.f32.gmra.mrb[20].mxu0 %v9890_v52  ;;  %1457 = vmatmul.mubr.f32.gmra.mrb[20].mxu1 %v1107_v61  ;;  %v418_v61 = vld [vmem:[%s9636_s30 + $0x110] sm:$0xff] }
  0x67   : > { %7834 = vmatprep.mubr.msk.f32.mxu0 %vm580_vm0, %v9899_v57  ;;  %7883 = vmatprep.mubr.msk.f32.mxu1 %vm580_vm0, %v1110_v2  ;;  %v323_v2 = vld [vmem:[%s9630_s27 + $0x128] sm:$0xff]  ;;  %v10006_v14 = vadd.f32 %v418_v61, %v320_v60  ;;  %v10052_v60 = vadd.f32 %v422_v34, %v324_v33  ;;  %v329_v61 = vld [vmem:[%s9630_s27 + $0x158] sm:$0xff]  ;;  %v428_v33 = vld [vmem:[%s9636_s30 + $0x160] sm:$0xff] }
  0x68   : > { %v10020_v24 = vadd.f32 %v421_v5, %v323_v2  ;;  %v10061_v5 = vadd.f32 %v425_v43, %v327_v42  ;;  %v333_v42 = vld [vmem:[%s9630_s27 + $0x178] sm:$0xff] }
  0x69   : > { %v1121_v36 = vmul.f32 %v10006_v14, %v10006_v14  ;;  %15503 = vst [vmem:[#allocation3_spill] sm:$0xff] %v10052_v60  ;;  %v431_v43 = vld [vmem:[%s9636_s30 + $0x178] sm:$0xff] }
  0x6a   : > { %859 = vmatmul.mubr.f32.gmra.mrb[22].mxu0 %v9906_v62  ;;  %1463 = vmatmul.mubr.f32.gmra.mrb[22].mxu1 %v1109_v8  ;;  %v10001_v8 = vadd.f32 %v419_v55, %v321_v53  ;;  %v1124_v48 = vmul.f32 %v10020_v24, %v10020_v24  ;;  %v326_v53 = vld [vmem:[%s9630_s27 + $0x140] sm:$0xff]  ;;  %15504 = vst [vmem:[#allocation4_spill] sm:$0xff] %v10061_v5 }
  0x6b   : > { %7835 = vmatprep.mubr.msk.f32.mxu0 %vm580_vm0, %v9915_v4  ;;  %7884 = vmatprep.mubr.msk.f32.mxu1 %vm580_vm0, %v1112_v15  ;;  %v322_v15 = vld [vmem:[%s9630_s27 + $0x120] sm:$0xff] }
  0x6c   : > { %v424_v55 = vld [vmem:[%s9636_s30 + $0x140] sm:$0xff] }
  0x6d   : > { %v10068_v18 = vadd.f32 %v424_v55, %v326_v53 }
  0x6e   : > { %865 = vmatmul.mubr.f32.gmra.mrb[24].mxu0 %v9922_v11  ;;  %1469 = vmatmul.mubr.f32.gmra.mrb[24].mxu1 %v1111_v22  ;;  %v1122_v22 = vmul.f32 %v10001_v8, %v10001_v8 }
  0x6f   : > { %7836 = vmatprep.mubr.msk.f32.mxu0 %vm580_vm0, %v9931_v16  ;;  %7885 = vmatprep.mubr.msk.f32.mxu1 %vm580_vm0, %v1114_v30  ;;  %v423_v30 = vld [vmem:[%s9636_s30 + $0x138] sm:$0xff]  ;;  %15505 = vst [vmem:[#allocation5_spill] sm:$0xff] %v10068_v18  ;;  %v1127_v34 = vmul.f32 %v10068_v18, %v10068_v18 }
  0x72   : > { %871 = vmatmul.mubr.f32.gmra.mrb[26].mxu0 %v9938_v23  ;;  %1475 = vmatmul.mubr.f32.gmra.mrb[26].mxu1 %v1113_v38  ;;  %v10030_v38 = vadd.f32 %v420_v26, %v322_v15  ;;  %v1125_v15 = vmul.f32 %v10052_v60, %v10052_v60  ;;  %v1128_v26 = vmul.f32 %v10061_v5, %v10061_v5 }
  0x73   : > { %7837 = vmatprep.mubr.msk.f32.mxu0 %vm580_vm0, %v9952_v32  ;;  %7886 = vmatprep.mubr.msk.f32.mxu1 %vm580_vm0, %v1116_v44  ;;  %v8554_v44 = vld [vmem:[%s15369_s2 + $0x1e0] ss:$24 sps:$4 sm:$0xff]  }
  0x74   : > { %2889 = vmatpush1.bf16.msra.mxu0 %v8554_v44 }
  0x76   : > { %877 = vmatmul.mubr.f32.gmra.mrb[28].mxu0 %v9960_v40  ;;  %1481 = vmatmul.mubr.f32.gmra.mrb[28].mxu1 %v1115_v50  ;;  %v10045_v50 = vadd.f32 %v423_v30, %v325_v28  ;;  %v330_v30 = vld [vmem:[%s9630_s27 + $0x160] sm:$0xff] }
  0x77   : > { %7838 = vmatprep.mubr.msk.f32.mxu0 %vm580_vm0, %v9969_v45  ;;  %7887 = vmatprep.mubr.msk.f32.mxu1 %vm580_vm0, %v1118_v56  ;;  %v1123_v56 = vmul.f32 %v10030_v38, %v10030_v38  ;;  %v10098_v53 = vadd.f32 %v428_v33, %v330_v30  ;;  %v432_v30 = vld [vmem:[%s9636_s30 + $0x180] sm:$0xff]  ;;  %v337_v33 = vld [vmem:[%s9630_s27 + $0x198] sm:$0xff] }
  0x78   : > { %15502 = vst [vmem:[#allocation2_spill] sm:$0xff] %v10045_v50  ;;  %v1126_v2 = vmul.f32 %v10045_v50, %v10045_v50 }
  0x79   : > { %15509 = vst [vmem:[#allocation9_spill] sm:$0xff] %v10098_v53 }
  0x7a   : > { %883 = vmatmul.mubr.f32.gmra.mrb[30].mxu0 %v9976_v51  ;;  %1487 = vmatmul.mubr.f32.gmra.mrb[30].mxu1 %v1117_v0  ;;  %v427_v0 = vld [vmem:[%s9636_s30 + $0x158] sm:$0xff] }
  0x7b   : > { %7839 = vmatprep.mubr.msk.f32.mxu0 %vm580_vm0, %v9985_v59  ;;  %7888 = vmatprep.mubr.msk.f32.mxu1 %vm580_vm0, %v1120_v7  ;;  %v328_v7 = vld [vmem:[%s9630_s27 + $0x150] sm:$0xff]  ;;  %v10077_v28 = vadd.f32 %v427_v0, %v329_v61 }
  0x7c   : > { %v332_v61 = vld [vmem:[%s9630_s27 + $0x170] sm:$0xff] }
  0x7d   : > { %15506 = vst [vmem:[#allocation6_spill] sm:$0xff] %v10077_v28  ;;  %v1130_v44 = vmul.f32 %v10077_v28, %v10077_v28  ;;  %v430_v0 = vld [vmem:[%s9636_s30 + $0x170] sm:$0xff] }
  0x7e   : > { %889 = vmatmul.mubr.f32.gmra.mrb[32].mxu0 %v9992_v1  ;;  %1493 = vmatmul.mubr.f32.gmra.mrb[32].mxu1 %v1119_v12  ;;  %v426_v12 = vld [vmem:[%s9636_s30 + $0x150] sm:$0xff] }
  0x7f   : > { %7840 = vmatprep.mubr.msk.f32.mxu0 %vm580_vm0, %v10001_v8  ;;  %7889 = vmatprep.mubr.msk.f32.mxu1 %vm580_vm0, %v1122_v22  ;;  %v429_v22 = vld [vmem:[%s9636_s30 + $0x168] sm:$0xff] }
  0x80   : > { %v10093_v47 = vadd.f32 %v429_v22, %v331_v21 }
  0x82   : > { %895 = vmatmul.mubr.f32.gmra.mrb[34].mxu0 %v10006_v14  ;;  %1499 = vmatmul.mubr.f32.gmra.mrb[34].mxu1 %v1121_v36  ;;  %v10084_v36 = vadd.f32 %v426_v12, %v328_v7  ;;  %15508 = vst [vmem:[#allocation8_spill] sm:$0xff] %v10093_v47  ;;  %v1132_v55 = vmul.f32 %v10093_v47, %v10093_v47  ;;  %v433_v7 = vld [vmem:[%s9636_s30 + $0x188] sm:$0xff] }
  0x83   : > { %7841 = vmatprep.mubr.msk.f32.mxu0 %vm580_vm0, %v10020_v24  ;;  %7890 = vmatprep.mubr.msk.f32.mxu1 %vm580_vm0, %v1124_v48  ;;  %v1131_v12 = vmul.f32 %v10098_v53, %v10098_v53 }
  0x84   : > { %15507 = vst [vmem:[#allocation7_spill] sm:$0xff] %v10084_v36  ;;  %v1129_v48 = vmul.f32 %v10084_v36, %v10084_v36 }
  0x86   : > { %901 = vmatmul.mubr.f32.gmra.mrb[36].mxu0 %v10030_v38  ;;  %1505 = vmatmul.mubr.f32.gmra.mrb[36].mxu1 %v1123_v56  ;;  %v10105_v56 = vadd.f32 %v431_v43, %v333_v42 }
  0x87   : > { %7842 = vmatprep.mubr.msk.f32.mxu0 %vm580_vm0, %v10045_v50  ;;  %7891 = vmatprep.mubr.msk.f32.mxu1 %vm580_vm0, %v1126_v2  ;;  %v335_v2 = vld [vmem:[%s9630_s27 + $0x188] sm:$0xff] }
  0x88   : > { %15510 = vst [vmem:[#allocation10_spill] sm:$0xff] %v10105_v56  ;;  %v1134_v21 = vmul.f32 %v10105_v56, %v10105_v56  ;;  %v10121_v22 = vadd.f32 %v433_v7, %v335_v2  ;;  %v437_v2 = vld [vmem:[%s9636_s30 + $0x1a8] sm:$0xff] }
  0x8a   : > { %907 = vmatmul.mubr.f32.gmra.mrb[38].mxu0 %v10052_v60  ;;  %1511 = vmatmul.mubr.f32.gmra.mrb[38].mxu1 %v1125_v15  ;;  %v10114_v15 = vadd.f32 %v430_v0, %v332_v61  ;;  %15512 = vst [vmem:[#allocation12_spill] sm:$0xff] %v10121_v22  ;;  %v434_v61 = vld [vmem:[%s9636_s30 + $0x190] sm:$0xff]  ;;  %v339_v0 = vld [vmem:[%s9630_s27 + $0x1a8] sm:$0xff] }
  0x8b   : > { %7843 = vmatprep.mubr.msk.f32.mxu0 %vm580_vm0, %v10061_v5  ;;  %7892 = vmatprep.mubr.msk.f32.mxu1 %vm580_vm0, %v1128_v26  ;;  %v334_v26 = vld [vmem:[%s9630_s27 + $0x180] sm:$0xff] }
  0x8c   : > { %15511 = vst [vmem:[#allocation11_spill] sm:$0xff] %v10114_v15  ;;  %v1133_v42 = vmul.f32 %v10114_v15, %v10114_v15  ;;  %v10130_v43 = vadd.f32 %v432_v30, %v334_v26  ;;  %v10153_v26 = vadd.f32 %v437_v2, %v339_v0  ;;  %v338_v30 = vld [vmem:[%s9630_s27 + $0x1a0] sm:$0xff]  ;;  %v340_v2 = vld [vmem:[%s9630_s27 + $0x1b0] sm:$0xff] }
  0x8e   : > { %913 = vmatmul.mubr.f32.gmra.mrb[40].mxu0 %v10068_v18  ;;  %1517 = vmatmul.mubr.f32.gmra.mrb[40].mxu1 %v1127_v34  ;;  %v435_v34 = vld [vmem:[%s9636_s30 + $0x198] sm:$0xff]  ;;  %15513 = vst [vmem:[#allocation13_spill] sm:$0xff] %v10130_v43  ;;  %v1135_v7 = vmul.f32 %v10130_v43, %v10130_v43  ;;  %15516 = vst [vmem:[#allocation16_spill] sm:$0xff] %v10153_v26 }
  0x8f   : > { %7844 = vmatprep.mubr.msk.f32.mxu0 %vm580_vm0, %v10077_v28  ;;  %7893 = vmatprep.mubr.msk.f32.mxu1 %vm580_vm0, %v1130_v44  ;;  %v1136_v44 = vmul.f32 %v10121_v22, %v10121_v22 }
  0x92   : > { %919 = vmatmul.mubr.f32.gmra.mrb[42].mxu0 %v10084_v36  ;;  %1523 = vmatmul.mubr.f32.gmra.mrb[42].mxu1 %v1129_v48  ;;  %v10137_v48 = vadd.f32 %v435_v34, %v337_v33  ;;  %v436_v33 = vld [vmem:[%s9636_s30 + $0x1a0] sm:$0xff]  ;;  %v341_v34 = vld [vmem:[%s9630_s27 + $0x1b8] sm:$0xff] }
  0x93   : > { %7845 = vmatprep.mubr.msk.f32.mxu0 %vm580_vm0, %v10093_v47  ;;  %7894 = vmatprep.mubr.msk.f32.mxu1 %vm580_vm0, %v1132_v55  ;;  %v336_v55 = vld [vmem:[%s9630_s27 + $0x190] sm:$0xff] }
  0x94   : > { %15514 = vst [vmem:[#allocation14_spill] sm:$0xff] %v10137_v48 }
  0x96   : > { %925 = vmatmul.mubr.f32.gmra.mrb[44].mxu0 %v10098_v53  ;;  %1529 = vmatmul.mubr.f32.gmra.mrb[44].mxu1 %v1131_v12  ;;  %v10146_v12 = vadd.f32 %v434_v61, %v336_v55  ;;  %v10162_v61 = vadd.f32 %v436_v33, %v338_v30 }
  0x97   : > { %7846 = vmatprep.mubr.msk.f32.mxu0 %vm580_vm0, %v10105_v56  ;;  %7895 = vmatprep.mubr.msk.f32.mxu1 %vm580_vm0, %v1134_v21  ;;  %v1138_v21 = vmul.f32 %v10137_v48, %v10137_v48  ;;  %v447_v56 = vld [vmem:[%s9636_s30 + $0x1f8] sm:$0xff] }
  0x98   : > { %15515 = vst [vmem:[#allocation15_spill] sm:$0xff] %v10146_v12  ;;  %v1137_v55 = vmul.f32 %v10146_v12, %v10146_v12  ;;  %15517 = vst [vmem:[#allocation17_spill] sm:$0xff] %v10162_v61  ;;  %v1139_v30 = vmul.f32 %v10162_v61, %v10162_v61 }
  0x9a   : > { %931 = vmatmul.mubr.f32.gmra.mrb[46].mxu0 %v10114_v15  ;;  %1535 = vmatmul.mubr.f32.gmra.mrb[46].mxu1 %v1133_v42  ;;  %v439_v42 = vld [vmem:[%s9636_s30 + $0x1b8] sm:$0xff] }
  0x9b   : > { %7847 = vmatprep.mubr.msk.f32.mxu0 %vm580_vm0, %v10121_v22  ;;  %7896 = vmatprep.mubr.msk.f32.mxu1 %vm580_vm0, %v1136_v44  ;;  %v1140_v44 = vmul.f32 %v10153_v26, %v10153_v26  ;;  %v10169_v0 = vadd.f32 %v439_v42, %v341_v34  ;;  %v343_v22 = vld [vmem:[%s9630_s27 + $0x1c8] sm:$0xff]  ;;  %v342_v42 = vld [vmem:[%s9630_s27 + $0x1c0] sm:$0xff]  ;;  %v475_v15 = vld [vmem:[%s9636_s30 + $0x2d8] sm:$0xff] }
  0x9d   : > { %15518 = vst [vmem:[#allocation18_spill] sm:$0xff] %v10169_v0 }
  0x9e   : > { %937 = vmatmul.mubr.f32.gmra.mrb[48].mxu0 %v10130_v43  ;;  %1541 = vmatmul.mubr.f32.gmra.mrb[48].mxu1 %v1135_v7  ;;  %v438_v7 = vld [vmem:[%s9636_s30 + $0x1b0] sm:$0xff]  ;;  %v441_v43 = vld [vmem:[%s9636_s30 + $0x1c8] sm:$0xff] }
  0x9f   : > { %7848 = vmatprep.mubr.msk.f32.mxu0 %vm580_vm0, %v10137_v48  ;;  %7897 = vmatprep.mubr.msk.f32.mxu1 %vm580_vm0, %v1138_v21  ;;  %v10178_v33 = vadd.f32 %v438_v7, %v340_v2  ;;  %v1142_v21 = vmul.f32 %v10169_v0, %v10169_v0  ;;  %v10185_v34 = vadd.f32 %v441_v43, %v343_v22  ;;  %v345_v48 = vld [vmem:[%s9630_s27 + $0x1d8] sm:$0xff] }
  0xa1   : > { %15519 = vst [vmem:[#allocation19_spill] sm:$0xff] %v10178_v33  ;;  %15520 = vst [vmem:[#allocation20_spill] sm:$0xff] %v10185_v34  ;;  %v1141_v2 = vmul.f32 %v10178_v33, %v10178_v33  ;;  %v1144_v22 = vmul.f32 %v10185_v34, %v10185_v34 }
  0xa2   : > { %943 = vmatmul.mubr.f32.gmra.mrb[50].mxu0 %v10146_v12  ;;  %1547 = vmatmul.mubr.f32.gmra.mrb[50].mxu1 %v1137_v55  ;;  %v440_v55 = vld [vmem:[%s9636_s30 + $0x1c0] sm:$0xff]  ;;  %v443_v12 = vld [vmem:[%s9636_s30 + $0x1d8] sm:$0xff] }
  0xa3   : > { %7849 = vmatprep.mubr.msk.f32.mxu0 %vm580_vm0, %v10153_v26  ;;  %7898 = vmatprep.mubr.msk.f32.mxu1 %vm580_vm0, %v1140_v44  ;;  %v10194_v7 = vadd.f32 %v440_v55, %v342_v42  ;;  %v10201_v43 = vadd.f32 %v443_v12, %v345_v48  ;;  %v344_v44 = vld [vmem:[%s9630_s27 + $0x1d0] sm:$0xff]  ;;  %v347_v42 = vld [vmem:[%s9630_s27 + $0x1e8] sm:$0xff] }
  0xa4   : > { %v442_v26 = vld [vmem:[%s9636_s30 + $0x1d0] sm:$0xff]  ;;  %v445_v55 = vld [vmem:[%s9636_s30 + $0x1e8] sm:$0xff] }
  0xa5   : > { %15521 = vst [vmem:[#allocation21_spill] sm:$0xff] %v10194_v7  ;;  %15522 = vst [vmem:[#allocation22_spill] sm:$0xff] %v10201_v43  ;;  %v1143_v48 = vmul.f32 %v10194_v7, %v10194_v7  ;;  %v10216_v12 = vadd.f32 %v442_v26, %v344_v44 }
  0xa6   : > { %949 = vmatmul.mubr.f32.gmra.mrb[52].mxu0 %v10162_v61  ;;  %1553 = vmatmul.mubr.f32.gmra.mrb[52].mxu1 %v1139_v30  ;;  %v8559_v30 = vld [vmem:[%s15369_s2 + $0x214] ss:$24 sps:$4 sm:$0xff]   ;;  %v10223_v61 = vadd.f32 %v445_v55, %v347_v42 }
  0xa7   : > { %7850 = vmatprep.mubr.msk.f32.mxu0 %vm580_vm0, %v10169_v0  ;;  %7899 = vmatprep.mubr.msk.f32.mxu1 %vm580_vm0, %v1142_v21  ;;  %v8557_v21 = vld [vmem:[%s15369_s2 + $0x210] ss:$24 sps:$4 sm:$0xff]   ;;  %15523 = vst [vmem:[#allocation23_spill] sm:$0xff] %v10216_v12  ;;  %v1146_v0 = vmul.f32 %v10201_v43, %v10201_v43  ;;  %v1145_v26 = vmul.f32 %v10216_v12, %v10216_v12 }
  0xa8   : > { %2890 = vmatprep.subr.bf16.mxu0 %v8559_v30  ;;  %15524 = vst [vmem:[#allocation24_spill] sm:$0xff] %v10223_v61  ;;  %v346_v30 = vld [vmem:[%s9630_s27 + $0x1e0] sm:$0xff]  ;;  %v1148_v44 = vmul.f32 %v10223_v61, %v10223_v61  ;;  %v348_v55 = vld [vmem:[%s9630_s27 + $0x1f0] sm:$0xff] }
  0xa9   : > { %2891 = vmatpush1.bf16.msra.mxu0 %v8557_v21  ;;  %v446_v21 = vld [vmem:[%s9636_s30 + $0x1f0] sm:$0xff] }
  0xaa   : > { %955 = vmatmul.mubr.f32.gmra.mrb[54].mxu0 %v10178_v33  ;;  %1559 = vmatmul.mubr.f32.gmra.mrb[54].mxu1 %v1141_v2  ;;  %v444_v2 = vld [vmem:[%s9636_s30 + $0x1e0] sm:$0xff]  ;;  %v349_v33 = vld [vmem:[%s9630_s27 + $0x1f8] sm:$0xff] }
  0xab   : > { %7851 = vmatprep.mubr.msk.f32.mxu0 %vm580_vm0, %v10185_v34  ;;  %7900 = vmatprep.mubr.msk.f32.mxu1 %vm580_vm0, %v1144_v22  ;;  %v10232_v22 = vadd.f32 %v444_v2, %v346_v30  ;;  %v10239_v42 = vadd.f32 %v447_v56, %v349_v33  ;;  %v449_v34 = vld [vmem:[%s9636_s30 + $0x208] sm:$0xff]  ;;  %v10251_v2 = vadd.f32 %v446_v21, %v348_v55 }
  0xac   : > { %v8562_v30 = vld [vmem:[%s15369_s2 + $0xc] ss:$24 sps:$4 sm:$0xff]  }
  0xad   : > { %15525 = vst [vmem:[#allocation25_spill] sm:$0xff] %v10232_v22  ;;  %15526 = vst [vmem:[#allocation26_spill] sm:$0xff] %v10239_v42  ;;  %v1150_v56 = vmul.f32 %v10239_v42, %v10239_v42  ;;  %3149 = vmatprep.subr.bf16.mxu0 %v8562_v30  ;;  %v450_v30 = vld [vmem:[%s9636_s30 + $0x210] sm:$0xff] }
  0xae   : > { %961 = vmatmul.mubr.f32.gmra.mrb[56].mxu0 %v10194_v7  ;;  %1565 = vmatmul.mubr.f32.gmra.mrb[56].mxu1 %v1143_v48  ;;  %v351_v48 = vld [vmem:[%s9630_s27 + $0x208] sm:$0xff]  ;;  %15527 = vst [vmem:[#allocation27_spill] sm:$0xff] %v10251_v2  ;;  %v451_v7 = vld [vmem:[%s9636_s30 + $0x218] sm:$0xff] }
  0xaf   : > { %7852 = vmatprep.mubr.msk.f32.mxu0 %vm580_vm0, %v10201_v43  ;;  %7901 = vmatprep.mubr.msk.f32.mxu1 %vm580_vm0, %v1146_v0  ;;  %v1147_v0 = vmul.f32 %v10232_v22, %v10232_v22  ;;  %v10258_v33 = vadd.f32 %v449_v34, %v351_v48  ;;  %v350_v43 = vld [vmem:[%s9630_s27 + $0x200] sm:$0xff]  ;;  %v352_v48 = vld [vmem:[%s9630_s27 + $0x210] sm:$0xff] }
  0xb1   : > { %15528 = vst [vmem:[#allocation28_spill] sm:$0xff] %v10258_v33  ;;  %v1152_v34 = vmul.f32 %v10258_v33, %v10258_v33 }
  0xb2   : > { %967 = vmatmul.mubr.f32.gmra.mrb[58].mxu0 %v10216_v12  ;;  %1571 = vmatmul.mubr.f32.gmra.mrb[58].mxu1 %v1145_v26  ;;  %v448_v26 = vld [vmem:[%s9636_s30 + $0x200] sm:$0xff]  ;;  %v353_v12 = vld [vmem:[%s9630_s27 + $0x218] sm:$0xff] }
  0xb3   : > { %7853 = vmatprep.mubr.msk.f32.mxu0 %vm580_vm0, %v10223_v61  ;;  %7902 = vmatprep.mubr.msk.f32.mxu1 %vm580_vm0, %v1148_v44  ;;  %v1149_v44 = vmul.f32 %v10251_v2, %v10251_v2  ;;  %v10267_v55 = vadd.f32 %v448_v26, %v350_v43  ;;  %v10274_v21 = vadd.f32 %v451_v7, %v353_v12  ;;  %v453_v61 = vld [vmem:[%s9636_s30 + $0x228] sm:$0xff] }
  0xb4   : > { %v10283_v26 = vadd.f32 %v450_v30, %v352_v48 }
  0xb5   : > { %15529 = vst [vmem:[#allocation29_spill] sm:$0xff] %v10267_v55  ;;  %15530 = vst [vmem:[#allocation30_spill] sm:$0xff] %v10274_v21  ;;  %v1151_v43 = vmul.f32 %v10267_v55, %v10267_v55  ;;  %v1154_v7 = vmul.f32 %v10274_v21, %v10274_v21 }
  0xb6   : > { %973 = vmatmul.mubr.f32.gmra.mrb[60].mxu0 %v10232_v22  ;;  %1577 = vmatmul.mubr.f32.gmra.mrb[60].mxu1 %v1147_v0  ;;  %v355_v0 = vld [vmem:[%s9630_s27 + $0x228] sm:$0xff]  ;;  %15531 = vst [vmem:[#allocation31_spill] sm:$0xff] %v10283_v26  ;;  %v1153_v48 = vmul.f32 %v10283_v26, %v10283_v26  ;;  %v374_v22 = vld [vmem:[%s9630_s27 + $0x2c0] sm:$0xff] }
  0xb7   : > { %7854 = vmatprep.mubr.msk.f32.mxu0 %vm580_vm0, %v10239_v42  ;;  %7903 = vmatprep.mubr.msk.f32.mxu1 %vm580_vm0, %v1150_v56  ;;  %v10290_v12 = vadd.f32 %v453_v61, %v355_v0  ;;  %v354_v56 = vld [vmem:[%s9630_s27 + $0x220] sm:$0xff]  ;;  %v357_v42 = vld [vmem:[%s9630_s27 + $0x238] sm:$0xff]  ;;  %v356_v0 = vld [vmem:[%s9630_s27 + $0x230] sm:$0xff] }
  0xb9   : > { %15532 = vst [vmem:[#allocation32_spill] sm:$0xff] %v10290_v12  ;;  %v1156_v61 = vmul.f32 %v10290_v12, %v10290_v12 }
  0xba   : > { %979 = vmatmul.mubr.f32.gmra.mrb[62].mxu0 %v10251_v2  ;;  %1583 = vmatmul.mubr.f32.gmra.mrb[62].mxu1 %v1149_v44  ;;  %v452_v44 = vld [vmem:[%s9636_s30 + $0x220] sm:$0xff]  ;;  %v455_v2 = vld [vmem:[%s9636_s30 + $0x238] sm:$0xff] }
  0xbb   : > { %7855 = vmatprep.mubr.msk.f32.mxu0 %vm580_vm0, %v10258_v33  ;;  %7904 = vmatprep.mubr.msk.f32.mxu1 %vm580_vm0, %v1152_v34  ;;  %v10299_v30 = vadd.f32 %v452_v44, %v354_v56  ;;  %v10306_v34 = vadd.f32 %v455_v2, %v357_v42  ;;  %v359_v33 = vld [vmem:[%s9630_s27 + $0x248] sm:$0xff] }
  0xbd   : > { %15533 = vst [vmem:[#allocation33_spill] sm:$0xff] %v10299_v30  ;;  %15534 = vst [vmem:[#allocation34_spill] sm:$0xff] %v10306_v34  ;;  %v1155_v56 = vmul.f32 %v10299_v30, %v10299_v30  ;;  %v1158_v42 = vmul.f32 %v10306_v34, %v10306_v34 }
  0xbe   : > { %985 = vmatmul.mubr.f32.gmra.mrb[64].mxu0 %v10267_v55  ;;  %1589 = vmatmul.mubr.f32.gmra.mrb[64].mxu1 %v1151_v43  ;;  %v454_v43 = vld [vmem:[%s9636_s30 + $0x230] sm:$0xff]  ;;  %v457_v55 = vld [vmem:[%s9636_s30 + $0x248] sm:$0xff] }
  0xbf   : > { %7856 = vmatprep.mubr.msk.f32.mxu0 %vm580_vm0, %v10274_v21  ;;  %7905 = vmatprep.mubr.msk.f32.mxu1 %vm580_vm0, %v1154_v7  ;;  %v10315_v44 = vadd.f32 %v454_v43, %v356_v0  ;;  %v10322_v2 = vadd.f32 %v457_v55, %v359_v33  ;;  %v358_v7 = vld [vmem:[%s9630_s27 + $0x240] sm:$0xff]  ;;  %v361_v21 = vld [vmem:[%s9630_s27 + $0x258] sm:$0xff] }
  0xc1   : > { %15535 = vst [vmem:[#allocation35_spill] sm:$0xff] %v10315_v44  ;;  %15536 = vst [vmem:[#allocation36_spill] sm:$0xff] %v10322_v2  ;;  %v1157_v0 = vmul.f32 %v10315_v44, %v10315_v44  ;;  %v1160_v33 = vmul.f32 %v10322_v2, %v10322_v2 }
  0xc2   : > { %991 = vmatmul.mubr.f32.gmra.mrb[66].mxu0 %v10283_v26  ;;  %1595 = vmatmul.mubr.f32.gmra.mrb[66].mxu1 %v1153_v48  ;;  %v456_v48 = vld [vmem:[%s9636_s30 + $0x240] sm:$0xff]  ;;  %v459_v26 = vld [vmem:[%s9636_s30 + $0x258] sm:$0xff] }
  0xc3   : > { %7857 = vmatprep.mubr.msk.f32.mxu0 %vm580_vm0, %v10290_v12  ;;  %7906 = vmatprep.mubr.msk.f32.mxu1 %vm580_vm0, %v1156_v61  ;;  %v10331_v43 = vadd.f32 %v456_v48, %v358_v7  ;;  %v10338_v55 = vadd.f32 %v459_v26, %v361_v21  ;;  %v360_v61 = vld [vmem:[%s9630_s27 + $0x250] sm:$0xff]  ;;  %v363_v12 = vld [vmem:[%s9630_s27 + $0x268] sm:$0xff] }
  0xc5   : > { %15537 = vst [vmem:[#allocation37_spill] sm:$0xff] %v10331_v43  ;;  %15538 = vst [vmem:[#allocation38_spill] sm:$0xff] %v10338_v55  ;;  %v1159_v7 = vmul.f32 %v10331_v43, %v10331_v43  ;;  %v1162_v21 = vmul.f32 %v10338_v55, %v10338_v55 }
  0xc6   : > { %997 = vmatmul.mubr.f32.gmra.mrb[68].mxu0 %v10299_v30  ;;  %1601 = vmatmul.mubr.f32.gmra.mrb[68].mxu1 %v1155_v56  ;;  %v458_v56 = vld [vmem:[%s9636_s30 + $0x250] sm:$0xff]  ;;  %v461_v30 = vld [vmem:[%s9636_s30 + $0x268] sm:$0xff] }
  0xc7   : > { %7858 = vmatprep.mubr.msk.f32.mxu0 %vm580_vm0, %v10306_v34  ;;  %7907 = vmatprep.mubr.msk.f32.mxu1 %vm580_vm0, %v1158_v42  ;;  %v10347_v48 = vadd.f32 %v458_v56, %v360_v61  ;;  %v10354_v26 = vadd.f32 %v461_v30, %v363_v12  ;;  %v362_v42 = vld [vmem:[%s9630_s27 + $0x260] sm:$0xff]  ;;  %v365_v34 = vld [vmem:[%s9630_s27 + $0x278] sm:$0xff] }
  0xc9   : > { %15539 = vst [vmem:[#allocation39_spill] sm:$0xff] %v10347_v48  ;;  %15540 = vst [vmem:[#allocation40_spill] sm:$0xff] %v10354_v26  ;;  %v1161_v61 = vmul.f32 %v10347_v48, %v10347_v48  ;;  %v1164_v12 = vmul.f32 %v10354_v26, %v10354_v26 }
  0xca   : > { %1003 = vmatmul.mubr.f32.gmra.mrb[70].mxu0 %v10315_v44  ;;  %1607 = vmatmul.mubr.f32.gmra.mrb[70].mxu1 %v1157_v0  ;;  %v460_v0 = vld [vmem:[%s9636_s30 + $0x260] sm:$0xff]  ;;  %v463_v44 = vld [vmem:[%s9636_s30 + $0x278] sm:$0xff] }
  0xcb   : > { %7859 = vmatprep.mubr.msk.f32.mxu0 %vm580_vm0, %v10322_v2  ;;  %7908 = vmatprep.mubr.msk.f32.mxu1 %vm580_vm0, %v1160_v33  ;;  %v10363_v56 = vadd.f32 %v460_v0, %v362_v42  ;;  %v10370_v30 = vadd.f32 %v463_v44, %v365_v34  ;;  %v364_v33 = vld [vmem:[%s9630_s27 + $0x270] sm:$0xff]  ;;  %v367_v2 = vld [vmem:[%s9630_s27 + $0x288] sm:$0xff] }
  0xcd   : > { %15541 = vst [vmem:[#allocation41_spill] sm:$0xff] %v10363_v56  ;;  %15542 = vst [vmem:[#allocation42_spill] sm:$0xff] %v10370_v30  ;;  %v1163_v42 = vmul.f32 %v10363_v56, %v10363_v56  ;;  %v1166_v34 = vmul.f32 %v10370_v30, %v10370_v30 }
  0xce   : > { %1009 = vmatmul.mubr.f32.gmra.mrb[72].mxu0 %v10331_v43  ;;  %1613 = vmatmul.mubr.f32.gmra.mrb[72].mxu1 %v1159_v7  ;;  %v462_v7 = vld [vmem:[%s9636_s30 + $0x270] sm:$0xff]  ;;  %v465_v43 = vld [vmem:[%s9636_s30 + $0x288] sm:$0xff] }
  0xcf   : > { %7860 = vmatprep.mubr.msk.f32.mxu0 %vm580_vm0, %v10338_v55  ;;  %7909 = vmatprep.mubr.msk.f32.mxu1 %vm580_vm0, %v1162_v21  ;;  %v10379_v0 = vadd.f32 %v462_v7, %v364_v33  ;;  %v10386_v44 = vadd.f32 %v465_v43, %v367_v2  ;;  %v366_v21 = vld [vmem:[%s9630_s27 + $0x280] sm:$0xff]  ;;  %v369_v55 = vld [vmem:[%s9630_s27 + $0x298] sm:$0xff] }
  0xd1   : > { %15543 = vst [vmem:[#allocation43_spill] sm:$0xff] %v10379_v0  ;;  %15544 = vst [vmem:[#allocation44_spill] sm:$0xff] %v10386_v44  ;;  %v1165_v33 = vmul.f32 %v10379_v0, %v10379_v0  ;;  %v1168_v2 = vmul.f32 %v10386_v44, %v10386_v44 }
  0xd2   : > { %1015 = vmatmul.mubr.f32.gmra.mrb[74].mxu0 %v10347_v48  ;;  %1619 = vmatmul.mubr.f32.gmra.mrb[74].mxu1 %v1161_v61  ;;  %v464_v61 = vld [vmem:[%s9636_s30 + $0x280] sm:$0xff]  ;;  %v467_v48 = vld [vmem:[%s9636_s30 + $0x298] sm:$0xff] }
  0xd3   : > { %7861 = vmatprep.mubr.msk.f32.mxu0 %vm580_vm0, %v10354_v26  ;;  %7910 = vmatprep.mubr.msk.f32.mxu1 %vm580_vm0, %v1164_v12  ;;  %v10395_v7 = vadd.f32 %v464_v61, %v366_v21  ;;  %v10402_v43 = vadd.f32 %v467_v48, %v369_v55  ;;  %v368_v12 = vld [vmem:[%s9630_s27 + $0x290] sm:$0xff]  ;;  %v371_v26 = vld [vmem:[%s9630_s27 + $0x2a8] sm:$0xff] }
  0xd5   : > { %15545 = vst [vmem:[#allocation45_spill] sm:$0xff] %v10395_v7  ;;  %15546 = vst [vmem:[#allocation46_spill] sm:$0xff] %v10402_v43  ;;  %v1167_v21 = vmul.f32 %v10395_v7, %v10395_v7  ;;  %v1170_v55 = vmul.f32 %v10402_v43, %v10402_v43 }
  0xd6   : > { %1021 = vmatmul.mubr.f32.gmra.mrb[76].mxu0 %v10363_v56  ;;  %1625 = vmatmul.mubr.f32.gmra.mrb[76].mxu1 %v1163_v42  ;;  %v466_v42 = vld [vmem:[%s9636_s30 + $0x290] sm:$0xff]  ;;  %v469_v56 = vld [vmem:[%s9636_s30 + $0x2a8] sm:$0xff] }
  0xd7   : > { %7862 = vmatprep.mubr.msk.f32.mxu0 %vm580_vm0, %v10370_v30  ;;  %7911 = vmatprep.mubr.msk.f32.mxu1 %vm580_vm0, %v1166_v34  ;;  %v10411_v61 = vadd.f32 %v466_v42, %v368_v12  ;;  %v10418_v48 = vadd.f32 %v469_v56, %v371_v26  ;;  %v370_v34 = vld [vmem:[%s9630_s27 + $0x2a0] sm:$0xff]  ;;  %v373_v30 = vld [vmem:[%s9630_s27 + $0x2b8] sm:$0xff] }
  0xd9   : > { %15547 = vst [vmem:[#allocation47_spill] sm:$0xff] %v10411_v61  ;;  %15548 = vst [vmem:[#allocation48_spill] sm:$0xff] %v10418_v48  ;;  %v1169_v12 = vmul.f32 %v10411_v61, %v10411_v61  ;;  %v1172_v26 = vmul.f32 %v10418_v48, %v10418_v48 }
  0xda   : > { %1027 = vmatmul.mubr.f32.gmra.mrb[78].mxu0 %v10379_v0  ;;  %1631 = vmatmul.mubr.f32.gmra.mrb[78].mxu1 %v1165_v33  ;;  %v468_v33 = vld [vmem:[%s9636_s30 + $0x2a0] sm:$0xff]  ;;  %v471_v0 = vld [vmem:[%s9636_s30 + $0x2b8] sm:$0xff] }
  0xdb   : > { %7863 = vmatprep.mubr.msk.f32.mxu0 %vm580_vm0, %v10386_v44  ;;  %7912 = vmatprep.mubr.msk.f32.mxu1 %vm580_vm0, %v1168_v2  ;;  %v10427_v42 = vadd.f32 %v468_v33, %v370_v34  ;;  %v10434_v56 = vadd.f32 %v471_v0, %v373_v30  ;;  %v372_v2 = vld [vmem:[%s9630_s27 + $0x2b0] sm:$0xff]  ;;  %v375_v44 = vld [vmem:[%s9630_s27 + $0x2c8] sm:$0xff] }
  0xdc   : > { %v8569_v34 = vld [vmem:[%s15371_s4] ss:$8 sps:$4 sm:$0xff]  }
  0xdd   : > { %15549 = vst [vmem:[#allocation49_spill] sm:$0xff] %v10427_v42  ;;  %15550 = vst [vmem:[#allocation50_spill] sm:$0xff] %v10434_v56  ;;  %v1171_v30 = vmul.f32 %v10427_v42, %v10427_v42  ;;  %v1174_v33 = vmul.f32 %v10434_v56, %v10434_v56 }
  0xde   : > { %1033 = vmatmul.mubr.f32.gmra.mrb[80].mxu0 %v10395_v7  ;;  %1637 = vmatmul.mubr.f32.gmra.mrb[80].mxu1 %v1167_v21  ;;  %v470_v21 = vld [vmem:[%s9636_s30 + $0x2b0] sm:$0xff]  ;;  %v473_v7 = vld [vmem:[%s9636_s30 + $0x2c8] sm:$0xff] }
  0xdf   : > { %7864 = vmatprep.mubr.msk.f32.mxu0 %vm580_vm0, %v10402_v43  ;;  %7913 = vmatprep.mubr.msk.f32.mxu1 %vm580_vm0, %v1170_v55  ;;  %v8571_v55 = vld [vmem:[%s15371_s4 + $0x4] ss:$8 sps:$4 sm:$0xff]   ;;  %v10449_v0 = vadd.f32 %v470_v21, %v372_v2  ;;  %v10456_v43 = vadd.f32 %v473_v7, %v375_v44  ;;  %v376_v21 = vld [vmem:[%s9630_s27 + $0x2d0] sm:$0xff] }
  0xe0   : > { %6801 = vmatprep.subr.bf16.mxu1 %v8571_v55  ;;  %v379_v55 = vld [vmem:[%s9630_s27 + $0x2e8] sm:$0xff] }
  0xe1   : > { %15551 = vst [vmem:[#allocation51_spill] sm:$0xff] %v10449_v0  ;;  %15552 = vst [vmem:[#allocation52_spill] sm:$0xff] %v10456_v43  ;;  %6802 = vmatpush1.bf16.msra.mxu1 %v8569_v34  ;;  %v1176_v44 = vmul.f32 %v10456_v43, %v10456_v43  ;;  %v474_v34 = vld [vmem:[%s9636_s30 + $0x2d0] sm:$0xff] }
  0xe2   : > { %1039 = vmatmul.mubr.f32.gmra.mrb[82].mxu0 %v10411_v61  ;;  %1643 = vmatmul.mubr.f32.gmra.mrb[82].mxu1 %v1169_v12  ;;  %v472_v12 = vld [vmem:[%s9636_s30 + $0x2c0] sm:$0xff]  ;;  %v377_v61 = vld [vmem:[%s9630_s27 + $0x2d8] sm:$0xff] }
  0xe3   : > { %7865 = vmatprep.mubr.msk.f32.mxu0 %vm580_vm0, %v10418_v48  ;;  %7914 = vmatprep.mubr.msk.f32.mxu1 %vm580_vm0, %v1172_v26  ;;  %v1173_v26 = vmul.f32 %v10449_v0, %v10449_v0  ;;  %v10465_v2 = vadd.f32 %v472_v12, %v374_v22  ;;  %v10472_v7 = vadd.f32 %v475_v15, %v377_v61  ;;  %v380_v48 = vld [vmem:[%s9630_s27 + $0x2f0] sm:$0xff] }
  0xe4   : > { %v10481_v12 = vadd.f32 %v474_v34, %v376_v21  ;;  %v8575_v21 = vld [vmem:[%s15371_s4 + $0x10] ss:$8 sps:$4 sm:$0xff]  }
  0xe5   : > { %15553 = vst [vmem:[#allocation53_spill] sm:$0xff] %v10465_v2  ;;  %15554 = vst [vmem:[#allocation54_spill] sm:$0xff] %v10472_v7  ;;  %v1175_v22 = vmul.f32 %v10465_v2, %v10465_v2  ;;  %v1178_v15 = vmul.f32 %v10472_v7, %v10472_v7 }
  0xe6   : > { %1045 = vmatmul.mubr.f32.gmra.mrb[84].mxu0 %v10427_v42  ;;  %1649 = vmatmul.mubr.f32.gmra.mrb[84].mxu1 %v1171_v30  ;;  %v477_v30 = vld [vmem:[%s9636_s30 + $0x2e8] sm:$0xff]  ;;  %15555 = vst [vmem:[#allocation55_spill] sm:$0xff] %v10481_v12  ;;  %v1177_v34 = vmul.f32 %v10481_v12, %v10481_v12 }
  0xe7   : > { %7866 = vmatprep.mubr.msk.f32.mxu0 %vm580_vm0, %v10434_v56  ;;  %7915 = vmatprep.mubr.msk.f32.mxu1 %vm580_vm0, %v1174_v33  ;;  %v10488_v61 = vadd.f32 %v477_v30, %v379_v55  ;;  %v378_v33 = vld [vmem:[%s9630_s27 + $0x2e0] sm:$0xff]  ;;  %v381_v56 = vld [vmem:[%s9630_s27 + $0x2f8] sm:$0xff]  ;;  %v481_v42 = vld [vmem:[%s9636_s30 + $0x308] sm:$0xff] }
  0xe9   : > { %15556 = vst [vmem:[#allocation56_spill] sm:$0xff] %v10488_v61  ;;  %v1180_v30 = vmul.f32 %v10488_v61, %v10488_v61 }
  0xea   : > { %1051 = vmatmul.mubr.f32.gmra.mrb[86].mxu0 %v10449_v0  ;;  %1655 = vmatmul.mubr.f32.gmra.mrb[86].mxu1 %v1173_v26  ;;  %v476_v26 = vld [vmem:[%s9636_s30 + $0x2e0] sm:$0xff]  ;;  %v479_v0 = vld [vmem:[%s9636_s30 + $0x2f8] sm:$0xff] }
  0xeb   : > { %7867 = vmatprep.mubr.msk.f32.mxu0 %vm580_vm0, %v10456_v43  ;;  %7916 = vmatprep.mubr.msk.f32.mxu1 %vm580_vm0, %v1176_v44  ;;  %v8577_v44 = vld [vmem:[%s15371_s4 + $0x14] ss:$8 sps:$4 sm:$0xff]   ;;  %v10503_v55 = vadd.f32 %v476_v26, %v378_v33  ;;  %v10510_v43 = vadd.f32 %v479_v0, %v381_v56  ;;  %v382_v26 = vld [vmem:[%s9630_s27 + $0x300] sm:$0xff] }
  0xec   : > { %6803 = vmatprep.subr.bf16.mxu1 %v8577_v44 }
  0xed   : > { %15557 = vst [vmem:[#allocation57_spill] sm:$0xff] %v10503_v55  ;;  %15558 = vst [vmem:[#allocation58_spill] sm:$0xff] %v10510_v43  ;;  %6804 = vmatpush1.bf16.msra.mxu1 %v8575_v21  ;;  %v1179_v33 = vmul.f32 %v10503_v55, %v10503_v55  ;;  %v1182_v56 = vmul.f32 %v10510_v43, %v10510_v43  ;;  %v480_v21 = vld [vmem:[%s9636_s30 + $0x300] sm:$0xff] }
  0xee   : > { %1057 = vmatmul.mubr.f32.gmra.mrb[88].mxu0 %v10465_v2  ;;  %1661 = vmatmul.mubr.f32.gmra.mrb[88].mxu1 %v1175_v22  ;;  %v478_v2 = vld [vmem:[%s9636_s30 + $0x2f0] sm:$0xff]  ;;  %v383_v22 = vld [vmem:[%s9630_s27 + $0x308] sm:$0xff]  ;;  %s15116_s27 = scalar_lea.vmem %s15373_s6, %s9622_s24 }
  0xef   : > { %7868 = vmatprep.mubr.msk.f32.mxu0 %vm580_vm0, %v10472_v7  ;;  %7917 = vmatprep.mubr.msk.f32.mxu1 %vm580_vm0, %v1178_v15  ;;  %v10519_v15 = vadd.f32 %v478_v2, %v380_v48  ;;  %v10526_v0 = vadd.f32 %v481_v42, %v383_v22  ;;  %v10533_v48 = vadd.f32 %v480_v21, %v382_v26  ;;  %v8581_v42 = vld [vmem:[%s15371_s4 + $0x20] ss:$8 sps:$4 sm:$0xff]   ;;  %v8587_v22 = vld [vmem:[%s15371_s4 + $0x30] ss:$8 sps:$4 sm:$0xff]  }
  0xf0   : > { %v8590_v21 = vld [vmem:[%s15371_s4 + $0x40] ss:$8 sps:$4 sm:$0xff]  }
  0xf1   : > { %15559 = vst [vmem:[#allocation59_spill] sm:$0xff] %v10519_v15  ;;  %15560 = vst [vmem:[#allocation60_spill] sm:$0xff] %v10526_v0  ;;  %v1181_v44 = vmul.f32 %v10519_v15, %v10519_v15  ;;  %v1184_v2 = vmul.f32 %v10526_v0, %v10526_v0 }
  0xf2   : > { %1063 = vmatmul.mubr.f32.gmra.mrb[90].mxu0 %v10481_v12  ;;  %1667 = vmatmul.mubr.f32.gmra.mrb[90].mxu1 %v1177_v34  ;;  %15561 = vst [vmem:[#allocation61_spill] sm:$0xff] %v10533_v48  ;;  %v8583_v34 = vld [vmem:[%s15371_s4 + $0x24] ss:$8 sps:$4 sm:$0xff]  }
  0xf3   : > { %7869 = vmatprep.mubr.msk.f32.mxu0 %vm580_vm0, %v10488_v61  ;;  %7918 = vmatprep.mubr.msk.f32.mxu1 %vm580_vm0, %v1180_v30  ;;  %v1183_v30 = vmul.f32 %v10533_v48, %v10533_v48 }
  0xf4   : > { %6805 = vmatprep.subr.bf16.mxu1 %v8583_v34 }
  0xf5   : > { %6806 = vmatpush1.bf16.msra.mxu1 %v8581_v42 }
  0xf6   : > { %1069 = vmatmul.mubr.f32.gmra.mrb[92].mxu0 %v10503_v55  ;;  %1673 = vmatmul.mubr.f32.gmra.mrb[92].mxu1 %v1179_v33  ;;  %v8589_v33 = vld [vmem:[%s15371_s4 + $0x34] ss:$8 sps:$4 sm:$0xff]  }
  0xf7   : > { %7870 = vmatprep.mubr.msk.f32.mxu0 %vm580_vm0, %v10510_v43  ;;  %7919 = vmatprep.mubr.msk.f32.mxu1 %vm580_vm0, %v1182_v56 }
  0xf8   : > { %6807 = vmatprep.subr.bf16.mxu1 %v8589_v33 }
  0xf9   : > { %6808 = vmatpush1.bf16.msra.mxu1 %v8587_v22 }
  0xfa   : > { %1075 = vmatmul.mubr.f32.gmra.mrb[94].mxu0 %v10519_v15  ;;  %1679 = vmatmul.mubr.f32.gmra.mrb[94].mxu1 %v1181_v44  ;;  %v8592_v44 = vld [vmem:[%s15371_s4 + $0x44] ss:$8 sps:$4 sm:$0xff]  }
  0xfb   : > { %7871 = vmatprep.mubr.msk.f32.mxu0 %vm580_vm0, %v10526_v0  ;;  %7920 = vmatprep.mubr.msk.f32.mxu1 %vm580_vm0, %v1184_v2 }
  0xfc   : > { %6809 = vmatprep.subr.bf16.mxu1 %v8592_v44 }
  0xfd   : > { %6810 = vmatpush1.bf16.msra.mxu1 %v8590_v21 }
  0xfe   : > { %1081 = vmatmul.mubr.f32.gmra.mrb[96].mxu0 %v10533_v48  ;;  %1685 = vmatmul.mubr.f32.gmra.mrb[96].mxu1 %v1183_v30 }
 0x111   : > { %v10559_v56 = vpop.f32.mrb[0].mxu0  ;;  %v1398_v26 = vpop.f32.mrb[0].mxu1 }
 0x112   : > { %v10567_v2 = vpop.f32.mrb[1].mxu0  ;;  %v1691_v42 = vmul.f32 %v10559_v56, %v10559_v56  ;;  %v1400_v34 = vpop.f32.mrb[1].mxu1 }
 0x113   : > { %v1692_v30 = vmul.f32 %v10567_v2, %v10567_v2  ;;  %v1888_v18 = vsub.f32 %v9640_v3, %v10567_v2 }
 0x114   : > { %v1789_v22 = vsub.f32 %v1398_v26, %v1691_v42 }
 0x115   : > { %v1790_v33 = vsub.f32 %v1400_v34, %v1692_v30  ;;  %v10573_v0 = vpop.f32.mrb[2].mxu0  ;;  %v1404_v48 = vpop.f32.mrb[2].mxu1 }
 0x116   : > { %v1985_v43 = vadd.f32 1e-05, %v1789_v22  ;;  %v10575_v15 = vpop.f32.mrb[3].mxu0  ;;  %v1693_v61 = vmul.f32 %v10573_v0, %v10573_v0  ;;  %v1406_v55 = vpop.f32.mrb[3].mxu1 }
 0x117   : > { %v1986_v7 = vadd.f32 1e-05, %v1790_v33  ;;  %v1694_v12 = vmul.f32 %v10575_v15, %v10575_v15  ;;  %v1890_v60 = vsub.f32 %v9687_v10, %v10575_v15 }
 0x118   : > { %8776 = vrsqrt.f32 %v1985_v43  ;;  %v1791_v47 = vsub.f32 %v1404_v48, %v1693_v61  ;;  %v8598_v61 = vld [vmem:[%s15371_s4 + $0x54] ss:$8 sps:$4 sm:$0xff]  }
 0x119   : > { %8778 = vrsqrt.f32 %v1986_v7  ;;  %v1792_v26 = vsub.f32 %v1406_v55, %v1694_v12  ;;  %v10581_v21 = vpop.f32.mrb[4].mxu0  ;;  %v1410_v44 = vpop.f32.mrb[4].mxu1  ;;  %6811 = vmatprep.subr.bf16.mxu1 %v8598_v61 }
 0x11a   : > { %v1987_v42 = vadd.f32 1e-05, %v1791_v47  ;;  %v10583_v34 = vpop.f32.mrb[5].mxu0  ;;  %v1695_v30 = vmul.f32 %v10581_v21, %v10581_v21  ;;  %v1412_v22 = vpop.f32.mrb[5].mxu1  ;;  %v8596_v47 = vld [vmem:[%s15371_s4 + $0x50] ss:$8 sps:$4 sm:$0xff]  }
 0x11b   : > { %v1988_v53 = vadd.f32 1e-05, %v1792_v26  ;;  %v1696_v33 = vmul.f32 %v10583_v34, %v10583_v34  ;;  %6812 = vmatpush1.bf16.msra.mxu1 %v8596_v47 }
 0x11c   : > { %8780 = vrsqrt.f32 %v1987_v42  ;;  %v1793_v28 = vsub.f32 %v1410_v44, %v1695_v30 }
 0x11d   : > { %8782 = vrsqrt.f32 %v1988_v53  ;;  %v1794_v43 = vsub.f32 %v1412_v22, %v1696_v33  ;;  %v10589_v7 = vpop.f32.mrb[6].mxu0  ;;  %v1416_v12 = vpop.f32.mrb[6].mxu1  ;;  %v1887_v22 = vsub.f32 %v9683_v9, %v10559_v56 }
 0x11e   : > { %v1989_v55 = vadd.f32 1e-05, %v1793_v28  ;;  %v10597_v48 = vpop.f32.mrb[7].mxu0  ;;  %v1697_v26 = vmul.f32 %v10589_v7, %v10589_v7  ;;  %v1418_v44 = vpop.f32.mrb[7].mxu1 }
 0x11f   : > { %v1990_v53 = vadd.f32 1e-05, %v1794_v43  ;;  %v1698_v42 = vmul.f32 %v10597_v48, %v10597_v48 }
 0x120   : > { %8784 = vrsqrt.f32 %v1989_v55  ;;  %v1795_v30 = vsub.f32 %v1416_v12, %v1697_v26 }
 0x121   : > { %8786 = vrsqrt.f32 %v1990_v53  ;;  %v1796_v33 = vsub.f32 %v1418_v44, %v1698_v42  ;;  %v10605_v28 = vpop.f32.mrb[8].mxu0  ;;  %v1422_v36 = vpop.f32.mrb[8].mxu1  ;;  %v1889_v53 = vsub.f32 %v9700_v17, %v10573_v0 }
 0x122   : > { %v8777_v5 = vpop.eup %8776  ;;  %v1991_v43 = vadd.f32 1e-05, %v1795_v30  ;;  %v10609_v50 = vpop.f32.mrb[9].mxu0  ;;  %v1699_v61 = vmul.f32 %v10605_v28, %v10605_v28 }
 0x123   : > { %v1424_v12 = vpop.f32.mrb[9].mxu1  ;;  %v8779_v47 = vpop.eup %8778  ;;  %v2181_v55 = vmul.f32 %v8777_v5, %v1887_v22  ;;  %v1992_v26 = vadd.f32 1e-05, %v1796_v33  ;;  %v1700_v9 = vmul.f32 %v10609_v50, %v10609_v50 }
 0x124   : > { %8788 = vrsqrt.f32 %v1991_v43  ;;  %v1797_v56 = vsub.f32 %v1422_v36, %v1699_v61  ;;  %v2182_v44 = vmul.f32 %v8779_v47, %v1888_v18  ;;  %v1891_v47 = vsub.f32 %v9721_v27, %v10581_v21 }
 0x125   : > { %8790 = vrsqrt.f32 %v1992_v26  ;;  %v1798_v3 = vsub.f32 %v1424_v12, %v1700_v9  ;;  %v10617_v2 = vpop.f32.mrb[10].mxu0  ;;  %v1428_v42 = vpop.f32.mrb[10].mxu1 }
 0x126   : > { %v8781_v30 = vpop.eup %8780  ;;  %v1993_v5 = vadd.f32 1e-05, %v1797_v56  ;;  %v10621_v22 = vpop.f32.mrb[11].mxu0  ;;  %v1701_v33 = vmul.f32 %v10617_v2, %v10617_v2  ;;  %v8602_v56 = vld [vmem:[%s15371_s4 + $0x60] ss:$8 sps:$4 sm:$0xff]  }
 0x127   : > { %v1430_v36 = vpop.f32.mrb[11].mxu1  ;;  %v8783_v18 = vpop.eup %8782  ;;  %v2183_v43 = vmul.f32 %v8781_v30, %v1889_v53  ;;  %v1994_v61 = vadd.f32 1e-05, %v1798_v3  ;;  %v1702_v17 = vmul.f32 %v10621_v22, %v10621_v22  ;;  %v8604_v53 = vld [vmem:[%s15371_s4 + $0x64] ss:$8 sps:$4 sm:$0xff]  }
 0x128   : > { %8792 = vrsqrt.f32 %v1993_v5  ;;  %v1799_v0 = vsub.f32 %v1428_v42, %v1701_v33  ;;  %v2184_v12 = vmul.f32 %v8783_v18, %v1890_v60  ;;  %v1892_v60 = vsub.f32 %v9706_v19, %v10583_v34  ;;  %v8560_v5 = vld [vmem:[%s15369_s2 + $0x8] ss:$24 sps:$4 sm:$0xff]   ;;  %v8565_v19 = vld [vmem:[%s15369_s2 + $0x3c] ss:$24 sps:$4 sm:$0xff]   ;;  %6813 = vmatprep.subr.bf16.mxu1 %v8604_v53 }
 0x129   : > { %8794 = vrsqrt.f32 %v1994_v61  ;;  %v1800_v10 = vsub.f32 %v1430_v36, %v1702_v17  ;;  %v10629_v15 = vpop.f32.mrb[12].mxu0  ;;  %v1434_v26 = vpop.f32.mrb[12].mxu1  ;;  %v10631_v9 = vpack.c.bf16 %v2183_v43, %v2181_v55  ;;  %6814 = vmatpush1.bf16.msra.mxu1 %v8602_v56  ;;  %v1893_v61 = vsub.f32 %v9743_v37, %v10589_v7  ;;  %v8563_v37 = vld [vmem:[%s15369_s2 + $0x38] ss:$24 sps:$4 sm:$0xff]  }
 0x12a   : > { %v8785_v3 = vpop.eup %8784  ;;  %v1995_v27 = vadd.f32 1e-05, %v1799_v0  ;;  %v10641_v21 = vpop.f32.mrb[13].mxu0  ;;  %v1703_v42 = vmul.f32 %v10629_v15, %v10629_v15  ;;  %v10645_v30 = vpack.c.bf16 %v2184_v12, %v2182_v44 }
 0x12b   : > { %15562 = vst [vmem:[#allocation62_spill] sm:$0xff] %v10631_v9  ;;  %v1436_v55 = vpop.f32.mrb[13].mxu1  ;;  %v8787_v33 = vpop.eup %8786  ;;  %v1996_v36 = vadd.f32 1e-05, %v1800_v10  ;;  %v1704_v18 = vmul.f32 %v10641_v21, %v10641_v21  ;;  %v2185_v43 = vmul.f32 %v8785_v3, %v1891_v47  ;;  %v1894_v10 = vsub.f32 %v9728_v29, %v10597_v48  ;;  %v8568_v29 = vld [vmem:[%s15369_s2 + $0x6c] ss:$24 sps:$4 sm:$0xff]  }
 0x12c   : > { %15563 = vst [vmem:[#allocation63_spill] sm:$0xff] %v10645_v30  ;;  %8796 = vrsqrt.f32 %v1995_v27  ;;  %v1801_v34 = vsub.f32 %v1434_v26, %v1703_v42  ;;  %7993 = vmatprep.mubr.msk.bf16.mxu0 %vm580_vm0, %v10645_v30  ;;  %v2186_v44 = vmul.f32 %v8787_v33, %v1892_v60 }
 0x12d   : > { %8798 = vrsqrt.f32 %v1996_v36  ;;  %v1802_v17 = vsub.f32 %v1436_v55, %v1704_v18  ;;  %v10659_v0 = vpop.f32.mrb[14].mxu0  ;;  %2901 = vmatmul.mubr.bf16.vlgmr.msra.gmra.mrb[100].mxu0 %v10631_v9  ;;  %v1440_v12 = vpop.f32.mrb[14].mxu1 }
 0x12e   : > { %v8789_v47 = vpop.eup %8788  ;;  %v1997_v26 = vadd.f32 1e-05, %v1801_v34  ;;  %3150 = vmatpush1.bf16.msra.mxu0 %v8560_v5  ;;  %v10664_v53 = vpop.f32.mrb[15].mxu0  ;;  %v1705_v56 = vmul.f32 %v10659_v0, %v10659_v0  ;;  %v1895_v5 = vsub.f32 %v9767_v49, %v10605_v28  ;;  %v8566_v49 = vld [vmem:[%s15369_s2 + $0x68] ss:$24 sps:$4 sm:$0xff]  }
 0x12f   : > { %v1442_v3 = vpop.f32.mrb[15].mxu1  ;;  %v8791_v7 = vpop.eup %8790  ;;  %v1998_v60 = vadd.f32 1e-05, %v1802_v17  ;;  %v1706_v27 = vmul.f32 %v10664_v53, %v10664_v53  ;;  %v2187_v42 = vmul.f32 %v8789_v47, %v1893_v61  ;;  %3151 = vmatprep.subr.bf16.mxu0 %v8565_v19  ;;  %v1896_v19 = vsub.f32 %v9750_v39, %v10609_v50  ;;  %v8574_v50 = vld [vmem:[%s15369_s2 + $0x9c] ss:$24 sps:$4 sm:$0xff]  }
 0x130   : > { %8800 = vrsqrt.f32 %v1997_v26  ;;  %v1803_v48 = vsub.f32 %v1440_v12, %v1705_v56  ;;  %v2188_v55 = vmul.f32 %v8791_v7, %v1894_v10 }
 0x131   : > { %8802 = vrsqrt.f32 %v1998_v60  ;;  %v1804_v33 = vsub.f32 %v1442_v3, %v1706_v27  ;;  %v10678_v36 = vpop.f32.mrb[16].mxu0  ;;  %v1446_v18 = vpop.f32.mrb[16].mxu1  ;;  %v10680_v34 = vpack.c.bf16 %v2187_v42, %v2185_v43  ;;  %v8605_v42 = vld [vmem:[%s15371_s4 + $0x70] ss:$8 sps:$4 sm:$0xff]  }
 0x132   : > { %v8793_v17 = vpop.eup %8792  ;;  %v1999_v61 = vadd.f32 1e-05, %v1803_v48  ;;  %v10684_v47 = vpop.f32.mrb[17].mxu0  ;;  %v1707_v12 = vmul.f32 %v10678_v36, %v10678_v36  ;;  %v10688_v26 = vpack.c.bf16 %v2188_v55, %v2186_v44  ;;  %3152 = vmatpush1.bf16.msra.mxu0 %v8563_v37  ;;  %v1897_v37 = vsub.f32 %v9788_v58, %v10617_v2 }
 0x133   : > { %15564 = vst [vmem:[#allocation64_spill] sm:$0xff] %v10680_v34  ;;  %v1448_v10 = vpop.f32.mrb[17].mxu1  ;;  %v8795_v28 = vpop.eup %8794  ;;  %v2000_v43 = vadd.f32 1e-05, %v1804_v33  ;;  %v1708_v56 = vmul.f32 %v10684_v47, %v10684_v47  ;;  %v2189_v39 = vmul.f32 %v8793_v17, %v1895_v5  ;;  %3153 = vmatprep.subr.bf16.mxu0 %v8568_v29  ;;  %v8607_v29 = vld [vmem:[%s15371_s4 + $0x74] ss:$8 sps:$4 sm:$0xff]   ;;  %v1898_v55 = vsub.f32 %v9779_v54, %v10621_v22 }
 0x134   : > { %15565 = vst [vmem:[#allocation65_spill] sm:$0xff] %v10688_v26  ;;  %8804 = vrsqrt.f32 %v1999_v61  ;;  %v1805_v3 = vsub.f32 %v1446_v18, %v1707_v12  ;;  %7994 = vmatprep.mubr.msk.bf16.mxu0 %vm580_vm0, %v10688_v26  ;;  %v2190_v44 = vmul.f32 %v8795_v28, %v1896_v19  ;;  %v8572_v18 = vld [vmem:[%s15369_s2 + $0x98] ss:$24 sps:$4 sm:$0xff]   ;;  %v8580_v54 = vld [vmem:[%s15369_s2 + $0xcc] ss:$24 sps:$4 sm:$0xff]   ;;  %6815 = vmatprep.subr.bf16.mxu1 %v8607_v29 }
 0x135   : > { %8806 = vrsqrt.f32 %v2000_v43  ;;  %v1806_v7 = vsub.f32 %v1448_v10, %v1708_v56  ;;  %v10702_v60 = vpop.f32.mrb[18].mxu0  ;;  %2911 = vmatmul.mubr.bf16.gmra.mrb[104].mxu0 %v10680_v34  ;;  %v1452_v27 = vpop.f32.mrb[18].mxu1  ;;  %6816 = vmatpush1.bf16.msra.mxu1 %v8605_v42 }
 0x136   : > { %v8797_v48 = vpop.eup %8796  ;;  %v2001_v58 = vadd.f32 1e-05, %v1805_v3  ;;  %v10713_v2 = vpop.f32.mrb[19].mxu0  ;;  %v1709_v5 = vmul.f32 %v10702_v60, %v10702_v60  ;;  %3154 = vmatpush1.bf16.msra.mxu0 %v8566_v49  ;;  %v1899_v49 = vsub.f32 %v9811_v6, %v10629_v15  ;;  %v8578_v6 = vld [vmem:[%s15369_s2 + $0xc8] ss:$24 sps:$4 sm:$0xff]  }
 0x137   : > { %v1454_v33 = vpop.f32.mrb[19].mxu1  ;;  %v8799_v17 = vpop.eup %8798  ;;  %v2002_v19 = vadd.f32 1e-05, %v1806_v7  ;;  %v1710_v61 = vmul.f32 %v10713_v2, %v10713_v2  ;;  %v2191_v12 = vmul.f32 %v8797_v48, %v1897_v37  ;;  %3155 = vmatprep.subr.bf16.mxu0 %v8574_v50  ;;  %v1900_v37 = vsub.f32 %v9798_v63, %v10641_v21  ;;  %v8586_v21 = vld [vmem:[%s15369_s2 + $0xfc] ss:$24 sps:$4 sm:$0xff]  }
 0x138   : > { %8808 = vrsqrt.f32 %v2001_v58  ;;  %v1807_v22 = vsub.f32 %v1452_v27, %v1709_v5  ;;  %v2192_v10 = vmul.f32 %v8799_v17, %v1898_v55  ;;  %v1901_v5 = vsub.f32 %v9833_v20, %v10659_v0  ;;  %v8584_v20 = vld [vmem:[%s15369_s2 + $0xf8] ss:$24 sps:$4 sm:$0xff]  }
 0x139   : > { %8810 = vrsqrt.f32 %v2002_v19  ;;  %v1808_v28 = vsub.f32 %v1454_v33, %v1710_v61  ;;  %v10727_v43 = vpop.f32.mrb[20].mxu0  ;;  %v1458_v56 = vpop.f32.mrb[20].mxu1  ;;  %v10729_v3 = vpack.c.bf16 %v2191_v12, %v2189_v39  ;;  %v1902_v61 = vsub.f32 %v9823_v13, %v10664_v53  ;;  %v8595_v13 = vld [vmem:[%s15369_s2 + $0x12c] ss:$24 sps:$4 sm:$0xff]  }
 0x13a   : > { %v8801_v50 = vpop.eup %8800  ;;  %v2003_v7 = vadd.f32 1e-05, %v1807_v22  ;;  %v10733_v29 = vpop.f32.mrb[21].mxu0  ;;  %v1711_v27 = vmul.f32 %v10727_v43, %v10727_v43  ;;  %v10737_v48 = vpack.c.bf16 %v2192_v10, %v2190_v44  ;;  %3156 = vmatpush1.bf16.msra.mxu0 %v8572_v18 }
 0x13b   : > { %15566 = vst [vmem:[#allocation66_spill] sm:$0xff] %v10729_v3  ;;  %v1460_v42 = vpop.f32.mrb[21].mxu1  ;;  %v8803_v15 = vpop.eup %8802  ;;  %v2004_v39 = vadd.f32 1e-05, %v1808_v28  ;;  %v1712_v55 = vmul.f32 %v10733_v29, %v10733_v29  ;;  %v2193_v63 = vmul.f32 %v8801_v50, %v1899_v49  ;;  %3157 = vmatprep.subr.bf16.mxu0 %v8580_v54 }
 0x13c   : > { %15567 = vst [vmem:[#allocation67_spill] sm:$0xff] %v10737_v48  ;;  %8812 = vrsqrt.f32 %v2003_v7  ;;  %v1809_v58 = vsub.f32 %v1458_v56, %v1711_v27  ;;  %7995 = vmatprep.mubr.msk.bf16.mxu0 %vm580_vm0, %v10737_v48  ;;  %v2194_v44 = vmul.f32 %v8803_v15, %v1900_v37  ;;  %v1903_v37 = vsub.f32 %v9852_v31, %v10678_v36  ;;  %v8611_v15 = vld [vmem:[%s15371_s4 + $0x80] ss:$8 sps:$4 sm:$0xff]  }
 0x13d   : > { %8814 = vrsqrt.f32 %v2004_v39  ;;  %v1810_v33 = vsub.f32 %v1460_v42, %v1712_v55  ;;  %v10751_v18 = vpop.f32.mrb[22].mxu0  ;;  %2921 = vmatmul.mubr.bf16.gmra.mrb[108].mxu0 %v10729_v3  ;;  %v1464_v17 = vpop.f32.mrb[22].mxu1  ;;  %v8613_v39 = vld [vmem:[%s15371_s4 + $0x84] ss:$8 sps:$4 sm:$0xff]  }
 0x13e   : > { %v8805_v19 = vpop.eup %8804  ;;  %v2005_v12 = vadd.f32 1e-05, %v1809_v58  ;;  %v10756_v54 = vpop.f32.mrb[23].mxu0  ;;  %v1713_v22 = vmul.f32 %v10751_v18, %v10751_v18  ;;  %3158 = vmatpush1.bf16.msra.mxu0 %v8578_v6  ;;  %6817 = vmatprep.subr.bf16.mxu1 %v8613_v39  ;;  %v1907_v39 = vsub.f32 %v9890_v52, %v10727_v43  ;;  %v8608_v52 = vld [vmem:[%s15369_s2 + $0x188] ss:$24 sps:$4 sm:$0xff]  }
 0x13f   : > { %v1466_v10 = vpop.f32.mrb[23].mxu1  ;;  %v8807_v0 = vpop.eup %8806  ;;  %v2006_v49 = vadd.f32 1e-05, %v1810_v33  ;;  %v1714_v28 = vmul.f32 %v10756_v54, %v10756_v54  ;;  %v2195_v56 = vmul.f32 %v8805_v19, %v1901_v5  ;;  %3159 = vmatprep.subr.bf16.mxu0 %v8586_v21  ;;  %v1904_v21 = vsub.f32 %v9845_v25, %v10684_v47  ;;  %v8593_v33 = vld [vmem:[%s15369_s2 + $0x128] ss:$24 sps:$4 sm:$0xff]   ;;  %6818 = vmatpush1.bf16.msra.mxu1 %v8611_v15 }
 0x140   : > { %8816 = vrsqrt.f32 %v2005_v12  ;;  %v1811_v53 = vsub.f32 %v1464_v17, %v1713_v22  ;;  %v2196_v50 = vmul.f32 %v8807_v0, %v1902_v61  ;;  %v8601_v47 = vld [vmem:[%s15369_s2 + $0x15c] ss:$24 sps:$4 sm:$0xff]   ;;  %v1905_v22 = vsub.f32 %v9868_v41, %v10702_v60  ;;  %v8599_v41 = vld [vmem:[%s15369_s2 + $0x158] ss:$24 sps:$4 sm:$0xff]  }
 0x141   : > { %8818 = vrsqrt.f32 %v2006_v49  ;;  %v1812_v7 = vsub.f32 %v1466_v10, %v1714_v28  ;;  %v10770_v27 = vpop.f32.mrb[24].mxu0  ;;  %v1470_v42 = vpop.f32.mrb[24].mxu1  ;;  %v10772_v6 = vpack.c.bf16 %v2195_v56, %v2193_v63  ;;  %v1906_v28 = vsub.f32 %v9861_v35, %v10713_v2  ;;  %v8610_v35 = vld [vmem:[%s15369_s2 + $0x18c] ss:$24 sps:$4 sm:$0xff]  }
 0x142   : > { %v8809_v55 = vpop.eup %8808  ;;  %v2007_v31 = vadd.f32 1e-05, %v1811_v53  ;;  %v10782_v36 = vpop.f32.mrb[25].mxu0  ;;  %v1715_v58 = vmul.f32 %v10770_v27, %v10770_v27  ;;  %v10786_v5 = vpack.c.bf16 %v2196_v50, %v2194_v44  ;;  %3160 = vmatpush1.bf16.msra.mxu0 %v8584_v20 }
 0x143   : > { %15568 = vst [vmem:[#allocation68_spill] sm:$0xff] %v10772_v6  ;;  %v1472_v63 = vpop.f32.mrb[25].mxu1  ;;  %v8811_v17 = vpop.eup %8810  ;;  %v2008_v19 = vadd.f32 1e-05, %v1812_v7  ;;  %v1716_v61 = vmul.f32 %v10782_v36, %v10782_v36  ;;  %v2197_v25 = vmul.f32 %v8809_v55, %v1903_v37  ;;  %3161 = vmatprep.subr.bf16.mxu0 %v8595_v13 }
 0x144   : > { %15569 = vst [vmem:[#allocation69_spill] sm:$0xff] %v10786_v5  ;;  %8820 = vrsqrt.f32 %v2007_v31  ;;  %v1813_v44 = vsub.f32 %v1470_v42, %v1715_v58  ;;  %7996 = vmatprep.mubr.msk.bf16.mxu0 %vm580_vm0, %v10786_v5  ;;  %v2198_v12 = vmul.f32 %v8811_v17, %v1904_v21 }
 0x145   : > { %8822 = vrsqrt.f32 %v2008_v19  ;;  %v1814_v10 = vsub.f32 %v1472_v63, %v1716_v61  ;;  %v10800_v20 = vpop.f32.mrb[26].mxu0  ;;  %2931 = vmatmul.mubr.bf16.gmra.mrb[112].mxu0 %v10772_v6  ;;  %v1476_v0 = vpop.f32.mrb[26].mxu1 }
 0x146   : > { %v8813_v49 = vpop.eup %8812  ;;  %v2009_v56 = vadd.f32 1e-05, %v1813_v44  ;;  %v10805_v13 = vpop.f32.mrb[27].mxu0  ;;  %v1717_v53 = vmul.f32 %v10800_v20, %v10800_v20  ;;  %3162 = vmatpush1.bf16.msra.mxu0 %v8593_v33  ;;  %v1908_v33 = vsub.f32 %v9882_v46, %v10733_v29  ;;  %v8616_v29 = vld [vmem:[%s15369_s2 + $0x1bc] ss:$24 sps:$4 sm:$0xff]  }
 0x147   : > { %v1478_v50 = vpop.f32.mrb[27].mxu1  ;;  %v8815_v60 = vpop.eup %8814  ;;  %v2010_v37 = vadd.f32 1e-05, %v1814_v10  ;;  %v1718_v7 = vmul.f32 %v10805_v13, %v10805_v13  ;;  %v2199_v42 = vmul.f32 %v8813_v49, %v1905_v22  ;;  %3163 = vmatprep.subr.bf16.mxu0 %v8601_v47 }
 0x148   : > { %8824 = vrsqrt.f32 %v2009_v56  ;;  %v1815_v2 = vsub.f32 %v1476_v0, %v1717_v53  ;;  %v2200_v15 = vmul.f32 %v8815_v60, %v1906_v28  ;;  %v1909_v0 = vsub.f32 %v9906_v62, %v10751_v18  ;;  %v8614_v62 = vld [vmem:[%s15369_s2 + $0x1b8] ss:$24 sps:$4 sm:$0xff]  }
 0x149   : > { %8826 = vrsqrt.f32 %v2010_v37  ;;  %v1816_v55 = vsub.f32 %v1478_v50, %v1718_v7  ;;  %v10819_v21 = vpop.f32.mrb[28].mxu0  ;;  %v1482_v31 = vpop.f32.mrb[28].mxu1  ;;  %v10821_v58 = vpack.c.bf16 %v2199_v42, %v2197_v25  ;;  %v1910_v50 = vsub.f32 %v9899_v57, %v10756_v54 }
 0x14a   : > { %v8817_v63 = vpop.eup %8816  ;;  %v2011_v17 = vadd.f32 1e-05, %v1815_v2  ;;  %v10825_v19 = vpop.f32.mrb[29].mxu0  ;;  %v1719_v61 = vmul.f32 %v10819_v21, %v10819_v21  ;;  %v10829_v44 = vpack.c.bf16 %v2200_v15, %v2198_v12  ;;  %3164 = vmatpush1.bf16.msra.mxu0 %v8599_v41  ;;  %v8617_v15 = vld [vmem:[%s15371_s4 + $0x90] ss:$8 sps:$4 sm:$0xff]  }
 0x14b   : > { %15570 = vst [vmem:[#allocation70_spill] sm:$0xff] %v10821_v58  ;;  %v1484_v47 = vpop.f32.mrb[29].mxu1  ;;  %v8819_v43 = vpop.eup %8818  ;;  %v2012_v25 = vadd.f32 1e-05, %v1816_v55  ;;  %v1720_v22 = vmul.f32 %v10825_v19, %v10825_v19  ;;  %v2201_v46 = vmul.f32 %v8817_v63, %v1907_v39  ;;  %3165 = vmatprep.subr.bf16.mxu0 %v8610_v35  ;;  %v8619_v39 = vld [vmem:[%s15371_s4 + $0x94] ss:$8 sps:$4 sm:$0xff]   ;;  %v1911_v55 = vsub.f32 %v9922_v11, %v10770_v27 }
 0x14c   : > { %15571 = vst [vmem:[#allocation71_spill] sm:$0xff] %v10829_v44  ;;  %8828 = vrsqrt.f32 %v2011_v17  ;;  %v1817_v10 = vsub.f32 %v1482_v31, %v1719_v61  ;;  %7997 = vmatprep.mubr.msk.bf16.mxu0 %vm580_vm0, %v10829_v44  ;;  %v2202_v12 = vmul.f32 %v8819_v43, %v1908_v33  ;;  %6819 = vmatprep.subr.bf16.mxu1 %v8619_v39 }
 0x14d   : > { %8830 = vrsqrt.f32 %v2012_v25  ;;  %v1818_v49 = vsub.f32 %v1484_v47, %v1720_v22  ;;  %v10843_v28 = vpop.f32.mrb[30].mxu0  ;;  %2941 = vmatmul.mubr.bf16.gmra.mrb[116].mxu0 %v10821_v58  ;;  %v1488_v56 = vpop.f32.mrb[30].mxu1  ;;  %v1912_v47 = vsub.f32 %v9915_v4, %v10782_v36  ;;  %6820 = vmatpush1.bf16.msra.mxu1 %v8617_v15 }
 0x14e   : > { %v8821_v53 = vpop.eup %8820  ;;  %v2013_v41 = vadd.f32 1e-05, %v1817_v10  ;;  %v10848_v60 = vpop.f32.mrb[31].mxu0  ;;  %v1721_v37 = vmul.f32 %v10843_v28, %v10843_v28  ;;  %3166 = vmatpush1.bf16.msra.mxu0 %v8608_v52 }
 0x14f   : > { %v1490_v7 = vpop.f32.mrb[31].mxu1  ;;  %v8823_v18 = vpop.eup %8822  ;;  %v2014_v42 = vadd.f32 1e-05, %v1818_v49  ;;  %v1722_v35 = vmul.f32 %v10848_v60, %v10848_v60  ;;  %v2203_v2 = vmul.f32 %v8821_v53, %v1909_v0  ;;  %3167 = vmatprep.subr.bf16.mxu0 %v8616_v29  ;;  %v1913_v0 = vsub.f32 %v9938_v23, %v10800_v20 }
 0x150   : > { %8832 = vrsqrt.f32 %v2013_v41  ;;  %v1819_v57 = vsub.f32 %v1488_v56, %v1721_v37  ;;  %v2204_v54 = vmul.f32 %v8823_v18, %v1910_v50  ;;  %v1914_v50 = vsub.f32 %v9931_v16, %v10805_v13  ;;  %v8620_v16 = vld [vmem:[%s15369_s2 + $0x1e8] ss:$24 sps:$4 sm:$0xff]   ;;  %v8622_v13 = vld [vmem:[%s15369_s2 + $0x1ec] ss:$24 sps:$4 sm:$0xff]  }
 0x151   : > { %8834 = vrsqrt.f32 %v2014_v42  ;;  %v1820_v31 = vsub.f32 %v1490_v7, %v1722_v35  ;;  %v10865_v63 = vpop.f32.mrb[32].mxu0  ;;  %v1494_v33 = vpop.f32.mrb[32].mxu1  ;;  %v10867_v17 = vpack.c.bf16 %v2203_v2, %v2201_v46 }
 0x152   : > { %v8825_v61 = vpop.eup %8824  ;;  %v2015_v52 = vadd.f32 1e-05, %v1819_v57  ;;  %v10871_v43 = vpop.f32.mrb[33].mxu0  ;;  %v1723_v25 = vmul.f32 %v10865_v63, %v10865_v63  ;;  %v10875_v29 = vpack.c.bf16 %v2204_v54, %v2202_v12  ;;  %3168 = vmatpush1.bf16.msra.mxu0 %v8614_v62  ;;  %v1915_v57 = vsub.f32 %v9960_v40, %v10819_v21 }
 0x153   : > { %15572 = vst [vmem:[#allocation72_spill] sm:$0xff] %v10867_v17  ;;  %v1496_v22 = vpop.f32.mrb[33].mxu1  ;;  %v8827_v11 = vpop.eup %8826  ;;  %v2016_v27 = vadd.f32 1e-05, %v1820_v31  ;;  %v1724_v46 = vmul.f32 %v10871_v43, %v10871_v43  ;;  %v2205_v10 = vmul.f32 %v8825_v61, %v1911_v55  ;;  %v8623_v31 = vld [vmem:[%s15371_s4 + $0xa0] ss:$8 sps:$4 sm:$0xff]   ;;  %3169 = vmatprep.subr.bf16.mxu0 %v8622_v13 }
 0x154   : > { %15573 = vst [vmem:[#allocation73_spill] sm:$0xff] %v10875_v29  ;;  %8836 = vrsqrt.f32 %v2015_v52  ;;  %v1821_v4 = vsub.f32 %v1494_v33, %v1723_v25  ;;  %7998 = vmatprep.mubr.msk.bf16.mxu0 %vm580_vm0, %v10875_v29  ;;  %v2206_v36 = vmul.f32 %v8827_v11, %v1912_v47  ;;  %v8625_v33 = vld [vmem:[%s15371_s4 + $0xa4] ss:$8 sps:$4 sm:$0xff]   ;;  %v1916_v47 = vsub.f32 %v9952_v32, %v10825_v19 }
 0x155   : > { %8838 = vrsqrt.f32 %v2016_v27  ;;  %v1822_v12 = vsub.f32 %v1496_v22, %v1724_v46  ;;  %v10883_v49 = vpop.f32.mrb[34].mxu0  ;;  %2951 = vmatmul.mubr.bf16.gmra.mrb[120].mxu0 %v10867_v17  ;;  %v1500_v56 = vpop.f32.mrb[34].mxu1  ;;  %6821 = vmatprep.subr.bf16.mxu1 %v8625_v33 }
 0x156   : > { %v8829_v53 = vpop.eup %8828  ;;  %v2017_v41 = vadd.f32 1e-05, %v1821_v4  ;;  %v10888_v37 = vpop.f32.mrb[35].mxu0  ;;  %v1725_v7 = vmul.f32 %v10883_v49, %v10883_v49  ;;  %3170 = vmatpush1.bf16.msra.mxu0 %v8620_v16  ;;  %6822 = vmatpush1.bf16.msra.mxu1 %v8623_v31  ;;  %v1917_v4 = vsub.f32 %v9976_v51, %v10843_v28 }
 0x157   : > { %v1502_v62 = vpop.f32.mrb[35].mxu1  ;;  %v8831_v18 = vpop.eup %8830  ;;  %v2018_v23 = vadd.f32 1e-05, %v1822_v12  ;;  %v1726_v20 = vmul.f32 %v10888_v37, %v10888_v37  ;;  %v2207_v42 = vmul.f32 %v8829_v53, %v1913_v0  ;;  %v8628_v53 = vld [vmem:[%s15371_s4 + $0xb4] ss:$8 sps:$4 sm:$0xff]  }
 0x158   : > { %8840 = vrsqrt.f32 %v2017_v41  ;;  %v1823_v35 = vsub.f32 %v1500_v56, %v1725_v7  ;;  %v2208_v2 = vmul.f32 %v8831_v18, %v1914_v50  ;;  %v8626_v56 = vld [vmem:[%s15371_s4 + $0xb0] ss:$8 sps:$4 sm:$0xff]   ;;  %v1918_v41 = vsub.f32 %v9969_v45, %v10848_v60  ;;  %6823 = vmatprep.subr.bf16.mxu1 %v8628_v53 }
 0x159   : > { %8842 = vrsqrt.f32 %v2018_v23  ;;  %v1824_v54 = vsub.f32 %v1502_v62, %v1726_v20  ;;  %v10902_v15 = vpop.f32.mrb[36].mxu0  ;;  %v1506_v39 = vpop.f32.mrb[36].mxu1  ;;  %v10904_v55 = vpack.c.bf16 %v2207_v42, %v2205_v10  ;;  %v1919_v45 = vsub.f32 %v9992_v1, %v10865_v63 }
 0x15a   : > { %v8833_v61 = vpop.eup %8832  ;;  %v2019_v40 = vadd.f32 1e-05, %v1823_v35  ;;  %v10914_v21 = vpop.f32.mrb[37].mxu0  ;;  %v1727_v52 = vmul.f32 %v10902_v15, %v10902_v15  ;;  %v10918_v22 = vpack.c.bf16 %v2208_v2, %v2206_v36  ;;  %6824 = vmatpush1.bf16.msra.mxu1 %v8626_v56 }
 0x15b   : > { %15574 = vst [vmem:[#allocation74_spill] sm:$0xff] %v10904_v55  ;;  %v1508_v25 = vpop.f32.mrb[37].mxu1  ;;  %v8835_v11 = vpop.eup %8834  ;;  %v2020_v27 = vadd.f32 1e-05, %v1824_v54  ;;  %v1728_v46 = vmul.f32 %v10914_v21, %v10914_v21  ;;  %v2209_v10 = vmul.f32 %v8833_v61, %v1915_v57 }
 0x15c   : > { %15575 = vst [vmem:[#allocation75_spill] sm:$0xff] %v10918_v22  ;;  %8844 = vrsqrt.f32 %v2019_v40  ;;  %v1825_v32 = vsub.f32 %v1506_v39, %v1727_v52  ;;  %7999 = vmatprep.mubr.msk.bf16.mxu0 %vm580_vm0, %v10918_v22  ;;  %v2210_v19 = vmul.f32 %v8835_v11, %v1916_v47  ;;  %v1920_v39 = vsub.f32 %v9985_v59, %v10871_v43  ;;  %v8629_v43 = vld [vmem:[%s15369_s2 + $0x218] ss:$24 sps:$4 sm:$0xff]  }
 0x15d   : > { %8846 = vrsqrt.f32 %v2020_v27  ;;  %v1826_v36 = vsub.f32 %v1508_v25, %v1728_v46  ;;  %v10926_v0 = vpop.f32.mrb[38].mxu0  ;;  %2961 = vmatmul.mubr.bf16.gmra.mrb[124].mxu0 %v10904_v55  ;;  %v1512_v12 = vpop.f32.mrb[38].mxu1  ;;  %v8631_v27 = vld [vmem:[%s15369_s2 + $0x21c] ss:$24 sps:$4 sm:$0xff]   ;;  %v1921_v46 = vsub.f32 %v10006_v14, %v10883_v49 }
 0x15e   : > { %v8837_v50 = vpop.eup %8836  ;;  %v2021_v51 = vadd.f32 1e-05, %v1825_v32  ;;  %v10937_v28 = vpop.f32.mrb[39].mxu0  ;;  %v1729_v7 = vmul.f32 %v10926_v0, %v10926_v0  ;;  %3171 = vmatprep.subr.bf16.mxu0 %v8631_v27 }
 0x15f   : > { %v1514_v62 = vpop.f32.mrb[39].mxu1  ;;  %v8839_v18 = vpop.eup %8838  ;;  %v2022_v23 = vadd.f32 1e-05, %v1826_v36  ;;  %v1730_v20 = vmul.f32 %v10937_v28, %v10937_v28  ;;  %v2211_v42 = vmul.f32 %v8837_v50, %v1917_v4  ;;  %v1922_v36 = vsub.f32 %v10001_v8, %v10888_v37  ;;  %3172 = vmatpush1.bf16.msra.mxu0 %v8629_v43 }
 0x160   : > { %8848 = vrsqrt.f32 %v2021_v51  ;;  %v1827_v35 = vsub.f32 %v1512_v12, %v1729_v7  ;;  %v2212_v2 = vmul.f32 %v8839_v18, %v1918_v41  ;;  %v1923_v8 = vsub.f32 %v10030_v38, %v10902_v15 }
 0x161   : > { %8850 = vrsqrt.f32 %v2022_v23  ;;  %v1828_v60 = vsub.f32 %v1514_v62, %v1730_v20  ;;  %v10945_v16 = vpop.f32.mrb[40].mxu0  ;;  %v1518_v13 = vpop.f32.mrb[40].mxu1  ;;  %v10947_v57 = vpack.c.bf16 %v2211_v42, %v2209_v10 }
 0x162   : > { %v8841_v54 = vpop.eup %8840  ;;  %v2023_v31 = vadd.f32 1e-05, %v1827_v35  ;;  %v10951_v33 = vpop.f32.mrb[41].mxu0  ;;  %v1731_v61 = vmul.f32 %v10945_v16, %v10945_v16  ;;  %v10955_v40 = vpack.c.bf16 %v2212_v2, %v2210_v19  ;;  %v1924_v35 = vsub.f32 %v10020_v24, %v10914_v21  ;;  %v15579_v21 = vld [vmem:[#allocation3_spill] sm:$0xff] }
 0x163   : > { %15576 = vst [vmem:[#allocation76_spill] sm:$0xff] %v10947_v57  ;;  %v1520_v47 = vpop.f32.mrb[41].mxu1  ;;  %v8843_v1 = vpop.eup %8842  ;;  %v2024_v63 = vadd.f32 1e-05, %v1828_v60  ;;  %v1732_v52 = vmul.f32 %v10951_v33, %v10951_v33  ;;  %v2213_v25 = vmul.f32 %v8841_v54, %v1919_v45 }
 0x164   : > { %15577 = vst [vmem:[#allocation77_spill] sm:$0xff] %v10955_v40  ;;  %8852 = vrsqrt.f32 %v2023_v31  ;;  %v1829_v11 = vsub.f32 %v1518_v13, %v1731_v61  ;;  %8000 = vmatprep.mubr.msk.bf16.mxu0 %vm580_vm0, %v10955_v40  ;;  %v2214_v59 = vmul.f32 %v8843_v1, %v1920_v39 }
 0x165   : > { %8854 = vrsqrt.f32 %v2024_v63  ;;  %v1830_v10 = vsub.f32 %v1520_v47, %v1732_v52  ;;  %v10969_v32 = vpop.f32.mrb[42].mxu0  ;;  %2971 = vmatmul.mubr.bf16.gmra.mrb[128].mxu0 %v10947_v57  ;;  %v1524_v19 = vpop.f32.mrb[42].mxu1  ;;  %v1925_v47 = vsub.f32 %v15579_v21, %v10926_v0  ;;  %v8632_v0 = vld [vmem:[%s15371_s4 + $0xc0] ss:$8 sps:$4 sm:$0xff]  }
 0x166   : > { %v8845_v4 = vpop.eup %8844  ;;  %v2025_v12 = vadd.f32 1e-05, %v1829_v11  ;;  %v10974_v56 = vpop.f32.mrb[43].mxu0  ;;  %v1733_v53 = vmul.f32 %v10969_v32, %v10969_v32  ;;  %v15580_v11 = vld [vmem:[#allocation2_spill] sm:$0xff]  ;;  %v15585_v21 = vld [vmem:[#allocation7_spill] sm:$0xff] }
 0x167   : > { %v1526_v50 = vpop.f32.mrb[43].mxu1  ;;  %v8847_v14 = vpop.eup %8846  ;;  %v2026_v49 = vadd.f32 1e-05, %v1830_v10  ;;  %v1734_v41 = vmul.f32 %v10974_v56, %v10974_v56  ;;  %v2215_v51 = vmul.f32 %v8845_v4, %v1921_v46 }
 0x168   : > { %8856 = vrsqrt.f32 %v2025_v12  ;;  %v1831_v7 = vsub.f32 %v1524_v19, %v1733_v53  ;;  %v2216_v62 = vmul.f32 %v8847_v14, %v1922_v36  ;;  %v8637_v14 = vld [vmem:[%s15369_s2 + $0x14] ss:$24 sps:$4 sm:$0xff]  }
 0x169   : > { %8858 = vrsqrt.f32 %v2026_v49  ;;  %v1832_v37 = vsub.f32 %v1526_v50, %v1734_v41  ;;  %v10982_v18 = vpop.f32.mrb[44].mxu0  ;;  %v1530_v23 = vpop.f32.mrb[44].mxu1  ;;  %v10984_v20 = vpack.c.bf16 %v2215_v51, %v2213_v25  ;;  %v15581_v49 = vld [vmem:[#allocation5_spill] sm:$0xff]  ;;  %3430 = vmatprep.subr.bf16.mxu0 %v8637_v14 }
 0x16a   : > { %v8849_v42 = vpop.eup %8848  ;;  %v2027_v2 = vadd.f32 1e-05, %v1831_v7  ;;  %v10988_v45 = vpop.f32.mrb[45].mxu0  ;;  %v1735_v60 = vmul.f32 %v10982_v18, %v10982_v18  ;;  %v10992_v54 = vpack.c.bf16 %v2216_v62, %v2214_v59  ;;  %v1926_v59 = vsub.f32 %v15580_v11, %v10937_v28  ;;  %v8634_v28 = vld [vmem:[%s15371_s4 + $0xc4] ss:$8 sps:$4 sm:$0xff]  }
 0x16b   : > { %v1532_v13 = vpop.f32.mrb[45].mxu1  ;;  %v8851_v38 = vpop.eup %8850  ;;  %v2028_v15 = vadd.f32 1e-05, %v1832_v37  ;;  %v1736_v39 = vmul.f32 %v10988_v45, %v10988_v45  ;;  %v2217_v31 = vmul.f32 %v8849_v42, %v1923_v8  ;;  %v1927_v41 = vsub.f32 %v15581_v49, %v10945_v16  ;;  %6825 = vmatprep.subr.bf16.mxu1 %v8634_v28  ;;  %v15586_v11 = vld [vmem:[#allocation6_spill] sm:$0xff] }
 0x16c   : > { %15578 = vst [vmem:[#allocation78_spill] sm:$0xff] %v10992_v54  ;;  %8860 = vrsqrt.f32 %v2027_v2  ;;  %v1833_v61 = vsub.f32 %v1530_v23, %v1735_v60  ;;  %8001 = vmatprep.mubr.msk.bf16.mxu0 %vm580_vm0, %v10992_v54  ;;  %v2218_v24 = vmul.f32 %v8851_v38, %v1924_v35  ;;  %v15583_v23 = vld [vmem:[#allocation4_spill] sm:$0xff]  ;;  %6826 = vmatpush1.bf16.msra.mxu1 %v8632_v0 }
 0x16d   : > { %8862 = vrsqrt.f32 %v2028_v15  ;;  %v1834_v1 = vsub.f32 %v1532_v13, %v1736_v39  ;;  %v11000_v63 = vpop.f32.mrb[46].mxu0  ;;  %2981 = vmatmul.mubr.bf16.gmra.mrb[132].mxu0 %v10984_v20  ;;  %v1536_v52 = vpop.f32.mrb[46].mxu1  ;;  %v1928_v42 = vsub.f32 %v15583_v23, %v10951_v33  ;;  %v15588_v23 = vld [vmem:[#allocation8_spill] sm:$0xff] }
 0x16e   : > { %v8853_v25 = vpop.eup %8852  ;;  %v2029_v43 = vadd.f32 1e-05, %v1833_v61  ;;  %v11005_v27 = vpop.f32.mrb[47].mxu0  ;;  %v1737_v46 = vmul.f32 %v11000_v63, %v11000_v63 }
 0x16f   : > { %v1538_v10 = vpop.f32.mrb[47].mxu1  ;;  %v8855_v19 = vpop.eup %8854  ;;  %v2030_v4 = vadd.f32 1e-05, %v1834_v1  ;;  %v1738_v36 = vmul.f32 %v11005_v27, %v11005_v27  ;;  %v2219_v12 = vmul.f32 %v8853_v25, %v1925_v47  ;;  %v1929_v47 = vsub.f32 %v15585_v21, %v10969_v32  ;;  %v8638_v32 = vld [vmem:[%s15371_s4 + $0xd0] ss:$8 sps:$4 sm:$0xff]  }
 0x170   : > { %8864 = vrsqrt.f32 %v2029_v43  ;;  %v1835_v53 = vsub.f32 %v1536_v52, %v1737_v46  ;;  %v2220_v50 = vmul.f32 %v8855_v19, %v1926_v59  ;;  %v1930_v59 = vsub.f32 %v15586_v11, %v10974_v56  ;;  %v8640_v56 = vld [vmem:[%s15371_s4 + $0xd4] ss:$8 sps:$4 sm:$0xff]  }
 0x171   : > { %8866 = vrsqrt.f32 %v2030_v4  ;;  %v1836_v51 = vsub.f32 %v1538_v10, %v1738_v36  ;;  %v11022_v7 = vpop.f32.mrb[48].mxu0  ;;  %v1542_v62 = vpop.f32.mrb[48].mxu1  ;;  %v11024_v8 = vpack.c.bf16 %v2219_v12, %v2217_v31  ;;  %6827 = vmatprep.subr.bf16.mxu1 %v8640_v56 }
 0x172   : > { %v8857_v37 = vpop.eup %8856  ;;  %v2031_v35 = vadd.f32 1e-05, %v1835_v53  ;;  %v11028_v2 = vpop.f32.mrb[49].mxu0  ;;  %v1739_v60 = vmul.f32 %v11022_v7, %v11022_v7  ;;  %v11032_v16 = vpack.c.bf16 %v2220_v50, %v2218_v24  ;;  %v15587_v50 = vld [vmem:[#allocation9_spill] sm:$0xff]  ;;  %6828 = vmatpush1.bf16.msra.mxu1 %v8638_v32 }
 0x173   : > { %15582 = vst [vmem:[#allocation3_spill] sm:$0xff] %v11024_v8  ;;  %v1544_v13 = vpop.f32.mrb[49].mxu1  ;;  %v8859_v38 = vpop.eup %8858  ;;  %v2032_v15 = vadd.f32 1e-05, %v1836_v51  ;;  %v1740_v39 = vmul.f32 %v11028_v2, %v11028_v2  ;;  %v2221_v31 = vmul.f32 %v8857_v37, %v1927_v41  ;;  %v1931_v14 = vsub.f32 %v15587_v50, %v10982_v18 }
 0x174   : > { %15584 = vst [vmem:[#allocation2_spill] sm:$0xff] %v11032_v16  ;;  %8868 = vrsqrt.f32 %v2031_v35  ;;  %v1837_v61 = vsub.f32 %v1542_v62, %v1739_v60  ;;  %8002 = vmatprep.mubr.msk.bf16.mxu0 %vm580_vm0, %v11032_v16  ;;  %v2222_v33 = vmul.f32 %v8859_v38, %v1928_v42  ;;  %v1932_v42 = vsub.f32 %v15588_v23, %v10988_v45  ;;  %v15594_v23 = vld [vmem:[#allocation12_spill] sm:$0xff] }
 0x175   : > { %8870 = vrsqrt.f32 %v2032_v15  ;;  %v1838_v24 = vsub.f32 %v1544_v13, %v1740_v39  ;;  %v11040_v1 = vpop.f32.mrb[50].mxu0  ;;  %2991 = vmatmul.mubr.bf16.gmra.mrb[136].mxu0 %v11024_v8  ;;  %v1548_v52 = vpop.f32.mrb[50].mxu1 }
 0x176   : > { %v8861_v25 = vpop.eup %8860  ;;  %v2033_v43 = vadd.f32 1e-05, %v1837_v61  ;;  %v11045_v46 = vpop.f32.mrb[51].mxu0  ;;  %v1741_v10 = vmul.f32 %v11040_v1, %v11040_v1 }
 0x177   : > { %v1550_v0 = vpop.f32.mrb[51].mxu1  ;;  %v8863_v19 = vpop.eup %8862  ;;  %v2034_v4 = vadd.f32 1e-05, %v1838_v24  ;;  %v1742_v36 = vmul.f32 %v11045_v46, %v11045_v46  ;;  %v2223_v12 = vmul.f32 %v8861_v25, %v1929_v47  ;;  %v15590_v47 = vld [vmem:[#allocation11_spill] sm:$0xff] }
 0x178   : > { %8872 = vrsqrt.f32 %v2033_v43  ;;  %v1839_v28 = vsub.f32 %v1548_v52, %v1741_v10  ;;  %v2224_v53 = vmul.f32 %v8863_v19, %v1930_v59  ;;  %v1933_v24 = vsub.f32 %v15590_v47, %v11000_v63  ;;  %v15591_v59 = vld [vmem:[#allocation10_spill] sm:$0xff] }
 0x179   : > { %8874 = vrsqrt.f32 %v2034_v4  ;;  %v1840_v49 = vsub.f32 %v1550_v0, %v1742_v36  ;;  %v11059_v41 = vpop.f32.mrb[52].mxu0  ;;  %v1554_v51 = vpop.f32.mrb[52].mxu1  ;;  %v11061_v62 = vpack.c.bf16 %v2223_v12, %v2221_v31  ;;  %v1934_v43 = vsub.f32 %v15591_v59, %v11005_v27 }
 0x17a   : > { %v8865_v37 = vpop.eup %8864  ;;  %v2035_v35 = vadd.f32 1e-05, %v1839_v28  ;;  %v11065_v60 = vpop.f32.mrb[53].mxu0  ;;  %v1743_v13 = vmul.f32 %v11059_v41, %v11059_v41  ;;  %v11069_v18 = vpack.c.bf16 %v2224_v53, %v2222_v33  ;;  %v15592_v53 = vld [vmem:[#allocation13_spill] sm:$0xff] }
 0x17b   : > { %v1556_v38 = vpop.f32.mrb[53].mxu1  ;;  %v8867_v15 = vpop.eup %8866  ;;  %v2036_v39 = vadd.f32 1e-05, %v1840_v49  ;;  %v1744_v31 = vmul.f32 %v11065_v60, %v11065_v60  ;;  %v2225_v61 = vmul.f32 %v8865_v37, %v1931_v14  ;;  %v1935_v50 = vsub.f32 %v15592_v53, %v11022_v7 }
 0x17c   : > { %15589 = vst [vmem:[#allocation5_spill] sm:$0xff] %v11069_v18  ;;  %8876 = vrsqrt.f32 %v2035_v35  ;;  %v1841_v21 = vsub.f32 %v1554_v51, %v1743_v13  ;;  %8003 = vmatprep.mubr.msk.bf16.mxu0 %vm580_vm0, %v11069_v18  ;;  %v2226_v45 = vmul.f32 %v8867_v15, %v1932_v42  ;;  %v1936_v42 = vsub.f32 %v15594_v23, %v11028_v2 }
 0x17d   : > { %8878 = vrsqrt.f32 %v2036_v39  ;;  %v1842_v52 = vsub.f32 %v1556_v38, %v1744_v31  ;;  %v11077_v33 = vpop.f32.mrb[54].mxu0  ;;  %3001 = vmatmul.mubr.bf16.gmra.mrb[140].mxu0 %v11061_v62  ;;  %v1560_v25 = vpop.f32.mrb[54].mxu1 }
 0x17e   : > { %v8869_v11 = vpop.eup %8868  ;;  %v2037_v10 = vadd.f32 1e-05, %v1841_v21  ;;  %v11082_v0 = vpop.f32.mrb[55].mxu0  ;;  %v1745_v32 = vmul.f32 %v11077_v33, %v11077_v33 }
 0x17f   : > { %v1562_v19 = vpop.f32.mrb[55].mxu1  ;;  %v8871_v4 = vpop.eup %8870  ;;  %v2038_v63 = vadd.f32 1e-05, %v1842_v52  ;;  %v1746_v36 = vmul.f32 %v11082_v0, %v11082_v0  ;;  %v2227_v12 = vmul.f32 %v8869_v11, %v1933_v24  ;;  %v15595_v24 = vld [vmem:[#allocation15_spill] sm:$0xff] }
 0x180   : > { %8880 = vrsqrt.f32 %v2037_v10  ;;  %v1843_v56 = vsub.f32 %v1560_v25, %v1745_v32  ;;  %v2228_v28 = vmul.f32 %v8871_v4, %v1934_v43  ;;  %v1937_v52 = vsub.f32 %v15595_v24, %v11040_v1  ;;  %v15596_v43 = vld [vmem:[#allocation14_spill] sm:$0xff] }
 0x181   : > { %8882 = vrsqrt.f32 %v2038_v63  ;;  %v1844_v27 = vsub.f32 %v1562_v19, %v1746_v36  ;;  %v11090_v14 = vpop.f32.mrb[56].mxu0  ;;  %v1566_v49 = vpop.f32.mrb[56].mxu1  ;;  %v11092_v51 = vpack.c.bf16 %v2227_v12, %v2225_v61  ;;  %v1938_v10 = vsub.f32 %v15596_v43, %v11045_v46 }
 0x182   : > { %v8873_v37 = vpop.eup %8872  ;;  %v2039_v35 = vadd.f32 1e-05, %v1843_v56  ;;  %v11096_v13 = vpop.f32.mrb[57].mxu0  ;;  %v1747_v38 = vmul.f32 %v11090_v14, %v11090_v14  ;;  %v11100_v39 = vpack.c.bf16 %v2228_v28, %v2226_v45 }
 0x183   : > { %15593 = vst [vmem:[#allocation4_spill] sm:$0xff] %v11092_v51  ;;  %v1568_v15 = vpop.f32.mrb[57].mxu1  ;;  %v8875_v7 = vpop.eup %8874  ;;  %v2040_v31 = vadd.f32 1e-05, %v1844_v27  ;;  %v1748_v21 = vmul.f32 %v11096_v13, %v11096_v13  ;;  %v2229_v61 = vmul.f32 %v8873_v37, %v1935_v50  ;;  %v15597_v50 = vld [vmem:[#allocation17_spill] sm:$0xff] }
 0x184   : > { %8884 = vrsqrt.f32 %v2039_v35  ;;  %v1845_v47 = vsub.f32 %v1566_v49, %v1747_v38  ;;  %8004 = vmatprep.mubr.msk.bf16.mxu0 %vm580_vm0, %v11100_v39  ;;  %v2230_v2 = vmul.f32 %v8875_v7, %v1936_v42  ;;  %v1939_v27 = vsub.f32 %v15597_v50, %v11059_v41  ;;  %v15599_v35 = vld [vmem:[#allocation16_spill] sm:$0xff] }
 0x185   : > { %8886 = vrsqrt.f32 %v2040_v31  ;;  %v1846_v25 = vsub.f32 %v1568_v15, %v1748_v21  ;;  %v11108_v11 = vpop.f32.mrb[58].mxu0  ;;  %3011 = vmatmul.mubr.bf16.gmra.mrb[144].mxu0 %v11092_v51  ;;  %v1572_v45 = vpop.f32.mrb[58].mxu1  ;;  %v1940_v38 = vsub.f32 %v15599_v35, %v11065_v60 }
 0x186   : > { %v8877_v59 = vpop.eup %8876  ;;  %v2041_v32 = vadd.f32 1e-05, %v1845_v47  ;;  %v11113_v19 = vpop.f32.mrb[59].mxu0  ;;  %v1749_v4 = vmul.f32 %v11108_v11, %v11108_v11 }
 0x187   : > { %v1574_v63 = vpop.f32.mrb[59].mxu1  ;;  %v8879_v36 = vpop.eup %8878  ;;  %v2042_v1 = vadd.f32 1e-05, %v1846_v25  ;;  %v1750_v12 = vmul.f32 %v11113_v19, %v11113_v19  ;;  %v2231_v56 = vmul.f32 %v8877_v59, %v1937_v52 }
 0x188   : > { %8888 = vrsqrt.f32 %v2041_v32  ;;  %v1847_v28 = vsub.f32 %v1572_v45, %v1749_v4  ;;  %v2232_v53 = vmul.f32 %v8879_v36, %v1938_v10  ;;  %v15601_v45 = vld [vmem:[#allocation19_spill] sm:$0xff]  ;;  %v15602_v4 = vld [vmem:[#allocation18_spill] sm:$0xff] }
 0x189   : > { %8890 = vrsqrt.f32 %v2042_v1  ;;  %v1848_v46 = vsub.f32 %v1574_v63, %v1750_v12  ;;  %v11121_v49 = vpop.f32.mrb[60].mxu0  ;;  %v1578_v37 = vpop.f32.mrb[60].mxu1  ;;  %v11123_v23 = vpack.c.bf16 %v2231_v56, %v2229_v61  ;;  %v1941_v59 = vsub.f32 %v15601_v45, %v11077_v33 }
 0x18a   : > { %v8881_v42 = vpop.eup %8880  ;;  %v2043_v15 = vadd.f32 1e-05, %v1847_v28  ;;  %v11127_v7 = vpop.f32.mrb[61].mxu0  ;;  %v1751_v31 = vmul.f32 %v11121_v49, %v11121_v49  ;;  %v11131_v47 = vpack.c.bf16 %v2232_v53, %v2230_v2  ;;  %v1942_v63 = vsub.f32 %v15602_v4, %v11082_v0  ;;  %v15607_v4 = vld [vmem:[#allocation23_spill] sm:$0xff] }
 0x18b   : > { %15598 = vst [vmem:[#allocation7_spill] sm:$0xff] %v11123_v23  ;;  %v1580_v21 = vpop.f32.mrb[61].mxu1  ;;  %v8883_v41 = vpop.eup %8882  ;;  %v2044_v24 = vadd.f32 1e-05, %v1848_v46  ;;  %v1752_v52 = vmul.f32 %v11127_v7, %v11127_v7  ;;  %v2233_v61 = vmul.f32 %v8881_v42, %v1939_v27 }
 0x18c   : > { %15600 = vst [vmem:[#allocation6_spill] sm:$0xff] %v11131_v47  ;;  %8892 = vrsqrt.f32 %v2043_v15  ;;  %v1849_v25 = vsub.f32 %v1578_v37, %v1751_v31  ;;  %8005 = vmatprep.mubr.msk.bf16.mxu0 %vm580_vm0, %v11131_v47  ;;  %v2234_v60 = vmul.f32 %v8883_v41, %v1940_v38  ;;  %v15603_v37 = vld [vmem:[#allocation21_spill] sm:$0xff] }
 0x18d   : > { %8894 = vrsqrt.f32 %v2044_v24  ;;  %v1850_v43 = vsub.f32 %v1580_v21, %v1752_v52  ;;  %v11139_v10 = vpop.f32.mrb[62].mxu0  ;;  %3021 = vmatmul.mubr.bf16.gmra.mrb[148].mxu0 %v11123_v23  ;;  %v1584_v2 = vpop.f32.mrb[62].mxu1  ;;  %v1943_v42 = vsub.f32 %v15603_v37, %v11090_v14  ;;  %v15605_v21 = vld [vmem:[#allocation20_spill] sm:$0xff] }
 0x18e   : > { %v8885_v32 = vpop.eup %8884  ;;  %v2045_v36 = vadd.f32 1e-05, %v1849_v25  ;;  %v11144_v1 = vpop.f32.mrb[63].mxu0  ;;  %v1753_v12 = vmul.f32 %v11139_v10, %v11139_v10  ;;  %v1944_v41 = vsub.f32 %v15605_v21, %v11096_v13 }
 0x18f   : > { %v1586_v56 = vpop.f32.mrb[63].mxu1  ;;  %v8887_v28 = vpop.eup %8886  ;;  %v2046_v33 = vadd.f32 1e-05, %v1850_v43  ;;  %v1754_v53 = vmul.f32 %v11144_v1, %v11144_v1  ;;  %v2235_v50 = vmul.f32 %v8885_v32, %v1941_v59 }
 0x190   : > { %8896 = vrsqrt.f32 %v2045_v36  ;;  %v1851_v27 = vsub.f32 %v1584_v2, %v1753_v12  ;;  %v2236_v46 = vmul.f32 %v8887_v28, %v1942_v63  ;;  %v1945_v63 = vsub.f32 %v15607_v4, %v11108_v11  ;;  %v15608_v28 = vld [vmem:[#allocation22_spill] sm:$0xff] }
 0x191   : > { %8898 = vrsqrt.f32 %v2046_v33  ;;  %v1852_v0 = vsub.f32 %v1586_v56, %v1754_v53  ;;  %v11152_v35 = vpop.f32.mrb[64].mxu0  ;;  %v1590_v38 = vpop.f32.mrb[64].mxu1  ;;  %v11154_v15 = vpack.c.bf16 %v2235_v50, %v2233_v61  ;;  %v1946_v33 = vsub.f32 %v15608_v28, %v11113_v19  ;;  %v8646_v11 = vld [vmem:[%s15371_s4 + $0xe4] ss:$8 sps:$4 sm:$0xff]   ;;  %v8644_v19 = vld [vmem:[%s15371_s4 + $0xe0] ss:$8 sps:$4 sm:$0xff]  }
 0x192   : > { %v8889_v31 = vpop.eup %8888  ;;  %v2047_v24 = vadd.f32 1e-05, %v1851_v27  ;;  %v11158_v52 = vpop.f32.mrb[65].mxu0  ;;  %v1755_v25 = vmul.f32 %v11152_v35, %v11152_v35  ;;  %v11162_v59 = vpack.c.bf16 %v2236_v46, %v2234_v60  ;;  %6829 = vmatprep.subr.bf16.mxu1 %v8646_v11  ;;  %v15613_v11 = vld [vmem:[#allocation27_spill] sm:$0xff] }
 0x193   : > { %15604 = vst [vmem:[#allocation9_spill] sm:$0xff] %v11154_v15  ;;  %v1592_v45 = vpop.f32.mrb[65].mxu1  ;;  %v8891_v14 = vpop.eup %8890  ;;  %v2048_v43 = vadd.f32 1e-05, %v1852_v0  ;;  %v1756_v2 = vmul.f32 %v11158_v52, %v11158_v52  ;;  %v2237_v61 = vmul.f32 %v8889_v31, %v1943_v42  ;;  %6830 = vmatpush1.bf16.msra.mxu1 %v8644_v19 }
 0x194   : > { %15606 = vst [vmem:[#allocation8_spill] sm:$0xff] %v11162_v59  ;;  %8900 = vrsqrt.f32 %v2047_v24  ;;  %v1853_v32 = vsub.f32 %v1590_v38, %v1755_v25  ;;  %8006 = vmatprep.mubr.msk.bf16.mxu0 %vm580_vm0, %v11162_v59  ;;  %v2238_v13 = vmul.f32 %v8891_v14, %v1944_v41  ;;  %v15609_v41 = vld [vmem:[#allocation25_spill] sm:$0xff] }
 0x195   : > { %8902 = vrsqrt.f32 %v2048_v43  ;;  %v1854_v36 = vsub.f32 %v1592_v45, %v1756_v2  ;;  %v11170_v12 = vpop.f32.mrb[66].mxu0  ;;  %3031 = vmatmul.mubr.bf16.gmra.mrb[152].mxu0 %v11154_v15  ;;  %v1596_v60 = vpop.f32.mrb[66].mxu1  ;;  %v1947_v24 = vsub.f32 %v15609_v41, %v11121_v49 }
 0x196   : > { %v8893_v56 = vpop.eup %8892  ;;  %v2049_v53 = vadd.f32 1e-05, %v1853_v32  ;;  %v11175_v50 = vpop.f32.mrb[67].mxu0  ;;  %v1757_v27 = vmul.f32 %v11170_v12, %v11170_v12  ;;  %v15611_v32 = vld [vmem:[#allocation24_spill] sm:$0xff] }
 0x197   : > { %v1598_v46 = vpop.f32.mrb[67].mxu1  ;;  %v8895_v37 = vpop.eup %8894  ;;  %v2050_v42 = vadd.f32 1e-05, %v1854_v36  ;;  %v1758_v0 = vmul.f32 %v11175_v50, %v11175_v50  ;;  %v2239_v38 = vmul.f32 %v8893_v56, %v1945_v63  ;;  %v1948_v4 = vsub.f32 %v15611_v32, %v11127_v7 }
 0x198   : > { %8904 = vrsqrt.f32 %v2049_v53  ;;  %v1855_v31 = vsub.f32 %v1596_v60, %v1757_v27  ;;  %v2240_v21 = vmul.f32 %v8895_v37, %v1946_v33  ;;  %v8647_v27 = vld [vmem:[%s15371_s4 + $0xf0] ss:$8 sps:$4 sm:$0xff]   ;;  %v1949_v37 = vsub.f32 %v15613_v11, %v11139_v10 }
 0x199   : > { %8906 = vrsqrt.f32 %v2050_v42  ;;  %v1856_v25 = vsub.f32 %v1598_v46, %v1758_v0  ;;  %v11189_v45 = vpop.f32.mrb[68].mxu0  ;;  %v1602_v14 = vpop.f32.mrb[68].mxu1  ;;  %v11191_v43 = vpack.c.bf16 %v2239_v38, %v2237_v61  ;;  %v15617_v11 = vld [vmem:[#allocation28_spill] sm:$0xff] }
 0x19a   : > { %v8897_v2 = vpop.eup %8896  ;;  %v2051_v63 = vadd.f32 1e-05, %v1855_v31  ;;  %v11195_v36 = vpop.f32.mrb[69].mxu0  ;;  %v1759_v60 = vmul.f32 %v11189_v45, %v11189_v45  ;;  %v11199_v49 = vpack.c.bf16 %v2240_v21, %v2238_v13  ;;  %v8649_v13 = vld [vmem:[%s15371_s4 + $0xf4] ss:$8 sps:$4 sm:$0xff]   ;;  %v15614_v31 = vld [vmem:[#allocation26_spill] sm:$0xff] }
 0x19b   : > { %15610 = vst [vmem:[#allocation11_spill] sm:$0xff] %v11191_v43  ;;  %v1604_v56 = vpop.f32.mrb[69].mxu1  ;;  %v8899_v28 = vpop.eup %8898  ;;  %v2052_v33 = vadd.f32 1e-05, %v1856_v25  ;;  %v1760_v61 = vmul.f32 %v11195_v36, %v11195_v36  ;;  %v2241_v53 = vmul.f32 %v8897_v2, %v1947_v24  ;;  %v1950_v21 = vsub.f32 %v15614_v31, %v11144_v1  ;;  %6831 = vmatprep.subr.bf16.mxu1 %v8649_v13  ;;  %v15615_v1 = vld [vmem:[#allocation29_spill] sm:$0xff] }
 0x19c   : > { %15612 = vst [vmem:[#allocation10_spill] sm:$0xff] %v11199_v49  ;;  %8908 = vrsqrt.f32 %v2051_v63  ;;  %v1857_v7 = vsub.f32 %v1602_v14, %v1759_v60  ;;  %8007 = vmatprep.mubr.msk.bf16.mxu0 %vm580_vm0, %v11199_v49  ;;  %v2242_v46 = vmul.f32 %v8899_v28, %v1948_v4  ;;  %6832 = vmatpush1.bf16.msra.mxu1 %v8647_v27 }
 0x19d   : > { %8910 = vrsqrt.f32 %v2052_v33  ;;  %v1858_v42 = vsub.f32 %v1604_v56, %v1760_v61  ;;  %v11213_v0 = vpop.f32.mrb[70].mxu0  ;;  %3041 = vmatmul.mubr.bf16.gmra.mrb[156].mxu0 %v11191_v43  ;;  %v1608_v38 = vpop.f32.mrb[70].mxu1  ;;  %v1951_v56 = vsub.f32 %v15615_v1, %v11152_v35 }
 0x19e   : > { %v8901_v19 = vpop.eup %8900  ;;  %v2053_v41 = vadd.f32 1e-05, %v1857_v7  ;;  %v11218_v24 = vpop.f32.mrb[71].mxu0  ;;  %v1761_v25 = vmul.f32 %v11213_v0, %v11213_v0 }
 0x19f   : > { %v1610_v14 = vpop.f32.mrb[71].mxu1  ;;  %v8903_v10 = vpop.eup %8902  ;;  %v2054_v2 = vadd.f32 1e-05, %v1858_v42  ;;  %v1762_v32 = vmul.f32 %v11218_v24, %v11218_v24  ;;  %v2243_v4 = vmul.f32 %v8901_v19, %v1949_v37  ;;  %v1952_v42 = vsub.f32 %v15617_v11, %v11158_v52 }
 0x1a0   : > { %8912 = vrsqrt.f32 %v2053_v41  ;;  %v1859_v63 = vsub.f32 %v1608_v38, %v1761_v25  ;;  %v2244_v60 = vmul.f32 %v8903_v10, %v1950_v21 }
 0x1a1   : > { %8914 = vrsqrt.f32 %v2054_v2  ;;  %v1860_v28 = vsub.f32 %v1610_v14, %v1762_v32  ;;  %v11226_v33 = vpop.f32.mrb[72].mxu0  ;;  %v1614_v61 = vpop.f32.mrb[72].mxu1  ;;  %v11228_v7 = vpack.c.bf16 %v2243_v4, %v2241_v53  ;;  %v15619_v14 = vld [vmem:[#allocation31_spill] sm:$0xff] }
 0x1a2   : > { %v8905_v13 = vpop.eup %8904  ;;  %v2055_v31 = vadd.f32 1e-05, %v1859_v63  ;;  %v11232_v37 = vpop.f32.mrb[73].mxu0  ;;  %v1763_v27 = vmul.f32 %v11226_v33, %v11226_v33  ;;  %v11236_v19 = vpack.c.bf16 %v2244_v60, %v2242_v46  ;;  %v1953_v10 = vsub.f32 %v15619_v14, %v11170_v12  ;;  %v15620_v63 = vld [vmem:[#allocation30_spill] sm:$0xff] }
 0x1a3   : > { %15616 = vst [vmem:[#allocation13_spill] sm:$0xff] %v11228_v7  ;;  %v1616_v38 = vpop.f32.mrb[73].mxu1  ;;  %v8907_v35 = vpop.eup %8906  ;;  %v2056_v21 = vadd.f32 1e-05, %v1860_v28  ;;  %v1764_v41 = vmul.f32 %v11232_v37, %v11232_v37  ;;  %v2245_v53 = vmul.f32 %v8905_v13, %v1951_v56  ;;  %v1954_v60 = vsub.f32 %v15620_v63, %v11175_v50 }
 0x1a4   : > { %15618 = vst [vmem:[#allocation12_spill] sm:$0xff] %v11236_v19  ;;  %8916 = vrsqrt.f32 %v2055_v31  ;;  %v1861_v25 = vsub.f32 %v1614_v61, %v1763_v27  ;;  %8008 = vmatprep.mubr.msk.bf16.mxu0 %vm580_vm0, %v11236_v19  ;;  %v2246_v52 = vmul.f32 %v8907_v35, %v1952_v42  ;;  %v8655_v31 = vld [vmem:[%s15371_s4 + $0x104] ss:$8 sps:$4 sm:$0xff]  }
 0x1a5   : > { %8918 = vrsqrt.f32 %v2056_v21  ;;  %v1862_v2 = vsub.f32 %v1616_v38, %v1764_v41  ;;  %v11244_v32 = vpop.f32.mrb[74].mxu0  ;;  %3051 = vmatmul.mubr.bf16.gmra.mrb[160].mxu0 %v11228_v7  ;;  %v1620_v46 = vpop.f32.mrb[74].mxu1  ;;  %v15621_v38 = vld [vmem:[#allocation33_spill] sm:$0xff]  ;;  %7082 = vmatprep.subr.bf16.mxu1 %v8655_v31 }
 0x1a6   : > { %v8909_v4 = vpop.eup %8908  ;;  %v2057_v1 = vadd.f32 1e-05, %v1861_v25  ;;  %v11249_v56 = vpop.f32.mrb[75].mxu0  ;;  %v1765_v28 = vmul.f32 %v11244_v32, %v11244_v32  ;;  %v1955_v35 = vsub.f32 %v15621_v38, %v11189_v45 }
 0x1a7   : > { %v1622_v61 = vpop.f32.mrb[75].mxu1  ;;  %v8911_v13 = vpop.eup %8910  ;;  %v2058_v12 = vadd.f32 1e-05, %v1862_v2  ;;  %v1766_v11 = vmul.f32 %v11249_v56, %v11249_v56  ;;  %v2247_v42 = vmul.f32 %v8909_v4, %v1953_v10  ;;  %v15623_v10 = vld [vmem:[#allocation32_spill] sm:$0xff] }
 0x1a8   : > { %8920 = vrsqrt.f32 %v2057_v1  ;;  %v1863_v27 = vsub.f32 %v1620_v46, %v1765_v28  ;;  %v2248_v50 = vmul.f32 %v8911_v13, %v1954_v60  ;;  %v1956_v4 = vsub.f32 %v15623_v10, %v11195_v36 }
 0x1a9   : > { %8922 = vrsqrt.f32 %v2058_v12  ;;  %v1864_v21 = vsub.f32 %v1622_v61, %v1766_v11  ;;  %v11260_v41 = vpop.f32.mrb[76].mxu0  ;;  %v1626_v25 = vpop.f32.mrb[76].mxu1  ;;  %v11262_v14 = vpack.c.bf16 %v2247_v42, %v2245_v53  ;;  %v15625_v12 = vld [vmem:[#allocation35_spill] sm:$0xff] }
 0x1aa   : > { %v8913_v2 = vpop.eup %8912  ;;  %v2059_v63 = vadd.f32 1e-05, %v1863_v27  ;;  %v11266_v7 = vpop.f32.mrb[77].mxu0  ;;  %v1767_v46 = vmul.f32 %v11260_v41, %v11260_v41  ;;  %v11270_v45 = vpack.c.bf16 %v2248_v50, %v2246_v52  ;;  %v1957_v11 = vsub.f32 %v15625_v12, %v11213_v0  ;;  %v15626_v50 = vld [vmem:[#allocation34_spill] sm:$0xff] }
 0x1ab   : > { %15622 = vst [vmem:[#allocation15_spill] sm:$0xff] %v11262_v14  ;;  %v1628_v60 = vpop.f32.mrb[77].mxu1  ;;  %v8915_v1 = vpop.eup %8914  ;;  %v2060_v28 = vadd.f32 1e-05, %v1864_v21  ;;  %v1768_v53 = vmul.f32 %v11266_v7, %v11266_v7  ;;  %v2249_v61 = vmul.f32 %v8913_v2, %v1955_v35  ;;  %v1958_v38 = vsub.f32 %v15626_v50, %v11218_v24 }
 0x1ac   : > { %15624 = vst [vmem:[#allocation14_spill] sm:$0xff] %v11270_v45  ;;  %8924 = vrsqrt.f32 %v2059_v63  ;;  %v1865_v13 = vsub.f32 %v1626_v25, %v1767_v46  ;;  %8009 = vmatprep.mubr.msk.bf16.mxu0 %vm580_vm0, %v11270_v45  ;;  %v2250_v36 = vmul.f32 %v8915_v1, %v1956_v4  ;;  %v15627_v1 = vld [vmem:[#allocation37_spill] sm:$0xff] }
 0x1ad   : > { %8926 = vrsqrt.f32 %v2060_v28  ;;  %v1866_v42 = vsub.f32 %v1628_v60, %v1768_v53  ;;  %v11278_v31 = vpop.f32.mrb[78].mxu0  ;;  %3061 = vmatmul.mubr.bf16.gmra.mrb[164].mxu0 %v11262_v14  ;;  %v1632_v52 = vpop.f32.mrb[78].mxu1  ;;  %v1959_v28 = vsub.f32 %v15627_v1, %v11226_v33 }
 0x1ae   : > { %v8917_v27 = vpop.eup %8916  ;;  %v2061_v35 = vadd.f32 1e-05, %v1865_v13  ;;  %v11283_v21 = vpop.f32.mrb[79].mxu0  ;;  %v1769_v25 = vmul.f32 %v11278_v31, %v11278_v31 }
 0x1af   : > { %v1634_v2 = vpop.f32.mrb[79].mxu1  ;;  %v8919_v10 = vpop.eup %8918  ;;  %v2062_v0 = vadd.f32 1e-05, %v1866_v42  ;;  %v1770_v4 = vmul.f32 %v11283_v21, %v11283_v21  ;;  %v2251_v63 = vmul.f32 %v8917_v27, %v1957_v11  ;;  %v15629_v42 = vld [vmem:[#allocation36_spill] sm:$0xff] }
 0x1b0   : > { %8928 = vrsqrt.f32 %v2061_v35  ;;  %v1867_v46 = vsub.f32 %v1632_v52, %v1769_v25  ;;  %v2252_v60 = vmul.f32 %v8919_v10, %v1958_v38  ;;  %v1960_v14 = vsub.f32 %v15629_v42, %v11232_v37 }
 0x1b1   : > { %8930 = vrsqrt.f32 %v2062_v0  ;;  %v1868_v24 = vsub.f32 %v1634_v2, %v1770_v4  ;;  %v11291_v53 = vpop.f32.mrb[80].mxu0  ;;  %v1638_v13 = vpop.f32.mrb[80].mxu1  ;;  %v11293_v12 = vpack.c.bf16 %v2251_v63, %v2249_v61  ;;  %v15631_v2 = vld [vmem:[#allocation39_spill] sm:$0xff] }
 0x1b2   : > { %v8921_v50 = vpop.eup %8920  ;;  %v2063_v45 = vadd.f32 1e-05, %v1867_v46  ;;  %v11297_v19 = vpop.f32.mrb[81].mxu0  ;;  %v1771_v11 = vmul.f32 %v11291_v53, %v11291_v53  ;;  %v11301_v27 = vpack.c.bf16 %v2252_v60, %v2250_v36  ;;  %v1961_v10 = vsub.f32 %v15631_v2, %v11244_v32  ;;  %v15632_v46 = vld [vmem:[#allocation38_spill] sm:$0xff] }
 0x1b3   : > { %15628 = vst [vmem:[#allocation17_spill] sm:$0xff] %v11293_v12  ;;  %v1640_v52 = vpop.f32.mrb[81].mxu1  ;;  %v8923_v33 = vpop.eup %8922  ;;  %v2064_v38 = vadd.f32 1e-05, %v1868_v24  ;;  %v1772_v35 = vmul.f32 %v11297_v19, %v11297_v19  ;;  %v2253_v61 = vmul.f32 %v8921_v50, %v1959_v28  ;;  %v1962_v60 = vsub.f32 %v15632_v46, %v11249_v56 }
 0x1b4   : > { %15630 = vst [vmem:[#allocation16_spill] sm:$0xff] %v11301_v27  ;;  %8932 = vrsqrt.f32 %v2063_v45  ;;  %v1869_v25 = vsub.f32 %v1638_v13, %v1771_v11  ;;  %8010 = vmatprep.mubr.msk.bf16.mxu0 %vm580_vm0, %v11301_v27  ;;  %v2254_v37 = vmul.f32 %v8923_v33, %v1960_v14 }
 0x1b5   : > { %8934 = vrsqrt.f32 %v2064_v38  ;;  %v1870_v0 = vsub.f32 %v1640_v52, %v1772_v35  ;;  %v11309_v4 = vpop.f32.mrb[82].mxu0  ;;  %3071 = vmatmul.mubr.bf16.gmra.mrb[168].mxu0 %v11293_v12  ;;  %v1644_v36 = vpop.f32.mrb[82].mxu1  ;;  %v15633_v52 = vld [vmem:[#allocation41_spill] sm:$0xff] }
 0x1b6   : > { %v8925_v63 = vpop.eup %8924  ;;  %v2065_v45 = vadd.f32 1e-05, %v1869_v25  ;;  %v11314_v1 = vpop.f32.mrb[83].mxu0  ;;  %v1773_v14 = vmul.f32 %v11309_v4, %v11309_v4  ;;  %v1963_v33 = vsub.f32 %v15633_v52, %v11260_v41 }
 0x1b7   : > { %v1646_v28 = vpop.f32.mrb[83].mxu1  ;;  %v8927_v24 = vpop.eup %8926  ;;  %v2066_v32 = vadd.f32 1e-05, %v1870_v0  ;;  %v1774_v13 = vmul.f32 %v11314_v1, %v11314_v1  ;;  %v2255_v50 = vmul.f32 %v8925_v63, %v1961_v10  ;;  %v15635_v0 = vld [vmem:[#allocation40_spill] sm:$0xff] }
 0x1b8   : > { %8936 = vrsqrt.f32 %v2065_v45  ;;  %v1871_v42 = vsub.f32 %v1644_v36, %v1773_v14  ;;  %v2256_v11 = vmul.f32 %v8927_v24, %v1962_v60  ;;  %v1964_v46 = vsub.f32 %v15635_v0, %v11266_v7 }
 0x1b9   : > { %8938 = vrsqrt.f32 %v2066_v32  ;;  %v1872_v56 = vsub.f32 %v1646_v28, %v1774_v13  ;;  %v11322_v38 = vpop.f32.mrb[84].mxu0  ;;  %v1650_v35 = vpop.f32.mrb[84].mxu1  ;;  %v11324_v25 = vpack.c.bf16 %v2255_v50, %v2253_v61  ;;  %v15637_v28 = vld [vmem:[#allocation43_spill] sm:$0xff] }
 0x1ba   : > { %v8929_v2 = vpop.eup %8928  ;;  %v2067_v12 = vadd.f32 1e-05, %v1871_v42  ;;  %v11328_v27 = vpop.f32.mrb[85].mxu0  ;;  %v1775_v10 = vmul.f32 %v11322_v38, %v11322_v38  ;;  %v11332_v63 = vpack.c.bf16 %v2256_v11, %v2254_v37  ;;  %v1965_v24 = vsub.f32 %v15637_v28, %v11278_v31  ;;  %v15638_v42 = vld [vmem:[#allocation42_spill] sm:$0xff] }
 0x1bb   : > { %15634 = vst [vmem:[#allocation19_spill] sm:$0xff] %v11324_v25  ;;  %v1652_v36 = vpop.f32.mrb[85].mxu1  ;;  %v8931_v41 = vpop.eup %8930  ;;  %v2068_v60 = vadd.f32 1e-05, %v1872_v56  ;;  %v1776_v45 = vmul.f32 %v11328_v27, %v11328_v27  ;;  %v2257_v61 = vmul.f32 %v8929_v2, %v1963_v33  ;;  %v1966_v11 = vsub.f32 %v15638_v42, %v11283_v21 }
 0x1bc   : > { %15636 = vst [vmem:[#allocation18_spill] sm:$0xff] %v11332_v63  ;;  %8940 = vrsqrt.f32 %v2067_v12  ;;  %v1873_v14 = vsub.f32 %v1650_v35, %v1775_v10  ;;  %8011 = vmatprep.mubr.msk.bf16.mxu0 %vm580_vm0, %v11332_v63  ;;  %v2258_v7 = vmul.f32 %v8931_v41, %v1964_v46 }
 0x1bd   : > { %8942 = vrsqrt.f32 %v2068_v60  ;;  %v1874_v32 = vsub.f32 %v1652_v36, %v1776_v45  ;;  %v11340_v13 = vpop.f32.mrb[86].mxu0  ;;  %3081 = vmatmul.mubr.bf16.gmra.mrb[172].mxu0 %v11324_v25  ;;  %v1656_v37 = vpop.f32.mrb[86].mxu1  ;;  %v15639_v36 = vld [vmem:[#allocation45_spill] sm:$0xff] }
 0x1be   : > { %v8933_v50 = vpop.eup %8932  ;;  %v2069_v12 = vadd.f32 1e-05, %v1873_v14  ;;  %v11345_v52 = vpop.f32.mrb[87].mxu0  ;;  %v1777_v33 = vmul.f32 %v11340_v13, %v11340_v13  ;;  %v1967_v41 = vsub.f32 %v15639_v36, %v11291_v53 }
 0x1bf   : > { %v1658_v56 = vpop.f32.mrb[87].mxu1  ;;  %v8935_v35 = vpop.eup %8934  ;;  %v2070_v31 = vadd.f32 1e-05, %v1874_v32  ;;  %v1778_v2 = vmul.f32 %v11345_v52, %v11345_v52  ;;  %v2259_v0 = vmul.f32 %v8933_v50, %v1965_v24  ;;  %v15641_v32 = vld [vmem:[#allocation44_spill] sm:$0xff] }
 0x1c0   : > { %8944 = vrsqrt.f32 %v2069_v12  ;;  %v1875_v46 = vsub.f32 %v1656_v37, %v1777_v33  ;;  %v2260_v10 = vmul.f32 %v8935_v35, %v1966_v11  ;;  %v1968_v42 = vsub.f32 %v15641_v32, %v11297_v19 }
 0x1c1   : > { %8946 = vrsqrt.f32 %v2070_v31  ;;  %v1876_v21 = vsub.f32 %v1658_v56, %v1778_v2  ;;  %v11353_v60 = vpop.f32.mrb[88].mxu0  ;;  %v1662_v45 = vpop.f32.mrb[88].mxu1  ;;  %v11355_v14 = vpack.c.bf16 %v2259_v0, %v2257_v61  ;;  %v15643_v56 = vld [vmem:[#allocation47_spill] sm:$0xff] }
 0x1c2   : > { %v8937_v28 = vpop.eup %8936  ;;  %v2071_v25 = vadd.f32 1e-05, %v1875_v46  ;;  %v11359_v63 = vpop.f32.mrb[89].mxu0  ;;  %v1779_v24 = vmul.f32 %v11353_v60, %v11353_v60  ;;  %v11363_v50 = vpack.c.bf16 %v2260_v10, %v2258_v7  ;;  %v1969_v35 = vsub.f32 %v15643_v56, %v11309_v4  ;;  %v15644_v46 = vld [vmem:[#allocation46_spill] sm:$0xff] }
 0x1c3   : > { %15640 = vst [vmem:[#allocation21_spill] sm:$0xff] %v11355_v14  ;;  %v1664_v37 = vpop.f32.mrb[89].mxu1  ;;  %v8939_v53 = vpop.eup %8938  ;;  %v2072_v11 = vadd.f32 1e-05, %v1876_v21  ;;  %v1780_v12 = vmul.f32 %v11359_v63, %v11359_v63  ;;  %v2261_v61 = vmul.f32 %v8937_v28, %v1967_v41  ;;  %v1970_v10 = vsub.f32 %v15644_v46, %v11314_v1 }
 0x1c4   : > { %15642 = vst [vmem:[#allocation20_spill] sm:$0xff] %v11363_v50  ;;  %8948 = vrsqrt.f32 %v2071_v25  ;;  %v1877_v33 = vsub.f32 %v1662_v45, %v1779_v24  ;;  %8012 = vmatprep.mubr.msk.bf16.mxu0 %vm580_vm0, %v11363_v50  ;;  %v2262_v19 = vmul.f32 %v8939_v53, %v1968_v42 }
 0x1c5   : > { %8950 = vrsqrt.f32 %v2072_v11  ;;  %v1878_v31 = vsub.f32 %v1664_v37, %v1780_v12  ;;  %v11371_v2 = vpop.f32.mrb[90].mxu0  ;;  %3091 = vmatmul.mubr.bf16.gmra.mrb[176].mxu0 %v11355_v14  ;;  %v1668_v7 = vpop.f32.mrb[90].mxu1  ;;  %v15645_v37 = vld [vmem:[#allocation49_spill] sm:$0xff] }
 0x1c6   : > { %v8941_v0 = vpop.eup %8940  ;;  %v2073_v25 = vadd.f32 1e-05, %v1877_v33  ;;  %v11376_v36 = vpop.f32.mrb[91].mxu0  ;;  %v1781_v41 = vmul.f32 %v11371_v2, %v11371_v2  ;;  %v1971_v53 = vsub.f32 %v15645_v37, %v11322_v38 }
 0x1c7   : > { %v1670_v21 = vpop.f32.mrb[91].mxu1  ;;  %v8943_v45 = vpop.eup %8942  ;;  %v2074_v4 = vadd.f32 1e-05, %v1878_v31  ;;  %v1782_v28 = vmul.f32 %v11376_v36, %v11376_v36  ;;  %v2263_v32 = vmul.f32 %v8941_v0, %v1969_v35  ;;  %v15647_v31 = vld [vmem:[#allocation48_spill] sm:$0xff] }
 0x1c8   : > { %8952 = vrsqrt.f32 %v2073_v25  ;;  %v1879_v42 = vsub.f32 %v1668_v7, %v1781_v41  ;;  %v2264_v24 = vmul.f32 %v8943_v45, %v1970_v10  ;;  %v1972_v46 = vsub.f32 %v15647_v31, %v11328_v27 }
 0x1c9   : > { %8954 = vrsqrt.f32 %v2074_v4  ;;  %v1880_v1 = vsub.f32 %v1670_v21, %v1782_v28  ;;  %v11384_v11 = vpop.f32.mrb[92].mxu0  ;;  %v1674_v12 = vpop.f32.mrb[92].mxu1  ;;  %v11386_v33 = vpack.c.bf16 %v2263_v32, %v2261_v61  ;;  %v15649_v21 = vld [vmem:[#allocation51_spill] sm:$0xff] }
 0x1ca   : > { %v8945_v56 = vpop.eup %8944  ;;  %v2075_v14 = vadd.f32 1e-05, %v1879_v42  ;;  %v11390_v50 = vpop.f32.mrb[93].mxu0  ;;  %v1783_v35 = vmul.f32 %v11384_v11, %v11384_v11  ;;  %v11394_v0 = vpack.c.bf16 %v2264_v24, %v2262_v19  ;;  %v1973_v45 = vsub.f32 %v15649_v21, %v11340_v13  ;;  %v15650_v42 = vld [vmem:[#allocation50_spill] sm:$0xff] }
 0x1cb   : > { %15646 = vst [vmem:[#allocation23_spill] sm:$0xff] %v11386_v33  ;;  %v1676_v7 = vpop.f32.mrb[93].mxu1  ;;  %v8947_v38 = vpop.eup %8946  ;;  %v2076_v10 = vadd.f32 1e-05, %v1880_v1  ;;  %v1784_v25 = vmul.f32 %v11390_v50, %v11390_v50  ;;  %v2265_v61 = vmul.f32 %v8945_v56, %v1971_v53  ;;  %v1974_v24 = vsub.f32 %v15650_v42, %v11345_v52  ;;  %v15653_v42 = vld [vmem:[#allocation52_spill] sm:$0xff] }
 0x1cc   : > { %15648 = vst [vmem:[#allocation22_spill] sm:$0xff] %v11394_v0  ;;  %8956 = vrsqrt.f32 %v2075_v14  ;;  %v1881_v41 = vsub.f32 %v1674_v12, %v1783_v35  ;;  %8013 = vmatprep.mubr.msk.bf16.mxu0 %vm580_vm0, %v11394_v0  ;;  %v2266_v27 = vmul.f32 %v8947_v38, %v1972_v46 }
 0x1cd   : > { %8958 = vrsqrt.f32 %v2076_v10  ;;  %v1882_v4 = vsub.f32 %v1676_v7, %v1784_v25  ;;  %v11402_v28 = vpop.f32.mrb[94].mxu0  ;;  %3101 = vmatmul.mubr.bf16.gmra.mrb[180].mxu0 %v11386_v33  ;;  %v1680_v19 = vpop.f32.mrb[94].mxu1  ;;  %v15651_v7 = vld [vmem:[#allocation53_spill] sm:$0xff]  ;;  %v1976_v33 = vsub.f32 %v15653_v42, %v11359_v63 }
 0x1ce   : > { %v8949_v32 = vpop.eup %8948  ;;  %v2077_v14 = vadd.f32 1e-05, %v1881_v41  ;;  %v1078_v37 = vpop.f32.mrb[95].mxu0  ;;  %v1785_v53 = vmul.f32 %v11402_v28, %v11402_v28  ;;  %v1975_v38 = vsub.f32 %v15651_v7, %v11353_v60  ;;  %v15657_v7 = vld [vmem:[#allocation57_spill] sm:$0xff] }
 0x1cf   : > { %v1682_v1 = vpop.f32.mrb[95].mxu1  ;;  %v8951_v12 = vpop.eup %8950  ;;  %v2078_v56 = vadd.f32 1e-05, %v1882_v4  ;;  %v1786_v13 = vmul.f32 %v1078_v37, %v1078_v37  ;;  %v2267_v31 = vmul.f32 %v8949_v32, %v1973_v45 }
 0x1d0   : > { %8960 = vrsqrt.f32 %v2077_v14  ;;  %v1883_v46 = vsub.f32 %v1680_v19, %v1785_v53  ;;  %v2268_v35 = vmul.f32 %v8951_v12, %v1974_v24 }
 0x1d1   : > { %8962 = vrsqrt.f32 %v2078_v56  ;;  %v1884_v10 = vsub.f32 %v1682_v1, %v1786_v13  ;;  %v1082_v25 = vpop.f32.mrb[96].mxu0  ;;  %v1686_v52 = vpop.f32.mrb[96].mxu1  ;;  %v11411_v41 = vpack.c.bf16 %v2267_v31, %v2265_v61  ;;  %v15655_v1 = vld [vmem:[#allocation55_spill] sm:$0xff] }
 0x1d2   : > { %v8953_v21 = vpop.eup %8952  ;;  %v2079_v0 = vadd.f32 1e-05, %v1883_v46  ;;  %v1084_v4 = vpop.f32.mrb[97].mxu0  ;;  %v1787_v43 = vmul.f32 %v1082_v25, %v1082_v25  ;;  %v11415_v32 = vpack.c.bf16 %v2268_v35, %v2266_v27  ;;  %v1977_v12 = vsub.f32 %v15655_v1, %v11371_v2  ;;  %v15656_v27 = vld [vmem:[#allocation54_spill] sm:$0xff] }
 0x1d3   : > { %15652 = vst [vmem:[#allocation25_spill] sm:$0xff] %v11411_v41  ;;  %v1688_v45 = vpop.f32.mrb[97].mxu1  ;;  %v8955_v19 = vpop.eup %8954  ;;  %v2080_v24 = vadd.f32 1e-05, %v1884_v10  ;;  %v1788_v14 = vmul.f32 %v1084_v4, %v1084_v4  ;;  %v2269_v60 = vmul.f32 %v8953_v21, %v1975_v38  ;;  %v1978_v13 = vsub.f32 %v15656_v27, %v11376_v36  ;;  %v15659_v10 = vld [vmem:[#allocation56_spill] sm:$0xff] }
 0x1d4   : > { %15654 = vst [vmem:[#allocation24_spill] sm:$0xff] %v11415_v32  ;;  %8964 = vrsqrt.f32 %v2079_v0  ;;  %v1885_v53 = vsub.f32 %v1686_v52, %v1787_v43  ;;  %8014 = vmatprep.mubr.msk.bf16.mxu0 %vm580_vm0, %v11415_v32  ;;  %v2270_v61 = vmul.f32 %v8955_v19, %v1976_v33  ;;  %v1979_v33 = vsub.f32 %v15657_v7, %v11384_v11  ;;  %v15661_v19 = vld [vmem:[#allocation59_spill] sm:$0xff]  ;;  %v15665_v27 = vld [vmem:[#allocation60_spill] sm:$0xff] }
 0x1d5   : > { %8966 = vrsqrt.f32 %v2080_v24  ;;  %v1886_v63 = vsub.f32 %v1688_v45, %v1788_v14  ;;  %3111 = vmatmul.mubr.bf16.gmra.mrb[184].mxu0 %v11411_v41  ;;  %v1980_v52 = vsub.f32 %v15659_v10, %v11390_v50  ;;  %v1981_v24 = vsub.f32 %v15661_v19, %v11402_v28  ;;  %v15662_v14 = vld [vmem:[#allocation58_spill] sm:$0xff]  ;;  %v15663_v50 = vld [vmem:[#allocation61_spill] sm:$0xff] }
 0x1d6   : > { %v8957_v56 = vpop.eup %8956  ;;  %v2081_v31 = vadd.f32 1e-05, %v1885_v53 }
 0x1d7   : > { %v8959_v46 = vpop.eup %8958  ;;  %v2082_v35 = vadd.f32 1e-05, %v1886_v63  ;;  %v2271_v0 = vmul.f32 %v8957_v56, %v1977_v12 }
 0x1d8   : > { %8968 = vrsqrt.f32 %v2081_v31  ;;  %v2272_v43 = vmul.f32 %v8959_v46, %v1978_v13  ;;  %v1984_v13 = vsub.f32 %v15665_v27, %v1084_v4  ;;  %v2403_v4 = vlaneseq }
 0x1d9   : > { %8970 = vrsqrt.f32 %v2082_v35  ;;  %v11426_v38 = vpack.c.bf16 %v2271_v0, %v2269_v60  ;;  %v1982_v60 = vsub.f32 %v15662_v14, %v1078_v37  ;;  %v8635_v0 = vld [vmem:[%s15369_s2 + $0x10] ss:$24 sps:$4 sm:$0xff]   ;;  %v8664_v14 = vld [vmem:[%s15369_s2 + $0xd4] ss:$24 sps:$4 sm:$0xff]  }
 0x1da   : > { %v8961_v2 = vpop.eup %8960  ;;  %v11430_v21 = vpack.c.bf16 %v2272_v43, %v2270_v61  ;;  %v1983_v61 = vsub.f32 %v15663_v50, %v1082_v25  ;;  %v8643_v43 = vld [vmem:[%s15369_s2 + $0x44] ss:$24 sps:$4 sm:$0xff]   ;;  %v11463_v7 = vshrl.u32 %v2403_v4, 7 }
 0x1db   : > { %15658 = vst [vmem:[#allocation27_spill] sm:$0xff] %v11426_v38  ;;  %v8963_v42 = vpop.eup %8962  ;;  %v2273_v36 = vmul.f32 %v8961_v2, %v1979_v33  ;;  %v8641_v33 = vld [vmem:[%s15369_s2 + $0x40] ss:$24 sps:$4 sm:$0xff]   ;;  %v8652_v2 = vld [vmem:[%s15369_s2 + $0x74] ss:$24 sps:$4 sm:$0xff]  }
 0x1dc   : > { %15660 = vst [vmem:[#allocation26_spill] sm:$0xff] %v11430_v21  ;;  %8015 = vmatprep.mubr.msk.bf16.mxu0 %vm580_vm0, %v11430_v21  ;;  %v2274_v45 = vmul.f32 %v8963_v42, %v1980_v52  ;;  %15669 = vst [vmem:[#allocation33_spill] sm:$0xff] %v11463_v7  ;;  %v15461_v10 = vsub.s32 0, %v11463_v7  ;;  %v2401_v52 = vld [vmem:[%s15370_s3] sm:$0x3f]  ;;  %v15460_v42 = vsub.s32 1, %v11463_v7 }
 0x1dd   : > { %3121 = vmatmul.mubr.bf16.gmra.mrb[188].mxu0 %v11426_v38 }
 0x1de   : > { %v8965_v11 = vpop.eup %8964  ;;  %v11487_v19 = vrot.slane %v2401_v52, %v15461_v10 }
 0x1df   : > { %v8967_v53 = vpop.eup %8966  ;;  %v2275_v1 = vmul.f32 %v8965_v11, %v1981_v24  ;;  %v11493_v24 = vrot.slane %v2401_v52, %v15460_v42  ;;  %v8656_v11 = vld [vmem:[%s15369_s2 + $0xa0] ss:$24 sps:$4 sm:$0xff]  }
 0x1e0   : > { %v2276_v12 = vmul.f32 %v8967_v53, %v1982_v60 }
 0x1e1   : > { %v11439_v63 = vpack.c.bf16 %v2275_v1, %v2273_v36  ;;  %v8650_v36 = vld [vmem:[%s15369_s2 + $0x70] ss:$24 sps:$4 sm:$0xff]  }
 0x1e2   : > { %v8969_v56 = vpop.eup %8968  ;;  %v11442_v31 = vpack.c.bf16 %v2276_v12, %v2274_v45  ;;  %v8658_v45 = vld [vmem:[%s15369_s2 + $0xa4] ss:$24 sps:$4 sm:$0xff]  }
 0x1e3   : > { %15664 = vst [vmem:[#allocation29_spill] sm:$0xff] %v11439_v63  ;;  %v8971_v46 = vpop.eup %8970  ;;  %v2277_v35 = vmul.f32 %v8969_v56, %v1983_v61  ;;  %v8662_v61 = vld [vmem:[%s15369_s2 + $0xd0] ss:$24 sps:$4 sm:$0xff]  }
 0x1e4   : > { %15666 = vst [vmem:[#allocation28_spill] sm:$0xff] %v11442_v31  ;;  %8016 = vmatprep.mubr.msk.bf16.mxu0 %vm580_vm0, %v11442_v31  ;;  %v2278_v28 = vmul.f32 %v8971_v46, %v1984_v13  ;;  %v8673_v46 = vld [vmem:[%s15369_s2 + $0x104] ss:$24 sps:$4 sm:$0xff]  }
 0x1e5   : > { %3131 = vmatmul.mubr.bf16.gmra.mrb[192].mxu0 %v11439_v63  ;;  %v11451_v25 = vpack.c.bf16 %v2277_v35, %v2277_v35 }
 0x1e6   : > { %v11447_v37 = vpack.c.bf16 %v2278_v28, %v2278_v28 }
 0x1e7   : > { %15668 = vst [vmem:[#allocation30_spill] sm:$0xff] %v11451_v25 }
 0x1e8   : > { %15667 = vst [vmem:[#allocation31_spill] sm:$0xff] %v11447_v37  ;;  %8017 = vmatprep.mubr.msk.bf16.mxu0 %vm580_vm0, %v11447_v37 }
 0x1ed   : > { %3141 = vmatmul.mubr.bf16.gmra.mrb[196].mxu0 %v11451_v25 }
 0x1ee   : > { %8018 = vmatprep.mubr.msk.bf16.mxu0 %vm580_vm0, %v10645_v30 }
 0x1f5   : > { %3182 = vmatmul.mubr.bf16.vlgmr.msra.gmra.mrb[200].mxu0 %v10631_v9 }
 0x1f6   : > { %3431 = vmatpush1.bf16.msra.mxu0 %v8635_v0  ;;  %8019 = vmatprep.mubr.msk.bf16.mxu0 %vm580_vm0, %v10688_v26 }
 0x1f7   : > { %3432 = vmatprep.subr.bf16.mxu0 %v8643_v43 }
 0x1fa   : > { %3433 = vmatpush1.bf16.msra.mxu0 %v8641_v33 }
 0x1fb   : > { %3434 = vmatprep.subr.bf16.mxu0 %v8652_v2  ;;  %v8671_v2 = vld [vmem:[%s15369_s2 + $0x100] ss:$24 sps:$4 sm:$0xff]  }
 0x1fd   : > { %3192 = vmatmul.mubr.bf16.gmra.mrb[204].mxu0 %v10680_v34 }
 0x1fe   : > { %8020 = vmatprep.mubr.msk.bf16.mxu0 %vm580_vm0, %v10737_v48  ;;  %3435 = vmatpush1.bf16.msra.mxu0 %v8650_v36 }
 0x1ff   : > { %3436 = vmatprep.subr.bf16.mxu0 %v8658_v45  ;;  %v8679_v45 = vld [vmem:[%s15369_s2 + $0x134] ss:$24 sps:$4 sm:$0xff]  }
 0x200   : > { %v2902_v60 = vpop.f32.mrb[100].mxu0 }
 0x201   : > { %v2903_v53 = vadd.f32 %v2902_v60, %v11487_v19  ;;  %v2904_v1 = vpop.f32.mrb[101].mxu0 }
 0x202   : > { %v2905_v12 = vadd.f32 %v2904_v1, %v11493_v24  ;;  %v2906_v50 = vpop.f32.mrb[102].mxu0  ;;  %3437 = vmatpush1.bf16.msra.mxu0 %v8656_v11 }
 0x203   : > { %v3711_v56 = vmul.f32 %v2903_v53, %v2903_v53  ;;  %v2907_v27 = vadd.f32 %v2906_v50, %v11487_v19  ;;  %v2908_v13 = vpop.f32.mrb[103].mxu0  ;;  %3438 = vmatprep.subr.bf16.mxu0 %v8664_v14 }
 0x204   : > { %v3712_v35 = vmul.f32 %v2905_v12, %v2905_v12  ;;  %v2909_v28 = vadd.f32 %v2908_v13, %v11493_v24 }
 0x205   : > { %v4005_v4 = vmul.f32 0.035677407, %v3711_v56  ;;  %v3717_v0 = vmul.f32 %v2907_v27, %v2907_v27  ;;  %3202 = vmatmul.mubr.bf16.gmra.mrb[208].mxu0 %v10729_v3 }
 0x206   : > { %v4006_v43 = vmul.f32 0.035677407, %v3712_v35  ;;  %v3718_v33 = vmul.f32 %v2909_v28, %v2909_v28  ;;  %8021 = vmatprep.mubr.msk.bf16.mxu0 %vm580_vm0, %v10786_v5  ;;  %3439 = vmatpush1.bf16.msra.mxu0 %v8662_v61 }
 0x207   : > { %v4299_v52 = vadd.f32 0.7978846, %v4005_v4  ;;  %v4011_v36 = vmul.f32 0.035677407, %v3717_v0  ;;  %3440 = vmatprep.subr.bf16.mxu0 %v8673_v46  ;;  %v8677_v46 = vld [vmem:[%s15369_s2 + $0x130] ss:$24 sps:$4 sm:$0xff]  }
 0x208   : > { %v4300_v11 = vadd.f32 0.7978846, %v4006_v43  ;;  %v4012_v14 = vmul.f32 0.035677407, %v3718_v33  ;;  %v2912_v60 = vpop.f32.mrb[104].mxu0 }
 0x209   : > { %v4593_v1 = vmul.f32 %v4299_v52, %v2903_v53  ;;  %v4305_v50 = vadd.f32 0.7978846, %v4011_v36  ;;  %v2913_v56 = vadd.f32 %v2912_v60, %v11487_v19  ;;  %v2914_v13 = vpop.f32.mrb[105].mxu0  ;;  %v8685_v52 = vld [vmem:[%s15369_s2 + $0x164] ss:$24 sps:$4 sm:$0xff]  }
 0x20a   : > { %v4594_v61 = vmul.f32 %v4300_v11, %v2905_v12  ;;  %v4306_v35 = vadd.f32 0.7978846, %v4012_v14  ;;  %v2915_v42 = vadd.f32 %v2914_v13, %v11493_v24  ;;  %v2916_v10 = vpop.f32.mrb[106].mxu0  ;;  %3441 = vmatpush1.bf16.msra.mxu0 %v8671_v2  ;;  %v11536_v13 = vmul.f32 0.5, %v2907_v27 }
 0x20b   : > { %8972 = vtanh.f32 %v4593_v1  ;;  %v4599_v4 = vmul.f32 %v4305_v50, %v2907_v27  ;;  %v3723_v0 = vmul.f32 %v2913_v56, %v2913_v56  ;;  %v2917_v43 = vadd.f32 %v2916_v10, %v11487_v19  ;;  %v2918_v33 = vpop.f32.mrb[107].mxu0  ;;  %3442 = vmatprep.subr.bf16.mxu0 %v8679_v45  ;;  %v8683_v45 = vld [vmem:[%s15369_s2 + $0x160] ss:$24 sps:$4 sm:$0xff]  }
 0x20c   : > { %8974 = vtanh.f32 %v4594_v61  ;;  %v4600_v36 = vmul.f32 %v4306_v35, %v2909_v28  ;;  %v3724_v11 = vmul.f32 %v2915_v42, %v2915_v42  ;;  %v2919_v2 = vadd.f32 %v2918_v33, %v11493_v24 }
 0x20d   : > { %8976 = vtanh.f32 %v4599_v4  ;;  %v4017_v14 = vmul.f32 0.035677407, %v3723_v0  ;;  %v3729_v60 = vmul.f32 %v2917_v43, %v2917_v43  ;;  %3212 = vmatmul.mubr.bf16.gmra.mrb[212].mxu0 %v10772_v6  ;;  %v5181_v1 = vmul.f32 0.5, %v2903_v53 }
 0x20e   : > { %8978 = vtanh.f32 %v4600_v36  ;;  %v4018_v50 = vmul.f32 0.035677407, %v3724_v11  ;;  %v3730_v10 = vmul.f32 %v2919_v2, %v2919_v2  ;;  %8022 = vmatprep.mubr.msk.bf16.mxu0 %vm580_vm0, %v10829_v44  ;;  %3443 = vmatpush1.bf16.msra.mxu0 %v8677_v46  ;;  %v11538_v4 = vmul.f32 0.5, %v2905_v12 }
 0x20f   : > { %v4311_v61 = vadd.f32 0.7978846, %v4017_v14  ;;  %v4023_v35 = vmul.f32 0.035677407, %v3729_v60  ;;  %3444 = vmatprep.subr.bf16.mxu0 %v8685_v52  ;;  %v11540_v36 = vmul.f32 0.5, %v2909_v28  ;;  %v11545_v6 = vmul.f32 0.5, %v2915_v42 }
 0x210   : > { %v4312_v0 = vadd.f32 0.7978846, %v4018_v50  ;;  %v4024_v53 = vmul.f32 0.035677407, %v3730_v10  ;;  %v2922_v33 = vpop.f32.mrb[108].mxu0  ;;  %v11548_v60 = vmul.f32 0.5, %v2919_v2 }
 0x211   : > { %v4605_v11 = vmul.f32 %v4311_v61, %v2913_v56  ;;  %v4317_v7 = vadd.f32 0.7978846, %v4023_v35  ;;  %v11543_v46 = vadd.f32 %v2922_v33, %v11487_v19  ;;  %v2924_v44 = vpop.f32.mrb[109].mxu0  ;;  %v11555_v61 = vmul.f32 0.5, %v2913_v56 }
 0x212   : > { %v4606_v27 = vmul.f32 %v4312_v0, %v2915_v42  ;;  %v4318_v5 = vadd.f32 0.7978846, %v4024_v53  ;;  %v2925_v14 = vadd.f32 %v2924_v44, %v11493_v24  ;;  %v2926_v12 = vpop.f32.mrb[110].mxu0  ;;  %3445 = vmatpush1.bf16.msra.mxu0 %v8683_v45  ;;  %v11563_v45 = vmul.f32 0.5, %v2917_v43 }
 0x213   : > { %v4611_v52 = vmul.f32 %v4317_v7, %v2917_v43  ;;  %v3735_v28 = vmul.f32 %v11543_v46, %v11543_v46  ;;  %v11553_v50 = vadd.f32 %v2926_v12, %v11487_v19  ;;  %v2928_v10 = vpop.f32.mrb[111].mxu0 }
 0x214   : > { %8980 = vtanh.f32 %v4606_v27  ;;  %v4612_v35 = vmul.f32 %v4318_v5, %v2919_v2  ;;  %v3736_v42 = vmul.f32 %v2925_v14, %v2925_v14  ;;  %v11558_v0 = vadd.f32 %v2928_v10, %v11493_v24 }
 0x215   : > { %v8973_v44 = vpop.eup %8972  ;;  %8982 = vtanh.f32 %v4605_v11  ;;  %v4029_v53 = vmul.f32 0.035677407, %v3735_v28  ;;  %v3741_v7 = vmul.f32 %v11553_v50, %v11553_v50  ;;  %3222 = vmatmul.mubr.bf16.gmra.mrb[216].mxu0 %v10821_v58  ;;  %v11569_v10 = vmul.f32 0.5, %v2925_v14 }
 0x216   : > { %v8975_v33 = vpop.eup %8974  ;;  %v5475_v12 = vadd.f32 1.0, %v8973_v44  ;;  %8984 = vtanh.f32 %v4612_v35  ;;  %v4030_v56 = vmul.f32 0.035677407, %v3736_v42  ;;  %v3742_v5 = vmul.f32 %v11558_v0, %v11558_v0  ;;  %8023 = vmatprep.mubr.msk.bf16.mxu0 %vm580_vm0, %v10875_v29 }
 0x217   : > { %v8977_v2 = vpop.eup %8976  ;;  %v4323_v11 = vadd.f32 0.7978846, %v4029_v53  ;;  %v4035_v27 = vmul.f32 0.035677407, %v3741_v7  ;;  %v5476_v28 = vadd.f32 1.0, %v8975_v33  ;;  %8986 = vtanh.f32 %v4611_v52 }
 0x218   : > { %v8979_v3 = vpop.eup %8978  ;;  %v5481_v58 = vadd.f32 1.0, %v8977_v2  ;;  %v4324_v43 = vadd.f32 0.7978846, %v4030_v56  ;;  %v4036_v48 = vmul.f32 0.035677407, %v3742_v5  ;;  %v2932_v44 = vpop.f32.mrb[112].mxu0  ;;  %v5769_v35 = vmul.f32 %v5475_v12, %v5181_v1 }
 0x219   : > { %v4617_v42 = vmul.f32 %v4323_v11, %v11543_v46  ;;  %v4329_v34 = vadd.f32 0.7978846, %v4035_v27  ;;  %v11573_v26 = vadd.f32 %v2932_v44, %v11487_v19  ;;  %v2934_v29 = vpop.f32.mrb[113].mxu0  ;;  %v8692_v53 = vld [vmem:[%s15369_s2 + $0x190] ss:$24 sps:$4 sm:$0xff]   ;;  %v5482_v56 = vadd.f32 1.0, %v8979_v3 }
 0x21a   : > { %v4618_v7 = vmul.f32 %v4324_v43, %v2925_v14  ;;  %v4330_v33 = vadd.f32 0.7978846, %v4036_v48  ;;  %v11579_v2 = vadd.f32 %v2934_v29, %v11493_v24  ;;  %v2936_v52 = vpop.f32.mrb[114].mxu0  ;;  %v8694_v1 = vld [vmem:[%s15369_s2 + $0x194] ss:$24 sps:$4 sm:$0xff]   ;;  %v5775_v12 = vmul.f32 %v5481_v58, %v11536_v13 }
 0x21b   : > { %v4623_v5 = vmul.f32 %v4329_v34, %v11553_v50  ;;  %v3747_v11 = vmul.f32 %v11573_v26, %v11573_v26  ;;  %v11589_v27 = vadd.f32 %v2936_v52, %v11487_v19  ;;  %v2938_v48 = vpop.f32.mrb[115].mxu0  ;;  %3446 = vmatprep.subr.bf16.mxu0 %v8694_v1  ;;  %v5770_v13 = vmul.f32 %v5476_v28, %v11538_v4  ;;  %v8653_v4 = vld [vmem:[%s15371_s4 + $0x100] ss:$8 sps:$4 sm:$0xff]  }
 0x21c   : > { %8988 = vtanh.f32 %v4618_v7  ;;  %v4624_v29 = vmul.f32 %v4330_v33, %v11558_v0  ;;  %v3748_v3 = vmul.f32 %v11579_v2, %v11579_v2  ;;  %v11595_v14 = vadd.f32 %v2938_v48, %v11493_v24  ;;  %3447 = vmatpush1.bf16.msra.mxu0 %v8692_v53 }
 0x21d   : > { %8990 = vtanh.f32 %v4617_v42  ;;  %v4041_v58 = vmul.f32 0.035677407, %v3747_v11  ;;  %v3753_v34 = vmul.f32 %v11589_v27, %v11589_v27  ;;  %3232 = vmatmul.mubr.bf16.gmra.mrb[220].mxu0 %v10867_v17  ;;  %v5776_v33 = vmul.f32 %v5482_v56, %v11540_v36 }
 0x21e   : > { %v8981_v43 = vpop.eup %8980  ;;  %8992 = vtanh.f32 %v4624_v29  ;;  %v4042_v44 = vmul.f32 0.035677407, %v3748_v3  ;;  %v3754_v7 = vmul.f32 %v11595_v14, %v11595_v14  ;;  %8024 = vmatprep.mubr.msk.bf16.mxu0 %vm580_vm0, %v10918_v22  ;;  %v6063_v28 = vpack.c.bf16 %v5775_v12, %v5769_v35 }
 0x21f   : > { %v8983_v42 = vpop.eup %8982  ;;  %8994 = vtanh.f32 %v4623_v5  ;;  %v4335_v52 = vadd.f32 0.7978846, %v4041_v58  ;;  %v4047_v1 = vmul.f32 0.035677407, %v3753_v34  ;;  %v6064_v3 = vpack.c.bf16 %v5776_v33, %v5770_v13  ;;  %v8661_v5 = vld [vmem:[%s15371_s4 + $0x114] ss:$8 sps:$4 sm:$0xff]  }
 0x220   : > { %v8985_v11 = vpop.eup %8984  ;;  %v4336_v48 = vadd.f32 0.7978846, %v4042_v44  ;;  %v4048_v29 = vmul.f32 0.035677407, %v3754_v7  ;;  %v2942_v17 = vpop.f32.mrb[116].mxu0  ;;  %v5488_v9 = vadd.f32 1.0, %v8981_v43 }
 0x221   : > { %v4629_v22 = vmul.f32 %v4335_v52, %v11573_v26  ;;  %v4341_v30 = vadd.f32 0.7978846, %v4047_v1  ;;  %v11611_v36 = vadd.f32 %v2942_v17, %v11487_v19  ;;  %v2944_v53 = vpop.f32.mrb[117].mxu0  ;;  %v5494_v56 = vadd.f32 1.0, %v8985_v11  ;;  %v8987_v58 = vpop.eup %8986  ;;  %6833 = vmatprep.mubr.bf16.mxu1 %v6064_v3 }
 0x222   : > { %v4630_v35 = vmul.f32 %v4336_v48, %v11579_v2  ;;  %v4342_v12 = vadd.f32 0.7978846, %v4048_v29  ;;  %v11618_v34 = vadd.f32 %v2944_v53, %v11493_v24  ;;  %v2946_v13 = vpop.f32.mrb[118].mxu0  ;;  %v5487_v43 = vadd.f32 1.0, %v8983_v42  ;;  %6834 = vmatmul.mubr.bf16.vlgmr.msra.gmra.mrb[100].mxu1 %v6063_v28  ;;  %v8667_v48 = vld [vmem:[%s15371_s4 + $0x124] ss:$8 sps:$4 sm:$0xff]  }
 0x223   : > { %8996 = vtanh.f32 %v4629_v22  ;;  %v4635_v17 = vmul.f32 %v4341_v30, %v11589_v27  ;;  %v3759_v44 = vmul.f32 %v11611_v36, %v11611_v36  ;;  %v11624_v7 = vadd.f32 %v2946_v13, %v11487_v19  ;;  %v2948_v33 = vpop.f32.mrb[119].mxu0  ;;  %7083 = vmatpush1.bf16.msra.mxu1 %v8653_v4  ;;  %v8659_v30 = vld [vmem:[%s15371_s4 + $0x110] ss:$8 sps:$4 sm:$0xff]  }
 0x224   : > { %8998 = vtanh.f32 %v4630_v35  ;;  %v3760_v52 = vmul.f32 %v11618_v34, %v11618_v34  ;;  %v11629_v1 = vadd.f32 %v2948_v33, %v11493_v24  ;;  %v5782_v22 = vmul.f32 %v5488_v9, %v11545_v6  ;;  %7084 = vmatprep.subr.bf16.mxu1 %v8661_v5 }
 0x225   : > { %v4636_v42 = vmul.f32 %v4342_v12, %v11595_v14  ;;  %v4053_v28 = vmul.f32 0.035677407, %v3759_v44  ;;  %v3765_v11 = vmul.f32 %v11624_v7, %v11624_v7  ;;  %3242 = vmatmul.mubr.bf16.gmra.mrb[224].mxu0 %v10904_v55  ;;  %v5788_v4 = vmul.f32 %v5494_v56, %v11548_v60 }
 0x226   : > { %v8989_v9 = vpop.eup %8988  ;;  %9000 = vtanh.f32 %v4635_v17  ;;  %v4054_v6 = vmul.f32 0.035677407, %v3760_v52  ;;  %v3766_v29 = vmul.f32 %v11629_v1, %v11629_v1  ;;  %8025 = vmatprep.mubr.msk.bf16.mxu0 %vm580_vm0, %v10955_v40  ;;  %v5493_v3 = vadd.f32 1.0, %v8987_v58 }
 0x227   : > { %v11647_v53 = vpop.eup %8990  ;;  %v4347_v35 = vadd.f32 0.7978846, %v4053_v28  ;;  %v4059_v12 = vmul.f32 0.035677407, %v3765_v11  ;;  %v6070_v60 = vpack.c.bf16 %v5788_v4, %v5782_v22  ;;  %v5781_v56 = vmul.f32 %v5487_v43, %v11555_v61  ;;  %7085 = vmatpush1.bf16.msra.mxu1 %v8659_v30  ;;  %v8665_v61 = vld [vmem:[%s15371_s4 + $0x120] ss:$8 sps:$4 sm:$0xff]  }
 0x228   : > { %v8993_v5 = vpop.eup %8992  ;;  %v4348_v13 = vadd.f32 0.7978846, %v4054_v6  ;;  %v4060_v44 = vmul.f32 0.035677407, %v3766_v29  ;;  %v2952_v33 = vpop.f32.mrb[120].mxu0  ;;  %v5787_v17 = vmul.f32 %v5493_v3, %v11563_v45  ;;  %v5500_v52 = vadd.f32 1.0, %v8989_v9  ;;  %7086 = vmatprep.subr.bf16.mxu1 %v8667_v48 }
 0x229   : > { %v8995_v55 = vpop.eup %8994  ;;  %v4641_v25 = vmul.f32 %v4347_v35, %v11611_v36  ;;  %v4353_v40 = vadd.f32 0.7978846, %v4059_v12  ;;  %6843 = vmatprep.mubr.bf16.mxu1 %v6070_v60  ;;  %v11653_v58 = vadd.f32 %v2952_v33, %v11487_v19  ;;  %v2954_v28 = vpop.f32.mrb[121].mxu0  ;;  %v5506_v22 = vadd.f32 1.0, %v8993_v5  ;;  %v8670_v9 = vld [vmem:[%s15371_s4 + $0x134] ss:$8 sps:$4 sm:$0xff]  }
 0x22a   : > { %v4642_v43 = vmul.f32 %v4348_v13, %v11618_v34  ;;  %v4354_v45 = vadd.f32 0.7978846, %v4060_v44  ;;  %v6069_v30 = vpack.c.bf16 %v5787_v17, %v5781_v56  ;;  %v11660_v11 = vadd.f32 %v2954_v28, %v11493_v24  ;;  %v2956_v4 = vpop.f32.mrb[122].mxu0  ;;  %v8700_v35 = vld [vmem:[%s15369_s2 + $0x1c4] ss:$24 sps:$4 sm:$0xff]  }
 0x22b   : > { %9002 = vtanh.f32 %v4636_v42  ;;  %v3771_v6 = vmul.f32 %v11653_v58, %v11653_v58  ;;  %v11668_v29 = vadd.f32 %v2956_v4, %v11487_v19  ;;  %v2958_v48 = vpop.f32.mrb[123].mxu0  ;;  %v5212_v3 = vmul.f32 0.5, %v11558_v0  ;;  %v8698_v56 = vld [vmem:[%s15369_s2 + $0x1c0] ss:$24 sps:$4 sm:$0xff]   ;;  %7087 = vmatpush1.bf16.msra.mxu1 %v8665_v61  ;;  %v8676_v61 = vld [vmem:[%s15371_s4 + $0x144] ss:$8 sps:$4 sm:$0xff]   ;;  %3448 = vmatprep.subr.bf16.mxu0 %v8700_v35 }
 0x22c   : > { %9004 = vtanh.f32 %v4641_v25  ;;  %v4647_v12 = vmul.f32 %v4353_v40, %v11624_v7  ;;  %6844 = vmatmul.mubr.bf16.gmra.mrb[104].mxu1 %v6069_v30  ;;  %v3772_v42 = vmul.f32 %v11660_v11, %v11660_v11  ;;  %v11678_v60 = vadd.f32 %v2958_v48, %v11493_v24  ;;  %v8668_v25 = vld [vmem:[%s15371_s4 + $0x130] ss:$8 sps:$4 sm:$0xff]   ;;  %7088 = vmatprep.subr.bf16.mxu1 %v8670_v9 }
 0x22d   : > { %v11683_v5 = vpop.eup %8996  ;;  %9006 = vtanh.f32 %v4642_v43  ;;  %v4648_v0 = vmul.f32 %v4354_v45, %v11629_v1  ;;  %v4065_v13 = vmul.f32 0.035677407, %v3771_v6  ;;  %v3777_v40 = vmul.f32 %v11668_v29, %v11668_v29  ;;  %3252 = vmatmul.mubr.bf16.gmra.mrb[228].mxu0 %v10947_v57 }
 0x22e   : > { %v11692_v44 = vpop.eup %8998  ;;  %v4066_v33 = vmul.f32 0.035677407, %v3772_v42  ;;  %v3778_v17 = vmul.f32 %v11678_v60, %v11678_v60  ;;  %8026 = vmatprep.mubr.msk.bf16.mxu0 %vm580_vm0, %v10992_v54  ;;  %v5794_v28 = vmul.f32 %v5500_v52, %v11569_v10  ;;  %v5800_v43 = vmul.f32 %v5506_v22, %v5212_v3  ;;  %3449 = vmatpush1.bf16.msra.mxu0 %v8698_v56 }
 0x22f   : > { %v4359_v45 = vadd.f32 0.7978846, %v4065_v13  ;;  %v4071_v30 = vmul.f32 0.035677407, %v3777_v40  ;;  %v5205_v4 = vmul.f32 0.5, %v11543_v46  ;;  %v5211_v6 = vmul.f32 0.5, %v11553_v50  ;;  %7089 = vmatpush1.bf16.msra.mxu1 %v8668_v25 }
 0x230   : > { %v11704_v48 = vpop.eup %9000  ;;  %v4360_v42 = vadd.f32 0.7978846, %v4066_v33  ;;  %v4072_v57 = vmul.f32 0.035677407, %v3778_v17  ;;  %v6076_v54 = vpack.c.bf16 %v5800_v43, %v5794_v28  ;;  %v2962_v37 = vpop.f32.mrb[124].mxu0  ;;  %v5499_v10 = vadd.f32 1.0, %v11647_v53  ;;  %7090 = vmatprep.subr.bf16.mxu1 %v8676_v61 }
 0x231   : > { %v4653_v52 = vmul.f32 %v4359_v45, %v11653_v58  ;;  %v4365_v22 = vadd.f32 0.7978846, %v4071_v30  ;;  %v11709_v9 = vadd.f32 %v2962_v37, %v11487_v19  ;;  %v5505_v3 = vadd.f32 1.0, %v8995_v55  ;;  %v2964_v46 = vpop.f32.mrb[125].mxu0  ;;  %v8674_v50 = vld [vmem:[%s15371_s4 + $0x140] ss:$8 sps:$4 sm:$0xff]  }
 0x232   : > { %9008 = vtanh.f32 %v4647_v12  ;;  %v4366_v35 = vadd.f32 0.7978846, %v4072_v57  ;;  %6853 = vmatprep.mubr.bf16.mxu1 %v6076_v54  ;;  %v11715_v13 = vadd.f32 %v2964_v46, %v11493_v24  ;;  %v2966_v53 = vpop.f32.mrb[126].mxu0  ;;  %v8682_v37 = vld [vmem:[%s15371_s4 + $0x154] ss:$8 sps:$4 sm:$0xff]   ;;  %v5793_v56 = vmul.f32 %v5499_v10, %v5205_v4 }
 0x233   : > { %9010 = vtanh.f32 %v4648_v0  ;;  %v3783_v55 = vmul.f32 %v11709_v9, %v11709_v9  ;;  %v5799_v40 = vmul.f32 %v5505_v3, %v5211_v6  ;;  %v2968_v25 = vpop.f32.mrb[127].mxu0  ;;  %v4654_v57 = vmul.f32 %v4360_v42, %v11660_v11  ;;  %7091 = vmatpush1.bf16.msra.mxu1 %v8674_v50  ;;  %v8680_v61 = vld [vmem:[%s15371_s4 + $0x150] ss:$8 sps:$4 sm:$0xff]   ;;  %v8688_v10 = vld [vmem:[%s15371_s4 + $0x164] ss:$8 sps:$4 sm:$0xff]  }
 0x234   : > { %9012 = vtanh.f32 %v4653_v52  ;;  %v3784_v54 = vmul.f32 %v11715_v13, %v11715_v13  ;;  %v11726_v12 = vadd.f32 %v2966_v53, %v11487_v19  ;;  %v4659_v17 = vmul.f32 %v4365_v22, %v11668_v29  ;;  %7092 = vmatprep.subr.bf16.mxu1 %v8682_v37 }
 0x235   : > { %v9003_v33 = vpop.eup %9002  ;;  %v4077_v28 = vmul.f32 0.035677407, %v3783_v55  ;;  %v6075_v0 = vpack.c.bf16 %v5799_v40, %v5793_v56  ;;  %v11730_v43 = vadd.f32 %v2968_v25, %v11493_v24  ;;  %3262 = vmatmul.mubr.bf16.gmra.mrb[232].mxu0 %v10984_v20  ;;  %v4660_v30 = vmul.f32 %v4366_v35, %v11678_v60  ;;  %v8686_v25 = vld [vmem:[%s15371_s4 + $0x160] ss:$8 sps:$4 sm:$0xff]  }
 0x236   : > { %v11736_v45 = vpop.eup %9004  ;;  %v4078_v4 = vmul.f32 0.035677407, %v3784_v54  ;;  %v3789_v6 = vmul.f32 %v11726_v12, %v11726_v12  ;;  %8027 = vmatprep.mubr.msk.bf16.mxu0 %vm580_vm0, %v11032_v16  ;;  %v5218_v42 = vmul.f32 0.5, %v11579_v2  ;;  %v5224_v46 = vmul.f32 0.5, %v11595_v14 }
 0x237   : > { %v11747_v52 = vpop.eup %9006  ;;  %v4371_v22 = vadd.f32 0.7978846, %v4077_v28  ;;  %6854 = vmatmul.mubr.bf16.gmra.mrb[108].mxu1 %v6075_v0  ;;  %v3790_v3 = vmul.f32 %v11730_v43, %v11730_v43  ;;  %v5512_v50 = vadd.f32 1.0, %v11692_v44  ;;  %9014 = vtanh.f32 %v4654_v57 }
 0x238   : > { %v4372_v35 = vadd.f32 0.7978846, %v4078_v4  ;;  %v4083_v53 = vmul.f32 0.035677407, %v3789_v6  ;;  %v5518_v2 = vadd.f32 1.0, %v9003_v33  ;;  %v2972_v37 = vpop.f32.mrb[128].mxu0  ;;  %9016 = vtanh.f32 %v4659_v17  ;;  %7093 = vmatpush1.bf16.msra.mxu1 %v8680_v61 }
 0x239   : > { %v4084_v55 = vmul.f32 0.035677407, %v3790_v3  ;;  %v11754_v56 = vadd.f32 %v2972_v37, %v11487_v19  ;;  %v2974_v40 = vpop.f32.mrb[129].mxu0  ;;  %v4665_v14 = vmul.f32 %v4371_v22, %v11709_v9  ;;  %v5806_v44 = vmul.f32 %v5512_v50, %v5218_v42  ;;  %7094 = vmatprep.subr.bf16.mxu1 %v8688_v10  ;;  %v8691_v61 = vld [vmem:[%s15371_s4 + $0x174] ss:$8 sps:$4 sm:$0xff]  }
 0x23a   : > { %v4377_v54 = vadd.f32 0.7978846, %v4083_v53  ;;  %v5812_v57 = vmul.f32 %v5518_v2, %v5224_v46  ;;  %v2976_v28 = vpop.f32.mrb[130].mxu0  ;;  %9018 = vtanh.f32 %v4660_v30  ;;  %v4666_v33 = vmul.f32 %v4372_v35, %v11715_v13  ;;  %v8689_v53 = vld [vmem:[%s15371_s4 + $0x170] ss:$8 sps:$4 sm:$0xff]  }
 0x23b   : > { %v3795_v17 = vmul.f32 %v11754_v56, %v11754_v56  ;;  %v2978_v0 = vpop.f32.mrb[131].mxu0  ;;  %v4378_v6 = vadd.f32 0.7978846, %v4084_v55  ;;  %v5217_v42 = vmul.f32 0.5, %v11573_v26  ;;  %v5511_v3 = vadd.f32 1.0, %v11683_v5 }
 0x23c   : > { %v11766_v4 = vpop.eup %9008  ;;  %v6082_v22 = vpack.c.bf16 %v5812_v57, %v5806_v44  ;;  %v5223_v46 = vmul.f32 0.5, %v11589_v27  ;;  %v5517_v50 = vadd.f32 1.0, %v11704_v48  ;;  %v11773_v35 = vadd.f32 %v2974_v40, %v11493_v24  ;;  %7095 = vmatpush1.bf16.msra.mxu1 %v8686_v25  ;;  %v8697_v48 = vld [vmem:[%s15371_s4 + $0x184] ss:$8 sps:$4 sm:$0xff]  }
 0x23d   : > { %v9011_v10 = vpop.eup %9010  ;;  %v4089_v30 = vmul.f32 0.035677407, %v3795_v17  ;;  %3272 = vmatmul.mubr.bf16.gmra.mrb[236].mxu0 %v11024_v8  ;;  %9020 = vtanh.f32 %v4665_v14  ;;  %v4671_v26 = vmul.f32 %v4377_v54, %v11726_v12  ;;  %v11783_v27 = vadd.f32 %v2976_v28, %v11487_v19  ;;  %7096 = vmatprep.subr.bf16.mxu1 %v8691_v61  ;;  %v8704_v14 = vld [vmem:[%s15369_s2 + $0x1f0] ss:$24 sps:$4 sm:$0xff]   ;;  %v8706_v54 = vld [vmem:[%s15369_s2 + $0x1f4] ss:$24 sps:$4 sm:$0xff]  }
 0x23e   : > { %v11779_v2 = vpop.eup %9012  ;;  %6863 = vmatprep.mubr.bf16.mxu1 %v6082_v22  ;;  %v11786_v5 = vadd.f32 %v2978_v0, %v11493_v24  ;;  %8028 = vmatprep.mubr.msk.bf16.mxu0 %vm580_vm0, %v11069_v18  ;;  %v5805_v55 = vmul.f32 %v5511_v3, %v5217_v42  ;;  %v5811_v40 = vmul.f32 %v5517_v50, %v5223_v46  ;;  %9022 = vtanh.f32 %v4666_v33  ;;  %v8695_v0 = vld [vmem:[%s15371_s4 + $0x180] ss:$8 sps:$4 sm:$0xff]   ;;  %v8703_v61 = vld [vmem:[%s15371_s4 + $0x194] ss:$8 sps:$4 sm:$0xff]  }
 0x23f   : > { %v4383_v37 = vadd.f32 0.7978846, %v4089_v30  ;;  %v3796_v25 = vmul.f32 %v11773_v35, %v11773_v35  ;;  %v4672_v44 = vmul.f32 %v4378_v6, %v11730_v43  ;;  %v3801_v57 = vmul.f32 %v11783_v27, %v11783_v27  ;;  %3450 = vmatprep.subr.bf16.mxu0 %v8706_v54 }
 0x240   : > { %v3802_v28 = vmul.f32 %v11786_v5, %v11786_v5  ;;  %v2982_v17 = vpop.f32.mrb[132].mxu0  ;;  %v6081_v22 = vpack.c.bf16 %v5811_v40, %v5805_v55  ;;  %v5230_v33 = vmul.f32 0.5, %v11618_v34  ;;  %v5524_v6 = vadd.f32 1.0, %v11747_v52  ;;  %7097 = vmatpush1.bf16.msra.mxu1 %v8689_v53  ;;  %3451 = vmatpush1.bf16.msra.mxu0 %v8704_v14 }
 0x241   : > { %v4090_v42 = vmul.f32 0.035677407, %v3796_v25  ;;  %v2984_v3 = vpop.f32.mrb[133].mxu0  ;;  %v9015_v30 = vpop.eup %9014  ;;  %v4095_v46 = vmul.f32 0.035677407, %v3801_v57  ;;  %v5236_v50 = vmul.f32 0.5, %v11629_v1  ;;  %v11816_v8 = vadd.f32 %v2982_v17, %v11487_v19  ;;  %7098 = vmatprep.subr.bf16.mxu1 %v8697_v48 }
 0x242   : > { %v5530_v18 = vadd.f32 1.0, %v9011_v10  ;;  %v2986_v16 = vpop.f32.mrb[134].mxu0  ;;  %v11818_v55 = vpop.eup %9016  ;;  %9024 = vtanh.f32 %v4671_v26  ;;  %v4677_v34 = vmul.f32 %v4383_v37, %v11754_v56  ;;  %6864 = vmatmul.mubr.bf16.gmra.mrb[112].mxu1 %v6081_v22  ;;  %v4096_v53 = vmul.f32 0.035677407, %v3802_v28  ;;  %v8701_v48 = vld [vmem:[%s15371_s4 + $0x190] ss:$8 sps:$4 sm:$0xff]  }
 0x243   : > { %v4384_v52 = vadd.f32 0.7978846, %v4090_v42  ;;  %v2988_v40 = vpop.f32.mrb[135].mxu0  ;;  %v5818_v25 = vmul.f32 %v5524_v6, %v5230_v33  ;;  %v3807_v1 = vmul.f32 %v11816_v8, %v11816_v8  ;;  %v5229_v10 = vmul.f32 0.5, %v11611_v36  ;;  %v8709_v36 = vld [vmem:[%s15371_s4 + $0x1a4] ss:$8 sps:$4 sm:$0xff]  }
 0x244   : > { %v5824_v54 = vmul.f32 %v5530_v18, %v5236_v50  ;;  %v9019_v14 = vpop.eup %9018  ;;  %v4389_v57 = vadd.f32 0.7978846, %v4095_v46  ;;  %v5235_v26 = vmul.f32 0.5, %v11624_v7  ;;  %v5523_v37 = vadd.f32 1.0, %v11736_v45  ;;  %7099 = vmatpush1.bf16.msra.mxu1 %v8695_v0 }
 0x245   : > { %v5529_v28 = vadd.f32 1.0, %v11766_v4  ;;  %3282 = vmatmul.mubr.bf16.gmra.mrb[240].mxu0 %v11061_v62  ;;  %9026 = vtanh.f32 %v4672_v44  ;;  %v4101_v17 = vmul.f32 0.035677407, %v3807_v1  ;;  %7100 = vmatprep.subr.bf16.mxu1 %v8703_v61  ;;  %v11837_v45 = vadd.f32 %v2984_v3, %v11493_v24 }
 0x246   : > { %v6088_v18 = vpack.c.bf16 %v5824_v54, %v5818_v25  ;;  %8029 = vmatprep.mubr.msk.bf16.mxu0 %vm580_vm0, %v11100_v39  ;;  %9028 = vtanh.f32 %v4677_v34  ;;  %v5817_v7 = vmul.f32 %v5523_v37, %v5229_v10  ;;  %v4390_v0 = vadd.f32 0.7978846, %v4096_v53  ;;  %v8707_v53 = vld [vmem:[%s15371_s4 + $0x1a0] ss:$8 sps:$4 sm:$0xff]  }
 0x247   : > { %v5823_v22 = vmul.f32 %v5529_v28, %v5235_v26  ;;  %v11839_v4 = vpop.eup %9020  ;;  %v4395_v44 = vadd.f32 0.7978846, %v4101_v17  ;;  %v11842_v42 = vadd.f32 %v2986_v16, %v11487_v19  ;;  %v11845_v61 = vadd.f32 %v2988_v40, %v11493_v24 }
 0x248   : > { %6873 = vmatprep.mubr.bf16.mxu1 %v6088_v18  ;;  %v2992_v33 = vpop.f32.mrb[136].mxu0  ;;  %v4678_v6 = vmul.f32 %v4384_v52, %v11773_v35  ;;  %v4683_v46 = vmul.f32 %v4389_v57, %v11783_v27  ;;  %v3808_v3 = vmul.f32 %v11837_v45, %v11837_v45  ;;  %7101 = vmatpush1.bf16.msra.mxu1 %v8701_v48  ;;  %v11854_v16 = vpop.eup %9022  ;;  %v5242_v25 = vmul.f32 0.5, %v11660_v11 }
 0x249   : > { %v6087_v50 = vpack.c.bf16 %v5823_v22, %v5817_v7  ;;  %v2994_v34 = vpop.f32.mrb[137].mxu0  ;;  %v3813_v40 = vmul.f32 %v11842_v42, %v11842_v42  ;;  %v3814_v52 = vmul.f32 %v11845_v61, %v11845_v61  ;;  %v5248_v54 = vmul.f32 0.5, %v11678_v60  ;;  %7102 = vmatprep.subr.bf16.mxu1 %v8709_v36 }
 0x24a   : > { %v2996_v1 = vpop.f32.mrb[138].mxu0  ;;  %v4102_v10 = vmul.f32 0.035677407, %v3808_v3  ;;  %v5536_v48 = vadd.f32 1.0, %v9015_v30  ;;  %v5542_v57 = vadd.f32 1.0, %v9019_v14  ;;  %v11863_v26 = vadd.f32 %v2992_v33, %v11487_v19 }
 0x24b   : > { %6874 = vmatmul.mubr.bf16.gmra.mrb[116].mxu1 %v6087_v50  ;;  %v2998_v37 = vpop.f32.mrb[139].mxu0  ;;  %v4684_v28 = vmul.f32 %v4390_v0, %v11786_v5  ;;  %v4689_v18 = vmul.f32 %v4395_v44, %v11816_v8  ;;  %v4107_v17 = vmul.f32 0.035677407, %v3813_v40  ;;  %v4108_v7 = vmul.f32 0.035677407, %v3814_v52 }
 0x24c   : > { %v11867_v22 = vpop.eup %9024  ;;  %9030 = vtanh.f32 %v4678_v6  ;;  %v5830_v11 = vmul.f32 %v5536_v48, %v5242_v25  ;;  %v5836_v60 = vmul.f32 %v5542_v57, %v5248_v54  ;;  %v3819_v36 = vmul.f32 %v11863_v26, %v11863_v26  ;;  %7103 = vmatpush1.bf16.msra.mxu1 %v8707_v53 }
 0x24d   : > { %3292 = vmatmul.mubr.bf16.gmra.mrb[244].mxu0 %v11092_v51  ;;  %v4396_v30 = vadd.f32 0.7978846, %v4102_v10  ;;  %v4401_v14 = vadd.f32 0.7978846, %v4107_v17  ;;  %v5241_v33 = vmul.f32 0.5, %v11653_v58  ;;  %v5535_v0 = vadd.f32 1.0, %v11779_v2 }
 0x24e   : > { %8030 = vmatprep.mubr.msk.bf16.mxu0 %vm580_vm0, %v11131_v47  ;;  %v4402_v44 = vadd.f32 0.7978846, %v4108_v7  ;;  %v6094_v50 = vpack.c.bf16 %v5836_v60, %v5830_v11  ;;  %v5247_v6 = vmul.f32 0.5, %v11668_v29  ;;  %v5541_v3 = vadd.f32 1.0, %v11818_v55  ;;  %v8710_v58 = vld [vmem:[%s15371_s4 + $0x1b0] ss:$8 sps:$4 sm:$0xff]  }
 0x24f   : > { %v9027_v40 = vpop.eup %9026  ;;  %9032 = vtanh.f32 %v4684_v28  ;;  %v11879_v52 = vadd.f32 %v2994_v34, %v11493_v24  ;;  %v8712_v2 = vld [vmem:[%s15371_s4 + $0x1b4] ss:$8 sps:$4 sm:$0xff]   ;;  %v4113_v29 = vmul.f32 0.035677407, %v3819_v36  ;;  %v5829_v54 = vmul.f32 %v5535_v0, %v5241_v33  ;;  %v8713_v7 = vld [vmem:[%s15369_s2 + $0x220] ss:$24 sps:$4 sm:$0xff]  }
 0x250   : > { %v3002_v53 = vpop.f32.mrb[140].mxu0  ;;  %v11887_v25 = vpop.eup %9028  ;;  %6883 = vmatprep.mubr.bf16.mxu1 %v6094_v50  ;;  %v5835_v55 = vmul.f32 %v5541_v3, %v5247_v6  ;;  %v11890_v10 = vadd.f32 %v2996_v1, %v11487_v19  ;;  %9034 = vtanh.f32 %v4683_v46  ;;  %v4690_v48 = vmul.f32 %v4396_v30, %v11837_v45  ;;  %7104 = vmatprep.subr.bf16.mxu1 %v8712_v2  ;;  %v8715_v1 = vld [vmem:[%s15369_s2 + $0x224] ss:$24 sps:$4 sm:$0xff]  }
 0x251   : > { %v3004_v34 = vpop.f32.mrb[141].mxu0  ;;  %v3820_v57 = vmul.f32 %v11879_v52, %v11879_v52  ;;  %v11896_v28 = vadd.f32 %v2998_v37, %v11493_v24  ;;  %9036 = vtanh.f32 %v4689_v18  ;;  %v4695_v46 = vmul.f32 %v4401_v14, %v11842_v42  ;;  %7105 = vmatpush1.bf16.msra.mxu1 %v8710_v58  ;;  %3452 = vmatprep.subr.bf16.mxu0 %v8715_v1 }
 0x252   : > { %v3006_v17 = vpop.f32.mrb[142].mxu0  ;;  %v6093_v11 = vpack.c.bf16 %v5835_v55, %v5829_v54  ;;  %v3825_v60 = vmul.f32 %v11890_v10, %v11890_v10  ;;  %v4696_v37 = vmul.f32 %v4402_v44, %v11845_v61  ;;  %v5548_v0 = vadd.f32 1.0, %v11854_v16  ;;  %3453 = vmatpush1.bf16.msra.mxu0 %v8713_v7 }
 0x253   : > { %v3008_v36 = vpop.f32.mrb[143].mxu0  ;;  %v4114_v30 = vmul.f32 0.035677407, %v3820_v57  ;;  %v3826_v33 = vmul.f32 %v11896_v28, %v11896_v28  ;;  %v5254_v18 = vmul.f32 0.5, %v11715_v13  ;;  %v5260_v14 = vmul.f32 0.5, %v11730_v43 }
 0x254   : > { %6884 = vmatmul.mubr.bf16.gmra.mrb[120].mxu1 %v6093_v11  ;;  %v5554_v50 = vadd.f32 1.0, %v9027_v40  ;;  %v11914_v6 = vadd.f32 %v3002_v53, %v11487_v19  ;;  %9038 = vtanh.f32 %v4690_v48  ;;  %v4407_v44 = vadd.f32 0.7978846, %v4113_v29 }
 0x255   : > { %3302 = vmatmul.mubr.bf16.gmra.mrb[248].mxu0 %v11123_v23  ;;  %v4408_v3 = vadd.f32 0.7978846, %v4114_v30  ;;  %v4119_v58 = vmul.f32 0.035677407, %v3825_v60  ;;  %v4120_v2 = vmul.f32 0.035677407, %v3826_v33  ;;  %v5842_v54 = vmul.f32 %v5548_v0, %v5254_v18 }
 0x256   : > { %8031 = vmatprep.mubr.msk.bf16.mxu0 %vm580_vm0, %v11162_v59  ;;  %v9031_v16 = vpop.eup %9030  ;;  %v5848_v13 = vmul.f32 %v5554_v50, %v5260_v14  ;;  %v3831_v43 = vmul.f32 %v11914_v6, %v11914_v6  ;;  %v5253_v40 = vmul.f32 0.5, %v11709_v9  ;;  %v5259_v53 = vmul.f32 0.5, %v11726_v12 }
 0x257   : > { %v5547_v55 = vadd.f32 1.0, %v11839_v4  ;;  %v5553_v29 = vadd.f32 1.0, %v11867_v22  ;;  %9040 = vtanh.f32 %v4695_v46  ;;  %v11926_v7 = vadd.f32 %v3004_v34, %v11493_v24 }
 0x258   : > { %v3012_v48 = vpop.f32.mrb[144].mxu0  ;;  %v6100_v57 = vpack.c.bf16 %v5848_v13, %v5842_v54  ;;  %v4125_v1 = vmul.f32 0.035677407, %v3831_v43  ;;  %9042 = vtanh.f32 %v4696_v37  ;;  %v4701_v30 = vmul.f32 %v4407_v44, %v11863_v26 }
 0x259   : > { %v3014_v11 = vpop.f32.mrb[145].mxu0  ;;  %v9033_v60 = vpop.eup %9032  ;;  %v5841_v33 = vmul.f32 %v5547_v55, %v5253_v40  ;;  %v5847_v9 = vmul.f32 %v5553_v29, %v5259_v53  ;;  %v4413_v12 = vadd.f32 0.7978846, %v4119_v58  ;;  %v4414_v18 = vadd.f32 0.7978846, %v4120_v2 }
 0x25a   : > { %v3016_v0 = vpop.f32.mrb[146].mxu0  ;;  %6893 = vmatprep.mubr.bf16.mxu1 %v6100_v57  ;;  %v3832_v4 = vmul.f32 %v11926_v7, %v11926_v7  ;;  %v11932_v22 = vadd.f32 %v3006_v17, %v11487_v19  ;;  %v9035_v34 = vpop.eup %9034  ;;  %v4702_v14 = vmul.f32 %v4408_v3, %v11879_v52  ;;  %v4419_v37 = vadd.f32 0.7978846, %v4125_v1  ;;  %v8716_v58 = vld [vmem:[%s15371_s4 + $0x1c0] ss:$8 sps:$4 sm:$0xff]  }
 0x25b   : > { %v11934_v46 = vpop.f32.mrb[147].mxu0  ;;  %v6099_v50 = vpack.c.bf16 %v5847_v9, %v5841_v33  ;;  %v11938_v44 = vadd.f32 %v3008_v36, %v11493_v24  ;;  %v8718_v2 = vld [vmem:[%s15371_s4 + $0x1c4] ss:$8 sps:$4 sm:$0xff]   ;;  %v11946_v17 = vpop.eup %9036  ;;  %v5266_v3 = vmul.f32 0.5, %v11773_v35  ;;  %v5272_v43 = vmul.f32 0.5, %v11786_v5 }
 0x25c   : > { %v4126_v54 = vmul.f32 0.035677407, %v3832_v4  ;;  %v3837_v13 = vmul.f32 %v11932_v22, %v11932_v22  ;;  %v5560_v40 = vadd.f32 1.0, %v9031_v16  ;;  %v5566_v53 = vadd.f32 1.0, %v9033_v60  ;;  %7106 = vmatprep.subr.bf16.mxu1 %v8718_v2 }
 0x25d   : > { %3312 = vmatmul.mubr.bf16.gmra.mrb[252].mxu0 %v11154_v15  ;;  %6894 = vmatmul.mubr.bf16.gmra.mrb[124].mxu1 %v6099_v50  ;;  %v3838_v36 = vmul.f32 %v11938_v44, %v11938_v44  ;;  %v3013_v55 = vadd.f32 %v3012_v48, %v11487_v19  ;;  %9044 = vtanh.f32 %v4701_v30  ;;  %v4707_v29 = vmul.f32 %v4413_v12, %v11890_v10 }
 0x25e   : > { %8032 = vmatprep.mubr.msk.bf16.mxu0 %vm580_vm0, %v11199_v49  ;;  %v4420_v57 = vadd.f32 0.7978846, %v4126_v54  ;;  %v4131_v35 = vmul.f32 0.035677407, %v3837_v13  ;;  %v9039_v5 = vpop.eup %9038  ;;  %v5854_v33 = vmul.f32 %v5560_v40, %v5266_v3  ;;  %v5860_v9 = vmul.f32 %v5566_v53, %v5272_v43  ;;  %7107 = vmatpush1.bf16.msra.mxu1 %v8716_v58 }
 0x25f   : > { %v4132_v1 = vmul.f32 0.035677407, %v3838_v36  ;;  %v3843_v4 = vmul.f32 %v3013_v55, %v3013_v55  ;;  %9046 = vtanh.f32 %v4702_v14  ;;  %v4708_v16 = vmul.f32 %v4414_v18, %v11896_v28 }
 0x260   : > { %v3022_v50 = vpop.f32.mrb[148].mxu0  ;;  %v4713_v48 = vmul.f32 %v4419_v37, %v11914_v6  ;;  %v4425_v30 = vadd.f32 0.7978846, %v4131_v35  ;;  %v6106_v49 = vpack.c.bf16 %v5860_v9, %v5854_v33  ;;  %v5559_v54 = vadd.f32 1.0, %v11887_v25 }
 0x261   : > { %v11961_v60 = vpop.f32.mrb[149].mxu0  ;;  %v4137_v12 = vmul.f32 0.035677407, %v3843_v4  ;;  %v9041_v13 = vpop.eup %9040  ;;  %v5265_v3 = vmul.f32 0.5, %v11754_v56  ;;  %v5271_v43 = vmul.f32 0.5, %v11783_v27  ;;  %v5565_v58 = vadd.f32 1.0, %v9035_v34 }
 0x262   : > { %v11964_v2 = vpop.f32.mrb[150].mxu0  ;;  %v11969_v14 = vadd.f32 %v3014_v11, %v11493_v24  ;;  %v9043_v37 = vpop.eup %9042  ;;  %9048 = vtanh.f32 %v4707_v29  ;;  %v4714_v36 = vmul.f32 %v4420_v57, %v11926_v7  ;;  %v4426_v40 = vadd.f32 0.7978846, %v4132_v1  ;;  %6903 = vmatprep.mubr.bf16.mxu1 %v6106_v49  ;;  %v15670_v34 = vld [vmem:[#allocation11_spill] sm:$0xff]  ;;  %v15671_v57 = vld [vmem:[#allocation12_spill] sm:$0xff] }
 0x263   : > { %v11971_v18 = vpop.f32.mrb[151].mxu0  ;;  %v11975_v25 = vadd.f32 %v3016_v0, %v11487_v19  ;;  %9050 = vtanh.f32 %v4708_v16  ;;  %v5853_v53 = vmul.f32 %v5559_v54, %v5265_v3  ;;  %v5859_v56 = vmul.f32 %v5565_v58, %v5271_v43 }
 0x264   : > { %v3844_v27 = vmul.f32 %v11969_v14, %v11969_v14  ;;  %9052 = vtanh.f32 %v4713_v48  ;;  %v4719_v11 = vmul.f32 %v4425_v30, %v11932_v22  ;;  %v4431_v35 = vadd.f32 0.7978846, %v4137_v12 }
 0x265   : > { %3322 = vmatmul.mubr.bf16.gmra.mrb[0].mxu0 %v15670_v34  ;;  %v3849_v29 = vmul.f32 %v11975_v25, %v11975_v25  ;;  %v11985_v49 = vmul.f32 0.5, %v3013_v55  ;;  %v6105_v0 = vpack.c.bf16 %v5859_v56, %v5853_v53  ;;  %v11989_v33 = vadd.f32 %v11934_v46, %v11493_v24 }
 0x266   : > { %8033 = vmatprep.mubr.msk.bf16.mxu0 %vm580_vm0, %v15671_v57  ;;  %v4138_v1 = vmul.f32 0.035677407, %v3844_v27  ;;  %9054 = vtanh.f32 %v4714_v36  ;;  %v4720_v9 = vmul.f32 %v4426_v40, %v11938_v44  ;;  %v5572_v16 = vadd.f32 1.0, %v9039_v5 }
 0x267   : > { %v4143_v4 = vmul.f32 0.035677407, %v3849_v29  ;;  %v11994_v30 = vpop.eup %9044  ;;  %6904 = vmatmul.mubr.bf16.gmra.mrb[128].mxu1 %v6105_v0  ;;  %v3850_v12 = vmul.f32 %v11989_v33, %v11989_v33  ;;  %v5278_v54 = vmul.f32 0.5, %v11837_v45  ;;  %v5284_v3 = vmul.f32 0.5, %v11845_v61 }
 0x268   : > { %v11992_v48 = vpop.f32.mrb[152].mxu0  ;;  %v5578_v43 = vadd.f32 1.0, %v9043_v37  ;;  %9056 = vtanh.f32 %v4719_v11  ;;  %v4725_v58 = vmul.f32 %v4431_v35, %v3013_v55  ;;  %v12003_v36 = vmul.f32 0.5, %v11969_v14  ;;  %v8721_v11 = vld [vmem:[%s15371_s4 + $0x1d4] ss:$8 sps:$4 sm:$0xff]  }
 0x269   : > { %v12000_v46 = vpop.f32.mrb[153].mxu0  ;;  %v12006_v5 = vadd.f32 %v3022_v50, %v11487_v19  ;;  %v9047_v53 = vpop.eup %9046  ;;  %v4432_v56 = vadd.f32 0.7978846, %v4138_v1  ;;  %v4437_v27 = vadd.f32 0.7978846, %v4143_v4  ;;  %v5866_v29 = vmul.f32 %v5572_v16, %v5278_v54  ;;  %v15672_v16 = vld [vmem:[#allocation13_spill] sm:$0xff]  ;;  %7108 = vmatprep.subr.bf16.mxu1 %v8721_v11 }
 0x26a   : > { %v12008_v40 = vpop.f32.mrb[154].mxu0  ;;  %v5872_v45 = vmul.f32 %v5578_v43, %v5284_v3  ;;  %9058 = vtanh.f32 %v4720_v9  ;;  %v5277_v55 = vmul.f32 0.5, %v11816_v8  ;;  %v5571_v37 = vadd.f32 1.0, %v11946_v17  ;;  %v8719_v50 = vld [vmem:[%s15371_s4 + $0x1d0] ss:$8 sps:$4 sm:$0xff]   ;;  %v15673_v43 = vld [vmem:[#allocation14_spill] sm:$0xff] }
 0x26b   : > { %v12010_v0 = vpop.f32.mrb[155].mxu0  ;;  %v3855_v61 = vmul.f32 %v12006_v5, %v12006_v5  ;;  %v4144_v35 = vmul.f32 0.035677407, %v3850_v12  ;;  %v5283_v4 = vmul.f32 0.5, %v11842_v42  ;;  %v5577_v9 = vadd.f32 1.0, %v9041_v13  ;;  %7109 = vmatpush1.bf16.msra.mxu1 %v8719_v50 }
 0x26c   : > { %v6112_v1 = vpack.c.bf16 %v5872_v45, %v5866_v29  ;;  %v9049_v54 = vpop.eup %9048  ;;  %9060 = vtanh.f32 %v4725_v58  ;;  %v12025_v8 = vmul.f32 0.5, %v11975_v25  ;;  %v3025_v3 = vadd.f32 %v11961_v60, %v11493_v24 }
 0x26d   : > { %3332 = vmatmul.mubr.bf16.gmra.mrb[4].mxu0 %v15672_v16  ;;  %v4149_v17 = vmul.f32 0.035677407, %v3855_v61  ;;  %v9051_v12 = vpop.eup %9050  ;;  %v5865_v29 = vmul.f32 %v5571_v37, %v5277_v55  ;;  %v5871_v42 = vmul.f32 %v5577_v9, %v5283_v4  ;;  %v3027_v13 = vadd.f32 %v11964_v2, %v11487_v19 }
 0x26e   : > { %8034 = vmatprep.mubr.msk.bf16.mxu0 %vm580_vm0, %v15673_v43  ;;  %6913 = vmatprep.mubr.bf16.mxu1 %v6112_v1  ;;  %v12035_v58 = vadd.f32 %v11971_v18, %v11493_v24  ;;  %v12037_v45 = vpop.eup %9052  ;;  %v4726_v61 = vmul.f32 %v4432_v56, %v11969_v14  ;;  %v4731_v60 = vmul.f32 %v4437_v27, %v11975_v25  ;;  %v12042_v43 = vmul.f32 0.5, %v11989_v33 }
 0x26f   : > { %v3856_v11 = vmul.f32 %v3025_v3, %v3025_v3  ;;  %v4438_v55 = vadd.f32 0.7978846, %v4144_v35  ;;  %v12047_v2 = vmul.f32 0.5, %v12006_v5  ;;  %v6111_v37 = vpack.c.bf16 %v5871_v42, %v5865_v29 }
 0x270   : > { %v12044_v1 = vpop.f32.mrb[156].mxu0  ;;  %v3861_v18 = vmul.f32 %v3027_v13, %v3027_v13  ;;  %v12051_v9 = vpop.eup %9054  ;;  %v4443_v14 = vadd.f32 0.7978846, %v4149_v17  ;;  %v3862_v25 = vmul.f32 %v12035_v58, %v12035_v58  ;;  %v5290_v27 = vmul.f32 0.5, %v11879_v52 }
 0x271   : > { %v12049_v4 = vpop.f32.mrb[157].mxu0  ;;  %v4150_v56 = vmul.f32 0.035677407, %v3856_v11  ;;  %6914 = vmatmul.mubr.bf16.gmra.mrb[132].mxu1 %v6111_v37  ;;  %v5296_v35 = vmul.f32 0.5, %v11896_v28  ;;  %v5584_v57 = vadd.f32 1.0, %v9047_v53  ;;  %v5590_v29 = vadd.f32 1.0, %v9051_v12 }
 0x272   : > { %v12056_v16 = vpop.f32.mrb[158].mxu0  ;;  %v4155_v50 = vmul.f32 0.035677407, %v3861_v18  ;;  %v12061_v34 = vpop.eup %9056  ;;  %9062 = vtanh.f32 %v4726_v61  ;;  %v4156_v11 = vmul.f32 0.035677407, %v3862_v25  ;;  %v3033_v15 = vadd.f32 %v11992_v48, %v11487_v19  ;;  %v15674_v18 = vld [vmem:[#allocation15_spill] sm:$0xff] }
 0x273   : > { %v12059_v42 = vpop.f32.mrb[159].mxu0  ;;  %v4444_v17 = vadd.f32 0.7978846, %v4150_v56  ;;  %v4732_v52 = vmul.f32 %v4438_v55, %v11989_v33  ;;  %v5878_v23 = vmul.f32 %v5584_v57, %v5290_v27  ;;  %v5884_v37 = vmul.f32 %v5590_v29, %v5296_v35  ;;  %v15675_v61 = vld [vmem:[#allocation16_spill] sm:$0xff] }
 0x274   : > { %v4449_v59 = vadd.f32 0.7978846, %v4155_v50  ;;  %v9059_v28 = vpop.eup %9058  ;;  %9064 = vtanh.f32 %v4731_v60  ;;  %v4737_v53 = vmul.f32 %v4443_v14, %v12006_v5  ;;  %v12068_v12 = vmul.f32 0.5, %v3025_v3 }
 0x275   : > { %3342 = vmatmul.mubr.bf16.gmra.mrb[8].mxu0 %v15674_v18  ;;  %v3867_v47 = vmul.f32 %v3033_v15, %v3033_v15  ;;  %v4450_v56 = vadd.f32 0.7978846, %v4156_v11  ;;  %v6118_v25 = vpack.c.bf16 %v5884_v37, %v5878_v23  ;;  %v5289_v48 = vmul.f32 0.5, %v11863_v26 }
 0x276   : > { %8035 = vmatprep.mubr.msk.bf16.mxu0 %vm580_vm0, %v15675_v61  ;;  %v5583_v33 = vadd.f32 1.0, %v11994_v30  ;;  %v12074_v57 = vpop.eup %9060  ;;  %v4738_v55 = vmul.f32 %v4444_v17, %v3025_v3  ;;  %v5295_v60 = vmul.f32 0.5, %v11890_v10  ;;  %v5589_v50 = vadd.f32 1.0, %v9049_v54 }
 0x277   : > { %v4161_v27 = vmul.f32 0.035677407, %v3867_v47  ;;  %9066 = vtanh.f32 %v4732_v52  ;;  %v4743_v14 = vmul.f32 %v4449_v59, %v3027_v13  ;;  %6923 = vmatprep.mubr.bf16.mxu1 %v6118_v25  ;;  %v3035_v35 = vadd.f32 %v12000_v46, %v11493_v24  ;;  %v15676_v25 = vld [vmem:[#allocation17_spill] sm:$0xff] }
 0x278   : > { %v12077_v5 = vpop.f32.mrb[160].mxu0  ;;  %v3037_v23 = vadd.f32 %v12008_v40, %v11487_v19  ;;  %v12085_v30 = vmul.f32 0.5, %v3027_v13  ;;  %v5877_v3 = vmul.f32 %v5583_v33, %v5289_v48  ;;  %v5883_v47 = vmul.f32 %v5589_v50, %v5295_v60 }
 0x279   : > { %v12083_v26 = vpop.f32.mrb[161].mxu0  ;;  %v12089_v10 = vadd.f32 %v12010_v0, %v11493_v24  ;;  %9068 = vtanh.f32 %v4737_v53  ;;  %v4744_v59 = vmul.f32 %v4450_v56, %v12035_v58  ;;  %v3868_v29 = vmul.f32 %v3035_v35, %v3035_v35 }
 0x27a   : > { %v12091_v54 = vpop.f32.mrb[162].mxu0  ;;  %v3873_v46 = vmul.f32 %v3037_v23, %v3037_v23  ;;  %9070 = vtanh.f32 %v4738_v55  ;;  %v4455_v40 = vadd.f32 0.7978846, %v4161_v27  ;;  %v6117_v11 = vpack.c.bf16 %v5883_v47, %v5877_v3  ;;  %v15677_v27 = vld [vmem:[#allocation18_spill] sm:$0xff] }
 0x27b   : > { %v12094_v17 = vpop.f32.mrb[163].mxu0  ;;  %v3874_v13 = vmul.f32 %v12089_v10, %v12089_v10  ;;  %9072 = vtanh.f32 %v4743_v14  ;;  %v4162_v52 = vmul.f32 0.035677407, %v3868_v29  ;;  %v5302_v0 = vmul.f32 0.5, %v11926_v7 }
 0x27c   : > { %v4167_v37 = vmul.f32 0.035677407, %v3873_v46  ;;  %v9063_v53 = vpop.eup %9062  ;;  %6924 = vmatmul.mubr.bf16.gmra.mrb[136].mxu1 %v6117_v11  ;;  %v5308_v48 = vmul.f32 0.5, %v11938_v44  ;;  %v5596_v33 = vadd.f32 1.0, %v12051_v9  ;;  %v5602_v55 = vadd.f32 1.0, %v9059_v28 }
 0x27d   : > { %3352 = vmatmul.mubr.bf16.gmra.mrb[12].mxu0 %v15676_v25  ;;  %v4168_v56 = vmul.f32 0.035677407, %v3874_v13  ;;  %9074 = vtanh.f32 %v4744_v59  ;;  %v12105_v60 = vmul.f32 0.5, %v12035_v58  ;;  %v12107_v50 = vmul.f32 0.5, %v3033_v15 }
 0x27e   : > { %8036 = vmatprep.mubr.msk.bf16.mxu0 %vm580_vm0, %v15677_v27  ;;  %v12111_v7 = vadd.f32 %v12044_v1, %v11487_v19  ;;  %v12113_v14 = vpop.eup %9064  ;;  %v4749_v3 = vmul.f32 %v4455_v40, %v3033_v15  ;;  %v4456_v44 = vadd.f32 0.7978846, %v4162_v52  ;;  %v5890_v47 = vmul.f32 %v5596_v33, %v5302_v0 }
 0x27f   : > { %v5896_v9 = vmul.f32 %v5602_v55, %v5308_v48  ;;  %v4461_v29 = vadd.f32 0.7978846, %v4167_v37  ;;  %v4462_v46 = vadd.f32 0.7978846, %v4168_v56  ;;  %v5301_v59 = vmul.f32 0.5, %v11914_v6 }
 0x280   : > { %v12115_v28 = vpop.f32.mrb[164].mxu0  ;;  %v3879_v58 = vmul.f32 %v12111_v7, %v12111_v7  ;;  %v5307_v1 = vmul.f32 0.5, %v11932_v22  ;;  %v5595_v27 = vadd.f32 1.0, %v12037_v45  ;;  %v5601_v15 = vadd.f32 1.0, %v12061_v34  ;;  %v8722_v22 = vld [vmem:[%s15371_s4 + $0x1e0] ss:$8 sps:$4 sm:$0xff]  }
 0x281   : > { %v12120_v11 = vpop.f32.mrb[165].mxu0  ;;  %v6124_v13 = vpack.c.bf16 %v5896_v9, %v5890_v47  ;;  %v9067_v52 = vpop.eup %9066  ;;  %v12127_v0 = vmul.f32 0.5, %v3035_v35  ;;  %v12131_v56 = vadd.f32 %v12049_v4, %v11493_v24  ;;  %v12135_v6 = vadd.f32 %v12056_v16, %v11487_v19  ;;  %v8724_v4 = vld [vmem:[%s15371_s4 + $0x1e4] ss:$8 sps:$4 sm:$0xff]  }
 0x282   : > { %v12125_v40 = vpop.f32.mrb[166].mxu0  ;;  %v4173_v37 = vmul.f32 0.035677407, %v3879_v58  ;;  %v4750_v34 = vmul.f32 %v4456_v44, %v3035_v35  ;;  %v5889_v45 = vmul.f32 %v5595_v27, %v5301_v59  ;;  %v5895_v33 = vmul.f32 %v5601_v15, %v5307_v1  ;;  %v15678_v27 = vld [vmem:[#allocation19_spill] sm:$0xff]  ;;  %7110 = vmatprep.subr.bf16.mxu1 %v8724_v4 }
 0x283   : > { %v12137_v48 = vpop.f32.mrb[167].mxu0  ;;  %6933 = vmatprep.mubr.bf16.mxu1 %v6124_v13  ;;  %v12144_v55 = vadd.f32 %v12059_v42, %v11493_v24  ;;  %v12149_v16 = vpop.eup %9068  ;;  %v4755_v47 = vmul.f32 %v4461_v29, %v3037_v23  ;;  %v12151_v9 = vmul.f32 0.5, %v3037_v23  ;;  %v12154_v58 = vmul.f32 0.5, %v12089_v10  ;;  %v15679_v29 = vld [vmem:[#allocation20_spill] sm:$0xff]  ;;  %7111 = vmatpush1.bf16.msra.mxu1 %v8722_v22 }
 0x284   : > { %v3880_v35 = vmul.f32 %v12131_v56, %v12131_v56  ;;  %v9071_v44 = vpop.eup %9070  ;;  %9076 = vtanh.f32 %v4749_v3  ;;  %v6123_v42 = vpack.c.bf16 %v5895_v33, %v5889_v45  ;;  %v3885_v59 = vmul.f32 %v12135_v6, %v12135_v6 }
 0x285   : > { %3362 = vmatmul.mubr.bf16.gmra.mrb[16].mxu0 %v15678_v27  ;;  %v3886_v13 = vmul.f32 %v12144_v55, %v12144_v55  ;;  %v12165_v23 = vpop.eup %9072  ;;  %v4756_v1 = vmul.f32 %v4462_v46, %v12089_v10  ;;  %v4467_v15 = vadd.f32 0.7978846, %v4173_v37  ;;  %v5608_v27 = vadd.f32 1.0, %v9063_v53 }
 0x286   : > { %8037 = vmatprep.mubr.msk.bf16.mxu0 %vm580_vm0, %v15679_v29  ;;  %v4174_v25 = vmul.f32 0.035677407, %v3880_v35  ;;  %9078 = vtanh.f32 %v4750_v34  ;;  %6934 = vmatmul.mubr.bf16.gmra.mrb[140].mxu1 %v6123_v42  ;;  %v4179_v3 = vmul.f32 0.035677407, %v3885_v59  ;;  %v5614_v45 = vadd.f32 1.0, %v9067_v52 }
 0x287   : > { %v12170_v33 = vadd.f32 %v12077_v5, %v11487_v19  ;;  %v9075_v29 = vpop.eup %9074  ;;  %9080 = vtanh.f32 %v4755_v47  ;;  %v12175_v4 = vmul.f32 0.5, %v12111_v7  ;;  %v4180_v10 = vmul.f32 0.035677407, %v3886_v13 }
 0x288   : > { %v12172_v61 = vpop.f32.mrb[168].mxu0  ;;  %v5607_v46 = vadd.f32 1.0, %v12074_v57  ;;  %v4468_v37 = vadd.f32 0.7978846, %v4174_v25  ;;  %v5902_v22 = vmul.f32 %v5608_v27, %v12003_v36  ;;  %v5908_v52 = vmul.f32 %v5614_v45, %v12042_v43  ;;  %v8725_v57 = vld [vmem:[%s15371_s4 + $0x1f0] ss:$8 sps:$4 sm:$0xff]  }
 0x289   : > { %v12178_v53 = vpop.f32.mrb[169].mxu0  ;;  %v3891_v5 = vmul.f32 %v12170_v33, %v12170_v33  ;;  %9082 = vtanh.f32 %v4756_v1  ;;  %v4761_v47 = vmul.f32 %v4467_v15, %v12111_v7  ;;  %v5613_v35 = vadd.f32 1.0, %v12113_v14  ;;  %v8727_v36 = vld [vmem:[%s15371_s4 + $0x1f4] ss:$8 sps:$4 sm:$0xff]  }
 0x28a   : > { %v12184_v34 = vpop.f32.mrb[170].mxu0  ;;  %v4473_v43 = vadd.f32 0.7978846, %v4179_v3  ;;  %v6130_v25 = vpack.c.bf16 %v5908_v52, %v5902_v22  ;;  %v5901_v59 = vmul.f32 %v5607_v46, %v11985_v49  ;;  %v4474_v13 = vadd.f32 0.7978846, %v4180_v10  ;;  %v15680_v15 = vld [vmem:[#allocation21_spill] sm:$0xff]  ;;  %7112 = vmatprep.subr.bf16.mxu1 %v8727_v36 }
 0x28b   : > { %v12188_v42 = vpop.f32.mrb[171].mxu0  ;;  %v4185_v27 = vmul.f32 0.035677407, %v3891_v5  ;;  %v5907_v7 = vmul.f32 %v5613_v35, %v12025_v8  ;;  %v3055_v14 = vadd.f32 %v12083_v26, %v11493_v24  ;;  %v12202_v1 = vadd.f32 %v12091_v54, %v11487_v19  ;;  %v15681_v26 = vld [vmem:[#allocation22_spill] sm:$0xff]  ;;  %7113 = vmatpush1.bf16.msra.mxu1 %v8725_v57 }
 0x28c   : > { %v12206_v45 = vmul.f32 0.5, %v12131_v56  ;;  %v12209_v3 = vmul.f32 0.5, %v12135_v6  ;;  %6943 = vmatprep.mubr.bf16.mxu1 %v6130_v25  ;;  %v12213_v49 = vadd.f32 %v12094_v17, %v11493_v24  ;;  %v5620_v8 = vadd.f32 1.0, %v9071_v44 }
 0x28d   : > { %3372 = vmatmul.mubr.bf16.gmra.mrb[20].mxu0 %v15680_v15  ;;  %9084 = vtanh.f32 %v4761_v47  ;;  %v12218_v54 = vmul.f32 0.5, %v12144_v55  ;;  %v6129_v10 = vpack.c.bf16 %v5907_v7, %v5901_v59  ;;  %v3892_v46 = vmul.f32 %v3055_v14, %v3055_v14 }
 0x28e   : > { %8038 = vmatprep.mubr.msk.bf16.mxu0 %vm580_vm0, %v15681_v26  ;;  %v12220_v22 = vpop.eup %9076  ;;  %v4762_v52 = vmul.f32 %v4468_v37, %v12131_v56  ;;  %v4479_v5 = vadd.f32 0.7978846, %v4185_v27  ;;  %v3897_v17 = vmul.f32 %v12202_v1, %v12202_v1  ;;  %v3898_v44 = vmul.f32 %v12213_v49, %v12213_v49 }
 0x28f   : > { %v4767_v47 = vmul.f32 %v4473_v43, %v12135_v6  ;;  %v4768_v36 = vmul.f32 %v4474_v13, %v12144_v55  ;;  %6944 = vmatmul.mubr.bf16.gmra.mrb[144].mxu1 %v6129_v10  ;;  %v4186_v25 = vmul.f32 0.035677407, %v3892_v46  ;;  %v5626_v57 = vadd.f32 1.0, %v9075_v29 }
 0x290   : > { %v12227_v35 = vpop.f32.mrb[172].mxu0  ;;  %v9079_v7 = vpop.eup %9078  ;;  %v4191_v56 = vmul.f32 0.035677407, %v3897_v17  ;;  %v4192_v37 = vmul.f32 0.035677407, %v3898_v44  ;;  %v5914_v27 = vmul.f32 %v5620_v8, %v12068_v12  ;;  %v12236_v26 = vadd.f32 %v12115_v28, %v11487_v19 }
 0x291   : > { %v12231_v59 = vpop.f32.mrb[173].mxu0  ;;  %v9081_v18 = vpop.eup %9080  ;;  %v4480_v6 = vadd.f32 0.7978846, %v4186_v25  ;;  %v5920_v55 = vmul.f32 %v5626_v57, %v12105_v60  ;;  %v5619_v43 = vadd.f32 1.0, %v12149_v16  ;;  %v5625_v29 = vadd.f32 1.0, %v12165_v23  ;;  %v15682_v25 = vld [vmem:[#allocation23_spill] sm:$0xff] }
 0x292   : > { %v12238_v15 = vpop.f32.mrb[174].mxu0  ;;  %9086 = vtanh.f32 %v4762_v52  ;;  %v4773_v10 = vmul.f32 %v4479_v5, %v12170_v33  ;;  %v4485_v12 = vadd.f32 0.7978846, %v4191_v56  ;;  %v3903_v28 = vmul.f32 %v12236_v26, %v12236_v26  ;;  %v8730_v16 = vld [vmem:[%s15371_s4 + $0x204] ss:$8 sps:$4 sm:$0xff]  }
 0x293   : > { %v12243_v13 = vpop.f32.mrb[175].mxu0  ;;  %v9083_v8 = vpop.eup %9082  ;;  %v4486_v46 = vadd.f32 0.7978846, %v4192_v37  ;;  %v6136_v17 = vpack.c.bf16 %v5920_v55, %v5914_v27  ;;  %v5913_v44 = vmul.f32 %v5619_v43, %v12047_v2  ;;  %v5919_v60 = vmul.f32 %v5625_v29, %v12085_v30  ;;  %7363 = vmatprep.subr.bf16.mxu1 %v8730_v16 }
 0x294   : > { %v12255_v23 = vmul.f32 0.5, %v12170_v33  ;;  %v4774_v52 = vmul.f32 %v4480_v6, %v3055_v14  ;;  %v4197_v5 = vmul.f32 0.035677407, %v3903_v28  ;;  %v12259_v57 = vadd.f32 %v12120_v11, %v11493_v24 }
 0x295   : > { %3382 = vmatmul.mubr.bf16.gmra.mrb[24].mxu0 %v15682_v25  ;;  %9088 = vtanh.f32 %v4768_v36  ;;  %6953 = vmatprep.mubr.bf16.mxu1 %v6136_v17  ;;  %v6135_v2 = vpack.c.bf16 %v5919_v60, %v5913_v44  ;;  %v12265_v30 = vadd.f32 %v12125_v40, %v11487_v19  ;;  %v12269_v33 = vadd.f32 %v12137_v48, %v11493_v24 }
 0x296   : > { %8039 = vmatprep.mubr.msk.bf16.mxu0 %vm580_vm0, %v11415_v32  ;;  %9090 = vtanh.f32 %v4767_v47  ;;  %v12271_v56 = vmul.f32 0.5, %v3055_v14  ;;  %v4779_v11 = vmul.f32 %v4485_v12, %v12202_v1  ;;  %v3904_v37 = vmul.f32 %v12259_v57, %v12259_v57 }
 0x297   : > { %v12278_v27 = vpop.eup %9084  ;;  %9092 = vtanh.f32 %v4773_v10  ;;  %v12281_v40 = vmul.f32 0.5, %v12202_v1  ;;  %v4780_v48 = vmul.f32 %v4486_v46, %v12213_v49  ;;  %6954 = vmatmul.mubr.bf16.gmra.mrb[148].mxu1 %v6135_v2  ;;  %v3910_v14 = vmul.f32 %v12269_v33, %v12269_v33 }
 0x298   : > { %v12276_v36 = vpop.f32.mrb[176].mxu0  ;;  %9094 = vtanh.f32 %v4774_v52  ;;  %v4491_v6 = vadd.f32 0.7978846, %v4197_v5  ;;  %v3909_v55 = vmul.f32 %v12265_v30, %v12265_v30  ;;  %v5632_v43 = vadd.f32 1.0, %v9079_v7 }
 0x299   : > { %v12286_v47 = vpop.f32.mrb[177].mxu0  ;;  %v4198_v10 = vmul.f32 0.035677407, %v3904_v37  ;;  %v4204_v12 = vmul.f32 0.035677407, %v3910_v14  ;;  %v5638_v1 = vadd.f32 1.0, %v9083_v8  ;;  %v12294_v28 = vadd.f32 %v12172_v61, %v11487_v19 }
 0x29a   : > { %v12290_v29 = vpop.f32.mrb[178].mxu0  ;;  %9096 = vtanh.f32 %v4779_v11  ;;  %v12299_v17 = vmul.f32 0.5, %v12213_v49  ;;  %v12302_v44 = vmul.f32 0.5, %v12236_v26  ;;  %v5631_v7 = vadd.f32 1.0, %v12220_v22 }
 0x29b   : > { %v12296_v46 = vpop.f32.mrb[179].mxu0  ;;  %v12306_v60 = vmul.f32 0.5, %v12259_v57  ;;  %v5926_v8 = vmul.f32 %v5632_v43, %v12127_v0  ;;  %v5932_v16 = vmul.f32 %v5638_v1, %v12154_v58  ;;  %v3915_v61 = vmul.f32 %v12294_v28, %v12294_v28 }
 0x29c   : > { %v9087_v52 = vpop.eup %9086  ;;  %9098 = vtanh.f32 %v4780_v48  ;;  %v4785_v49 = vmul.f32 %v4491_v6, %v12236_v26  ;;  %v4203_v5 = vmul.f32 0.035677407, %v3909_v55  ;;  %v5637_v2 = vadd.f32 1.0, %v9081_v18 }
 0x29d   : > { %3392 = vmatmul.mubr.bf16.gmra.mrb[28].mxu0 %v11411_v41  ;;  %v4492_v22 = vadd.f32 0.7978846, %v4198_v10  ;;  %v4498_v11 = vadd.f32 0.7978846, %v4204_v12  ;;  %v6142_v37 = vpack.c.bf16 %v5932_v16, %v5926_v8  ;;  %v5925_v0 = vmul.f32 %v5631_v7, %v12107_v50 }
 0x29e   : > { %8040 = vmatprep.mubr.msk.bf16.mxu0 %vm580_vm0, %v11430_v21  ;;  %v4209_v58 = vmul.f32 0.035677407, %v3915_v61  ;;  %v5931_v14 = vmul.f32 %v5637_v2, %v12151_v9  ;;  %v3075_v43 = vadd.f32 %v12178_v53, %v11493_v24  ;;  %v12322_v48 = vadd.f32 %v12184_v34, %v11487_v19 }
 0x29f   : > { %v9089_v18 = vpop.eup %9088  ;;  %v12327_v6 = vmul.f32 0.5, %v12265_v30  ;;  %v12330_v55 = vmul.f32 0.5, %v12269_v33  ;;  %6963 = vmatprep.mubr.bf16.mxu1 %v6142_v37  ;;  %v12334_v50 = vadd.f32 %v12188_v42, %v11493_v24  ;;  %v5644_v9 = vadd.f32 1.0, %v9087_v52 }
 0x2a0   : > { %v12324_v26 = vpop.f32.mrb[180].mxu0  ;;  %v9091_v10 = vpop.eup %9090  ;;  %9100 = vtanh.f32 %v4785_v49  ;;  %v4497_v34 = vadd.f32 0.7978846, %v4203_v5  ;;  %v6141_v12 = vpack.c.bf16 %v5931_v14, %v5925_v0  ;;  %v3916_v1 = vmul.f32 %v3075_v43, %v3075_v43 }
 0x2a1   : > { %v12336_v53 = vpop.f32.mrb[181].mxu0  ;;  %v12340_v8 = vpop.eup %9092  ;;  %v4786_v16 = vmul.f32 %v4492_v22, %v12259_v57  ;;  %v12344_v61 = vmul.f32 0.5, %v12294_v28  ;;  %v3921_v42 = vmul.f32 %v12322_v48, %v12322_v48  ;;  %v3922_v52 = vmul.f32 %v12334_v50, %v12334_v50 }
 0x2a2   : > { %v12338_v7 = vpop.f32.mrb[182].mxu0  ;;  %v9095_v49 = vpop.eup %9094  ;;  %v4792_v5 = vmul.f32 %v4498_v11, %v12269_v33  ;;  %v4503_v37 = vadd.f32 0.7978846, %v4209_v58  ;;  %6964 = vmatmul.mubr.bf16.gmra.mrb[152].mxu1 %v6141_v12  ;;  %v4210_v0 = vmul.f32 0.035677407, %v3916_v1  ;;  %v5650_v14 = vadd.f32 1.0, %v9089_v18 }
 0x2a3   : > { %v12350_v2 = vpop.f32.mrb[183].mxu0  ;;  %v4215_v21 = vmul.f32 0.035677407, %v3921_v42  ;;  %v4216_v57 = vmul.f32 0.035677407, %v3922_v52  ;;  %v5938_v22 = vmul.f32 %v5644_v9, %v12206_v45  ;;  %v12356_v41 = vadd.f32 %v12227_v35, %v11487_v19 }
 0x2a4   : > { %v9097_v32 = vpop.eup %9096  ;;  %v4504_v25 = vadd.f32 0.7978846, %v4210_v0  ;;  %v5944_v51 = vmul.f32 %v5650_v14, %v12218_v54  ;;  %v5643_v33 = vadd.f32 1.0, %v12278_v27  ;;  %v5649_v11 = vadd.f32 1.0, %v9091_v10 }
 0x2a5   : > { %3402 = vmatmul.mubr.bf16.gmra.mrb[32].mxu0 %v11426_v38  ;;  %9102 = vtanh.f32 %v4786_v16  ;;  %v4791_v58 = vmul.f32 %v4497_v34, %v12265_v30  ;;  %v4509_v45 = vadd.f32 0.7978846, %v4215_v21  ;;  %v3927_v35 = vmul.f32 %v12356_v41, %v12356_v41 }
 0x2a6   : > { %8041 = vmatprep.mubr.msk.bf16.mxu0 %vm580_vm0, %v11442_v31  ;;  %v9099_v18 = vpop.eup %9098  ;;  %v4797_v9 = vmul.f32 %v4503_v37, %v12294_v28  ;;  %v6148_v12 = vpack.c.bf16 %v5944_v51, %v5938_v22  ;;  %v5937_v1 = vmul.f32 %v5643_v33, %v12175_v4  ;;  %v5943_v54 = vmul.f32 %v5649_v11, %v12209_v3  ;;  %v15683_v11 = vld [vmem:[#allocation31_spill] sm:$0xff] }
 0x2a7   : > { %9104 = vtanh.f32 %v4792_v5  ;;  %v4798_v10 = vmul.f32 %v4504_v25, %v3075_v43  ;;  %v4510_v42 = vadd.f32 0.7978846, %v4216_v57  ;;  %v3085_v30 = vadd.f32 %v12231_v59, %v11493_v24 }
 0x2a8   : > { %v12369_v27 = vpop.f32.mrb[184].mxu0  ;;  %6973 = vmatprep.mubr.bf16.mxu1 %v6148_v12  ;;  %v4221_v34 = vmul.f32 0.035677407, %v3927_v35  ;;  %v6147_v16 = vpack.c.bf16 %v5943_v54, %v5937_v1  ;;  %v12377_v51 = vadd.f32 %v12238_v15, %v11487_v19  ;;  %v12381_v4 = vadd.f32 %v12243_v13, %v11493_v24 }
 0x2a9   : > { %v12373_v21 = vpop.f32.mrb[185].mxu0  ;;  %9106 = vtanh.f32 %v4791_v58  ;;  %v12385_v25 = vmul.f32 0.5, %v3075_v43  ;;  %v4803_v59 = vmul.f32 %v4509_v45, %v12322_v48  ;;  %v3928_v28 = vmul.f32 %v3085_v30, %v3085_v30 }
 0x2aa   : > { %v12383_v3 = vpop.f32.mrb[186].mxu0  ;;  %v12390_v5 = vpop.eup %9100  ;;  %9108 = vtanh.f32 %v4797_v9  ;;  %v12393_v15 = vmul.f32 0.5, %v12322_v48  ;;  %6974 = vmatmul.mubr.bf16.gmra.mrb[156].mxu1 %v6147_v16  ;;  %v3933_v13 = vmul.f32 %v12377_v51, %v12377_v51  ;;  %v3934_v37 = vmul.f32 %v12381_v4, %v12381_v4 }
 0x2ab   : > { %v12388_v52 = vpop.f32.mrb[187].mxu0  ;;  %9110 = vtanh.f32 %v4798_v10  ;;  %v4804_v43 = vmul.f32 %v4510_v42, %v12334_v50  ;;  %v4222_v0 = vmul.f32 0.035677407, %v3928_v28  ;;  %v5656_v14 = vadd.f32 1.0, %v9095_v49 }
 0x2ac   : > { %v4515_v57 = vadd.f32 0.7978846, %v4221_v34  ;;  %v4227_v22 = vmul.f32 0.035677407, %v3933_v13  ;;  %v5662_v33 = vadd.f32 1.0, %v9099_v18  ;;  %v12403_v48 = vadd.f32 %v12276_v36, %v11487_v19 }
 0x2ad   : > { %3412 = vmatmul.mubr.bf16.gmra.mrb[36].mxu0 %v11439_v63  ;;  %9112 = vtanh.f32 %v4803_v59  ;;  %v12408_v58 = vmul.f32 0.5, %v12334_v50  ;;  %v4228_v45 = vmul.f32 0.035677407, %v3934_v37  ;;  %v5655_v35 = vadd.f32 1.0, %v12340_v8 }
 0x2ae   : > { %8042 = vmatprep.mubr.msk.bf16.mxu0 %vm580_vm0, %v15683_v11  ;;  %v4516_v49 = vadd.f32 0.7978846, %v4222_v0  ;;  %v5950_v9 = vmul.f32 %v5656_v14, %v12271_v56  ;;  %v5956_v12 = vmul.f32 %v5662_v33, %v12299_v17  ;;  %v3939_v18 = vmul.f32 %v12403_v48, %v12403_v48  ;;  %v15684_v33 = vld [vmem:[#allocation30_spill] sm:$0xff] }
 0x2af   : > { %v9103_v1 = vpop.eup %9102  ;;  %9114 = vtanh.f32 %v4804_v43  ;;  %v12418_v54 = vmul.f32 0.5, %v12356_v41  ;;  %v12420_v50 = vmul.f32 0.5, %v3085_v30  ;;  %v5661_v10 = vadd.f32 1.0, %v9097_v32 }
 0x2b0   : > { %v12415_v36 = vpop.f32.mrb[188].mxu0  ;;  %v4809_v8 = vmul.f32 %v4515_v57, %v12356_v41  ;;  %v4521_v56 = vadd.f32 0.7978846, %v4227_v22  ;;  %v6154_v34 = vpack.c.bf16 %v5956_v12, %v5950_v9  ;;  %v5949_v17 = vmul.f32 %v5655_v35, %v12255_v23 }
 0x2b1   : > { %v12422_v42 = vpop.f32.mrb[189].mxu0  ;;  %v9105_v59 = vpop.eup %9104  ;;  %v4233_v28 = vmul.f32 0.035677407, %v3939_v18  ;;  %v5955_v13 = vmul.f32 %v5661_v10, %v12281_v40  ;;  %v3095_v37 = vadd.f32 %v12286_v47, %v11493_v24  ;;  %v12433_v32 = vadd.f32 %v12290_v29, %v11487_v19 }
 0x2b2   : > { %v12426_v16 = vpop.f32.mrb[190].mxu0  ;;  %v4810_v41 = vmul.f32 %v4516_v49, %v3085_v30  ;;  %v12438_v0 = vmul.f32 0.5, %v12377_v51  ;;  %v4522_v23 = vadd.f32 0.7978846, %v4228_v45  ;;  %6983 = vmatprep.mubr.bf16.mxu1 %v6154_v34  ;;  %v12442_v14 = vadd.f32 %v12296_v46, %v11493_v24  ;;  %v15685_v49 = vld [vmem:[#allocation63_spill] sm:$0xff] }
 0x2b3   : > { %v12435_v43 = vpop.f32.mrb[191].mxu0  ;;  %v9107_v40 = vpop.eup %9106  ;;  %v12445_v57 = vmul.f32 0.5, %v12381_v4  ;;  %v6153_v47 = vpack.c.bf16 %v5955_v13, %v5949_v17  ;;  %v3940_v22 = vmul.f32 %v3095_v37, %v3095_v37  ;;  %v5668_v29 = vadd.f32 1.0, %v9103_v1 }
 0x2b4   : > { %v12448_v35 = vpop.eup %9108  ;;  %9116 = vtanh.f32 %v4809_v8  ;;  %v4815_v30 = vmul.f32 %v4521_v56, %v12377_v51  ;;  %v3945_v45 = vmul.f32 %v12433_v32, %v12433_v32  ;;  %v3946_v46 = vmul.f32 %v12442_v14, %v12442_v14 }
 0x2b5   : > { %3422 = vmatmul.mubr.bf16.gmra.mrb[40].mxu0 %v15684_v33  ;;  %v9111_v9 = vpop.eup %9110  ;;  %v4527_v12 = vadd.f32 0.7978846, %v4233_v28  ;;  %v12458_v18 = vmul.f32 0.5, %v12403_v48  ;;  %6984 = vmatmul.mubr.bf16.gmra.mrb[160].mxu1 %v6153_v47  ;;  %v4234_v1 = vmul.f32 0.035677407, %v3940_v22  ;;  %v5674_v10 = vadd.f32 1.0, %v9105_v59 }
 0x2b6   : > { %8043 = vmatprep.mubr.msk.bf16.mxu0 %vm580_vm0, %v15685_v49  ;;  %9118 = vtanh.f32 %v4810_v41  ;;  %v4816_v51 = vmul.f32 %v4522_v23, %v12381_v4  ;;  %v4239_v8 = vmul.f32 0.035677407, %v3945_v45  ;;  %v12463_v56 = vadd.f32 %v12324_v26, %v11487_v19 }
 0x2b7   : > { %v9113_v17 = vpop.eup %9112  ;;  %v5962_v13 = vmul.f32 %v5668_v29, %v12306_v60  ;;  %v5968_v28 = vmul.f32 %v5674_v10, %v12330_v55  ;;  %v5667_v49 = vadd.f32 1.0, %v12390_v5  ;;  %v5673_v47 = vadd.f32 1.0, %v9107_v40 }
 0x2b8   : > { %v12465_v34 = vpop.f32.mrb[192].mxu0  ;;  %9120 = vtanh.f32 %v4815_v30  ;;  %v4528_v59 = vadd.f32 0.7978846, %v4234_v1  ;;  %v4240_v4 = vmul.f32 0.035677407, %v3946_v46  ;;  %v3951_v41 = vmul.f32 %v12463_v56, %v12463_v56 }
 0x2b9   : > { %v12470_v22 = vpop.f32.mrb[193].mxu0  ;;  %v9115_v23 = vpop.eup %9114  ;;  %v4821_v45 = vmul.f32 %v4527_v12, %v12403_v48  ;;  %v6160_v33 = vpack.c.bf16 %v5968_v28, %v5962_v13  ;;  %v5961_v60 = vmul.f32 %v5667_v49, %v12302_v44  ;;  %v5967_v55 = vmul.f32 %v5673_v47, %v12327_v6  ;;  %v15686_v6 = vld [vmem:[#allocation62_spill] sm:$0xff] }
 0x2ba   : > { %v12474_v26 = vpop.f32.mrb[194].mxu0  ;;  %9122 = vtanh.f32 %v4816_v51  ;;  %v4533_v40 = vadd.f32 0.7978846, %v4239_v8  ;;  %v4245_v29 = vmul.f32 0.035677407, %v3951_v41  ;;  %v3105_v30 = vadd.f32 %v12336_v53, %v11493_v24  ;;  %v15687_v53 = vld [vmem:[#allocation65_spill] sm:$0xff] }
 0x2bb   : > { %v12479_v5 = vpop.f32.mrb[195].mxu0  ;;  %v12483_v46 = vmul.f32 0.5, %v3095_v37  ;;  %6993 = vmatprep.mubr.bf16.mxu1 %v6160_v33  ;;  %v6159_v1 = vpack.c.bf16 %v5967_v55, %v5961_v60  ;;  %v3107_v48 = vadd.f32 %v12338_v7, %v11487_v19  ;;  %v12489_v44 = vadd.f32 %v12350_v2, %v11493_v24 }
 0x2bc   : > { %v4822_v12 = vmul.f32 %v4528_v59, %v3095_v37  ;;  %v12493_v10 = vmul.f32 0.5, %v12433_v32  ;;  %v4534_v51 = vadd.f32 0.7978846, %v4240_v4  ;;  %v3952_v8 = vmul.f32 %v3105_v30, %v3105_v30 }
 0x2bd   : > { %3463 = vmatmul.mubr.bf16.vlgmr.msra.gmra.mrb[44].mxu0 %v15686_v6  ;;  %9124 = vtanh.f32 %v4821_v45  ;;  %v12498_v33 = vmul.f32 0.5, %v12442_v14  ;;  %6994 = vmatmul.mubr.bf16.gmra.mrb[164].mxu1 %v6159_v1  ;;  %v3957_v7 = vmul.f32 %v3107_v48, %v3107_v48  ;;  %v3958_v2 = vmul.f32 %v12489_v44, %v12489_v44 }
 0x2be   : > { %8044 = vmatprep.mubr.msk.bf16.mxu0 %vm580_vm0, %v15687_v53  ;;  %v12502_v13 = vpop.eup %9116  ;;  %v4827_v37 = vmul.f32 %v4533_v40, %v12433_v32  ;;  %v4539_v28 = vadd.f32 0.7978846, %v4245_v29  ;;  %v4246_v49 = vmul.f32 0.035677407, %v3952_v8  ;;  %v5680_v47 = vadd.f32 1.0, %v9111_v9 }
 0x2bf   : > { %v4251_v4 = vmul.f32 0.035677407, %v3957_v7  ;;  %v4252_v41 = vmul.f32 0.035677407, %v3958_v2  ;;  %v5686_v45 = vadd.f32 1.0, %v9115_v23  ;;  %v3113_v60 = vadd.f32 %v12369_v27, %v11487_v19 }
 0x2c0   : > { %v12505_v59 = vpop.f32.mrb[196].mxu0  ;;  %v9119_v1 = vpop.eup %9118  ;;  %9126 = vtanh.f32 %v4822_v12  ;;  %v4828_v6 = vmul.f32 %v4534_v51, %v12442_v14  ;;  %v12513_v53 = vmul.f32 0.5, %v12463_v56  ;;  %v5679_v32 = vadd.f32 1.0, %v12448_v35  ;;  %v15688_v35 = vld [vmem:[#allocation64_spill] sm:$0xff] }
 0x2c1   : > { %v12509_v55 = vpop.f32.mrb[197].mxu0  ;;  %v4540_v40 = vadd.f32 0.7978846, %v4246_v49  ;;  %v5974_v29 = vmul.f32 %v5680_v47, %v12385_v25  ;;  %v5980_v23 = vmul.f32 %v5686_v45, %v12408_v58  ;;  %v3963_v8 = vmul.f32 %v3113_v60, %v3113_v60 }
 0x2c2   : > { %v3146_v9 = vpop.f32.mrb[198].mxu0  ;;  %v9121_v27 = vpop.eup %9120  ;;  %9128 = vtanh.f32 %v4827_v37  ;;  %v4833_v2 = vmul.f32 %v4539_v28, %v12463_v56  ;;  %v12519_v12 = vmul.f32 0.5, %v3105_v30  ;;  %v5685_v14 = vadd.f32 1.0, %v9113_v17  ;;  %v15689_v37 = vld [vmem:[#allocation67_spill] sm:$0xff] }
 0x2c3   : > { %v3147_v7 = vpop.f32.mrb[199].mxu0  ;;  %v4545_v51 = vadd.f32 0.7978846, %v4251_v4  ;;  %v4546_v11 = vadd.f32 0.7978846, %v4252_v41  ;;  %v6166_v63 = vpack.c.bf16 %v5980_v23, %v5974_v29  ;;  %v5973_v25 = vmul.f32 %v5679_v32, %v12344_v61 }
 0x2c4   : > { %v4257_v31 = vmul.f32 0.035677407, %v3963_v8  ;;  %v9123_v49 = vpop.eup %9122  ;;  %v5979_v58 = vmul.f32 %v5685_v14, %v12393_v15  ;;  %v3115_v47 = vadd.f32 %v12373_v21, %v11493_v24  ;;  %v12528_v56 = vadd.f32 %v12383_v3, %v11487_v19 }
 0x2c5   : > { %3473 = vmatmul.mubr.bf16.gmra.mrb[48].mxu0 %v15688_v35  ;;  %9130 = vtanh.f32 %v4828_v6  ;;  %v4834_v17 = vmul.f32 %v4540_v40, %v3105_v30  ;;  %v12532_v28 = vmul.f32 0.5, %v3107_v48  ;;  %7003 = vmatprep.mubr.bf16.mxu1 %v6166_v63  ;;  %v3119_v61 = vadd.f32 %v12388_v52, %v11493_v24 }
 0x2c6   : > { %8045 = vmatprep.mubr.msk.bf16.mxu0 %vm580_vm0, %v15689_v37  ;;  %v12537_v15 = vmul.f32 0.5, %v12489_v44  ;;  %v6165_v4 = vpack.c.bf16 %v5979_v58, %v5973_v25  ;;  %v3964_v21 = vmul.f32 %v3115_v47, %v3115_v47  ;;  %v5692_v41 = vadd.f32 1.0, %v9119_v1  ;;  %v15690_v25 = vld [vmem:[#allocation66_spill] sm:$0xff] }
 0x2c7   : > { %v12541_v3 = vpop.eup %9124  ;;  %v4839_v32 = vmul.f32 %v4545_v51, %v3107_v48  ;;  %v4551_v9 = vadd.f32 0.7978846, %v4257_v31  ;;  %v3969_v30 = vmul.f32 %v12528_v56, %v12528_v56  ;;  %v3970_v6 = vmul.f32 %v3119_v61, %v3119_v61 }
 0x2c8   : > { %v12539_v45 = vpop.f32.mrb[200].mxu0  ;;  %9132 = vtanh.f32 %v4833_v2  ;;  %v4840_v52 = vmul.f32 %v4546_v11, %v12489_v44  ;;  %7004 = vmatmul.mubr.bf16.gmra.mrb[168].mxu1 %v6165_v4  ;;  %v4258_v40 = vmul.f32 0.035677407, %v3964_v21  ;;  %v5698_v29 = vadd.f32 1.0, %v9123_v49 }
 0x2c9   : > { %v12545_v63 = vpop.f32.mrb[201].mxu0  ;;  %9134 = vtanh.f32 %v4834_v17  ;;  %v4263_v1 = vmul.f32 0.035677407, %v3969_v30  ;;  %v4264_v8 = vmul.f32 0.035677407, %v3970_v6  ;;  %v12552_v31 = vadd.f32 %v12415_v36, %v11487_v19 }
 0x2ca   : > { %v12548_v23 = vpop.f32.mrb[202].mxu0  ;;  %v9127_v7 = vpop.eup %9126  ;;  %v5986_v14 = vmul.f32 %v5692_v41, %v12420_v50  ;;  %v5992_v2 = vmul.f32 %v5698_v29, %v12445_v57  ;;  %v5691_v11 = vadd.f32 1.0, %v12502_v13  ;;  %v5697_v44 = vadd.f32 1.0, %v9121_v27  ;;  %v15691_v50 = vld [vmem:[#allocation69_spill] sm:$0xff] }
 0x2cb   : > { %v12554_v48 = vpop.f32.mrb[203].mxu0  ;;  %9136 = vtanh.f32 %v4839_v32  ;;  %v4845_v51 = vmul.f32 %v4551_v9, %v3113_v60  ;;  %v12559_v35 = vmul.f32 0.5, %v3113_v60  ;;  %v4552_v49 = vadd.f32 0.7978846, %v4258_v40 }
 0x2cc   : > { %v9129_v58 = vpop.eup %9128  ;;  %v4558_v36 = vadd.f32 0.7978846, %v4264_v8  ;;  %v6172_v37 = vpack.c.bf16 %v5992_v2, %v5986_v14  ;;  %v5985_v17 = vmul.f32 %v5691_v11, %v12418_v54  ;;  %v5991_v4 = vmul.f32 %v5697_v44, %v12438_v0 }
 0x2cd   : > { %3483 = vmatmul.mubr.bf16.gmra.mrb[52].mxu0 %v15690_v25  ;;  %9138 = vtanh.f32 %v4840_v52  ;;  %v4557_v57 = vadd.f32 0.7978846, %v4263_v1  ;;  %v3975_v13 = vmul.f32 %v12552_v31, %v12552_v31  ;;  %v3125_v60 = vadd.f32 %v12422_v42, %v11493_v24 }
 0x2ce   : > { %8046 = vmatprep.mubr.msk.bf16.mxu0 %vm580_vm0, %v15691_v50  ;;  %v12570_v27 = vmul.f32 0.5, %v3115_v47  ;;  %7013 = vmatprep.mubr.bf16.mxu1 %v6172_v37  ;;  %v6171_v21 = vpack.c.bf16 %v5991_v4, %v5985_v17  ;;  %v12574_v54 = vadd.f32 %v12426_v16, %v11487_v19  ;;  %v12578_v0 = vadd.f32 %v12435_v43, %v11493_v24  ;;  %v15692_v17 = vld [vmem:[#allocation68_spill] sm:$0xff] }
 0x2cf   : > { %v9131_v32 = vpop.eup %9130  ;;  %v4846_v9 = vmul.f32 %v4552_v49, %v3115_v47  ;;  %v12583_v30 = vmul.f32 0.5, %v12528_v56  ;;  %v12585_v42 = vmul.f32 0.5, %v3119_v61  ;;  %v3976_v6 = vmul.f32 %v3125_v60, %v3125_v60 }
 0x2d0   : > { %v12580_v41 = vpop.f32.mrb[204].mxu0  ;;  %9140 = vtanh.f32 %v4845_v51  ;;  %v4852_v40 = vmul.f32 %v4558_v36, %v3119_v61  ;;  %7014 = vmatmul.mubr.bf16.gmra.mrb[172].mxu1 %v6171_v21  ;;  %v3981_v16 = vmul.f32 %v12574_v54, %v12574_v54  ;;  %v3982_v43 = vmul.f32 %v12578_v0, %v12578_v0 }
 0x2d1   : > { %v12587_v52 = vpop.f32.mrb[205].mxu0  ;;  %v4851_v47 = vmul.f32 %v4557_v57, %v12528_v56  ;;  %v4269_v1 = vmul.f32 0.035677407, %v3975_v13  ;;  %v4270_v8 = vmul.f32 0.035677407, %v3976_v6  ;;  %v5704_v14 = vadd.f32 1.0, %v9127_v7 }
 0x2d2   : > { %v12593_v29 = vpop.f32.mrb[206].mxu0  ;;  %v9133_v11 = vpop.eup %9132  ;;  %v4275_v44 = vmul.f32 0.035677407, %v3981_v16  ;;  %v4276_v51 = vmul.f32 0.035677407, %v3982_v43  ;;  %v5710_v61 = vadd.f32 1.0, %v9131_v32  ;;  %v12600_v49 = vadd.f32 %v12465_v34, %v11487_v19 }
 0x2d3   : > { %v12596_v2 = vpop.f32.mrb[207].mxu0  ;;  %v9135_v25 = vpop.eup %9134  ;;  %9142 = vtanh.f32 %v4846_v9  ;;  %v12603_v36 = vmul.f32 0.5, %v12552_v31  ;;  %v4564_v37 = vadd.f32 0.7978846, %v4270_v8  ;;  %v5703_v56 = vadd.f32 1.0, %v12541_v3  ;;  %v15693_v57 = vld [vmem:[#allocation71_spill] sm:$0xff] }
 0x2d4   : > { %9144 = vtanh.f32 %v4852_v40  ;;  %v4570_v7 = vadd.f32 0.7978846, %v4276_v51  ;;  %v5998_v4 = vmul.f32 %v5704_v14, %v12483_v46  ;;  %v6004_v50 = vmul.f32 %v5710_v61, %v12498_v33 }
 0x2d5   : > { %3493 = vmatmul.mubr.bf16.gmra.mrb[56].mxu0 %v15692_v17  ;;  %v9137_v34 = vpop.eup %9136  ;;  %9146 = vtanh.f32 %v4851_v47  ;;  %v4563_v13 = vadd.f32 0.7978846, %v4269_v1  ;;  %v4858_v21 = vmul.f32 %v4564_v37, %v3125_v60  ;;  %v5709_v32 = vadd.f32 1.0, %v9129_v58 }
 0x2d6   : > { %8047 = vmatprep.mubr.msk.bf16.mxu0 %vm580_vm0, %v15693_v57  ;;  %v4569_v9 = vadd.f32 0.7978846, %v4275_v44  ;;  %v4864_v6 = vmul.f32 %v4570_v7, %v12578_v0  ;;  %v6178_v3 = vpack.c.bf16 %v6004_v50, %v5998_v4  ;;  %v3987_v40 = vmul.f32 %v12600_v49, %v12600_v49  ;;  %v15694_v4 = vld [vmem:[#allocation70_spill] sm:$0xff] }
 0x2d7   : > { %v9139_v46 = vpop.eup %9138  ;;  %v5997_v33 = vmul.f32 %v5703_v56, %v12458_v18  ;;  %v6003_v43 = vmul.f32 %v5709_v32, %v12493_v10  ;;  %v3135_v47 = vadd.f32 %v12470_v22, %v11493_v24  ;;  %v12622_v58 = vadd.f32 %v12474_v26, %v11487_v19  ;;  %v15695_v32 = vld [vmem:[#allocation73_spill] sm:$0xff] }
 0x2d8   : > { %v12614_v16 = vpop.f32.mrb[208].mxu0  ;;  %v12626_v8 = vmul.f32 0.5, %v3125_v60  ;;  %v12629_v14 = vmul.f32 0.5, %v12574_v54  ;;  %7023 = vmatprep.mubr.bf16.mxu1 %v6178_v3  ;;  %v12633_v18 = vadd.f32 %v12479_v5, %v11493_v24  ;;  %v5716_v10 = vadd.f32 1.0, %v9135_v25 }
 0x2d9   : > { %v12624_v1 = vpop.f32.mrb[209].mxu0  ;;  %v4857_v22 = vmul.f32 %v4563_v13, %v12552_v31  ;;  %9148 = vtanh.f32 %v4858_v21  ;;  %v6177_v26 = vpack.c.bf16 %v6003_v43, %v5997_v33  ;;  %v3988_v51 = vmul.f32 %v3135_v47, %v3135_v47 }
 0x2da   : > { %v12635_v44 = vpop.f32.mrb[210].mxu0  ;;  %v9141_v60 = vpop.eup %9140  ;;  %9150 = vtanh.f32 %v4864_v6  ;;  %v4281_v37 = vmul.f32 0.035677407, %v3987_v40  ;;  %v3993_v56 = vmul.f32 %v12622_v58, %v12622_v58  ;;  %v3994_v5 = vmul.f32 %v12633_v18, %v12633_v18 }
 0x2db   : > { %v12638_v61 = vpop.f32.mrb[211].mxu0  ;;  %v4863_v25 = vmul.f32 %v4569_v9, %v12574_v54  ;;  %v12646_v17 = vmul.f32 0.5, %v12578_v0  ;;  %7024 = vmatmul.mubr.bf16.gmra.mrb[176].mxu1 %v6177_v26  ;;  %v4282_v31 = vmul.f32 0.035677407, %v3988_v51  ;;  %v5722_v7 = vadd.f32 1.0, %v9139_v46 }
 0x2dc   : > { %v4287_v50 = vmul.f32 0.035677407, %v3993_v56  ;;  %v4288_v57 = vmul.f32 0.035677407, %v3994_v5  ;;  %v6010_v13 = vmul.f32 %v5716_v10, %v12519_v12  ;;  %v12652_v21 = vadd.f32 %v12505_v59, %v11487_v19 }
 0x2dd   : > { %3503 = vmatmul.mubr.bf16.gmra.mrb[60].mxu0 %v15694_v4  ;;  %v9143_v54 = vpop.eup %9142  ;;  %v4576_v9 = vadd.f32 0.7978846, %v4282_v31  ;;  %v6016_v0 = vmul.f32 %v5722_v7, %v12537_v15  ;;  %v5715_v6 = vadd.f32 1.0, %v9133_v11  ;;  %v5721_v3 = vadd.f32 1.0, %v9137_v34 }
 0x2de   : > { %8048 = vmatprep.mubr.msk.bf16.mxu0 %vm580_vm0, %v15695_v32  ;;  %v9145_v40 = vpop.eup %9144  ;;  %9152 = vtanh.f32 %v4857_v22  ;;  %v4575_v46 = vadd.f32 0.7978846, %v4281_v37  ;;  %v4582_v33 = vadd.f32 0.7978846, %v4288_v57  ;;  %v3999_v12 = vmul.f32 %v12652_v21, %v12652_v21  ;;  %v15696_v32 = vld [vmem:[#allocation33_spill] sm:$0xff] }
 0x2df   : > { %v9147_v19 = vpop.eup %9146  ;;  %v4581_v59 = vadd.f32 0.7978846, %v4287_v50  ;;  %v6184_v10 = vpack.c.bf16 %v6016_v0, %v6010_v13  ;;  %v6009_v26 = vmul.f32 %v5715_v6, %v12513_v53  ;;  %v6015_v51 = vmul.f32 %v5721_v3, %v12532_v28  ;;  %v15698_v3 = vld [vmem:[#allocation75_spill] sm:$0xff] }
 0x2e0   : > { %v12659_v43 = vpop.f32.mrb[212].mxu0  ;;  %9154 = vtanh.f32 %v4863_v25  ;;  %v12666_v15 = vmul.f32 0.5, %v12600_v49  ;;  %v4870_v11 = vmul.f32 %v4576_v9, %v3135_v47  ;;  %v12670_v34 = vadd.f32 %v12509_v55, %v11493_v24  ;;  %v15697_v9 = vld [vmem:[#allocation72_spill] sm:$0xff] }
 0x2e1   : > { %v12663_v56 = vpop.f32.mrb[213].mxu0  ;;  %7033 = vmatprep.mubr.bf16.mxu1 %v6184_v10  ;;  %v4293_v37 = vmul.f32 0.035677407, %v3999_v12  ;;  %v6183_v5 = vpack.c.bf16 %v6015_v51, %v6009_v26  ;;  %v5728_v31 = vadd.f32 1.0, %v9143_v54  ;;  %v5734_v53 = vadd.f32 1.0, %v9145_v40 }
 0x2e2   : > { %v12672_v22 = vpop.f32.mrb[214].mxu0  ;;  %v4869_v28 = vmul.f32 %v4575_v46, %v12600_v49  ;;  %v12677_v25 = vmul.f32 0.5, %v3135_v47  ;;  %v4876_v4 = vmul.f32 %v4582_v33, %v12633_v18  ;;  %v4000_v50 = vmul.f32 %v12670_v34, %v12670_v34 }
 0x2e3   : > { %v12674_v7 = vpop.f32.mrb[215].mxu0  ;;  %v9149_v24 = vpop.eup %9148  ;;  %v4875_v55 = vmul.f32 %v4581_v59, %v12622_v58  ;;  %7034 = vmatmul.mubr.bf16.gmra.mrb[180].mxu1 %v6183_v5  ;;  %v6022_v57 = vmul.f32 %v5728_v31, %v12570_v27  ;;  %v6028_v13 = vmul.f32 %v5734_v53, %v12585_v42  ;;  %v2413_v54 = vsub.s32 2, %v15696_v32  ;;  %v9560_v27 = vld [vmem:[%s15370_s3] sm:$0x3f] }
 0x2e4   : > { %v9151_v49 = vpop.eup %9150  ;;  %9156 = vtanh.f32 %v4870_v11  ;;  %v4294_v47 = vmul.f32 0.035677407, %v4000_v50  ;;  %v5727_v0 = vadd.f32 1.0, %v9141_v60  ;;  %v5733_v6 = vadd.f32 1.0, %v9147_v19 }
 0x2e5   : > { %3513 = vmatmul.mubr.bf16.gmra.mrb[64].mxu0 %v15697_v9  ;;  %v4587_v40 = vadd.f32 0.7978846, %v4293_v37  ;;  %v6190_v46 = vpack.c.bf16 %v6028_v13, %v6022_v57  ;;  %v12692_v33 = vrot.slane %v9560_v27, %v2413_v54  ;;  %v2417_v42 = vsub.s32 3, %v15696_v32 }
 0x2e6   : > { %8049 = vmatprep.mubr.msk.bf16.mxu0 %vm580_vm0, %v15698_v3  ;;  %9158 = vtanh.f32 %v4876_v4  ;;  %v6021_v12 = vmul.f32 %v5727_v0, %v12559_v35  ;;  %v6027_v59 = vmul.f32 %v5733_v6, %v12583_v30  ;;  %v5740_v60 = vadd.f32 1.0, %v9149_v24 }
 0x2e7   : > { %7043 = vmatprep.mubr.bf16.mxu1 %v6190_v46  ;;  %v3184_v10 = vadd.f32 %v12539_v45, %v12692_v33  ;;  %v12701_v26 = vrot.slane %v9560_v27, %v2417_v42  ;;  %v12705_v51 = vadd.f32 %v12548_v23, %v12692_v33  ;;  %v5746_v11 = vadd.f32 1.0, %v9151_v49  ;;  %v15699_v49 = vld [vmem:[#allocation74_spill] sm:$0xff] }
 0x2e8   : > { %v12697_v19 = vpop.f32.mrb[216].mxu0  ;;  %v9153_v5 = vpop.eup %9152  ;;  %v12710_v35 = vmul.f32 0.5, %v12622_v58  ;;  %v4588_v30 = vadd.f32 0.7978846, %v4294_v47  ;;  %v6189_v31 = vpack.c.bf16 %v6027_v59, %v6021_v12  ;;  %v12714_v53 = vadd.f32 %v12580_v41, %v12692_v33 }
 0x2e9   : > { %v12707_v37 = vpop.f32.mrb[217].mxu0  ;;  %9160 = vtanh.f32 %v4869_v28  ;;  %v3713_v4 = vmul.f32 %v3184_v10, %v3184_v10  ;;  %v3186_v23 = vadd.f32 %v12545_v63, %v12701_v26  ;;  %v3719_v50 = vmul.f32 %v12705_v51, %v12705_v51 }
 0x2ea   : > { %v12716_v45 = vpop.f32.mrb[218].mxu0  ;;  %v9155_v58 = vpop.eup %9154  ;;  %v4881_v57 = vmul.f32 %v4587_v40, %v12652_v21  ;;  %v3190_v13 = vadd.f32 %v12554_v48, %v12701_v26  ;;  %v6034_v41 = vmul.f32 %v5740_v60, %v12626_v8  ;;  %v6040_v54 = vmul.f32 %v5746_v11, %v12646_v17  ;;  %v15700_v40 = vld [vmem:[#allocation77_spill] sm:$0xff] }
 0x2eb   : > { %v12722_v24 = vpop.f32.mrb[219].mxu0  ;;  %9162 = vtanh.f32 %v4875_v55  ;;  %v4007_v28 = vmul.f32 0.035677407, %v3713_v4  ;;  %7044 = vmatmul.mubr.bf16.gmra.mrb[184].mxu1 %v6189_v31  ;;  %v3714_v9 = vmul.f32 %v3186_v23, %v3186_v23  ;;  %v4013_v63 = vmul.f32 0.035677407, %v3719_v50 }
 0x2ec   : > { %v4882_v47 = vmul.f32 %v4588_v30, %v12670_v34  ;;  %v3720_v0 = vmul.f32 %v3190_v13, %v3190_v13  ;;  %v6196_v6 = vpack.c.bf16 %v6040_v54, %v6034_v41  ;;  %v3725_v3 = vmul.f32 %v12714_v53, %v12714_v53 }
 0x2ed   : > { %3523 = vmatmul.mubr.bf16.gmra.mrb[68].mxu0 %v15699_v49  ;;  %v4301_v48 = vadd.f32 0.7978846, %v4007_v28  ;;  %v4008_v8 = vmul.f32 0.035677407, %v3714_v9  ;;  %v4307_v17 = vadd.f32 0.7978846, %v4013_v63  ;;  %v12737_v55 = vadd.f32 %v12587_v52, %v12701_v26 }
 0x2ee   : > { %8050 = vmatprep.mubr.msk.bf16.mxu0 %vm580_vm0, %v15700_v40  ;;  %v9157_v46 = vpop.eup %9156  ;;  %9164 = vtanh.f32 %v4881_v57  ;;  %v4014_v27 = vmul.f32 0.035677407, %v3720_v0  ;;  %7053 = vmatprep.mubr.bf16.mxu1 %v6196_v6  ;;  %v4019_v42 = vmul.f32 0.035677407, %v3725_v3  ;;  %v5739_v12 = vadd.f32 1.0, %v9153_v5 }
 0x2ef   : > { %v4595_v59 = vmul.f32 %v4301_v48, %v3184_v10  ;;  %v4302_v60 = vadd.f32 0.7978846, %v4008_v8  ;;  %v4601_v11 = vmul.f32 %v4307_v17, %v12705_v51  ;;  %v5745_v30 = vadd.f32 1.0, %v9155_v58  ;;  %v15702_v48 = vld [vmem:[#allocation78_spill] sm:$0xff] }
 0x2f0   : > { %v12740_v31 = vpop.f32.mrb[220].mxu0  ;;  %v9159_v4 = vpop.eup %9158  ;;  %v5464_v50 = vmul.f32 0.5, %v12633_v18  ;;  %v12744_v41 = vmul.f32 0.5, %v12652_v21  ;;  %9166 = vtanh.f32 %v4882_v47  ;;  %v3726_v52 = vmul.f32 %v12737_v55, %v12737_v55 }
 0x2f1   : > { %v12748_v57 = vpop.f32.mrb[221].mxu0  ;;  %9168 = vtanh.f32 %v4595_v59  ;;  %v4308_v5 = vadd.f32 0.7978846, %v4014_v27  ;;  %v6033_v54 = vmul.f32 %v5739_v12, %v12603_v36  ;;  %v6039_v58 = vmul.f32 %v5745_v30, %v12629_v14  ;;  %v15701_v14 = vld [vmem:[#allocation76_spill] sm:$0xff] }
 0x2f2   : > { %v12752_v28 = vpop.f32.mrb[222].mxu0  ;;  %v12755_v9 = vmul.f32 0.5, %v12670_v34  ;;  %v12757_v18 = vmul.f32 0.5, %v3184_v10  ;;  %9170 = vtanh.f32 %v4601_v11  ;;  %v4313_v21 = vadd.f32 0.7978846, %v4019_v42 }
 0x2f3   : > { %v12759_v63 = vpop.f32.mrb[223].mxu0  ;;  %v9161_v49 = vpop.eup %9160  ;;  %v4596_v47 = vmul.f32 %v4302_v60, %v3186_v23  ;;  %v6195_v0 = vpack.c.bf16 %v6039_v58, %v6033_v54  ;;  %v12763_v6 = vadd.f32 %v12593_v29, %v12692_v33  ;;  %v3200_v36 = vadd.f32 %v12596_v2, %v12701_v26 }
 0x2f4   : > { %v5189_v34 = vmul.f32 0.5, %v12705_v51  ;;  %v4020_v10 = vmul.f32 0.035677407, %v3726_v52  ;;  %v5752_v3 = vadd.f32 1.0, %v9157_v46  ;;  %v5758_v40 = vadd.f32 1.0, %v9159_v4 }
 0x2f5   : > { %3533 = vmatmul.mubr.bf16.gmra.mrb[72].mxu0 %v15701_v14  ;;  %v9163_v8 = vpop.eup %9162  ;;  %v12771_v17 = vmul.f32 0.5, %v3186_v23  ;;  %v4602_v27 = vmul.f32 %v4308_v5, %v3190_v13  ;;  %7054 = vmatmul.mubr.bf16.gmra.mrb[188].mxu1 %v6195_v0  ;;  %v3731_v29 = vmul.f32 %v12763_v6, %v12763_v6  ;;  %v3732_v42 = vmul.f32 %v3200_v36, %v3200_v36 }
 0x2f6   : > { %8051 = vmatprep.mubr.msk.bf16.mxu0 %vm580_vm0, %v15702_v48  ;;  %v12775_v2 = vmul.f32 0.5, %v3190_v13  ;;  %v4607_v12 = vmul.f32 %v4313_v21, %v12714_v53  ;;  %v6046_v51 = vmul.f32 %v5752_v3, %v12677_v25  ;;  %v6052_v46 = vmul.f32 %v5758_v40, %v5464_v50 }
 0x2f7   : > { %9172 = vtanh.f32 %v4596_v47  ;;  %v4026_v60 = vmul.f32 0.035677407, %v3732_v42  ;;  %v12783_v23 = vadd.f32 %v12614_v16, %v12692_v33  ;;  %v5751_v11 = vadd.f32 1.0, %v9161_v49 }
 0x2f8   : > { %v12779_v59 = vpop.f32.mrb[224].mxu0  ;;  %v9165_v4 = vpop.eup %9164  ;;  %v4314_v52 = vadd.f32 0.7978846, %v4020_v10  ;;  %v6202_v13 = vpack.c.bf16 %v6052_v46, %v6046_v51  ;;  %v5757_v5 = vadd.f32 1.0, %v9163_v8  ;;  %v12789_v54 = vadd.f32 %v12624_v1, %v12701_v26 }
 0x2f9   : > { %v12785_v30 = vpop.f32.mrb[225].mxu0  ;;  %9174 = vtanh.f32 %v4602_v27  ;;  %v12794_v50 = vmul.f32 0.5, %v12714_v53  ;;  %v4025_v58 = vmul.f32 0.035677407, %v3731_v29  ;;  %v3737_v16 = vmul.f32 %v12783_v23, %v12783_v23  ;;  %v15703_v29 = vld [vmem:[#allocation2_spill] sm:$0xff] }
 0x2fa   : > { %v12791_v25 = vpop.f32.mrb[226].mxu0  ;;  %v9167_v49 = vpop.eup %9166  ;;  %v4320_v47 = vadd.f32 0.7978846, %v4026_v60  ;;  %7063 = vmatprep.mubr.bf16.mxu1 %v6202_v13  ;;  %v6045_v0 = vmul.f32 %v5751_v11, %v12666_v15  ;;  %v6051_v1 = vmul.f32 %v5757_v5, %v12710_v35  ;;  %v3738_v14 = vmul.f32 %v12789_v54, %v12789_v54 }
 0x2fb   : > { %v12798_v21 = vpop.f32.mrb[227].mxu0  ;;  %v9169_v10 = vpop.eup %9168  ;;  %9176 = vtanh.f32 %v4607_v12  ;;  %v12805_v53 = vmul.f32 0.5, %v12737_v55  ;;  %v4031_v3 = vmul.f32 0.035677407, %v3737_v16  ;;  %v3208_v40 = vadd.f32 %v12635_v44, %v12692_v33 }
 0x2fc   : > { %v9171_v48 = vpop.eup %9170  ;;  %v5477_v8 = vadd.f32 1.0, %v9169_v10  ;;  %v4608_v15 = vmul.f32 %v4314_v52, %v12737_v55  ;;  %v6201_v27 = vpack.c.bf16 %v6051_v1, %v6045_v0  ;;  %v3210_v35 = vadd.f32 %v12638_v61, %v12701_v26 }
 0x2fd   : > { %3543 = vmatmul.mubr.bf16.gmra.mrb[76].mxu0 %v10984_v20  ;;  %v5483_v42 = vadd.f32 1.0, %v9171_v48  ;;  %v4319_v12 = vadd.f32 0.7978846, %v4025_v58  ;;  %v12816_v51 = vmul.f32 0.5, %v12763_v6  ;;  %v3743_v46 = vmul.f32 %v3208_v40, %v3208_v40 }
 0x2fe   : > { %8052 = vmatprep.mubr.msk.bf16.mxu0 %vm580_vm0, %v15703_v29  ;;  %v4614_v44 = vmul.f32 %v4320_v47, %v3200_v36  ;;  %v12818_v60 = vmul.f32 0.5, %v3200_v36  ;;  %v4325_v20 = vadd.f32 0.7978846, %v4031_v3  ;;  %7064 = vmatmul.mubr.bf16.gmra.mrb[192].mxu1 %v6201_v27  ;;  %v4032_v11 = vmul.f32 0.035677407, %v3738_v14 }
 0x2ff   : > { %v12823_v52 = vmul.f32 %v5477_v8, %v12757_v18  ;;  %v12825_v61 = vmul.f32 %v5483_v42, %v5189_v34  ;;  %v4037_v13 = vmul.f32 0.035677407, %v3743_v46  ;;  %v3744_v5 = vmul.f32 %v3210_v35, %v3210_v35  ;;  %v15704_v42 = vld [vmem:[#allocation3_spill] sm:$0xff] }
 0x300   : > { %v12820_v55 = vpop.f32.mrb[228].mxu0  ;;  %9178 = vtanh.f32 %v4608_v15  ;;  %v12830_v16 = vmul.f32 0.5, %v12783_v23  ;;  %v5764_v36 = vadd.f32 1.0, %v9167_v49  ;;  %v12834_v47 = vadd.f32 %v12659_v43, %v12692_v33 }
 0x301   : > { %v12827_v58 = vpop.f32.mrb[229].mxu0  ;;  %v9173_v1 = vpop.eup %9172  ;;  %v4613_v34 = vmul.f32 %v4319_v12, %v12763_v6  ;;  %v12842_v14 = vmul.f32 0.5, %v12789_v54  ;;  %v4038_v10 = vmul.f32 0.035677407, %v3744_v5  ;;  %9180 = vtanh.f32 %v4614_v44 }
 0x302   : > { %v12836_v0 = vpop.f32.mrb[230].mxu0  ;;  %v4326_v49 = vadd.f32 0.7978846, %v4032_v11  ;;  %v6058_v48 = vmul.f32 %v5764_v36, %v12755_v9  ;;  %v3749_v43 = vmul.f32 %v12834_v47, %v12834_v47  ;;  %v4619_v15 = vmul.f32 %v4325_v20, %v12783_v23  ;;  %v15705_v11 = vld [vmem:[#allocation5_spill] sm:$0xff] }
 0x303   : > { %v12844_v3 = vpop.f32.mrb[231].mxu0  ;;  %v9175_v8 = vpop.eup %9174  ;;  %v4331_v27 = vadd.f32 0.7978846, %v4037_v13  ;;  %v5763_v29 = vadd.f32 1.0, %v9165_v4  ;;  %v3216_v6 = vadd.f32 %v12663_v56, %v12701_v26  ;;  %v4332_v12 = vadd.f32 0.7978846, %v4038_v10 }
 0x304   : > { %v6208_v46 = vpack.c.bf16 %v6058_v48, %v6058_v48  ;;  %v12855_v44 = vadd.f32 %v12672_v22, %v12692_v33  ;;  %v12859_v9 = vadd.f32 %v12674_v7, %v12701_v26  ;;  %9182 = vtanh.f32 %v4613_v34 }
 0x305   : > { %3553 = vmatmul.mubr.bf16.gmra.mrb[80].mxu0 %v15704_v42  ;;  %v12863_v23 = vpop.eup %9176  ;;  %v4043_v4 = vmul.f32 0.035677407, %v3749_v43  ;;  %v6057_v56 = vmul.f32 %v5763_v29, %v12744_v41  ;;  %v3750_v20 = vmul.f32 %v3216_v6, %v3216_v6  ;;  %v4620_v13 = vmul.f32 %v4326_v49, %v12789_v54 }
 0x306   : > { %8053 = vmatprep.mubr.msk.bf16.mxu0 %vm580_vm0, %v15705_v11  ;;  %v12867_v5 = vmul.f32 0.5, %v3208_v40  ;;  %v12869_v22 = vmul.f32 0.5, %v3210_v35  ;;  %7073 = vmatprep.mubr.bf16.mxu1 %v6208_v46  ;;  %v3755_v7 = vmul.f32 %v12855_v44, %v12855_v44  ;;  %v4625_v10 = vmul.f32 %v4331_v27, %v3208_v40 }
 0x307   : > { %v6207_v48 = vpack.c.bf16 %v6057_v56, %v6057_v56  ;;  %v4044_v42 = vmul.f32 0.035677407, %v3750_v20  ;;  %v3756_v34 = vmul.f32 %v12859_v9, %v12859_v9  ;;  %9184 = vtanh.f32 %v4619_v15 }
 0x308   : > { %v12873_v36 = vpop.f32.mrb[232].mxu0  ;;  %v4626_v54 = vmul.f32 %v4332_v12, %v3210_v35  ;;  %v4049_v49 = vmul.f32 0.035677407, %v3755_v7  ;;  %v5478_v43 = vadd.f32 1.0, %v9173_v1  ;;  %v4337_v46 = vadd.f32 0.7978846, %v4043_v4 }
 0x309   : > { %v12877_v41 = vpop.f32.mrb[233].mxu0  ;;  %7074 = vmatmul.mubr.bf16.gmra.mrb[196].mxu1 %v6207_v48  ;;  %v4338_v11 = vadd.f32 0.7978846, %v4044_v42  ;;  %v5484_v18 = vadd.f32 1.0, %v9175_v8  ;;  %v12883_v40 = vadd.f32 %v12697_v19, %v12692_v33  ;;  %9186 = vtanh.f32 %v4620_v13 }
 0x30a   : > { %v12879_v29 = vpop.f32.mrb[234].mxu0  ;;  %v9179_v56 = vpop.eup %9178  ;;  %v12888_v20 = vmul.f32 0.5, %v12834_v47  ;;  %v4050_v35 = vmul.f32 0.035677407, %v3756_v34  ;;  %v12892_v1 = vadd.f32 %v12707_v37, %v12701_v26  ;;  %9188 = vtanh.f32 %v4625_v10  ;;  %v8733_v10 = vld [vmem:[%s15371_s4 + $0x214] ss:$8 sps:$4 sm:$0xff]  }
 0x30b   : > { %v12885_v27 = vpop.f32.mrb[235].mxu0  ;;  %v5772_v15 = vmul.f32 %v5478_v43, %v12771_v17  ;;  %v5778_v8 = vmul.f32 %v5484_v18, %v12775_v2  ;;  %v3761_v19 = vmul.f32 %v12883_v40, %v12883_v40  ;;  %v9181_v12 = vpop.eup %9180  ;;  %9190 = vtanh.f32 %v4626_v54  ;;  %v8728_v18 = vld [vmem:[%s15371_s4 + $0x200] ss:$8 sps:$4 sm:$0xff]  }
 0x30c   : > { %v12899_v4 = vmul.f32 0.5, %v3216_v6  ;;  %v4343_v13 = vadd.f32 0.7978846, %v4049_v49  ;;  %v3762_v7 = vmul.f32 %v12892_v1, %v12892_v1  ;;  %v4631_v37 = vmul.f32 %v4337_v46, %v12834_v47 }
 0x30d   : > { %3563 = vmatmul.mubr.bf16.gmra.mrb[84].mxu0 %v11061_v62  ;;  %v4632_v17 = vmul.f32 %v4338_v11, %v3216_v6  ;;  %v6066_v2 = vpack.c.bf16 %v5778_v8, %v5772_v15  ;;  %v4055_v62 = vmul.f32 0.035677407, %v3761_v19  ;;  %v4344_v48 = vadd.f32 0.7978846, %v4050_v35 }
 0x30e   : > { %8054 = vmatprep.mubr.msk.bf16.mxu0 %vm580_vm0, %v11100_v39  ;;  %v4056_v42 = vmul.f32 0.035677407, %v3762_v7  ;;  %v12914_v34 = vadd.f32 %v12716_v45, %v12692_v33  ;;  %v12918_v39 = vadd.f32 %v12722_v24, %v12701_v26  ;;  %v9183_v6 = vpop.eup %9182  ;;  %v12923_v54 = vmul.f32 0.5, %v12855_v44 }
 0x30f   : > { %v12926_v49 = vmul.f32 0.5, %v12859_v9  ;;  %7114 = vmatprep.mubr.bf16.mxu1 %v6066_v2  ;;  %v5490_v43 = vadd.f32 1.0, %v9179_v56  ;;  %v5496_v46 = vadd.f32 1.0, %v9181_v12  ;;  %v4637_v45 = vmul.f32 %v4343_v13, %v12855_v44 }
 0x310   : > { %v12920_v47 = vpop.f32.mrb[236].mxu0  ;;  %v4349_v35 = vadd.f32 0.7978846, %v4055_v62  ;;  %v4350_v15 = vadd.f32 0.7978846, %v4056_v42  ;;  %v3768_v24 = vmul.f32 %v12918_v39, %v12918_v39  ;;  %9192 = vtanh.f32 %v4631_v37 }
 0x311   : > { %v12928_v11 = vpop.f32.mrb[237].mxu0  ;;  %v15706_v19 = vpack.c.bf16 %v12825_v61, %v12823_v52  ;;  %v3767_v56 = vmul.f32 %v12914_v34, %v12914_v34  ;;  %v5784_v12 = vmul.f32 %v5490_v43, %v12805_v53  ;;  %v5790_v7 = vmul.f32 %v5496_v46, %v12818_v60  ;;  %v12944_v13 = vpop.eup %9184  ;;  %v8731_v53 = vld [vmem:[%s15371_s4 + $0x210] ss:$8 sps:$4 sm:$0xff]   ;;  %v15708_v46 = vld [vmem:[#allocation6_spill] sm:$0xff] }
 0x312   : > { %v12933_v8 = vpop.f32.mrb[238].mxu0  ;;  %9194 = vtanh.f32 %v4632_v17  ;;  %v4638_v2 = vmul.f32 %v4344_v48, %v12859_v9  ;;  %v12948_v37 = vmul.f32 0.5, %v12883_v40  ;;  %v12952_v52 = vadd.f32 %v12740_v31, %v12692_v33  ;;  %v8736_v9 = vld [vmem:[%s15371_s4 + $0x224] ss:$8 sps:$4 sm:$0xff]   ;;  %v15707_v17 = vld [vmem:[#allocation4_spill] sm:$0xff] }
 0x313   : > { %7115 = vmatmul.mubr.bf16.vlgmr.msra.gmra.mrb[100].mxu1 %v15706_v19  ;;  %v12942_v44 = vpop.f32.mrb[239].mxu0  ;;  %v4062_v60 = vmul.f32 0.035677407, %v3768_v24  ;;  %v6072_v61 = vpack.c.bf16 %v5790_v7, %v5784_v12  ;;  %v5489_v62 = vadd.f32 1.0, %v12863_v23  ;;  %v5495_v42 = vadd.f32 1.0, %v9183_v6 }
 0x314   : > { %7364 = vmatpush1.bf16.msra.mxu1 %v8728_v18  ;;  %v9187_v18 = vpop.eup %9186  ;;  %9196 = vtanh.f32 %v4637_v45  ;;  %v4643_v31 = vmul.f32 %v4349_v35, %v12883_v40  ;;  %v4644_v48 = vmul.f32 %v4350_v15, %v12892_v1  ;;  %v3773_v43 = vmul.f32 %v12952_v52, %v12952_v52 }
 0x315   : > { %7365 = vmatprep.subr.bf16.mxu1 %v8733_v10  ;;  %3573 = vmatmul.mubr.bf16.gmra.mrb[88].mxu0 %v15707_v17  ;;  %v9189_v23 = vpop.eup %9188  ;;  %v4061_v10 = vmul.f32 0.035677407, %v3767_v56  ;;  %v5783_v6 = vmul.f32 %v5489_v62, %v12794_v50  ;;  %v5789_v24 = vmul.f32 %v5495_v42, %v12816_v51  ;;  %v3236_v45 = vadd.f32 %v12748_v57, %v12701_v26  ;;  %v8734_v50 = vld [vmem:[%s15371_s4 + $0x220] ss:$8 sps:$4 sm:$0xff]  }
 0x316   : > { %8055 = vmatprep.mubr.msk.bf16.mxu0 %vm580_vm0, %v15708_v46  ;;  %7124 = vmatprep.mubr.bf16.mxu1 %v6072_v61  ;;  %v9191_v19 = vpop.eup %9190  ;;  %9198 = vtanh.f32 %v4638_v2  ;;  %v12973_v40 = vmul.f32 0.5, %v12892_v1  ;;  %v4067_v35 = vmul.f32 0.035677407, %v3773_v43  ;;  %v12977_v15 = vadd.f32 %v12752_v28, %v12692_v33  ;;  %v8739_v28 = vld [vmem:[%s15371_s4 + $0x234] ss:$8 sps:$4 sm:$0xff]  }
 0x317   : > { %v4356_v51 = vadd.f32 0.7978846, %v4062_v60  ;;  %v6071_v12 = vpack.c.bf16 %v5789_v24, %v5783_v6  ;;  %v3774_v57 = vmul.f32 %v3236_v45, %v3236_v45  ;;  %v12986_v7 = vadd.f32 %v12759_v63, %v12701_v26  ;;  %v8737_v63 = vld [vmem:[%s15371_s4 + $0x230] ss:$8 sps:$4 sm:$0xff]  }
 0x318   : > { %7366 = vmatpush1.bf16.msra.mxu1 %v8731_v53  ;;  %v12982_v56 = vpop.f32.mrb[240].mxu0  ;;  %9200 = vtanh.f32 %v4643_v31  ;;  %v12994_v2 = vmul.f32 0.5, %v12914_v34  ;;  %v12997_v53 = vmul.f32 0.5, %v12918_v39  ;;  %v3779_v60 = vmul.f32 %v12977_v15, %v12977_v15 }
 0x319   : > { %7367 = vmatprep.subr.bf16.mxu1 %v8736_v9  ;;  %v12991_v1 = vpop.f32.mrb[241].mxu0  ;;  %9202 = vtanh.f32 %v4644_v48  ;;  %v4355_v62 = vadd.f32 0.7978846, %v4061_v10  ;;  %v4068_v42 = vmul.f32 0.035677407, %v3774_v57  ;;  %v3780_v9 = vmul.f32 %v12986_v7, %v12986_v7 }
 0x31a   : > { %v13004_v61 = vpop.f32.mrb[242].mxu0  ;;  %v4361_v31 = vadd.f32 0.7978846, %v4067_v35  ;;  %v4073_v43 = vmul.f32 0.035677407, %v3779_v60  ;;  %v5502_v46 = vadd.f32 1.0, %v9187_v18  ;;  %v13010_v24 = vpop.eup %9192  ;;  %v4650_v32 = vmul.f32 %v4356_v51, %v12918_v39 }
 0x31b   : > { %15709 = vst [vmem:[#allocation32_spill] sm:$0xff] %v13004_v61  ;;  %7125 = vmatmul.mubr.bf16.gmra.mrb[104].mxu1 %v6071_v12  ;;  %v13008_v17 = vpop.f32.mrb[243].mxu0  ;;  %v5508_v6 = vadd.f32 1.0, %v9191_v19  ;;  %v4362_v38 = vadd.f32 0.7978846, %v4068_v42  ;;  %v13015_v48 = vadd.f32 %v12779_v59, %v12692_v33  ;;  %v15710_v35 = vld [vmem:[#allocation7_spill] sm:$0xff]  ;;  %v4649_v59 = vmul.f32 %v4355_v62, %v12914_v34 }
 0x31c   : > { %7368 = vmatpush1.bf16.msra.mxu1 %v8734_v50  ;;  %v4074_v61 = vmul.f32 0.035677407, %v3780_v9  ;;  %v8742_v10 = vld [vmem:[%s15371_s4 + $0x244] ss:$8 sps:$4 sm:$0xff]   ;;  %v9195_v18 = vpop.eup %9194  ;;  %v13022_v19 = vmul.f32 0.5, %v12952_v52  ;;  %v5796_v50 = vmul.f32 %v5502_v46, %v12842_v14  ;;  %v5501_v51 = vadd.f32 1.0, %v12944_v13 }
 0x31d   : > { %7369 = vmatprep.subr.bf16.mxu1 %v8739_v28  ;;  %3583 = vmatmul.mubr.bf16.gmra.mrb[92].mxu0 %v15710_v35  ;;  %v5802_v39 = vmul.f32 %v5508_v6, %v12869_v22  ;;  %v15711_v12 = vld [vmem:[#allocation8_spill] sm:$0xff]  ;;  %v13030_v57 = vmul.f32 0.5, %v3236_v45  ;;  %v4367_v28 = vadd.f32 0.7978846, %v4073_v43  ;;  %v3785_v60 = vmul.f32 %v13015_v48, %v13015_v48  ;;  %v8740_v22 = vld [vmem:[%s15371_s4 + $0x240] ss:$8 sps:$4 sm:$0xff]  }
 0x31e   : > { %8056 = vmatprep.mubr.msk.bf16.mxu0 %vm580_vm0, %v15711_v12  ;;  %v9197_v42 = vpop.eup %9196  ;;  %v4655_v9 = vmul.f32 %v4361_v31, %v12952_v52  ;;  %v4368_v35 = vadd.f32 0.7978846, %v4074_v61  ;;  %v5507_v46 = vadd.f32 1.0, %v9189_v23  ;;  %9204 = vtanh.f32 %v4650_v32  ;;  %v8745_v52 = vld [vmem:[%s15371_s4 + $0x254] ss:$8 sps:$4 sm:$0xff]  }
 0x31f   : > { %v6078_v14 = vpack.c.bf16 %v5802_v39, %v5796_v50  ;;  %v4656_v34 = vmul.f32 %v4362_v38, %v3236_v45  ;;  %v4079_v62 = vmul.f32 0.035677407, %v3785_v60  ;;  %v13042_v43 = vadd.f32 %v12785_v30, %v12701_v26  ;;  %v8748_v60 = vld [vmem:[%s15371_s4 + $0x264] ss:$8 sps:$4 sm:$0xff]  }
 0x320   : > { %7370 = vmatpush1.bf16.msra.mxu1 %v8737_v63  ;;  %v13038_v13 = vpop.f32.mrb[244].mxu0  ;;  %v9199_v23 = vpop.eup %9198  ;;  %v5795_v63 = vmul.f32 %v5501_v51, %v12830_v16  ;;  %v5801_v61 = vmul.f32 %v5507_v46, %v12867_v5  ;;  %v13053_v38 = vadd.f32 %v12791_v25, %v12692_v33  ;;  %v13057_v32 = vadd.f32 %v12798_v21, %v12701_v26 }
 0x321   : > { %7371 = vmatprep.subr.bf16.mxu1 %v8742_v10  ;;  %v13044_v6 = vpop.f32.mrb[245].mxu0  ;;  %7134 = vmatprep.mubr.bf16.mxu1 %v6078_v14  ;;  %9206 = vtanh.f32 %v4649_v59  ;;  %v4661_v45 = vmul.f32 %v4367_v28, %v12977_v15  ;;  %v13063_v31 = vmul.f32 0.5, %v12977_v15  ;;  %v3786_v16 = vmul.f32 %v13042_v43, %v13042_v43  ;;  %v8743_v15 = vld [vmem:[%s15371_s4 + $0x250] ss:$8 sps:$4 sm:$0xff]  }
 0x322   : > { %v13059_v30 = vpop.f32.mrb[246].mxu0  ;;  %v13069_v10 = vpop.eup %9200  ;;  %9208 = vtanh.f32 %v4655_v9  ;;  %v4662_v25 = vmul.f32 %v4368_v35, %v12986_v7  ;;  %v6077_v21 = vpack.c.bf16 %v5801_v61, %v5795_v63  ;;  %v3792_v50 = vmul.f32 %v13057_v32, %v13057_v32  ;;  %v15712_v28 = vld [vmem:[#allocation9_spill] sm:$0xff] }
 0x323   : > { %v13067_v5 = vpop.f32.mrb[247].mxu0  ;;  %v9203_v39 = vpop.eup %9202  ;;  %9210 = vtanh.f32 %v4656_v34  ;;  %v4373_v51 = vadd.f32 0.7978846, %v4079_v62  ;;  %v3791_v12 = vmul.f32 %v13053_v38, %v13053_v38  ;;  %v5514_v59 = vadd.f32 1.0, %v9195_v18  ;;  %v8751_v61 = vld [vmem:[%s15371_s4 + $0x274] ss:$8 sps:$4 sm:$0xff]  }
 0x324   : > { %7372 = vmatpush1.bf16.msra.mxu1 %v8740_v22  ;;  %v4080_v9 = vmul.f32 0.035677407, %v3786_v16  ;;  %v4086_v35 = vmul.f32 0.035677407, %v3792_v50  ;;  %v5520_v14 = vadd.f32 1.0, %v9199_v23  ;;  %v13085_v46 = vadd.f32 %v12820_v55, %v12692_v33  ;;  %v15713_v22 = vld [vmem:[#allocation10_spill] sm:$0xff] }
 0x325   : > { %3593 = vmatmul.mubr.bf16.gmra.mrb[96].mxu0 %v15712_v28  ;;  %7373 = vmatprep.subr.bf16.mxu1 %v8745_v52  ;;  %9212 = vtanh.f32 %v4661_v45  ;;  %v13090_v18 = vmul.f32 0.5, %v12986_v7  ;;  %v13093_v34 = vmul.f32 0.5, %v13015_v48  ;;  %v5513_v62 = vadd.f32 1.0, %v13010_v24  ;;  %v8746_v7 = vld [vmem:[%s15371_s4 + $0x260] ss:$8 sps:$4 sm:$0xff]  }
 0x326   : > { %7135 = vmatmul.mubr.bf16.gmra.mrb[108].mxu1 %v6077_v21  ;;  %8057 = vmatprep.mubr.msk.bf16.mxu0 %vm580_vm0, %v15713_v22  ;;  %9214 = vtanh.f32 %v4662_v25  ;;  %v5808_v52 = vmul.f32 %v5514_v59, %v12899_v4  ;;  %v5814_v23 = vmul.f32 %v5520_v14, %v12926_v49  ;;  %v3797_v55 = vmul.f32 %v13085_v46, %v13085_v46 }
 0x327   : > { %v4667_v24 = vmul.f32 %v4373_v51, %v13015_v48  ;;  %v13110_v4 = vmul.f32 0.5, %v13042_v43  ;;  %v4085_v49 = vmul.f32 0.035677407, %v3791_v12  ;;  %v5519_v45 = vadd.f32 1.0, %v9197_v42 }
 0x328   : > { %7374 = vmatpush1.bf16.msra.mxu1 %v8743_v15  ;;  %v13100_v63 = vpop.f32.mrb[248].mxu0  ;;  %v4374_v25 = vadd.f32 0.7978846, %v4080_v9  ;;  %v4380_v21 = vadd.f32 0.7978846, %v4086_v35  ;;  %v6084_v50 = vpack.c.bf16 %v5814_v23, %v5808_v52  ;;  %v5807_v15 = vmul.f32 %v5513_v62, %v12888_v20  ;;  %v9205_v28 = vpop.eup %9204  ;;  %v15718_v52 = vld [vmem:[#allocation11_spill] sm:$0xff] }
 0x329   : > { %15714 = vst [vmem:[#allocation35_spill] sm:$0xff] %v13100_v63  ;;  %v13112_v16 = vpop.f32.mrb[249].mxu0  ;;  %7375 = vmatprep.subr.bf16.mxu1 %v8748_v60  ;;  %v4091_v14 = vmul.f32 0.035677407, %v3797_v55  ;;  %v5813_v22 = vmul.f32 %v5519_v45, %v12923_v54  ;;  %v13120_v48 = vadd.f32 %v12827_v58, %v12701_v26  ;;  %v13124_v42 = vadd.f32 %v12836_v0, %v12692_v33  ;;  %v8749_v58 = vld [vmem:[%s15371_s4 + $0x270] ss:$8 sps:$4 sm:$0xff]  }
 0x32a   : > { %15715 = vst [vmem:[#allocation34_spill] sm:$0xff] %v13112_v16  ;;  %v13115_v59 = vpop.f32.mrb[250].mxu0  ;;  %v13129_v12 = vmul.f32 0.5, %v13053_v38  ;;  %v13132_v20 = vmul.f32 0.5, %v13057_v32  ;;  %7144 = vmatprep.mubr.bf16.mxu1 %v6084_v50  ;;  %v13136_v54 = vadd.f32 %v12844_v3, %v12701_v26  ;;  %v5526_v60 = vadd.f32 1.0, %v9203_v39 }
 0x32b   : > { %15716 = vst [vmem:[#allocation37_spill] sm:$0xff] %v13115_v59  ;;  %v13126_v51 = vpop.f32.mrb[251].mxu0  ;;  %v9207_v0 = vpop.eup %9206  ;;  %9216 = vtanh.f32 %v4667_v24  ;;  %v4379_v9 = vadd.f32 0.7978846, %v4085_v49  ;;  %v6083_v35 = vpack.c.bf16 %v5813_v22, %v5807_v15  ;;  %v3798_v62 = vmul.f32 %v13120_v48, %v13120_v48  ;;  %v8754_v3 = vld [vmem:[%s15371_s4 + $0x284] ss:$8 sps:$4 sm:$0xff]  }
 0x32c   : > { %15717 = vst [vmem:[#allocation36_spill] sm:$0xff] %v13126_v51  ;;  %7376 = vmatpush1.bf16.msra.mxu1 %v8746_v7  ;;  %v13147_v39 = vpop.eup %9208  ;;  %v4668_v23 = vmul.f32 %v4374_v25, %v13042_v43  ;;  %v13151_v55 = vmul.f32 0.5, %v13085_v46  ;;  %v3803_v7 = vmul.f32 %v13124_v42, %v13124_v42  ;;  %v3804_v24 = vmul.f32 %v13136_v54, %v13136_v54  ;;  %v15719_v49 = vld [vmem:[#allocation12_spill] sm:$0xff] }
 0x32d   : > { %3603 = vmatmul.mubr.bf16.gmra.mrb[100].mxu0 %v15718_v52  ;;  %7377 = vmatprep.subr.bf16.mxu1 %v8751_v61  ;;  %v8752_v61 = vld [vmem:[%s15371_s4 + $0x280] ss:$8 sps:$4 sm:$0xff]   ;;  %v9211_v45 = vpop.eup %9210  ;;  %v4674_v50 = vmul.f32 %v4380_v21, %v13057_v32  ;;  %v4385_v43 = vadd.f32 0.7978846, %v4091_v14  ;;  %v4092_v25 = vmul.f32 0.035677407, %v3798_v62  ;;  %v5820_v51 = vmul.f32 %v5526_v60, %v12973_v40 }
 0x32e   : > { %8058 = vmatprep.mubr.msk.bf16.mxu0 %vm580_vm0, %v15719_v49  ;;  %7145 = vmatmul.mubr.bf16.gmra.mrb[112].mxu1 %v6083_v35  ;;  %v5532_v15 = vadd.f32 1.0, %v9205_v28  ;;  %v4097_v22 = vmul.f32 0.035677407, %v3803_v7  ;;  %v4098_v52 = vmul.f32 0.035677407, %v3804_v24  ;;  %v13166_v59 = vadd.f32 %v12873_v36, %v12692_v33  ;;  %v15720_v24 = vld [vmem:[#allocation13_spill] sm:$0xff] }
 0x32f   : > { %v13170_v16 = vpop.eup %9212  ;;  %v4386_v63 = vadd.f32 0.7978846, %v4092_v25  ;;  %v5525_v21 = vadd.f32 1.0, %v13069_v10  ;;  %v5531_v14 = vadd.f32 1.0, %v9207_v0  ;;  %9218 = vtanh.f32 %v4668_v23 }
 0x330   : > { %v13168_v49 = vpop.f32.mrb[252].mxu0  ;;  %7378 = vmatpush1.bf16.msra.mxu1 %v8749_v58  ;;  %v5826_v32 = vmul.f32 %v5532_v15, %v12997_v53  ;;  %v9215_v35 = vpop.eup %9214  ;;  %v4673_v40 = vmul.f32 %v4379_v9, %v13053_v38  ;;  %v4391_v36 = vadd.f32 0.7978846, %v4097_v22  ;;  %v3809_v60 = vmul.f32 %v13166_v59, %v13166_v59  ;;  %v8757_v53 = vld [vmem:[%s15371_s4 + $0x294] ss:$8 sps:$4 sm:$0xff]  }
 0x331   : > { %v13174_v28 = vpop.f32.mrb[253].mxu0  ;;  %7379 = vmatprep.subr.bf16.mxu1 %v8754_v3  ;;  %v4679_v10 = vmul.f32 %v4385_v43, %v13085_v46  ;;  %v5819_v62 = vmul.f32 %v5525_v21, %v12948_v37  ;;  %v5825_v3 = vmul.f32 %v5531_v14, %v12994_v2  ;;  %9220 = vtanh.f32 %v4674_v50  ;;  %v8755_v46 = vld [vmem:[%s15371_s4 + $0x290] ss:$8 sps:$4 sm:$0xff]   ;;  %v15721_v43 = vld [vmem:[#allocation14_spill] sm:$0xff] }
 0x332   : > { %v13179_v58 = vpop.f32.mrb[254].mxu0  ;;  %v6090_v0 = vpack.c.bf16 %v5826_v32, %v5820_v51  ;;  %v4680_v38 = vmul.f32 %v4386_v63, %v13120_v48  ;;  %v4392_v9 = vadd.f32 0.7978846, %v4098_v52  ;;  %v13192_v7 = vadd.f32 %v12877_v41, %v12701_v26  ;;  %v8760_v41 = vld [vmem:[%s15371_s4 + $0x2a4] ss:$8 sps:$4 sm:$0xff]  }
 0x333   : > { %v13187_v23 = vpop.f32.mrb[255].mxu0  ;;  %v4103_v51 = vmul.f32 0.035677407, %v3809_v60  ;;  %v6089_v37 = vpack.c.bf16 %v5825_v3, %v5819_v62  ;;  %v13199_v2 = vadd.f32 %v12879_v29, %v12692_v33  ;;  %v13203_v63 = vadd.f32 %v12885_v27, %v12701_v26 }
 0x334   : > { %7380 = vmatpush1.bf16.msra.mxu1 %v8752_v61  ;;  %7154 = vmatprep.mubr.bf16.mxu1 %v6090_v0  ;;  %9222 = vtanh.f32 %v4673_v40  ;;  %v13210_v61 = vmul.f32 0.5, %v13120_v48  ;;  %v4685_v50 = vmul.f32 %v4391_v36, %v13124_v42  ;;  %v3810_v29 = vmul.f32 %v13192_v7, %v13192_v7 }
 0x335   : > { %3613 = vmatmul.mubr.bf16.gmra.mrb[104].mxu0 %v15720_v24  ;;  %7381 = vmatprep.subr.bf16.mxu1 %v8757_v53  ;;  %v13217_v27 = vpop.eup %9216  ;;  %9224 = vtanh.f32 %v4679_v10  ;;  %v13220_v25 = vmul.f32 0.5, %v13124_v42  ;;  %v3815_v48 = vmul.f32 %v13199_v2, %v13199_v2  ;;  %v3816_v15 = vmul.f32 %v13203_v63, %v13203_v63  ;;  %v8758_v42 = vld [vmem:[%s15371_s4 + $0x2a0] ss:$8 sps:$4 sm:$0xff]  }
 0x336   : > { %8059 = vmatprep.mubr.msk.bf16.mxu0 %vm580_vm0, %v15721_v43  ;;  %7155 = vmatmul.mubr.bf16.gmra.mrb[116].mxu1 %v6089_v37  ;;  %9226 = vtanh.f32 %v4680_v38  ;;  %v4686_v22 = vmul.f32 %v4392_v9, %v13136_v54  ;;  %v13228_v52 = vmul.f32 0.5, %v13136_v54  ;;  %v5538_v32 = vadd.f32 1.0, %v9211_v45 }
 0x337   : > { %v4397_v14 = vadd.f32 0.7978846, %v4103_v51  ;;  %v4104_v40 = vmul.f32 0.035677407, %v3810_v29  ;;  %v5544_v36 = vadd.f32 1.0, %v9215_v35  ;;  %v13237_v60 = vadd.f32 %v12920_v47, %v12692_v33 }
 0x338   : > { %v13230_v21 = vpop.f32.mrb[0].mxu0  ;;  %7382 = vmatpush1.bf16.msra.mxu1 %v8755_v46  ;;  %9228 = vtanh.f32 %v4685_v50  ;;  %v13242_v54 = vmul.f32 0.5, %v13166_v59  ;;  %v4109_v45 = vmul.f32 0.035677407, %v3815_v48  ;;  %v5537_v10 = vadd.f32 1.0, %v13147_v39  ;;  %v15722_v50 = vld [vmem:[#allocation15_spill] sm:$0xff] }
 0x339   : > { %v13239_v53 = vpop.f32.mrb[1].mxu0  ;;  %7383 = vmatprep.subr.bf16.mxu1 %v8760_v41  ;;  %v4110_v62 = vmul.f32 0.035677407, %v3816_v15  ;;  %v5832_v3 = vmul.f32 %v5538_v32, %v13030_v57  ;;  %v5838_v35 = vmul.f32 %v5544_v36, %v13090_v18  ;;  %v3821_v47 = vmul.f32 %v13237_v60, %v13237_v60  ;;  %v9219_v9 = vpop.eup %9218  ;;  %v8761_v39 = vld [vmem:[%s15371_s4 + $0x2b0] ss:$8 sps:$4 sm:$0xff]  }
 0x33a   : > { %v13245_v0 = vpop.f32.mrb[2].mxu0  ;;  %9230 = vtanh.f32 %v4686_v22  ;;  %v13254_v46 = vmul.f32 0.5, %v13192_v7  ;;  %v5543_v51 = vadd.f32 1.0, %v13170_v16  ;;  %v8763_v57 = vld [vmem:[%s15371_s4 + $0x2b4] ss:$8 sps:$4 sm:$0xff]   ;;  %v4691_v18 = vmul.f32 %v4397_v14, %v13166_v59 }
 0x33b   : > { %v13251_v38 = vpop.f32.mrb[3].mxu0  ;;  %v4398_v37 = vadd.f32 0.7978846, %v4104_v40  ;;  %v6096_v24 = vpack.c.bf16 %v5838_v35, %v5832_v3  ;;  %v5831_v41 = vmul.f32 %v5537_v10, %v13022_v19  ;;  %v9221_v29 = vpop.eup %9220  ;;  %v4115_v43 = vmul.f32 0.035677407, %v3821_v47  ;;  %v15723_v22 = vld [vmem:[#allocation16_spill] sm:$0xff] }
 0x33c   : > { %7384 = vmatpush1.bf16.msra.mxu1 %v8758_v42  ;;  %v5837_v16 = vmul.f32 %v5543_v51, %v13063_v31  ;;  %v13269_v48 = vadd.f32 %v12928_v11, %v12701_v26  ;;  %v13273_v15 = vadd.f32 %v12933_v8, %v12692_v33  ;;  %v4403_v59 = vadd.f32 0.7978846, %v4109_v45 }
 0x33d   : > { %3623 = vmatmul.mubr.bf16.gmra.mrb[108].mxu0 %v15722_v50  ;;  %7385 = vmatprep.subr.bf16.mxu1 %v8763_v57  ;;  %v13278_v19 = vmul.f32 0.5, %v13199_v2  ;;  %v4404_v32 = vadd.f32 0.7978846, %v4110_v62  ;;  %v13282_v31 = vadd.f32 %v12942_v44, %v12701_v26  ;;  %v13285_v42 = vmul.f32 0.5, %v13203_v63 }
 0x33e   : > { %8060 = vmatprep.mubr.msk.bf16.mxu0 %vm580_vm0, %v15723_v22  ;;  %7164 = vmatprep.mubr.bf16.mxu1 %v6096_v24  ;;  %v9223_v11 = vpop.eup %9222  ;;  %v6095_v8 = vpack.c.bf16 %v5837_v16, %v5831_v41  ;;  %v3822_v14 = vmul.f32 %v13269_v48, %v13269_v48  ;;  %v5550_v40 = vadd.f32 1.0, %v9219_v9  ;;  %v4692_v10 = vmul.f32 %v4398_v37, %v13192_v7 }
 0x33f   : > { %v13291_v45 = vpop.eup %9224  ;;  %v13295_v62 = vmul.f32 0.5, %v13237_v60  ;;  %v3827_v44 = vmul.f32 %v13273_v15, %v13273_v15  ;;  %v3828_v3 = vmul.f32 %v13282_v31, %v13282_v31  ;;  %9232 = vtanh.f32 %v4691_v18 }
 0x340   : > { %v13289_v36 = vpop.f32.mrb[4].mxu0  ;;  %7386 = vmatpush1.bf16.msra.mxu1 %v8761_v39  ;;  %v9227_v47 = vpop.eup %9226  ;;  %v4409_v9 = vadd.f32 0.7978846, %v4115_v43  ;;  %v4116_v51 = vmul.f32 0.035677407, %v3822_v14  ;;  %v5556_v39 = vadd.f32 1.0, %v9221_v29  ;;  %v4697_v7 = vmul.f32 %v4403_v59, %v13199_v2 }
 0x341   : > { %v13301_v35 = vpop.f32.mrb[5].mxu0  ;;  %7165 = vmatmul.mubr.bf16.gmra.mrb[120].mxu1 %v6095_v8  ;;  %v4698_v37 = vmul.f32 %v4404_v32, %v13203_v63  ;;  %v4121_v24 = vmul.f32 0.035677407, %v3827_v44  ;;  %v13309_v41 = vadd.f32 %v12982_v56, %v12692_v33  ;;  %v5844_v18 = vmul.f32 %v5550_v40, %v13110_v4  ;;  %v15724_v32 = vld [vmem:[#allocation17_spill] sm:$0xff] }
 0x342   : > { %v13303_v57 = vpop.f32.mrb[6].mxu0  ;;  %v13313_v16 = vpop.eup %9228  ;;  %v5850_v43 = vmul.f32 %v5556_v39, %v13132_v20  ;;  %v5549_v29 = vadd.f32 1.0, %v13217_v27  ;;  %v5555_v22 = vadd.f32 1.0, %v9223_v11  ;;  %9234 = vtanh.f32 %v4692_v10  ;;  %v15725_v20 = vld [vmem:[#allocation18_spill] sm:$0xff] }
 0x343   : > { %v13311_v50 = vpop.f32.mrb[7].mxu0  ;;  %v4410_v2 = vadd.f32 0.7978846, %v4116_v51  ;;  %v4122_v59 = vmul.f32 0.035677407, %v3828_v3  ;;  %v3833_v63 = vmul.f32 %v13309_v41, %v13309_v41  ;;  %v4703_v8 = vmul.f32 %v4409_v9, %v13237_v60 }
 0x344   : > { %v9231_v56 = vpop.eup %9230  ;;  %v6102_v14 = vpack.c.bf16 %v5850_v43, %v5844_v18  ;;  %v5843_v44 = vmul.f32 %v5549_v29, %v13093_v34  ;;  %v5849_v4 = vmul.f32 %v5555_v22, %v13129_v12  ;;  %v8764_v27 = vld [vmem:[%s15371_s4 + $0x2c0] ss:$8 sps:$4 sm:$0xff]   ;;  %v8766_v11 = vld [vmem:[%s15371_s4 + $0x2c4] ss:$8 sps:$4 sm:$0xff]   ;;  %9236 = vtanh.f32 %v4697_v7  ;;  %v15726_v12 = vld [vmem:[#allocation32_spill] sm:$0xff] }
 0x345   : > { %3633 = vmatmul.mubr.bf16.gmra.mrb[112].mxu0 %v15724_v32  ;;  %v4415_v40 = vadd.f32 0.7978846, %v4121_v24  ;;  %v4127_v10 = vmul.f32 0.035677407, %v3833_v63  ;;  %v3286_v60 = vadd.f32 %v12991_v1, %v12701_v26  ;;  %9238 = vtanh.f32 %v4698_v37  ;;  %7387 = vmatprep.subr.bf16.mxu1 %v8766_v11 }
 0x346   : > { %8061 = vmatprep.mubr.msk.bf16.mxu0 %vm580_vm0, %v15725_v20  ;;  %7174 = vmatprep.mubr.bf16.mxu1 %v6102_v14  ;;  %v6101_v34 = vpack.c.bf16 %v5849_v4, %v5843_v44  ;;  %v13336_v3 = vadd.f32 %v15726_v12, %v12692_v33  ;;  %v13340_v9 = vadd.f32 %v13008_v17, %v12701_v26  ;;  %v13346_v7 = vmul.f32 0.5, %v13269_v48 }
 0x347   : > { %v4704_v39 = vmul.f32 %v4410_v2, %v13269_v48  ;;  %v4416_v1 = vadd.f32 0.7978846, %v4122_v59  ;;  %v3834_v37 = vmul.f32 %v3286_v60, %v3286_v60  ;;  %7388 = vmatpush1.bf16.msra.mxu1 %v8764_v27  ;;  %9240 = vtanh.f32 %v4703_v8 }
 0x348   : > { %v13342_v51 = vpop.f32.mrb[8].mxu0  ;;  %v13351_v18 = vmul.f32 0.5, %v13273_v15  ;;  %v3839_v17 = vmul.f32 %v13336_v3, %v13336_v3  ;;  %v3840_v43 = vmul.f32 %v13340_v9, %v13340_v9  ;;  %v4709_v48 = vmul.f32 %v4415_v40, %v13273_v15 }
 0x349   : > { %v13348_v24 = vpop.f32.mrb[9].mxu0  ;;  %7175 = vmatmul.mubr.bf16.gmra.mrb[124].mxu1 %v6101_v34  ;;  %v4421_v22 = vadd.f32 0.7978846, %v4127_v10  ;;  %v4128_v2 = vmul.f32 0.035677407, %v3834_v37  ;;  %v5562_v59 = vadd.f32 1.0, %v9227_v47  ;;  %v13362_v32 = vpop.eup %9232  ;;  %v13366_v4 = vadd.f32 %v13038_v13, %v12692_v33 }
 0x34a   : > { %v13357_v29 = vpop.f32.mrb[10].mxu0  ;;  %v4133_v8 = vmul.f32 0.035677407, %v3839_v17  ;;  %v4134_v14 = vmul.f32 0.035677407, %v3840_v43  ;;  %v5568_v44 = vadd.f32 1.0, %v9231_v56  ;;  %9242 = vtanh.f32 %v4704_v39 }
 0x34b   : > { %v13360_v63 = vpop.f32.mrb[11].mxu0  ;;  %v4710_v20 = vmul.f32 %v4416_v1, %v13282_v31  ;;  %v13370_v27 = vmul.f32 0.5, %v13282_v31  ;;  %v5561_v15 = vadd.f32 1.0, %v13291_v45  ;;  %v15727_v47 = vld [vmem:[#allocation19_spill] sm:$0xff]  ;;  %v4422_v11 = vadd.f32 0.7978846, %v4128_v2 }
 0x34c   : > { %v5856_v40 = vmul.f32 %v5562_v59, %v13210_v61  ;;  %v5862_v10 = vmul.f32 %v5568_v44, %v13228_v52  ;;  %v3845_v56 = vmul.f32 %v13366_v4, %v13366_v4  ;;  %v15728_v13 = vld [vmem:[#allocation20_spill] sm:$0xff]  ;;  %v9235_v34 = vpop.eup %9234  ;;  %9244 = vtanh.f32 %v4709_v48 }
 0x34d   : > { %3643 = vmatmul.mubr.bf16.gmra.mrb[116].mxu0 %v15727_v47  ;;  %v13381_v31 = vmul.f32 0.5, %v13309_v41  ;;  %v13383_v12 = vmul.f32 0.5, %v3286_v60  ;;  %v5567_v45 = vadd.f32 1.0, %v13313_v16  ;;  %v4715_v39 = vmul.f32 %v4421_v22, %v13309_v41 }
 0x34e   : > { %8062 = vmatprep.mubr.msk.bf16.mxu0 %vm580_vm0, %v15728_v13  ;;  %v4427_v61 = vadd.f32 0.7978846, %v4133_v8  ;;  %v4428_v1 = vadd.f32 0.7978846, %v4134_v14  ;;  %v6108_v52 = vpack.c.bf16 %v5862_v10, %v5856_v40  ;;  %v9237_v17 = vpop.eup %9236  ;;  %v5855_v43 = vmul.f32 %v5561_v15, %v13151_v55  ;;  %v15729_v13 = vld [vmem:[#allocation21_spill] sm:$0xff] }
 0x34f   : > { %v5861_v2 = vmul.f32 %v5567_v45, %v13220_v25  ;;  %v13393_v48 = vadd.f32 %v13044_v6, %v12701_v26  ;;  %v13397_v59 = vadd.f32 %v13059_v30, %v12692_v33  ;;  %v9239_v41 = vpop.eup %9238  ;;  %9246 = vtanh.f32 %v4710_v20  ;;  %v15730_v45 = vld [vmem:[#allocation35_spill] sm:$0xff] }
 0x350   : > { %v13387_v37 = vpop.f32.mrb[12].mxu0  ;;  %v4716_v22 = vmul.f32 %v4422_v11, %v3286_v60  ;;  %7184 = vmatprep.mubr.bf16.mxu1 %v6108_v52  ;;  %v4139_v8 = vmul.f32 0.035677407, %v3845_v56  ;;  %v13403_v55 = vadd.f32 %v13067_v5, %v12701_v26  ;;  %v13408_v6 = vmul.f32 0.5, %v13336_v3  ;;  %v15731_v52 = vld [vmem:[#allocation22_spill] sm:$0xff] }
 0x351   : > { %v13399_v16 = vpop.f32.mrb[13].mxu0  ;;  %v6107_v14 = vpack.c.bf16 %v5861_v2, %v5855_v43  ;;  %v3846_v30 = vmul.f32 %v13393_v48, %v13393_v48  ;;  %v5574_v44 = vadd.f32 1.0, %v9235_v34  ;;  %v13414_v20 = vpop.eup %9240  ;;  %v4721_v60 = vmul.f32 %v4427_v61, %v13336_v3 }
 0x352   : > { %v13405_v25 = vpop.f32.mrb[14].mxu0  ;;  %v13418_v47 = vmul.f32 0.5, %v13340_v9  ;;  %v3851_v5 = vmul.f32 %v13397_v59, %v13397_v59  ;;  %v3852_v11 = vmul.f32 %v13403_v55, %v13403_v55  ;;  %9248 = vtanh.f32 %v4715_v39  ;;  %v8767_v39 = vld [vmem:[%s15371_s4 + $0x2d0] ss:$8 sps:$4 sm:$0xff]  }
 0x353   : > { %v13412_v15 = vpop.f32.mrb[15].mxu0  ;;  %v4722_v40 = vmul.f32 %v4428_v1, %v13340_v9  ;;  %7185 = vmatmul.mubr.bf16.gmra.mrb[128].mxu1 %v6107_v14  ;;  %v4140_v10 = vmul.f32 0.035677407, %v3846_v30  ;;  %v5580_v56 = vadd.f32 1.0, %v9239_v41  ;;  %9250 = vtanh.f32 %v4716_v22  ;;  %v8769_v22 = vld [vmem:[%s15371_s4 + $0x2d4] ss:$8 sps:$4 sm:$0xff]  }
 0x354   : > { %v4433_v34 = vadd.f32 0.7978846, %v4139_v8  ;;  %v4145_v3 = vmul.f32 0.035677407, %v3851_v5  ;;  %v13428_v61 = vadd.f32 %v15730_v45, %v12692_v33  ;;  %v9243_v9 = vpop.eup %9242  ;;  %v5868_v1 = vmul.f32 %v5574_v44, %v13254_v46  ;;  %7389 = vmatprep.subr.bf16.mxu1 %v8769_v22 }
 0x355   : > { %3653 = vmatmul.mubr.bf16.gmra.mrb[120].mxu0 %v15729_v13  ;;  %v5874_v43 = vmul.f32 %v5580_v56, %v13285_v42  ;;  %v5573_v2 = vadd.f32 1.0, %v13362_v32  ;;  %v5579_v41 = vadd.f32 1.0, %v9237_v17  ;;  %9252 = vtanh.f32 %v4721_v60  ;;  %7390 = vmatpush1.bf16.msra.mxu1 %v8767_v39 }
 0x356   : > { %8063 = vmatprep.mubr.msk.bf16.mxu0 %vm580_vm0, %v15731_v52  ;;  %v13442_v8 = vmul.f32 0.5, %v13366_v4  ;;  %v4434_v14 = vadd.f32 0.7978846, %v4140_v10  ;;  %v4146_v30 = vmul.f32 0.035677407, %v3852_v11  ;;  %v9245_v13 = vpop.eup %9244  ;;  %v3857_v46 = vmul.f32 %v13428_v61, %v13428_v61  ;;  %v15733_v11 = vld [vmem:[#allocation34_spill] sm:$0xff] }
 0x357   : > { %v6114_v45 = vpack.c.bf16 %v5874_v43, %v5868_v1  ;;  %v5867_v42 = vmul.f32 %v5573_v2, %v13242_v54  ;;  %v5873_v32 = vmul.f32 %v5579_v41, %v13278_v19  ;;  %9254 = vtanh.f32 %v4722_v40  ;;  %v15735_v19 = vld [vmem:[#allocation37_spill] sm:$0xff]  ;;  %v15736_v40 = vld [vmem:[#allocation36_spill] sm:$0xff] }
 0x358   : > { %v13444_v5 = vpop.f32.mrb[16].mxu0  ;;  %v4727_v44 = vmul.f32 %v4433_v34, %v13366_v4  ;;  %v4439_v60 = vadd.f32 0.7978846, %v4145_v3  ;;  %v13455_v10 = vadd.f32 %v15733_v11, %v12701_v26  ;;  %v13460_v52 = vmul.f32 0.5, %v13393_v48  ;;  %v15738_v11 = vld [vmem:[#allocation23_spill] sm:$0xff] }
 0x359   : > { %v13450_v17 = vpop.f32.mrb[17].mxu0  ;;  %7194 = vmatprep.mubr.bf16.mxu1 %v6114_v45  ;;  %v6113_v54 = vpack.c.bf16 %v5873_v32, %v5867_v42  ;;  %v13464_v1 = vadd.f32 %v15735_v19, %v12692_v33  ;;  %v13468_v4 = vadd.f32 %v15736_v40, %v12701_v26  ;;  %v9247_v3 = vpop.eup %9246  ;;  %v4728_v43 = vmul.f32 %v4434_v14, %v13393_v48  ;;  %v15739_v19 = vld [vmem:[#allocation24_spill] sm:$0xff] }
 0x35a   : > { %15732 = vst [vmem:[#allocation39_spill] sm:$0xff] %v13450_v17  ;;  %v13457_v56 = vpop.f32.mrb[18].mxu0  ;;  %v13474_v39 = vmul.f32 0.5, %v13397_v59  ;;  %v4440_v2 = vadd.f32 0.7978846, %v4146_v30  ;;  %v3858_v41 = vmul.f32 %v13455_v10, %v13455_v10  ;;  %v13479_v22 = vmul.f32 0.5, %v13403_v55 }
 0x35b   : > { %15734 = vst [vmem:[#allocation38_spill] sm:$0xff] %v13457_v56  ;;  %v13470_v34 = vpop.f32.mrb[19].mxu0  ;;  %v4151_v45 = vmul.f32 0.035677407, %v3857_v46  ;;  %7195 = vmatmul.mubr.bf16.gmra.mrb[132].mxu1 %v6113_v54  ;;  %v3863_v42 = vmul.f32 %v13464_v1, %v13464_v1  ;;  %v3864_v32 = vmul.f32 %v13468_v4, %v13468_v4  ;;  %9256 = vtanh.f32 %v4727_v44 }
 0x35c   : > { %15737 = vst [vmem:[#allocation41_spill] sm:$0xff] %v13470_v34  ;;  %v4733_v48 = vmul.f32 %v4439_v60, %v13397_v59  ;;  %v4152_v14 = vmul.f32 0.035677407, %v3858_v41  ;;  %v5586_v30 = vadd.f32 1.0, %v9243_v9  ;;  %v9249_v40 = vpop.eup %9248  ;;  %v5592_v54 = vadd.f32 1.0, %v9247_v3 }
 0x35d   : > { %3663 = vmatmul.mubr.bf16.gmra.mrb[124].mxu0 %v15738_v11  ;;  %v4157_v34 = vmul.f32 0.035677407, %v3863_v42  ;;  %v4158_v46 = vmul.f32 0.035677407, %v3864_v32  ;;  %v13491_v56 = vadd.f32 %v13168_v49, %v12692_v33  ;;  %v9251_v17 = vpop.eup %9250  ;;  %9258 = vtanh.f32 %v4728_v43 }
 0x35e   : > { %8064 = vmatprep.mubr.msk.bf16.mxu0 %vm580_vm0, %v15739_v19  ;;  %v4734_v11 = vmul.f32 %v4440_v2, %v13403_v55  ;;  %v13495_v44 = vmul.f32 0.5, %v13428_v61  ;;  %v5585_v59 = vadd.f32 1.0, %v13414_v20  ;;  %v4445_v60 = vadd.f32 0.7978846, %v4151_v45 }
 0x35f   : > { %v5880_v41 = vmul.f32 %v5586_v30, %v13346_v7  ;;  %v5886_v3 = vmul.f32 %v5592_v54, %v13370_v27  ;;  %v3869_v49 = vmul.f32 %v13491_v56, %v13491_v56  ;;  %v9253_v43 = vpop.eup %9252  ;;  %9260 = vtanh.f32 %v4733_v48 }
 0x360   : > { %v13498_v9 = vpop.f32.mrb[20].mxu0  ;;  %v4446_v55 = vadd.f32 0.7978846, %v4152_v14  ;;  %v4451_v2 = vadd.f32 0.7978846, %v4157_v34  ;;  %v5591_v32 = vadd.f32 1.0, %v9245_v13  ;;  %v5879_v54 = vmul.f32 %v5585_v59, %v13295_v62 }
 0x361   : > { %15740 = vst [vmem:[#allocation40_spill] sm:$0xff] %v13498_v9  ;;  %v13504_v42 = vpop.f32.mrb[21].mxu0  ;;  %v13509_v20 = vmul.f32 0.5, %v13455_v10  ;;  %v4452_v45 = vadd.f32 0.7978846, %v4158_v46  ;;  %v6120_v9 = vpack.c.bf16 %v5886_v3, %v5880_v41  ;;  %v9255_v27 = vpop.eup %9254  ;;  %v13517_v48 = vadd.f32 %v13174_v28, %v12701_v26  ;;  %v15743_v46 = vld [vmem:[#allocation25_spill] sm:$0xff] }
 0x362   : > { %15741 = vst [vmem:[#allocation43_spill] sm:$0xff] %v13504_v42  ;;  %v13506_v19 = vpop.f32.mrb[22].mxu0  ;;  %v4163_v7 = vmul.f32 0.035677407, %v3869_v49  ;;  %v5885_v42 = vmul.f32 %v5591_v32, %v13351_v18  ;;  %v13521_v13 = vadd.f32 %v13179_v58, %v12692_v33  ;;  %9262 = vtanh.f32 %v4734_v11  ;;  %v15744_v11 = vld [vmem:[#allocation26_spill] sm:$0xff] }
 0x363   : > { %v13511_v30 = vpop.f32.mrb[23].mxu0  ;;  %v13524_v34 = vmul.f32 0.5, %v13464_v1  ;;  %7204 = vmatprep.mubr.bf16.mxu1 %v6120_v9  ;;  %v13528_v14 = vadd.f32 %v13187_v23, %v12701_v26  ;;  %v5598_v62 = vadd.f32 1.0, %v9251_v17  ;;  %v4739_v18 = vmul.f32 %v4445_v60, %v13428_v61 }
 0x364   : > { %15742 = vst [vmem:[#allocation42_spill] sm:$0xff] %v13511_v30  ;;  %v13533_v28 = vmul.f32 0.5, %v13468_v4  ;;  %v6119_v59 = vpack.c.bf16 %v5885_v42, %v5879_v54  ;;  %v3870_v58 = vmul.f32 %v13517_v48, %v13517_v48  ;;  %v4740_v9 = vmul.f32 %v4446_v55, %v13455_v10 }
 0x365   : > { %3673 = vmatmul.mubr.bf16.gmra.mrb[128].mxu0 %v15743_v46  ;;  %v4457_v41 = vadd.f32 0.7978846, %v4163_v7  ;;  %v3875_v23 = vmul.f32 %v13521_v13, %v13521_v13  ;;  %v3876_v17 = vmul.f32 %v13528_v14, %v13528_v14  ;;  %v13544_v61 = vpop.eup %9256  ;;  %v4745_v60 = vmul.f32 %v4451_v2, %v13464_v1 }
 0x366   : > { %8065 = vmatprep.mubr.msk.bf16.mxu0 %vm580_vm0, %v15744_v11  ;;  %v4746_v3 = vmul.f32 %v4452_v45, %v13468_v4  ;;  %7205 = vmatmul.mubr.bf16.gmra.mrb[136].mxu1 %v6119_v59  ;;  %v4164_v49 = vmul.f32 0.035677407, %v3870_v58  ;;  %v5604_v42 = vadd.f32 1.0, %v9255_v27  ;;  %v5892_v55 = vmul.f32 %v5598_v62, %v13383_v12 }
 0x367   : > { %v4169_v54 = vmul.f32 0.035677407, %v3875_v23  ;;  %v4170_v10 = vmul.f32 0.035677407, %v3876_v17  ;;  %v13553_v7 = vadd.f32 %v13230_v21, %v12692_v33  ;;  %v9259_v11 = vpop.eup %9258  ;;  %v5597_v4 = vadd.f32 1.0, %v9249_v40 }
 0x368   : > { %v13548_v32 = vpop.f32.mrb[24].mxu0  ;;  %v4458_v30 = vadd.f32 0.7978846, %v4164_v49  ;;  %v5898_v1 = vmul.f32 %v5604_v42, %v13418_v47  ;;  %v5603_v2 = vadd.f32 1.0, %v9253_v43  ;;  %9264 = vtanh.f32 %v4740_v9  ;;  %v8770_v49 = vld [vmem:[%s15371_s4 + $0x2e0] ss:$8 sps:$4 sm:$0xff]  }
 0x369   : > { %v13555_v46 = vpop.f32.mrb[25].mxu0  ;;  %v4751_v27 = vmul.f32 %v4457_v41, %v13491_v56  ;;  %v4463_v59 = vadd.f32 0.7978846, %v4169_v54  ;;  %v3881_v12 = vmul.f32 %v13553_v7, %v13553_v7  ;;  %v9261_v21 = vpop.eup %9260  ;;  %v4464_v58 = vadd.f32 0.7978846, %v4170_v10  ;;  %v15745_v41 = vld [vmem:[#allocation27_spill] sm:$0xff] }
 0x36a   : > { %v13558_v45 = vpop.f32.mrb[26].mxu0  ;;  %v6126_v23 = vpack.c.bf16 %v5898_v1, %v5892_v55  ;;  %v5891_v17 = vmul.f32 %v5597_v4, %v13381_v31  ;;  %v5897_v47 = vmul.f32 %v5603_v2, %v13408_v6  ;;  %9266 = vtanh.f32 %v4739_v18  ;;  %v8772_v31 = vld [vmem:[%s15371_s4 + $0x2e4] ss:$8 sps:$4 sm:$0xff]   ;;  %v15746_v18 = vld [vmem:[#allocation28_spill] sm:$0xff] }
 0x36b   : > { %v13563_v62 = vpop.f32.mrb[27].mxu0  ;;  %v4752_v40 = vmul.f32 %v4458_v30, %v13517_v48  ;;  %v4175_v43 = vmul.f32 0.035677407, %v3881_v12  ;;  %v13570_v9 = vadd.f32 %v13239_v53, %v12701_v26  ;;  %9268 = vtanh.f32 %v4746_v3  ;;  %7391 = vmatprep.subr.bf16.mxu1 %v8772_v31 }
 0x36c   : > { %7214 = vmatprep.mubr.bf16.mxu1 %v6126_v23  ;;  %v6125_v6 = vpack.c.bf16 %v5897_v47, %v5891_v17  ;;  %v13581_v30 = vadd.f32 %v13245_v0, %v12692_v33  ;;  %v13585_v53 = vadd.f32 %v13251_v38, %v12701_v26  ;;  %v9263_v42 = vpop.eup %9262  ;;  %9270 = vtanh.f32 %v4745_v60  ;;  %7392 = vmatpush1.bf16.msra.mxu1 %v8770_v49 }
 0x36d   : > { %3683 = vmatmul.mubr.bf16.gmra.mrb[132].mxu0 %v15745_v41  ;;  %v13590_v54 = vmul.f32 0.5, %v13491_v56  ;;  %v4757_v3 = vmul.f32 %v4463_v59, %v13521_v13  ;;  %v3882_v10 = vmul.f32 %v13570_v9, %v13570_v9  ;;  %9272 = vtanh.f32 %v4751_v27 }
 0x36e   : > { %8066 = vmatprep.mubr.msk.bf16.mxu0 %vm580_vm0, %v15746_v18  ;;  %v13596_v0 = vmul.f32 0.5, %v13517_v48  ;;  %7215 = vmatmul.mubr.bf16.gmra.mrb[140].mxu1 %v6125_v6  ;;  %v3887_v38 = vmul.f32 %v13581_v30, %v13581_v30  ;;  %v3888_v60 = vmul.f32 %v13585_v53, %v13585_v53  ;;  %9274 = vtanh.f32 %v4752_v40  ;;  %v8773_v40 = vld [vmem:[%s15371_s4 + $0x2f0] ss:$8 sps:$4 sm:$0xff]  }
 0x36f   : > { %v4758_v56 = vmul.f32 %v4464_v58, %v13528_v14  ;;  %v4469_v1 = vadd.f32 0.7978846, %v4175_v43  ;;  %v5610_v4 = vadd.f32 1.0, %v9259_v11  ;;  %v4176_v27 = vmul.f32 0.035677407, %v3882_v10  ;;  %v15748_v18 = vld [vmem:[#allocation29_spill] sm:$0xff] }
 0x370   : > { %v13602_v55 = vpop.f32.mrb[28].mxu0  ;;  %v4181_v48 = vmul.f32 0.035677407, %v3887_v38  ;;  %v5616_v59 = vadd.f32 1.0, %v9263_v42  ;;  %v13609_v12 = vadd.f32 %v13289_v36, %v12692_v33  ;;  %9276 = vtanh.f32 %v4757_v3  ;;  %v15749_v10 = vld [vmem:[#allocation31_spill] sm:$0xff] }
 0x371   : > { %v13605_v2 = vpop.f32.mrb[29].mxu0  ;;  %v13614_v17 = vmul.f32 0.5, %v13521_v13  ;;  %v13617_v58 = vmul.f32 0.5, %v13528_v14  ;;  %v5609_v11 = vadd.f32 1.0, %v13544_v61  ;;  %v4182_v43 = vmul.f32 0.035677407, %v3888_v60 }
 0x372   : > { %v13611_v23 = vpop.f32.mrb[30].mxu0  ;;  %v5904_v36 = vmul.f32 %v5610_v4, %v13460_v52  ;;  %v5910_v41 = vmul.f32 %v5616_v59, %v13479_v22  ;;  %v3893_v13 = vmul.f32 %v13609_v12, %v13609_v12  ;;  %v8775_v14 = vld [vmem:[%s15371_s4 + $0x2f4] ss:$8 sps:$4 sm:$0xff]   ;;  %v9265_v49 = vpop.eup %9264  ;;  %9278 = vtanh.f32 %v4758_v56 }
 0x373   : > { %v13620_v47 = vpop.f32.mrb[31].mxu0  ;;  %v13633_v61 = vmul.f32 0.5, %v13553_v7  ;;  %v13636_v31 = vmul.f32 0.5, %v13570_v9  ;;  %v5615_v6 = vadd.f32 1.0, %v9261_v21  ;;  %v4763_v52 = vmul.f32 %v4469_v1, %v13553_v7  ;;  %7393 = vmatprep.subr.bf16.mxu1 %v8775_v14 }
 0x374   : > { %15747 = vst [vmem:[#allocation45_spill] sm:$0xff] %v13620_v47  ;;  %v4470_v22 = vadd.f32 0.7978846, %v4176_v27  ;;  %v4475_v42 = vadd.f32 0.7978846, %v4181_v48  ;;  %v6132_v3 = vpack.c.bf16 %v5910_v41, %v5904_v36  ;;  %v9267_v38 = vpop.eup %9266  ;;  %v5903_v60 = vmul.f32 %v5609_v11, %v13442_v8  ;;  %7394 = vmatpush1.bf16.msra.mxu1 %v8773_v40  ;;  %v15754_v47 = vld [vmem:[#allocation30_spill] sm:$0xff] }
 0x375   : > { %3693 = vmatmul.mubr.bf16.gmra.mrb[136].mxu0 %v15748_v18  ;;  %v5909_v56 = vmul.f32 %v5615_v6, %v13474_v39  ;;  %v3336_v4 = vadd.f32 %v13301_v35, %v12701_v26  ;;  %v13648_v21 = vadd.f32 %v13303_v57, %v12692_v33  ;;  %v9269_v7 = vpop.eup %9268  ;;  %v13651_v1 = vmul.f32 0.5, %v13581_v30 }
 0x376   : > { %8067 = vmatprep.mubr.msk.bf16.mxu0 %vm580_vm0, %v15749_v10  ;;  %v4476_v27 = vadd.f32 0.7978846, %v4182_v43  ;;  %7224 = vmatprep.mubr.bf16.mxu1 %v6132_v3  ;;  %v4187_v48 = vmul.f32 0.035677407, %v3893_v13  ;;  %v13655_v8 = vadd.f32 %v13311_v50, %v12701_v26  ;;  %v9271_v59 = vpop.eup %9270  ;;  %v13660_v35 = vmul.f32 0.5, %v13585_v53 }
 0x377   : > { %v6131_v57 = vpack.c.bf16 %v5909_v56, %v5903_v60  ;;  %v3894_v11 = vmul.f32 %v3336_v4, %v3336_v4  ;;  %v5622_v40 = vadd.f32 1.0, %v9265_v49  ;;  %v13664_v41 = vpop.eup %9272  ;;  %9280 = vtanh.f32 %v4763_v52 }
 0x378   : > { %v13657_v39 = vpop.f32.mrb[32].mxu0  ;;  %v4764_v43 = vmul.f32 %v4470_v22, %v13570_v9  ;;  %v3899_v50 = vmul.f32 %v13648_v21, %v13648_v21  ;;  %v3900_v13 = vmul.f32 %v13655_v8, %v13655_v8  ;;  %v9275_v6 = vpop.eup %9274  ;;  %v4769_v18 = vmul.f32 %v4475_v42, %v13581_v30 }
 0x379   : > { %15750 = vst [vmem:[#allocation44_spill] sm:$0xff] %v13657_v39  ;;  %v13662_v36 = vpop.f32.mrb[33].mxu0  ;;  %v13675_v49 = vmul.f32 0.5, %v13609_v12  ;;  %7225 = vmatmul.mubr.bf16.gmra.mrb[144].mxu1 %v6131_v57  ;;  %v4188_v3 = vmul.f32 0.035677407, %v3894_v11  ;;  %v5628_v10 = vadd.f32 1.0, %v9269_v7  ;;  %v4770_v9 = vmul.f32 %v4476_v27, %v13585_v53 }
 0x37a   : > { %15751 = vst [vmem:[#allocation47_spill] sm:$0xff] %v13662_v36  ;;  %v13671_v14 = vpop.f32.mrb[34].mxu0  ;;  %v4481_v22 = vadd.f32 0.7978846, %v4187_v48  ;;  %v4193_v60 = vmul.f32 0.035677407, %v3899_v50  ;;  %v3344_v56 = vadd.f32 %v13342_v51, %v12692_v33  ;;  %v9277_v36 = vpop.eup %9276  ;;  %9282 = vtanh.f32 %v4764_v43 }
 0x37b   : > { %15752 = vst [vmem:[#allocation46_spill] sm:$0xff] %v13671_v14  ;;  %v13677_v52 = vpop.f32.mrb[35].mxu0  ;;  %v5916_v14 = vmul.f32 %v5622_v40, %v13509_v20  ;;  %v5922_v30 = vmul.f32 %v5628_v10, %v13533_v28  ;;  %v5621_v42 = vadd.f32 1.0, %v9267_v38  ;;  %v5627_v39 = vadd.f32 1.0, %v9271_v59 }
 0x37c   : > { %15753 = vst [vmem:[#allocation49_spill] sm:$0xff] %v13677_v52  ;;  %v4482_v7 = vadd.f32 0.7978846, %v4188_v3  ;;  %v4194_v57 = vmul.f32 0.035677407, %v3900_v13  ;;  %v3905_v11 = vmul.f32 %v3344_v56, %v3344_v56  ;;  %v9279_v52 = vpop.eup %9278  ;;  %9284 = vtanh.f32 %v4769_v18 }
 0x37d   : > { %3703 = vmatmul.mubr.bf16.gmra.mrb[140].mxu0 %v15754_v47  ;;  %v4487_v53 = vadd.f32 0.7978846, %v4193_v60  ;;  %v6138_v27 = vpack.c.bf16 %v5922_v30, %v5916_v14  ;;  %v5915_v48 = vmul.f32 %v5621_v42, %v13495_v44  ;;  %v5921_v51 = vmul.f32 %v5627_v39, %v13524_v34 }
 0x37e   : > { %v4775_v20 = vmul.f32 %v4481_v22, %v13609_v12  ;;  %v4199_v40 = vmul.f32 0.035677407, %v3905_v11  ;;  %v13690_v28 = vadd.f32 %v13348_v24, %v12701_v26  ;;  %9286 = vtanh.f32 %v4770_v9 }
 0x37f   : > { %7234 = vmatprep.mubr.bf16.mxu1 %v6138_v27  ;;  %v6137_v38 = vpack.c.bf16 %v5921_v51, %v5915_v48  ;;  %v13696_v59 = vadd.f32 %v13357_v29, %v12692_v33  ;;  %v13700_v44 = vadd.f32 %v13360_v63, %v12701_v26  ;;  %v4776_v12 = vmul.f32 %v4482_v7, %v3336_v4 }
 0x380   : > { %v13692_v47 = vpop.f32.mrb[36].mxu0  ;;  %v13704_v39 = vmul.f32 0.5, %v3336_v4  ;;  %v4488_v24 = vadd.f32 0.7978846, %v4194_v57  ;;  %v3906_v43 = vmul.f32 %v13690_v28, %v13690_v28  ;;  %v4781_v13 = vmul.f32 %v4487_v53, %v13648_v21 }
 0x381   : > { %v13702_v34 = vpop.f32.mrb[37].mxu0  ;;  %v13712_v29 = vmul.f32 0.5, %v13648_v21  ;;  %v13715_v14 = vmul.f32 0.5, %v13655_v8  ;;  %7235 = vmatmul.mubr.bf16.gmra.mrb[148].mxu1 %v6137_v38  ;;  %v3912_v63 = vmul.f32 %v13700_v44, %v13700_v44  ;;  %v9281_v18 = vpop.eup %9280  ;;  %9288 = vtanh.f32 %v4775_v20 }
 0x382   : > { %v13708_v50 = vpop.f32.mrb[38].mxu0  ;;  %v4493_v3 = vadd.f32 0.7978846, %v4199_v40  ;;  %v3911_v10 = vmul.f32 %v13696_v59, %v13696_v59  ;;  %v5634_v9 = vadd.f32 1.0, %v9275_v6  ;;  %v4200_v22 = vmul.f32 0.035677407, %v3906_v43 }
 0x383   : > { %v13719_v4 = vpop.f32.mrb[39].mxu0  ;;  %v4206_v60 = vmul.f32 0.035677407, %v3912_v63  ;;  %v5640_v21 = vadd.f32 1.0, %v9279_v52  ;;  %v13725_v30 = vadd.f32 %v13387_v37, %v12692_v33  ;;  %9290 = vtanh.f32 %v4776_v12 }
 0x384   : > { %v4782_v42 = vmul.f32 %v4488_v24, %v13655_v8  ;;  %v13728_v7 = vmul.f32 0.5, %v3344_v56  ;;  %v5633_v57 = vadd.f32 1.0, %v13664_v41  ;;  %9292 = vtanh.f32 %v4781_v13  ;;  %v9283_v52 = vpop.eup %9282 }
 0x385   : > { %v5928_v11 = vmul.f32 %v5634_v9, %v13596_v0  ;;  %v5934_v53 = vmul.f32 %v5640_v21, %v13617_v58  ;;  %v3917_v6 = vmul.f32 %v13725_v30, %v13725_v30  ;;  %v4787_v27 = vmul.f32 %v4493_v3, %v3344_v56 }
 0x386   : > { %v13736_v37 = vmul.f32 0.5, %v13690_v28  ;;  %v4205_v48 = vmul.f32 0.035677407, %v3911_v10  ;;  %v5639_v51 = vadd.f32 1.0, %v9277_v36  ;;  %v4494_v20 = vadd.f32 0.7978846, %v4200_v22  ;;  %v9285_v58 = vpop.eup %9284 }
 0x387   : > { %v4500_v40 = vadd.f32 0.7978846, %v4206_v60  ;;  %v6144_v41 = vpack.c.bf16 %v5934_v53, %v5928_v11  ;;  %v5927_v38 = vmul.f32 %v5633_v57, %v13590_v54  ;;  %v4211_v12 = vmul.f32 0.035677407, %v3917_v6 }
 0x388   : > { %v13738_v8 = vpop.f32.mrb[40].mxu0  ;;  %v5933_v24 = vmul.f32 %v5639_v51, %v13614_v17  ;;  %v3356_v56 = vadd.f32 %v13399_v16, %v12701_v26  ;;  %v13748_v43 = vadd.f32 %v13405_v25, %v12692_v33  ;;  %v9287_v13 = vpop.eup %9286  ;;  %9294 = vtanh.f32 %v4782_v42 }
 0x389   : > { %v13741_v0 = vpop.f32.mrb[41].mxu0  ;;  %v13751_v63 = vmul.f32 0.5, %v13696_v59  ;;  %7244 = vmatprep.mubr.bf16.mxu1 %v6144_v41  ;;  %v13755_v54 = vadd.f32 %v13412_v15, %v12701_v26  ;;  %v5646_v3 = vadd.f32 1.0, %v9283_v52  ;;  %9296 = vtanh.f32 %v4787_v27 }
 0x38a   : > { %v3427_v36 = vpop.f32.mrb[42].mxu0  ;;  %v13758_v16 = vmul.f32 0.5, %v13700_v44  ;;  %v6143_v10 = vpack.c.bf16 %v5933_v24, %v5927_v38  ;;  %v3918_v25 = vmul.f32 %v3356_v56, %v3356_v56  ;;  %v4788_v9 = vmul.f32 %v4494_v20, %v13690_v28 }
 0x38b   : > { %v3428_v17 = vpop.f32.mrb[43].mxu0  ;;  %v4499_v22 = vadd.f32 0.7978846, %v4205_v48  ;;  %v3923_v60 = vmul.f32 %v13748_v43, %v13748_v43  ;;  %v3924_v21 = vmul.f32 %v13755_v54, %v13755_v54  ;;  %v9289_v42 = vpop.eup %9288  ;;  %v4794_v15 = vmul.f32 %v4500_v40, %v13700_v44 }
 0x38c   : > { %v4505_v57 = vadd.f32 0.7978846, %v4211_v12  ;;  %7245 = vmatmul.mubr.bf16.gmra.mrb[152].mxu1 %v6143_v10  ;;  %v4212_v11 = vmul.f32 0.035677407, %v3918_v25  ;;  %v5652_v53 = vadd.f32 1.0, %v9287_v13  ;;  %v5940_v27 = vmul.f32 %v5646_v3, %v13636_v31 }
 0x38d   : > { %v4217_v6 = vmul.f32 0.035677407, %v3923_v60  ;;  %v4218_v52 = vmul.f32 0.035677407, %v3924_v21  ;;  %v13769_v28 = vadd.f32 %v13444_v5, %v12692_v33  ;;  %v9291_v48 = vpop.eup %9290  ;;  %v5645_v41 = vadd.f32 1.0, %v9281_v18  ;;  %v15757_v60 = vld [vmem:[#allocation38_spill] sm:$0xff] }
 0x38e   : > { %v4506_v51 = vadd.f32 0.7978846, %v4212_v11  ;;  %v5946_v20 = vmul.f32 %v5652_v53, %v13660_v35  ;;  %v5651_v38 = vadd.f32 1.0, %v9285_v58  ;;  %v9293_v44 = vpop.eup %9292  ;;  %9298 = vtanh.f32 %v4788_v9 }
 0x38f   : > { %v4793_v40 = vmul.f32 %v4499_v22, %v13696_v59  ;;  %v4511_v12 = vadd.f32 0.7978846, %v4217_v6  ;;  %v3929_v31 = vmul.f32 %v13769_v28, %v13769_v28  ;;  %v4799_v5 = vmul.f32 %v4505_v57, %v13725_v30  ;;  %v15755_v59 = vld [vmem:[#allocation39_spill] sm:$0xff] }
 0x390   : > { %v13772_v24 = vpop.f32.mrb[44].mxu0  ;;  %v6150_v13 = vpack.c.bf16 %v5946_v20, %v5940_v27  ;;  %v5939_v3 = vmul.f32 %v5645_v41, %v13633_v61  ;;  %v5945_v35 = vmul.f32 %v5651_v38, %v13651_v1  ;;  %9300 = vtanh.f32 %v4794_v15  ;;  %v15758_v61 = vld [vmem:[#allocation41_spill] sm:$0xff] }
 0x391   : > { %v13777_v36 = vpop.f32.mrb[45].mxu0  ;;  %v4800_v58 = vmul.f32 %v4506_v51, %v3356_v56  ;;  %v4512_v17 = vadd.f32 0.7978846, %v4218_v52  ;;  %v13786_v10 = vadd.f32 %v15755_v59, %v12701_v26  ;;  %v4223_v9 = vmul.f32 0.035677407, %v3929_v31 }
 0x392   : > { %v13782_v18 = vpop.f32.mrb[46].mxu0  ;;  %7254 = vmatprep.mubr.bf16.mxu1 %v6150_v13  ;;  %v6149_v22 = vpack.c.bf16 %v5945_v35, %v5939_v3  ;;  %v13792_v21 = vadd.f32 %v15757_v60, %v12692_v33  ;;  %v13796_v1 = vadd.f32 %v15758_v61, %v12701_v26  ;;  %v9295_v15 = vpop.eup %9294  ;;  %9302 = vtanh.f32 %v4793_v40 }
 0x393   : > { %v13788_v25 = vpop.f32.mrb[47].mxu0  ;;  %v13799_v57 = vmul.f32 0.5, %v13725_v30  ;;  %v4805_v11 = vmul.f32 %v4511_v12, %v13748_v43  ;;  %v3930_v53 = vmul.f32 %v13786_v10, %v13786_v10  ;;  %v13804_v6 = vpop.eup %9296  ;;  %9304 = vtanh.f32 %v4799_v5 }
 0x394   : > { %15756 = vst [vmem:[#allocation48_spill] sm:$0xff] %v13788_v25  ;;  %v13806_v52 = vmul.f32 0.5, %v3356_v56  ;;  %7255 = vmatmul.mubr.bf16.gmra.mrb[156].mxu1 %v6149_v22  ;;  %v3935_v27 = vmul.f32 %v13792_v21, %v13792_v21  ;;  %v3936_v51 = vmul.f32 %v13796_v1, %v13796_v1  ;;  %9306 = vtanh.f32 %v4800_v58  ;;  %v15759_v56 = vld [vmem:[#allocation40_spill] sm:$0xff] }
 0x395   : > { %v13813_v30 = vmul.f32 0.5, %v13748_v43  ;;  %v4806_v20 = vmul.f32 %v4512_v17, %v13755_v54  ;;  %v5658_v41 = vadd.f32 1.0, %v9291_v48  ;;  %v4517_v38 = vadd.f32 0.7978846, %v4223_v9 }
 0x396   : > { %v4224_v40 = vmul.f32 0.035677407, %v3930_v53  ;;  %v5664_v12 = vadd.f32 1.0, %v9295_v15  ;;  %v13818_v31 = vadd.f32 %v15759_v56, %v12692_v33  ;;  %9308 = vtanh.f32 %v4805_v11 }
 0x397   : > { %v13823_v13 = vmul.f32 0.5, %v13755_v54  ;;  %v4229_v3 = vmul.f32 0.035677407, %v3935_v27  ;;  %v5657_v35 = vadd.f32 1.0, %v9289_v42  ;;  %v4230_v58 = vmul.f32 0.035677407, %v3936_v51 }
 0x398   : > { %v13820_v5 = vpop.f32.mrb[48].mxu0  ;;  %v5952_v48 = vmul.f32 %v5658_v41, %v13704_v39  ;;  %v5958_v17 = vmul.f32 %v5664_v12, %v13715_v14  ;;  %v3941_v59 = vmul.f32 %v13818_v31, %v13818_v31  ;;  %v9299_v22 = vpop.eup %9298  ;;  %9310 = vtanh.f32 %v4806_v20  ;;  %v15763_v20 = vld [vmem:[#allocation43_spill] sm:$0xff] }
 0x399   : > { %v13825_v43 = vpop.f32.mrb[49].mxu0  ;;  %v13834_v60 = vmul.f32 0.5, %v13769_v28  ;;  %v13837_v54 = vmul.f32 0.5, %v13786_v10  ;;  %v5663_v42 = vadd.f32 1.0, %v9293_v44  ;;  %v4811_v39 = vmul.f32 %v4517_v38, %v13769_v28  ;;  %v15764_v38 = vld [vmem:[#allocation42_spill] sm:$0xff] }
 0x39a   : > { %15760 = vst [vmem:[#allocation51_spill] sm:$0xff] %v13825_v43  ;;  %v13831_v9 = vpop.f32.mrb[50].mxu0  ;;  %v4518_v15 = vadd.f32 0.7978846, %v4224_v40  ;;  %v6156_v14 = vpack.c.bf16 %v5958_v17, %v5952_v48  ;;  %v5951_v11 = vmul.f32 %v5657_v35, %v13675_v49  ;;  %v9301_v53 = vpop.eup %9300  ;;  %v4235_v27 = vmul.f32 0.035677407, %v3941_v59 }
 0x39b   : > { %15761 = vst [vmem:[#allocation50_spill] sm:$0xff] %v13831_v9  ;;  %v13839_v61 = vpop.f32.mrb[51].mxu0  ;;  %v5957_v51 = vmul.f32 %v5663_v42, %v13712_v29  ;;  %v3376_v41 = vadd.f32 %v15763_v20, %v12701_v26  ;;  %v13848_v12 = vadd.f32 %v13506_v19, %v12692_v33  ;;  %v4523_v44 = vadd.f32 0.7978846, %v4229_v3 }
 0x39c   : > { %15762 = vst [vmem:[#allocation53_spill] sm:$0xff] %v13839_v61  ;;  %v13851_v56 = vmul.f32 0.5, %v13792_v21  ;;  %v4524_v28 = vadd.f32 0.7978846, %v4230_v58  ;;  %7264 = vmatprep.mubr.bf16.mxu1 %v6156_v14  ;;  %v13855_v49 = vadd.f32 %v15764_v38, %v12701_v26  ;;  %v9303_v40 = vpop.eup %9302  ;;  %v13858_v29 = vmul.f32 0.5, %v13796_v1 }
 0x39d   : > { %v6155_v35 = vpack.c.bf16 %v5957_v51, %v5951_v11  ;;  %v3942_v48 = vmul.f32 %v3376_v41, %v3376_v41  ;;  %v5670_v17 = vadd.f32 1.0, %v9299_v22  ;;  %v13860_v59 = vpop.eup %9304  ;;  %v4812_v19 = vmul.f32 %v4518_v15, %v13786_v10 }
 0x39e   : > { %v13864_v3 = vmul.f32 0.5, %v13818_v31  ;;  %v3947_v58 = vmul.f32 %v13848_v12, %v13848_v12  ;;  %v3948_v42 = vmul.f32 %v13855_v49, %v13855_v49  ;;  %v9307_v20 = vpop.eup %9306  ;;  %9312 = vtanh.f32 %v4811_v39 }
 0x39f   : > { %v4529_v11 = vadd.f32 0.7978846, %v4235_v27  ;;  %7265 = vmatmul.mubr.bf16.gmra.mrb[160].mxu1 %v6155_v35  ;;  %v4236_v22 = vmul.f32 0.035677407, %v3942_v48  ;;  %v5676_v51 = vadd.f32 1.0, %v9301_v53  ;;  %v4817_v10 = vmul.f32 %v4523_v44, %v13792_v21 }
 0x3a0   : > { %v13870_v14 = vpop.f32.mrb[52].mxu0  ;;  %v4818_v15 = vmul.f32 %v4524_v28, %v13796_v1  ;;  %v4241_v61 = vmul.f32 0.035677407, %v3947_v58  ;;  %v3384_v9 = vadd.f32 %v13548_v32, %v12692_v33  ;;  %v9309_v25 = vpop.eup %9308  ;;  %v5669_v27 = vadd.f32 1.0, %v13804_v6 }
 0x3a1   : > { %15765 = vst [vmem:[#allocation52_spill] sm:$0xff] %v13870_v14  ;;  %v13872_v38 = vpop.f32.mrb[53].mxu0  ;;  %v5964_v14 = vmul.f32 %v5670_v17, %v13736_v37  ;;  %v5970_v39 = vmul.f32 %v5676_v51, %v13758_v16  ;;  %v5675_v53 = vadd.f32 1.0, %v9303_v40  ;;  %9314 = vtanh.f32 %v4812_v19 }
 0x3a2   : > { %v13878_v43 = vpop.f32.mrb[54].mxu0  ;;  %v4530_v21 = vadd.f32 0.7978846, %v4236_v22  ;;  %v4242_v44 = vmul.f32 0.035677407, %v3948_v42  ;;  %v3953_v1 = vmul.f32 %v3384_v9, %v3384_v9  ;;  %v9311_v28 = vpop.eup %9310  ;;  %v4823_v48 = vmul.f32 %v4529_v11, %v13818_v31 }
 0x3a3   : > { %15766 = vst [vmem:[#allocation55_spill] sm:$0xff] %v13878_v43  ;;  %v13883_v35 = vpop.f32.mrb[55].mxu0  ;;  %v6162_v32 = vpack.c.bf16 %v5970_v39, %v5964_v14  ;;  %v5963_v58 = vmul.f32 %v5669_v27, %v13728_v7  ;;  %v5969_v43 = vmul.f32 %v5675_v53, %v13751_v63  ;;  %9316 = vtanh.f32 %v4817_v10 }
 0x3a4   : > { %v4535_v37 = vadd.f32 0.7978846, %v4241_v61  ;;  %v4247_v16 = vmul.f32 0.035677407, %v3953_v1  ;;  %v3386_v6 = vadd.f32 %v13555_v46, %v12701_v26  ;;  %9318 = vtanh.f32 %v4818_v15 }
 0x3a5   : > { %7274 = vmatprep.mubr.bf16.mxu1 %v6162_v32  ;;  %v6161_v40 = vpack.c.bf16 %v5969_v43, %v5963_v58  ;;  %v3388_v17 = vadd.f32 %v13558_v45, %v12692_v33  ;;  %v13894_v31 = vadd.f32 %v13563_v62, %v12701_v26  ;;  %v4824_v19 = vmul.f32 %v4530_v21, %v3376_v41 }
 0x3a6   : > { %v13896_v7 = vmul.f32 0.5, %v3376_v41  ;;  %v4536_v63 = vadd.f32 0.7978846, %v4242_v44  ;;  %v3954_v42 = vmul.f32 %v3386_v6, %v3386_v6  ;;  %9320 = vtanh.f32 %v4823_v48 }
 0x3a7   : > { %v13901_v46 = vmul.f32 0.5, %v13848_v12  ;;  %7275 = vmatmul.mubr.bf16.gmra.mrb[164].mxu1 %v6161_v40  ;;  %v3959_v43 = vmul.f32 %v3388_v17, %v3388_v17  ;;  %v3960_v45 = vmul.f32 %v13894_v31, %v13894_v31  ;;  %v4829_v62 = vmul.f32 %v4535_v37, %v13848_v12 }
 0x3a8   : > { %v13898_v61 = vpop.f32.mrb[56].mxu0  ;;  %v4541_v11 = vadd.f32 0.7978846, %v4247_v16  ;;  %v4248_v41 = vmul.f32 0.035677407, %v3954_v42  ;;  %v5682_v22 = vadd.f32 1.0, %v9307_v20  ;;  %v9313_v10 = vpop.eup %9312  ;;  %v13912_v53 = vadd.f32 %v13602_v55, %v12692_v33 }
 0x3a9   : > { %v13905_v14 = vpop.f32.mrb[57].mxu0  ;;  %v4253_v15 = vmul.f32 0.035677407, %v3959_v43  ;;  %v4254_v39 = vmul.f32 0.035677407, %v3960_v45  ;;  %v5688_v27 = vadd.f32 1.0, %v9311_v28  ;;  %9322 = vtanh.f32 %v4824_v19 }
 0x3aa   : > { %v13908_v51 = vpop.f32.mrb[58].mxu0  ;;  %v4830_v44 = vmul.f32 %v4536_v63, %v13855_v49  ;;  %v13918_v12 = vmul.f32 0.5, %v13855_v49  ;;  %v5681_v20 = vadd.f32 1.0, %v13860_v59  ;;  %v4542_v1 = vadd.f32 0.7978846, %v4248_v41 }
 0x3ab   : > { %v13914_v21 = vpop.f32.mrb[59].mxu0  ;;  %v5976_v48 = vmul.f32 %v5682_v22, %v13806_v52  ;;  %v5982_v32 = vmul.f32 %v5688_v27, %v13823_v13  ;;  %v3965_v28 = vmul.f32 %v13912_v53, %v13912_v53  ;;  %v9315_v55 = vpop.eup %9314  ;;  %9324 = vtanh.f32 %v4829_v62  ;;  %v15767_v62 = vld [vmem:[#allocation45_spill] sm:$0xff] }
 0x3ac   : > { %v4835_v58 = vmul.f32 %v4541_v11, %v3384_v9  ;;  %v13925_v37 = vmul.f32 0.5, %v3384_v9  ;;  %v5687_v16 = vadd.f32 1.0, %v9309_v25  ;;  %v4547_v40 = vadd.f32 0.7978846, %v4253_v15 }
 0x3ad   : > { %v4548_v19 = vadd.f32 0.7978846, %v4254_v39  ;;  %v6168_v49 = vpack.c.bf16 %v5982_v32, %v5976_v48  ;;  %v4259_v63 = vmul.f32 0.035677407, %v3965_v28  ;;  %v9317_v42 = vpop.eup %9316  ;;  %v5975_v59 = vmul.f32 %v5681_v20, %v13799_v57 }
 0x3ae   : > { %v5981_v52 = vmul.f32 %v5687_v16, %v13813_v30  ;;  %v3396_v13 = vadd.f32 %v13605_v2, %v12701_v26  ;;  %v13933_v43 = vadd.f32 %v13611_v23, %v12692_v33  ;;  %v9319_v9 = vpop.eup %9318  ;;  %9326 = vtanh.f32 %v4830_v44 }
 0x3af   : > { %v4836_v25 = vmul.f32 %v4542_v1, %v3386_v6  ;;  %7284 = vmatprep.mubr.bf16.mxu1 %v6168_v49  ;;  %v3400_v11 = vadd.f32 %v15767_v62, %v12701_v26  ;;  %v5694_v41 = vadd.f32 1.0, %v9315_v55  ;;  %v13941_v30 = vmul.f32 0.5, %v3386_v6 }
 0x3b0   : > { %v13935_v45 = vpop.f32.mrb[60].mxu0  ;;  %v13943_v22 = vmul.f32 0.5, %v3388_v17  ;;  %v6167_v2 = vpack.c.bf16 %v5981_v52, %v5975_v59  ;;  %v3966_v15 = vmul.f32 %v3396_v13, %v3396_v13  ;;  %v13947_v39 = vpop.eup %9320  ;;  %v4841_v27 = vmul.f32 %v4547_v40, %v3388_v17  ;;  %v15768_v40 = vld [vmem:[#allocation44_spill] sm:$0xff] }
 0x3b1   : > { %v13939_v57 = vpop.f32.mrb[61].mxu0  ;;  %v4553_v44 = vadd.f32 0.7978846, %v4259_v63  ;;  %v3971_v20 = vmul.f32 %v13933_v43, %v13933_v43  ;;  %v3972_v1 = vmul.f32 %v3400_v11, %v3400_v11  ;;  %9328 = vtanh.f32 %v4835_v58 }
 0x3b2   : > { %v13945_v23 = vpop.f32.mrb[62].mxu0  ;;  %v4842_v6 = vmul.f32 %v4548_v19, %v13894_v31  ;;  %7285 = vmatmul.mubr.bf16.gmra.mrb[168].mxu1 %v6167_v2  ;;  %v4260_v32 = vmul.f32 0.035677407, %v3966_v15  ;;  %v5700_v28 = vadd.f32 1.0, %v9319_v9  ;;  %9330 = vtanh.f32 %v4836_v25 }
 0x3b3   : > { %v13951_v48 = vpop.f32.mrb[63].mxu0  ;;  %v4265_v55 = vmul.f32 0.035677407, %v3971_v20  ;;  %v4266_v16 = vmul.f32 0.035677407, %v3972_v1  ;;  %v5988_v49 = vmul.f32 %v5694_v41, %v13837_v54  ;;  %v9323_v59 = vpop.eup %9322  ;;  %v13958_v63 = vadd.f32 %v15768_v40, %v12692_v33 }
 0x3b4   : > { %v5994_v17 = vmul.f32 %v5700_v28, %v13858_v29  ;;  %v5693_v52 = vadd.f32 1.0, %v9313_v10  ;;  %v5699_v62 = vadd.f32 1.0, %v9317_v42  ;;  %9332 = vtanh.f32 %v4841_v27 }
 0x3b5   : > { %v13961_v58 = vmul.f32 0.5, %v13894_v31  ;;  %v4847_v19 = vmul.f32 %v4553_v44, %v13912_v53  ;;  %v4554_v9 = vadd.f32 0.7978846, %v4260_v32  ;;  %v9325_v25 = vpop.eup %9324  ;;  %v4560_v2 = vadd.f32 0.7978846, %v4266_v16  ;;  %v15770_v31 = vld [vmem:[#allocation47_spill] sm:$0xff] }
 0x3b6   : > { %v6174_v15 = vpack.c.bf16 %v5994_v17, %v5988_v49  ;;  %v5987_v54 = vmul.f32 %v5693_v52, %v13834_v60  ;;  %v5993_v29 = vmul.f32 %v5699_v62, %v13851_v56  ;;  %9334 = vtanh.f32 %v4842_v6  ;;  %v15772_v60 = vld [vmem:[#allocation46_spill] sm:$0xff]  ;;  %v15773_v6 = vld [vmem:[#allocation49_spill] sm:$0xff] }
 0x3b7   : > { %v13969_v10 = vmul.f32 0.5, %v13912_v53  ;;  %v4559_v42 = vadd.f32 0.7978846, %v4265_v55  ;;  %v3406_v27 = vadd.f32 %v15770_v31, %v12701_v26  ;;  %v3977_v44 = vmul.f32 %v13958_v63, %v13958_v63 }
 0x3b8   : > { %v13966_v41 = vpop.f32.mrb[64].mxu0  ;;  %7294 = vmatprep.mubr.bf16.mxu1 %v6174_v15  ;;  %v6173_v1 = vpack.c.bf16 %v5993_v29, %v5987_v54  ;;  %v13979_v56 = vadd.f32 %v15772_v60, %v12692_v33  ;;  %v13983_v32 = vadd.f32 %v15773_v6, %v12701_v26  ;;  %v9327_v28 = vpop.eup %9326  ;;  %v4848_v55 = vmul.f32 %v4554_v9, %v3396_v13 }
 0x3b9   : > { %15769 = vst [vmem:[#allocation54_spill] sm:$0xff] %v13966_v41  ;;  %v13973_v20 = vpop.f32.mrb[65].mxu0  ;;  %v13987_v16 = vmul.f32 0.5, %v3396_v13  ;;  %v13990_v49 = vmul.f32 0.5, %v13933_v43  ;;  %v3978_v17 = vmul.f32 %v3406_v27, %v3406_v27  ;;  %9336 = vtanh.f32 %v4847_v19 }
 0x3ba   : > { %15771 = vst [vmem:[#allocation57_spill] sm:$0xff] %v13973_v20  ;;  %v13985_v53 = vpop.f32.mrb[66].mxu0  ;;  %v4854_v52 = vmul.f32 %v4560_v2, %v3400_v11  ;;  %v13994_v62 = vmul.f32 0.5, %v3400_v11  ;;  %7295 = vmatmul.mubr.bf16.gmra.mrb[172].mxu1 %v6173_v1  ;;  %v3984_v15 = vmul.f32 %v13983_v32, %v13983_v32  ;;  %v4853_v54 = vmul.f32 %v4559_v42, %v13933_v43 }
 0x3bb   : > { %15774 = vst [vmem:[#allocation56_spill] sm:$0xff] %v13985_v53  ;;  %v13992_v40 = vpop.f32.mrb[67].mxu0  ;;  %v4272_v29 = vmul.f32 0.035677407, %v3978_v17  ;;  %v3983_v13 = vmul.f32 %v13979_v56, %v13979_v56  ;;  %v5706_v9 = vadd.f32 1.0, %v9323_v59  ;;  %v9329_v31 = vpop.eup %9328  ;;  %v5712_v53 = vadd.f32 1.0, %v9327_v28 }
 0x3bc   : > { %15775 = vst [vmem:[#allocation59_spill] sm:$0xff] %v13992_v40  ;;  %v4271_v60 = vmul.f32 0.035677407, %v3977_v44  ;;  %v4278_v6 = vmul.f32 0.035677407, %v3984_v15  ;;  %v14003_v19 = vadd.f32 %v13692_v47, %v12692_v33  ;;  %v9331_v11 = vpop.eup %9330  ;;  %9338 = vtanh.f32 %v4848_v55 }
 0x3bd   : > { %v14006_v2 = vmul.f32 0.5, %v13958_v63  ;;  %v4566_v1 = vadd.f32 0.7978846, %v4272_v29  ;;  %v5705_v43 = vadd.f32 1.0, %v13947_v39  ;;  %9340 = vtanh.f32 %v4854_v52 }
 0x3be   : > { %v4572_v42 = vadd.f32 0.7978846, %v4278_v6  ;;  %v6000_v59 = vmul.f32 %v5706_v9, %v13896_v7  ;;  %v6006_v44 = vmul.f32 %v5712_v53, %v13918_v12  ;;  %v9333_v28 = vpop.eup %9332  ;;  %9342 = vtanh.f32 %v4853_v54 }
 0x3bf   : > { %v4860_v47 = vmul.f32 %v4566_v1, %v3406_v27  ;;  %v4277_v15 = vmul.f32 0.035677407, %v3983_v13  ;;  %v5711_v40 = vadd.f32 1.0, %v9325_v25  ;;  %v4565_v20 = vadd.f32 0.7978846, %v4271_v60 }
 0x3c0   : > { %v14011_v17 = vpop.f32.mrb[68].mxu0  ;;  %v4866_v29 = vmul.f32 %v4572_v42, %v13983_v32  ;;  %v6180_v41 = vpack.c.bf16 %v6006_v44, %v6000_v59  ;;  %v3989_v39 = vmul.f32 %v14003_v19, %v14003_v19  ;;  %v9335_v7 = vpop.eup %9334  ;;  %v5999_v12 = vmul.f32 %v5705_v43, %v13864_v3 }
 0x3c1   : > { %v14013_v55 = vpop.f32.mrb[69].mxu0  ;;  %v6005_v53 = vmul.f32 %v5711_v40, %v13901_v46  ;;  %v14024_v54 = vadd.f32 %v13702_v34, %v12701_v26  ;;  %v14028_v25 = vadd.f32 %v13708_v50, %v12692_v33  ;;  %v14032_v9 = vmul.f32 0.5, %v3406_v27 }
 0x3c2   : > { %v14018_v52 = vpop.f32.mrb[70].mxu0  ;;  %v14035_v60 = vmul.f32 0.5, %v13979_v56  ;;  %7304 = vmatprep.mubr.bf16.mxu1 %v6180_v41  ;;  %v14039_v3 = vadd.f32 %v13719_v4, %v12701_v26  ;;  %v5718_v46 = vadd.f32 1.0, %v9331_v11  ;;  %9344 = vtanh.f32 %v4860_v47 }
 0x3c3   : > { %v14030_v13 = vpop.f32.mrb[71].mxu0  ;;  %v4571_v34 = vadd.f32 0.7978846, %v4277_v15  ;;  %v6179_v40 = vpack.c.bf16 %v6005_v53, %v5999_v12  ;;  %v3990_v50 = vmul.f32 %v14024_v54, %v14024_v54  ;;  %v9337_v6 = vpop.eup %9336  ;;  %9346 = vtanh.f32 %v4866_v29 }
 0x3c4   : > { %v4283_v1 = vmul.f32 0.035677407, %v3989_v39  ;;  %v3995_v27 = vmul.f32 %v14028_v25, %v14028_v25  ;;  %v3996_v41 = vmul.f32 %v14039_v3, %v14039_v3  ;;  %v4859_v43 = vmul.f32 %v4565_v20, %v13958_v63 }
 0x3c5   : > { %v14049_v4 = vmul.f32 0.5, %v13983_v32  ;;  %7305 = vmatmul.mubr.bf16.gmra.mrb[176].mxu1 %v6179_v40  ;;  %v4284_v11 = vmul.f32 0.035677407, %v3990_v50  ;;  %v5724_v42 = vadd.f32 1.0, %v9335_v7  ;;  %v6012_v47 = vmul.f32 %v5718_v46, %v13941_v30 }
 0x3c6   : > { %v4289_v59 = vmul.f32 0.035677407, %v3995_v27  ;;  %v4290_v44 = vmul.f32 0.035677407, %v3996_v41  ;;  %v14054_v15 = vadd.f32 %v13738_v8, %v12692_v33  ;;  %v9339_v39 = vpop.eup %9338  ;;  %v5717_v20 = vadd.f32 1.0, %v9329_v31 }
 0x3c7   : > { %v4578_v12 = vadd.f32 0.7978846, %v4284_v11  ;;  %v6018_v63 = vmul.f32 %v5724_v42, %v13961_v58  ;;  %v5723_v32 = vadd.f32 1.0, %v9333_v28  ;;  %v9341_v40 = vpop.eup %9340  ;;  %v4865_v7 = vmul.f32 %v4571_v34, %v13979_v56 }
 0x3c8   : > { %v14056_v29 = vpop.f32.mrb[72].mxu0  ;;  %v4577_v50 = vadd.f32 0.7978846, %v4283_v1  ;;  %v4584_v27 = vadd.f32 0.7978846, %v4290_v44  ;;  %v4001_v30 = vmul.f32 %v14054_v15, %v14054_v15  ;;  %v9343_v8 = vpop.eup %9342  ;;  %v6011_v11 = vmul.f32 %v5717_v20, %v13925_v37 }
 0x3c9   : > { %v14059_v53 = vpop.f32.mrb[73].mxu0  ;;  %v4583_v46 = vadd.f32 0.7978846, %v4289_v59  ;;  %v6186_v41 = vpack.c.bf16 %v6018_v63, %v6012_v47  ;;  %v6017_v58 = vmul.f32 %v5723_v32, %v13943_v22  ;;  %9348 = vtanh.f32 %v4859_v43  ;;  %v15776_v63 = vld [vmem:[#allocation33_spill] sm:$0xff] }
 0x3ca   : > { %v14064_v33 = vpop.f32.mrb[74].mxu0  ;;  %v14071_v28 = vmul.f32 0.5, %v14003_v19  ;;  %v4872_v56 = vmul.f32 %v4578_v12, %v14024_v54  ;;  %v14076_v34 = vadd.f32 %v13741_v0, %v12701_v26  ;;  %v4295_v1 = vmul.f32 0.035677407, %v4001_v30  ;;  %v9561_v30 = vld [vmem:[%s15370_s3] sm:$0x3f] }
 0x3cb   : > { %v14068_v31 = vpop.f32.mrb[75].mxu0  ;;  %7314 = vmatprep.mubr.bf16.mxu1 %v6186_v41  ;;  %v6185_v42 = vpack.c.bf16 %v6017_v58, %v6011_v11  ;;  %v5730_v59 = vadd.f32 1.0, %v9339_v39  ;;  %v5736_v44 = vadd.f32 1.0, %v9341_v40  ;;  %9350 = vtanh.f32 %v4865_v7 }
 0x3cc   : > { %v4871_v37 = vmul.f32 %v4577_v50, %v14003_v19  ;;  %v4878_v22 = vmul.f32 %v4584_v27, %v14039_v3  ;;  %v4002_v43 = vmul.f32 %v14076_v34, %v14076_v34  ;;  %v9345_v47 = vpop.eup %9344  ;;  %v4877_v12 = vmul.f32 %v4583_v46, %v14028_v25 }
 0x3cd   : > { %7315 = vmatmul.mubr.bf16.gmra.mrb[180].mxu1 %v6185_v42  ;;  %v6024_v26 = vmul.f32 %v5730_v59, %v13987_v16  ;;  %v6030_v0 = vmul.f32 %v5736_v44, %v13994_v62  ;;  %v2421_v20 = vsub.s32 4, %v15776_v63  ;;  %v9347_v39 = vpop.eup %9346  ;;  %9352 = vtanh.f32 %v4872_v56 }
 0x3ce   : > { %v4296_v32 = vmul.f32 0.035677407, %v4002_v43  ;;  %v5729_v40 = vadd.f32 1.0, %v9337_v6  ;;  %v5735_v19 = vadd.f32 1.0, %v9343_v8  ;;  %v4589_v50 = vadd.f32 0.7978846, %v4295_v1 }
 0x3cf   : > { %v6192_v27 = vpack.c.bf16 %v6030_v0, %v6024_v26  ;;  %v14091_v46 = vrot.slane %v9561_v30, %v2421_v20  ;;  %v2425_v16 = vsub.s32 5, %v15776_v63  ;;  %9354 = vtanh.f32 %v4878_v22  ;;  %v15777_v0 = vld [vmem:[#allocation48_spill] sm:$0xff] }
 0x3d0   : > { %v14086_v7 = vpop.f32.mrb[76].mxu0  ;;  %v6023_v41 = vmul.f32 %v5729_v40, %v13969_v10  ;;  %v6029_v6 = vmul.f32 %v5735_v19, %v13990_v49  ;;  %v5742_v8 = vadd.f32 1.0, %v9345_v47  ;;  %v5748_v42 = vadd.f32 1.0, %v9347_v39 }
 0x3d1   : > { %v14094_v62 = vpop.f32.mrb[77].mxu0  ;;  %7324 = vmatprep.mubr.bf16.mxu1 %v6192_v27  ;;  %v3465_v58 = vadd.f32 %v13772_v24, %v14091_v46  ;;  %v14102_v56 = vrot.slane %v9561_v30, %v2425_v16  ;;  %v3469_v1 = vadd.f32 %v13782_v18, %v14091_v46  ;;  %v14109_v44 = vmul.f32 0.5, %v14024_v54 }
 0x3d2   : > { %v14098_v11 = vpop.f32.mrb[78].mxu0  ;;  %v4590_v10 = vadd.f32 0.7978846, %v4296_v32  ;;  %v6191_v49 = vpack.c.bf16 %v6029_v6, %v6023_v41  ;;  %v14113_v22 = vadd.f32 %v13820_v5, %v14091_v46  ;;  %9356 = vtanh.f32 %v4871_v37 }
 0x3d3   : > { %v14106_v59 = vpop.f32.mrb[79].mxu0  ;;  %v3715_v43 = vmul.f32 %v3465_v58, %v3465_v58  ;;  %v3467_v24 = vadd.f32 %v13777_v36, %v14102_v56  ;;  %v3721_v47 = vmul.f32 %v3469_v1, %v3469_v1  ;;  %v9349_v26 = vpop.eup %9348  ;;  %v4883_v18 = vmul.f32 %v4589_v50, %v14054_v15 }
 0x3d4   : > { %v14120_v20 = vadd.f32 %v15777_v0, %v14102_v56  ;;  %v6036_v54 = vmul.f32 %v5742_v8, %v14032_v9  ;;  %v6042_v39 = vmul.f32 %v5748_v42, %v14049_v4  ;;  %9358 = vtanh.f32 %v4877_v12  ;;  %v15779_v12 = vld [vmem:[#allocation51_spill] sm:$0xff] }
 0x3d5   : > { %v4009_v5 = vmul.f32 0.035677407, %v3715_v43  ;;  %7325 = vmatmul.mubr.bf16.gmra.mrb[184].mxu1 %v6191_v49  ;;  %v3716_v37 = vmul.f32 %v3467_v24, %v3467_v24  ;;  %v4015_v32 = vmul.f32 0.035677407, %v3721_v47  ;;  %v9351_v40 = vpop.eup %9350  ;;  %v4884_v36 = vmul.f32 %v4590_v10, %v14076_v34 }
 0x3d6   : > { %v3722_v19 = vmul.f32 %v14120_v20, %v14120_v20  ;;  %v6198_v50 = vpack.c.bf16 %v6042_v39, %v6036_v54  ;;  %v3727_v27 = vmul.f32 %v14113_v22, %v14113_v22  ;;  %v14133_v41 = vadd.f32 %v15779_v12, %v14102_v56 }
 0x3d7   : > { %v4303_v9 = vadd.f32 0.7978846, %v4009_v5  ;;  %v4010_v16 = vmul.f32 0.035677407, %v3716_v37  ;;  %v4309_v4 = vadd.f32 0.7978846, %v4015_v32  ;;  %v9353_v6 = vpop.eup %9352  ;;  %9360 = vtanh.f32 %v4883_v18 }
 0x3d8   : > { %v14129_v30 = vpop.f32.mrb[80].mxu0  ;;  %v14136_v8 = vmul.f32 0.5, %v14028_v25  ;;  %v5466_v42 = vmul.f32 0.5, %v14039_v3  ;;  %7334 = vmatprep.mubr.bf16.mxu1 %v6198_v50  ;;  %v5741_v10 = vadd.f32 1.0, %v9349_v26  ;;  %v4016_v47 = vmul.f32 0.035677407, %v3722_v19 }
 0x3d9   : > { %15778 = vst [vmem:[#allocation58_spill] sm:$0xff] %v14129_v30  ;;  %v4597_v49 = vmul.f32 %v4303_v9, %v3465_v58  ;;  %v4603_v43 = vmul.f32 %v4309_v4, %v3469_v1  ;;  %v5747_v0 = vadd.f32 1.0, %v9351_v40  ;;  %v14139_v54 = vpop.f32.mrb[81].mxu0  ;;  %v9355_v39 = vpop.eup %9354  ;;  %v14142_v5 = vmul.f32 0.5, %v14054_v15  ;;  %v15783_v4 = vld [vmem:[#allocation50_spill] sm:$0xff] }
 0x3da   : > { %15780 = vst [vmem:[#allocation61_spill] sm:$0xff] %v14139_v54  ;;  %9362 = vtanh.f32 %v4884_v36  ;;  %v4021_v37 = vmul.f32 0.035677407, %v3727_v27  ;;  %v3728_v25 = vmul.f32 %v14133_v41, %v14133_v41  ;;  %v14146_v32 = vpop.f32.mrb[82].mxu0  ;;  %v4304_v3 = vadd.f32 0.7978846, %v4010_v16 }
 0x3db   : > { %15781 = vst [vmem:[#allocation60_spill] sm:$0xff] %v14146_v32  ;;  %9364 = vtanh.f32 %v4597_v49  ;;  %v6035_v26 = vmul.f32 %v5741_v10, %v14006_v2  ;;  %v6041_v18 = vmul.f32 %v5747_v0, %v14035_v60  ;;  %v14150_v40 = vpop.f32.mrb[83].mxu0  ;;  %v14153_v19 = vmul.f32 0.5, %v14076_v34  ;;  %v15784_v2 = vld [vmem:[#allocation53_spill] sm:$0xff] }
 0x3dc   : > { %15782 = vst [vmem:[#allocation63_spill] sm:$0xff] %v14150_v40  ;;  %v14155_v15 = vmul.f32 0.5, %v3465_v58  ;;  %9366 = vtanh.f32 %v4603_v43  ;;  %v14157_v36 = vmul.f32 0.5, %v3469_v1  ;;  %v9357_v50 = vpop.eup %9356  ;;  %v4310_v27 = vadd.f32 0.7978846, %v4016_v47 }
 0x3dd   : > { %v6197_v9 = vpack.c.bf16 %v6041_v18, %v6035_v26  ;;  %v14161_v16 = vadd.f32 %v15783_v4, %v14091_v46  ;;  %v3481_v60 = vadd.f32 %v15784_v2, %v14102_v56  ;;  %v14165_v12 = vmul.f32 0.5, %v3467_v24 }
 0x3de   : > { %v4022_v10 = vmul.f32 0.035677407, %v3728_v25  ;;  %v5754_v34 = vadd.f32 1.0, %v9353_v6  ;;  %v5760_v49 = vadd.f32 1.0, %v9355_v39  ;;  %v9359_v43 = vpop.eup %9358  ;;  %v4598_v1 = vmul.f32 %v4304_v3, %v3467_v24  ;;  %v15787_v3 = vld [vmem:[#allocation52_spill] sm:$0xff] }
 0x3df   : > { %v4315_v0 = vadd.f32 0.7978846, %v4021_v37  ;;  %7335 = vmatmul.mubr.bf16.gmra.mrb[188].mxu1 %v6197_v9  ;;  %v3733_v47 = vmul.f32 %v14161_v16, %v14161_v16  ;;  %v3734_v26 = vmul.f32 %v3481_v60, %v3481_v60  ;;  %v14174_v4 = vmul.f32 0.5, %v14120_v20 }
 0x3e0   : > { %v14167_v58 = vpop.f32.mrb[84].mxu0  ;;  %v14177_v2 = vmul.f32 0.5, %v14113_v22  ;;  %v6048_v6 = vmul.f32 %v5754_v34, %v14109_v44  ;;  %v6054_v39 = vmul.f32 %v5760_v49, %v5466_v42  ;;  %v4604_v24 = vmul.f32 %v4310_v27, %v14120_v20 }
 0x3e1   : > { %15785 = vst [vmem:[#allocation62_spill] sm:$0xff] %v14167_v58  ;;  %v14171_v18 = vpop.f32.mrb[85].mxu0  ;;  %v4028_v37 = vmul.f32 0.035677407, %v3734_v26  ;;  %v3485_v9 = vadd.f32 %v15787_v3, %v14091_v46  ;;  %v5753_v63 = vadd.f32 1.0, %v9357_v50  ;;  %v5759_v54 = vadd.f32 1.0, %v9359_v43 }
 0x3e2   : > { %15786 = vst [vmem:[#allocation65_spill] sm:$0xff] %v14171_v18  ;;  %v14180_v25 = vpop.f32.mrb[86].mxu0  ;;  %v9361_v18 = vpop.eup %9360  ;;  %v4316_v40 = vadd.f32 0.7978846, %v4022_v10  ;;  %v6204_v32 = vpack.c.bf16 %v6054_v39, %v6048_v6  ;;  %v14189_v30 = vadd.f32 %v13872_v38, %v14102_v56  ;;  %9368 = vtanh.f32 %v4598_v1 }
 0x3e3   : > { %v14185_v58 = vpop.f32.mrb[87].mxu0  ;;  %v4609_v44 = vmul.f32 %v4315_v0, %v14113_v22  ;;  %v4027_v42 = vmul.f32 0.035677407, %v3733_v47  ;;  %v3739_v20 = vmul.f32 %v3485_v9, %v3485_v9  ;;  %v4322_v34 = vadd.f32 0.7978846, %v4028_v37  ;;  %v15788_v22 = vld [vmem:[#allocation55_spill] sm:$0xff] }
 0x3e4   : > { %v9363_v27 = vpop.eup %9362  ;;  %7344 = vmatprep.mubr.bf16.mxu1 %v6204_v32  ;;  %v6047_v50 = vmul.f32 %v5753_v63, %v14071_v28  ;;  %v6053_v49 = vmul.f32 %v5759_v54, %v14136_v8  ;;  %v3740_v10 = vmul.f32 %v14189_v30, %v14189_v30  ;;  %9370 = vtanh.f32 %v4604_v24 }
 0x3e5   : > { %v9365_v43 = vpop.eup %9364  ;;  %v14197_v38 = vmul.f32 0.5, %v14133_v41  ;;  %v4033_v1 = vmul.f32 0.035677407, %v3739_v20  ;;  %v14201_v0 = vadd.f32 %v15788_v22, %v14091_v46  ;;  %v4610_v32 = vmul.f32 %v4316_v40, %v14133_v41 }
 0x3e6   : > { %v9367_v47 = vpop.eup %9366  ;;  %v5479_v26 = vadd.f32 1.0, %v9365_v43  ;;  %v6203_v28 = vpack.c.bf16 %v6053_v49, %v6047_v50  ;;  %v3491_v63 = vadd.f32 %v13883_v35, %v14102_v56  ;;  %9372 = vtanh.f32 %v4609_v44 }
 0x3e7   : > { %v5485_v54 = vadd.f32 1.0, %v9367_v47  ;;  %v4321_v6 = vadd.f32 0.7978846, %v4027_v42  ;;  %v3745_v39 = vmul.f32 %v14201_v0, %v14201_v0  ;;  %v14213_v37 = vmul.f32 0.5, %v14161_v16 }
 0x3e8   : > { %v14206_v8 = vpop.f32.mrb[88].mxu0  ;;  %v4616_v3 = vmul.f32 %v4322_v34, %v3481_v60  ;;  %v14215_v20 = vmul.f32 0.5, %v3481_v60  ;;  %7345 = vmatmul.mubr.bf16.gmra.mrb[192].mxu1 %v6203_v28  ;;  %v4034_v41 = vmul.f32 0.035677407, %v3740_v10  ;;  %v14220_v35 = vmul.f32 %v5479_v26, %v14155_v15 }
 0x3e9   : > { %v14210_v24 = vpop.f32.mrb[89].mxu0  ;;  %v14223_v44 = vmul.f32 %v5485_v54, %v14157_v36  ;;  %v4327_v42 = vadd.f32 0.7978846, %v4033_v1  ;;  %v3746_v50 = vmul.f32 %v3491_v63, %v3491_v63  ;;  %9374 = vtanh.f32 %v4610_v32 }
 0x3ea   : > { %v14217_v40 = vpop.f32.mrb[90].mxu0  ;;  %v4039_v43 = vmul.f32 0.035677407, %v3745_v39  ;;  %v5766_v22 = vadd.f32 1.0, %v9363_v27  ;;  %v3495_v60 = vadd.f32 %v13898_v61, %v14091_v46  ;;  %v4615_v10 = vmul.f32 %v4321_v6, %v14161_v16 }
 0x3eb   : > { %v14225_v49 = vpop.f32.mrb[91].mxu0  ;;  %v14232_v15 = vmul.f32 0.5, %v3485_v9  ;;  %v4040_v47 = vmul.f32 0.035677407, %v3746_v50  ;;  %9376 = vtanh.f32 %v4616_v3  ;;  %v4328_v36 = vadd.f32 0.7978846, %v4034_v41 }
 0x3ec   : > { %15789 = vst [vmem:[#allocation64_spill] sm:$0xff] %v14225_v49  ;;  %v6060_v1 = vmul.f32 %v5766_v22, %v14153_v19  ;;  %v3751_v26 = vmul.f32 %v3495_v60, %v3495_v60  ;;  %v9369_v28 = vpop.eup %9368  ;;  %v4621_v32 = vmul.f32 %v4327_v42, %v3485_v9  ;;  %v14236_v27 = vmul.f32 0.5, %v14189_v30 }
 0x3ed   : > { %v5765_v54 = vadd.f32 1.0, %v9361_v18  ;;  %v3497_v61 = vadd.f32 %v13905_v14, %v14102_v56  ;;  %v4333_v39 = vadd.f32 0.7978846, %v4039_v43  ;;  %v3499_v16 = vadd.f32 %v13908_v51, %v14091_v46 }
 0x3ee   : > { %v6210_v34 = vpack.c.bf16 %v6060_v1, %v6060_v1  ;;  %v14244_v6 = vadd.f32 %v13914_v21, %v14102_v56  ;;  %v9371_v3 = vpop.eup %9370  ;;  %v4334_v9 = vadd.f32 0.7978846, %v4040_v47  ;;  %v4045_v41 = vmul.f32 0.035677407, %v3751_v26 }
 0x3ef   : > { %v6059_v42 = vmul.f32 %v5765_v54, %v14142_v5  ;;  %v3752_v18 = vmul.f32 %v3497_v61, %v3497_v61  ;;  %9378 = vtanh.f32 %v4615_v10  ;;  %v4622_v14 = vmul.f32 %v4328_v36, %v14189_v30 }
 0x3f0   : > { %v14246_v19 = vpop.f32.mrb[92].mxu0  ;;  %v14253_v43 = vmul.f32 0.5, %v14201_v0  ;;  %7354 = vmatprep.mubr.bf16.mxu1 %v6210_v34  ;;  %v3757_v51 = vmul.f32 %v3499_v16, %v3499_v16  ;;  %v14257_v22 = vpop.eup %9372  ;;  %v14259_v1 = vmul.f32 0.5, %v3491_v63  ;;  %v3758_v5 = vmul.f32 %v14244_v6, %v14244_v6 }
 0x3f1   : > { %15790 = vst [vmem:[#allocation67_spill] sm:$0xff] %v14246_v19  ;;  %v14249_v50 = vpop.f32.mrb[93].mxu0  ;;  %v6209_v47 = vpack.c.bf16 %v6059_v42, %v6059_v42  ;;  %v4046_v26 = vmul.f32 0.035677407, %v3752_v18  ;;  %9380 = vtanh.f32 %v4621_v32  ;;  %v4627_v30 = vmul.f32 %v4333_v39, %v14201_v0 }
 0x3f2   : > { %15791 = vst [vmem:[#allocation66_spill] sm:$0xff] %v14249_v50  ;;  %v14255_v21 = vpop.f32.mrb[94].mxu0  ;;  %v4051_v10 = vmul.f32 0.035677407, %v3757_v51  ;;  %v5480_v36 = vadd.f32 1.0, %v9369_v28  ;;  %v4628_v34 = vmul.f32 %v4334_v9, %v3491_v63  ;;  %v14268_v19 = vadd.f32 %v13935_v45, %v14091_v46 }
 0x3f3   : > { %15792 = vst [vmem:[#allocation69_spill] sm:$0xff] %v14255_v21  ;;  %v14263_v54 = vpop.f32.mrb[95].mxu0  ;;  %v4339_v50 = vadd.f32 0.7978846, %v4045_v41  ;;  %7355 = vmatmul.mubr.bf16.gmra.mrb[196].mxu1 %v6209_v47  ;;  %v5486_v21 = vadd.f32 1.0, %v9371_v3  ;;  %v9375_v42 = vpop.eup %9374  ;;  %9382 = vtanh.f32 %v4622_v14  ;;  %v14274_v32 = vmul.f32 0.5, %v3495_v60 }
 0x3f4   : > { %15793 = vst [vmem:[#allocation68_spill] sm:$0xff] %v14263_v54  ;;  %v4340_v18 = vadd.f32 0.7978846, %v4046_v26  ;;  %v4052_v49 = vmul.f32 0.035677407, %v3758_v5  ;;  %v14272_v54 = vadd.f32 %v13939_v57, %v14102_v56  ;;  %v5774_v0 = vmul.f32 %v5480_v36, %v14165_v12 }
 0x3f5   : > { %v5780_v63 = vmul.f32 %v5486_v21, %v14174_v4  ;;  %v3763_v28 = vmul.f32 %v14268_v19, %v14268_v19  ;;  %v9377_v39 = vpop.eup %9376  ;;  %9384 = vtanh.f32 %v4627_v30  ;;  %v14280_v45 = vmul.f32 0.5, %v3497_v61 }
 0x3f6   : > { %v4345_v3 = vadd.f32 0.7978846, %v4051_v10  ;;  %v3764_v9 = vmul.f32 %v14272_v54, %v14272_v54  ;;  %9386 = vtanh.f32 %v4628_v34  ;;  %v4633_v57 = vmul.f32 %v4339_v50, %v3495_v60 }
 0x3f7   : > { %v14286_v14 = vmul.f32 0.5, %v3499_v16  ;;  %v6068_v12 = vpack.c.bf16 %v5780_v63, %v5774_v0  ;;  %v4634_v4 = vmul.f32 %v4340_v18, %v3497_v61  ;;  %v4346_v21 = vadd.f32 0.7978846, %v4052_v49 }
 0x3f8   : > { %v14284_v41 = vpop.f32.mrb[96].mxu0  ;;  %v14292_v47 = vadd.f32 %v13945_v23, %v14091_v46  ;;  %v3511_v26 = vadd.f32 %v13951_v48, %v14102_v56  ;;  %v14299_v30 = vmul.f32 0.5, %v14244_v6  ;;  %v4057_v60 = vmul.f32 0.035677407, %v3763_v28 }
 0x3f9   : > { %v14288_v51 = vpop.f32.mrb[97].mxu0  ;;  %7395 = vmatprep.mubr.bf16.mxu1 %v6068_v12  ;;  %v5492_v50 = vadd.f32 1.0, %v9375_v42  ;;  %v5498_v10 = vadd.f32 1.0, %v9377_v39  ;;  %v9379_v61 = vpop.eup %9378  ;;  %v4639_v49 = vmul.f32 %v4345_v3, %v3499_v16  ;;  %v4058_v34 = vmul.f32 0.035677407, %v3764_v9  ;;  %v15798_v3 = vld [vmem:[#allocation54_spill] sm:$0xff] }
 0x3fa   : > { %15794 = vst [vmem:[#allocation71_spill] sm:$0xff] %v14288_v51  ;;  %v14296_v5 = vpop.f32.mrb[98].mxu0  ;;  %v3769_v23 = vmul.f32 %v14292_v47, %v14292_v47  ;;  %v3770_v18 = vmul.f32 %v3511_v26, %v3511_v26  ;;  %9388 = vtanh.f32 %v4633_v57  ;;  %v14306_v48 = vmul.f32 0.5, %v14268_v19 }
 0x3fb   : > { %15795 = vst [vmem:[#allocation70_spill] sm:$0xff] %v14296_v5  ;;  %v14301_v36 = vpop.f32.mrb[99].mxu0  ;;  %v15797_v0 = vpack.c.bf16 %v14223_v44, %v14220_v35  ;;  %v5786_v42 = vmul.f32 %v5492_v50, %v14197_v38  ;;  %v5792_v63 = vmul.f32 %v5498_v10, %v14215_v20  ;;  %v9381_v28 = vpop.eup %9380  ;;  %9390 = vtanh.f32 %v4634_v4 }
 0x3fc   : > { %15796 = vst [vmem:[#allocation73_spill] sm:$0xff] %v14301_v36  ;;  %v4640_v16 = vmul.f32 %v4346_v21, %v14244_v6  ;;  %v4064_v39 = vmul.f32 0.035677407, %v3770_v18  ;;  %v3515_v9 = vadd.f32 %v15798_v3, %v14091_v46  ;;  %v4351_v57 = vadd.f32 0.7978846, %v4057_v60  ;;  %v15799_v21 = vld [vmem:[#allocation57_spill] sm:$0xff] }
 0x3fd   : > { %7396 = vmatmul.mubr.bf16.vlgmr.msra.gmra.mrb[100].mxu1 %v15797_v0  ;;  %v6074_v12 = vpack.c.bf16 %v5792_v63, %v5786_v42  ;;  %v5491_v36 = vadd.f32 1.0, %v14257_v22  ;;  %v5497_v5 = vadd.f32 1.0, %v9379_v61  ;;  %v9383_v51 = vpop.eup %9382  ;;  %9392 = vtanh.f32 %v4639_v49  ;;  %v15803_v0 = vld [vmem:[#allocation59_spill] sm:$0xff] }
 0x3fe   : > { %v4352_v35 = vadd.f32 0.7978846, %v4058_v34  ;;  %v4063_v44 = vmul.f32 0.035677407, %v3769_v23  ;;  %v3775_v38 = vmul.f32 %v3515_v9, %v3515_v9  ;;  %v4358_v20 = vadd.f32 0.7978846, %v4064_v39 }
 0x3ff   : > { %7405 = vmatprep.mubr.bf16.mxu1 %v6074_v12  ;;  %v5785_v6 = vmul.f32 %v5491_v36, %v14177_v2  ;;  %v5791_v4 = vmul.f32 %v5497_v5, %v14213_v37  ;;  %v3517_v60 = vadd.f32 %v15799_v21, %v14102_v56  ;;  %v9385_v22 = vpop.eup %9384  ;;  %9394 = vtanh.f32 %v4640_v16  ;;  %v15801_v34 = vld [vmem:[#allocation56_spill] sm:$0xff] }
 0x400   : > { %v14317_v50 = vpop.f32.mrb[100].mxu0  ;;  %v14326_v61 = vmul.f32 0.5, %v14272_v54  ;;  %v4069_v49 = vmul.f32 0.035677407, %v3775_v38  ;;  %v14330_v23 = vadd.f32 %v15801_v34, %v14091_v46  ;;  %v9387_v2 = vpop.eup %9386  ;;  %v4645_v37 = vmul.f32 %v4351_v57, %v14268_v19 }
 0x401   : > { %v14323_v10 = vpop.f32.mrb[101].mxu0  ;;  %v6073_v5 = vpack.c.bf16 %v5791_v4, %v5785_v6  ;;  %v3776_v36 = vmul.f32 %v3517_v60, %v3517_v60  ;;  %v14337_v42 = vadd.f32 %v15803_v0, %v14102_v56  ;;  %v4646_v16 = vmul.f32 %v4352_v35, %v14272_v54 }
 0x402   : > { %15800 = vst [vmem:[#allocation72_spill] sm:$0xff] %v14323_v10  ;;  %v14332_v18 = vpop.f32.mrb[102].mxu0  ;;  %v14343_v39 = vmul.f32 0.5, %v14292_v47  ;;  %v14345_v3 = vmul.f32 0.5, %v3511_v26  ;;  %v3781_v12 = vmul.f32 %v14330_v23, %v14330_v23  ;;  %v4357_v38 = vadd.f32 0.7978846, %v4063_v44 }
 0x403   : > { %15802 = vst [vmem:[#allocation75_spill] sm:$0xff] %v14332_v18  ;;  %v14339_v63 = vpop.f32.mrb[103].mxu0  ;;  %v4652_v19 = vmul.f32 %v4358_v20, %v3511_v26  ;;  %v4070_v57 = vmul.f32 0.035677407, %v3776_v36  ;;  %v3782_v6 = vmul.f32 %v14337_v42, %v14337_v42  ;;  %v4363_v4 = vadd.f32 0.7978846, %v4069_v49 }
 0x404   : > { %15804 = vst [vmem:[#allocation74_spill] sm:$0xff] %v14339_v63  ;;  %v4075_v21 = vmul.f32 0.035677407, %v3781_v12  ;;  %v5504_v34 = vadd.f32 1.0, %v9383_v51  ;;  %v5510_v0 = vadd.f32 1.0, %v9387_v2  ;;  %v9389_v54 = vpop.eup %9388  ;;  %9396 = vtanh.f32 %v4645_v37 }
 0x405   : > { %7406 = vmatmul.mubr.bf16.gmra.mrb[104].mxu1 %v6073_v5  ;;  %v4364_v35 = vadd.f32 0.7978846, %v4070_v57  ;;  %v4076_v63 = vmul.f32 0.035677407, %v3782_v6  ;;  %v14353_v18 = vadd.f32 %v14011_v17, %v14091_v46  ;;  %v9391_v10 = vpop.eup %9390  ;;  %9398 = vtanh.f32 %v4646_v16 }
 0x406   : > { %v5798_v26 = vmul.f32 %v5504_v34, %v14236_v27  ;;  %v5804_v44 = vmul.f32 %v5510_v0, %v14259_v1  ;;  %v5503_v20 = vadd.f32 1.0, %v9381_v28  ;;  %v4651_v51 = vmul.f32 %v4357_v38, %v14292_v47 }
 0x407   : > { %v14360_v49 = vmul.f32 0.5, %v3515_v9  ;;  %v4369_v2 = vadd.f32 0.7978846, %v4075_v21  ;;  %v3787_v37 = vmul.f32 %v14353_v18, %v14353_v18  ;;  %v9393_v17 = vpop.eup %9392  ;;  %9400 = vtanh.f32 %v4652_v19 }
 0x408   : > { %v14357_v5 = vpop.f32.mrb[104].mxu0  ;;  %v4657_v16 = vmul.f32 %v4363_v4, %v3515_v9  ;;  %v6080_v12 = vpack.c.bf16 %v5804_v44, %v5798_v26  ;;  %v5509_v27 = vadd.f32 1.0, %v9385_v22  ;;  %v4658_v1 = vmul.f32 %v4364_v35, %v3517_v60 }
 0x409   : > { %v14364_v36 = vpop.f32.mrb[105].mxu0  ;;  %v4370_v28 = vadd.f32 0.7978846, %v4076_v63  ;;  %v4081_v6 = vmul.f32 0.035677407, %v3787_v37  ;;  %v14370_v47 = vadd.f32 %v14013_v55, %v14102_v56  ;;  %v9395_v21 = vpop.eup %9394  ;;  %v5797_v34 = vmul.f32 %v5503_v20, %v14232_v15 }
 0x40a   : > { %v14366_v57 = vpop.f32.mrb[106].mxu0  ;;  %7415 = vmatprep.mubr.bf16.mxu1 %v6080_v12  ;;  %v5803_v19 = vmul.f32 %v5509_v27, %v14253_v43  ;;  %v14378_v9 = vadd.f32 %v14018_v52, %v14091_v46  ;;  %v14382_v22 = vadd.f32 %v14030_v13, %v14102_v56  ;;  %9402 = vtanh.f32 %v4651_v51 }
 0x40b   : > { %v14372_v38 = vpop.f32.mrb[107].mxu0  ;;  %v14384_v63 = vmul.f32 0.5, %v3517_v60  ;;  %v4663_v55 = vmul.f32 %v4369_v2, %v14330_v23  ;;  %v3788_v4 = vmul.f32 %v14370_v47, %v14370_v47  ;;  %9404 = vtanh.f32 %v4657_v16 }
 0x40c   : > { %v6079_v15 = vpack.c.bf16 %v5803_v19, %v5797_v34  ;;  %v3793_v43 = vmul.f32 %v14378_v9, %v14378_v9  ;;  %v3794_v52 = vmul.f32 %v14382_v22, %v14382_v22  ;;  %9406 = vtanh.f32 %v4658_v1 }
 0x40d   : > { %v4664_v13 = vmul.f32 %v4370_v28, %v14337_v42  ;;  %v4375_v0 = vadd.f32 0.7978846, %v4081_v6  ;;  %v5516_v35 = vadd.f32 1.0, %v9391_v10  ;;  %v4082_v60 = vmul.f32 0.035677407, %v3788_v4 }
 0x40e   : > { %7416 = vmatmul.mubr.bf16.gmra.mrb[108].mxu1 %v6079_v15  ;;  %v4087_v26 = vmul.f32 0.035677407, %v3793_v43  ;;  %v5522_v44 = vadd.f32 1.0, %v9395_v21  ;;  %v14396_v20 = vadd.f32 %v14056_v29, %v14091_v46  ;;  %v9397_v2 = vpop.eup %9396  ;;  %9408 = vtanh.f32 %v4663_v55 }
 0x40f   : > { %v14401_v37 = vmul.f32 0.5, %v14330_v23  ;;  %v14404_v16 = vmul.f32 0.5, %v14337_v42  ;;  %v5515_v12 = vadd.f32 1.0, %v9389_v54  ;;  %v9399_v27 = vpop.eup %9398  ;;  %v4088_v1 = vmul.f32 0.035677407, %v3794_v52 }
 0x410   : > { %v14398_v51 = vpop.f32.mrb[108].mxu0  ;;  %v5810_v28 = vmul.f32 %v5516_v35, %v14280_v45  ;;  %v5816_v29 = vmul.f32 %v5522_v44, %v14299_v30  ;;  %v3799_v6 = vmul.f32 %v14396_v20, %v14396_v20  ;;  %9410 = vtanh.f32 %v4664_v13 }
 0x411   : > { %v14406_v10 = vpop.f32.mrb[109].mxu0  ;;  %v14415_v23 = vmul.f32 0.5, %v14353_v18  ;;  %v14418_v42 = vmul.f32 0.5, %v14370_v47  ;;  %v5521_v54 = vadd.f32 1.0, %v9393_v17  ;;  %v9401_v19 = vpop.eup %9400  ;;  %v4669_v45 = vmul.f32 %v4375_v0, %v14353_v18 }
 0x412   : > { %v14412_v21 = vpop.f32.mrb[110].mxu0  ;;  %v4376_v55 = vadd.f32 0.7978846, %v4082_v60  ;;  %v4381_v30 = vadd.f32 0.7978846, %v4087_v26  ;;  %v6086_v4 = vpack.c.bf16 %v5816_v29, %v5810_v28  ;;  %v5809_v15 = vmul.f32 %v5515_v12, %v14274_v32 }
 0x413   : > { %v14420_v34 = vpop.f32.mrb[111].mxu0  ;;  %v5815_v43 = vmul.f32 %v5521_v54, %v14286_v14  ;;  %v3537_v52 = vadd.f32 %v14059_v53, %v14102_v56  ;;  %v3539_v13 = vadd.f32 %v14064_v33, %v14091_v46  ;;  %v14430_v17 = vmul.f32 0.5, %v14378_v9 }
 0x414   : > { %15805 = vst [vmem:[#allocation77_spill] sm:$0xff] %v14420_v34  ;;  %v4382_v35 = vadd.f32 0.7978846, %v4088_v1  ;;  %7425 = vmatprep.mubr.bf16.mxu1 %v6086_v4  ;;  %v4093_v44 = vmul.f32 0.035677407, %v3799_v6  ;;  %v14434_v18 = vadd.f32 %v14068_v31, %v14102_v56  ;;  %v9403_v0 = vpop.eup %9402  ;;  %v14437_v32 = vmul.f32 0.5, %v14382_v22 }
 0x415   : > { %v6085_v14 = vpack.c.bf16 %v5815_v43, %v5809_v15  ;;  %v3800_v60 = vmul.f32 %v3537_v52, %v3537_v52  ;;  %v5528_v53 = vadd.f32 1.0, %v9399_v27  ;;  %v14439_v26 = vpop.eup %9404  ;;  %9412 = vtanh.f32 %v4669_v45 }
 0x416   : > { %v4670_v33 = vmul.f32 %v4376_v55, %v14370_v47  ;;  %v3805_v12 = vmul.f32 %v3539_v13, %v3539_v13  ;;  %v3806_v1 = vmul.f32 %v14434_v18, %v14434_v18  ;;  %v9407_v31 = vpop.eup %9406  ;;  %v4675_v29 = vmul.f32 %v4381_v30, %v14378_v9 }
 0x417   : > { %v14448_v6 = vmul.f32 0.5, %v14396_v20  ;;  %7426 = vmatmul.mubr.bf16.gmra.mrb[112].mxu1 %v6085_v14  ;;  %v4094_v54 = vmul.f32 0.035677407, %v3800_v60  ;;  %v5534_v27 = vadd.f32 1.0, %v9401_v19  ;;  %v4676_v45 = vmul.f32 %v4382_v35, %v14382_v22 }
 0x418   : > { %v14444_v28 = vpop.f32.mrb[112].mxu0  ;;  %v4387_v47 = vadd.f32 0.7978846, %v4093_v44  ;;  %v4099_v55 = vmul.f32 0.035677407, %v3805_v12  ;;  %v3545_v15 = vadd.f32 %v14086_v7, %v14091_v46  ;;  %v5822_v9 = vmul.f32 %v5528_v53, %v14326_v61 }
 0x419   : > { %15806 = vst [vmem:[#allocation76_spill] sm:$0xff] %v14444_v28  ;;  %v14450_v4 = vpop.f32.mrb[113].mxu0  ;;  %v9409_v28 = vpop.eup %9408  ;;  %v5828_v30 = vmul.f32 %v5534_v27, %v14345_v3  ;;  %v5527_v34 = vadd.f32 1.0, %v9397_v2  ;;  %v5533_v14 = vadd.f32 1.0, %v9403_v0  ;;  %9414 = vtanh.f32 %v4670_v33 }
 0x41a   : > { %15807 = vst [vmem:[#allocation78_spill] sm:$0xff] %v14450_v4  ;;  %v14455_v43 = vpop.f32.mrb[114].mxu0  ;;  %v4388_v19 = vadd.f32 0.7978846, %v4094_v54  ;;  %v4100_v4 = vmul.f32 0.035677407, %v3806_v1  ;;  %v3811_v22 = vmul.f32 %v3545_v15, %v3545_v15  ;;  %v9411_v35 = vpop.eup %9410  ;;  %9416 = vtanh.f32 %v4675_v29 }
 0x41b   : > { %15808 = vst [vmem:[#allocation2_spill] sm:$0xff] %v14455_v43  ;;  %v14459_v60 = vpop.f32.mrb[115].mxu0  ;;  %v4393_v44 = vadd.f32 0.7978846, %v4099_v55  ;;  %v6092_v12 = vpack.c.bf16 %v5828_v30, %v5822_v9  ;;  %v5821_v7 = vmul.f32 %v5527_v34, %v14306_v48  ;;  %v5827_v43 = vmul.f32 %v5533_v14, %v14343_v39  ;;  %v15811_v9 = vld [vmem:[#allocation58_spill] sm:$0xff] }
 0x41c   : > { %v4681_v61 = vmul.f32 %v4387_v47, %v14396_v20  ;;  %v4105_v53 = vmul.f32 0.035677407, %v3811_v22  ;;  %v14466_v3 = vadd.f32 %v14094_v62, %v14102_v56  ;;  %9418 = vtanh.f32 %v4676_v45 }
 0x41d   : > { %7435 = vmatprep.mubr.bf16.mxu1 %v6092_v12  ;;  %v6091_v2 = vpack.c.bf16 %v5827_v43, %v5821_v7  ;;  %v14470_v0 = vadd.f32 %v14098_v11, %v14091_v46  ;;  %v14474_v48 = vadd.f32 %v14106_v59, %v14102_v56  ;;  %v4682_v39 = vmul.f32 %v4388_v19, %v3537_v52 }
 0x41e   : > { %v14476_v34 = vmul.f32 0.5, %v3537_v52  ;;  %v4394_v20 = vadd.f32 0.7978846, %v4100_v4  ;;  %v3812_v33 = vmul.f32 %v14466_v3, %v14466_v3  ;;  %v4687_v1 = vmul.f32 %v4393_v44, %v3539_v13 }
 0x41f   : > { %v14482_v29 = vmul.f32 0.5, %v3539_v13  ;;  %v14485_v54 = vmul.f32 0.5, %v14434_v18  ;;  %7436 = vmatmul.mubr.bf16.gmra.mrb[116].mxu1 %v6091_v2  ;;  %v3818_v11 = vmul.f32 %v14474_v48, %v14474_v48  ;;  %v14491_v52 = vpop.eup %9412  ;;  %9420 = vtanh.f32 %v4681_v61 }
 0x420   : > { %v14480_v62 = vpop.f32.mrb[116].mxu0  ;;  %v4399_v27 = vadd.f32 0.7978846, %v4105_v53  ;;  %v3817_v4 = vmul.f32 %v14470_v0, %v14470_v0  ;;  %v5540_v45 = vadd.f32 1.0, %v9407_v31  ;;  %v4106_v13 = vmul.f32 0.035677407, %v3812_v33 }
 0x421   : > { %v14489_v59 = vpop.f32.mrb[117].mxu0  ;;  %v4112_v55 = vmul.f32 0.035677407, %v3818_v11  ;;  %v5546_v43 = vadd.f32 1.0, %v9411_v35  ;;  %v14499_v30 = vadd.f32 %v15811_v9, %v14091_v46  ;;  %9422 = vtanh.f32 %v4682_v39 }
 0x422   : > { %15809 = vst [vmem:[#allocation3_spill] sm:$0xff] %v14489_v59  ;;  %v14495_v47 = vpop.f32.mrb[118].mxu0  ;;  %v4688_v19 = vmul.f32 %v4394_v20, %v14434_v18  ;;  %v14504_v22 = vmul.f32 0.5, %v3545_v15  ;;  %v5539_v44 = vadd.f32 1.0, %v14439_v26  ;;  %9424 = vtanh.f32 %v4687_v1 }
 0x423   : > { %15810 = vst [vmem:[#allocation5_spill] sm:$0xff] %v14495_v47  ;;  %v14501_v14 = vpop.f32.mrb[119].mxu0  ;;  %v5834_v31 = vmul.f32 %v5540_v45, %v14384_v63  ;;  %v5840_v12 = vmul.f32 %v5546_v43, %v14404_v16  ;;  %v3823_v35 = vmul.f32 %v14499_v30, %v14499_v30  ;;  %v9415_v7 = vpop.eup %9414  ;;  %v4693_v61 = vmul.f32 %v4399_v27, %v3545_v15  ;;  %v15813_v16 = vld [vmem:[#allocation61_spill] sm:$0xff]  ;;  %v15814_v15 = vld [vmem:[#allocation60_spill] sm:$0xff] }
 0x424   : > { %15812 = vst [vmem:[#allocation4_spill] sm:$0xff] %v14501_v14  ;;  %v14512_v53 = vmul.f32 0.5, %v14466_v3  ;;  %v4111_v2 = vmul.f32 0.035677407, %v3817_v4  ;;  %v5545_v39 = vadd.f32 1.0, %v9409_v28  ;;  %v5833_v26 = vmul.f32 %v5539_v44, %v14360_v49  ;;  %v9417_v1 = vpop.eup %9416  ;;  %v15816_v49 = vld [vmem:[#allocation63_spill] sm:$0xff] }
 0x425   : > { %v4400_v18 = vadd.f32 0.7978846, %v4106_v13  ;;  %v4406_v20 = vadd.f32 0.7978846, %v4112_v55  ;;  %v6098_v33 = vpack.c.bf16 %v5840_v12, %v5834_v31  ;;  %v4117_v11 = vmul.f32 0.035677407, %v3823_v35 }
 0x426   : > { %v5839_v63 = vmul.f32 %v5545_v39, %v14401_v37  ;;  %v14518_v45 = vadd.f32 %v15813_v16, %v14102_v56  ;;  %v14522_v27 = vadd.f32 %v15814_v15, %v14091_v46  ;;  %v9419_v28 = vpop.eup %9418  ;;  %9426 = vtanh.f32 %v4688_v19 }
 0x427   : > { %v14527_v4 = vmul.f32 0.5, %v14470_v0  ;;  %7445 = vmatprep.mubr.bf16.mxu1 %v6098_v33  ;;  %v14531_v13 = vadd.f32 %v15816_v49, %v14102_v56  ;;  %v5552_v37 = vadd.f32 1.0, %v9415_v7  ;;  %9428 = vtanh.f32 %v4693_v61 }
 0x428   : > { %v14524_v43 = vpop.f32.mrb[120].mxu0  ;;  %v14536_v9 = vmul.f32 0.5, %v14474_v48  ;;  %v6097_v44 = vpack.c.bf16 %v5839_v63, %v5833_v26  ;;  %v3824_v31 = vmul.f32 %v14518_v45, %v14518_v45  ;;  %v4694_v12 = vmul.f32 %v4400_v18, %v14466_v3 }
 0x429   : > { %15815 = vst [vmem:[#allocation6_spill] sm:$0xff] %v14524_v43  ;;  %v14533_v55 = vpop.f32.mrb[121].mxu0  ;;  %v4405_v35 = vadd.f32 0.7978846, %v4111_v2  ;;  %v3829_v39 = vmul.f32 %v14522_v27, %v14522_v27  ;;  %v3830_v7 = vmul.f32 %v14531_v13, %v14531_v13  ;;  %v9421_v61 = vpop.eup %9420  ;;  %v4700_v16 = vmul.f32 %v4406_v20, %v14474_v48  ;;  %v15820_v2 = vld [vmem:[#allocation62_spill] sm:$0xff] }
 0x42a   : > { %15817 = vst [vmem:[#allocation7_spill] sm:$0xff] %v14533_v55  ;;  %v14540_v19 = vpop.f32.mrb[122].mxu0  ;;  %v4411_v26 = vadd.f32 0.7978846, %v4117_v11  ;;  %7446 = vmatmul.mubr.bf16.gmra.mrb[120].mxu1 %v6097_v44  ;;  %v4118_v63 = vmul.f32 0.035677407, %v3824_v31  ;;  %v5846_v3 = vmul.f32 %v5552_v37, %v14418_v42  ;;  %v3565_v18 = vadd.f32 %v15820_v2, %v14091_v46 }
 0x42b   : > { %15818 = vst [vmem:[#allocation8_spill] sm:$0xff] %v14540_v19  ;;  %v14547_v33 = vpop.f32.mrb[123].mxu0  ;;  %v5558_v15 = vadd.f32 1.0, %v9419_v28  ;;  %v4123_v49 = vmul.f32 0.035677407, %v3829_v39  ;;  %v9423_v55 = vpop.eup %9422  ;;  %v5557_v47 = vadd.f32 1.0, %v9417_v1  ;;  %9430 = vtanh.f32 %v4694_v12 }
 0x42c   : > { %15819 = vst [vmem:[#allocation9_spill] sm:$0xff] %v14547_v33  ;;  %v4124_v19 = vmul.f32 0.035677407, %v3830_v7  ;;  %v4412_v43 = vadd.f32 0.7978846, %v4118_v63  ;;  %v5551_v33 = vadd.f32 1.0, %v14491_v52  ;;  %v9425_v59 = vpop.eup %9424  ;;  %v4699_v48 = vmul.f32 %v4405_v35, %v14470_v0 }
 0x42d   : > { %v5852_v14 = vmul.f32 %v5558_v15, %v14437_v32  ;;  %v4417_v20 = vadd.f32 0.7978846, %v4123_v49  ;;  %v3835_v11 = vmul.f32 %v3565_v18, %v3565_v18  ;;  %v4705_v28 = vmul.f32 %v4411_v26, %v14499_v30  ;;  %v15821_v1 = vld [vmem:[#allocation65_spill] sm:$0xff] }
 0x42e   : > { %v5845_v42 = vmul.f32 %v5551_v33, %v14415_v23  ;;  %v5851_v37 = vmul.f32 %v5557_v47, %v14430_v17  ;;  %v4706_v32 = vmul.f32 %v4412_v43, %v14518_v45  ;;  %v4418_v39 = vadd.f32 0.7978846, %v4124_v19 }
 0x42f   : > { %v6104_v44 = vpack.c.bf16 %v5852_v14, %v5846_v3  ;;  %v4129_v52 = vmul.f32 0.035677407, %v3835_v11  ;;  %v14564_v12 = vadd.f32 %v15821_v1, %v14102_v56  ;;  %9432 = vtanh.f32 %v4700_v16 }
 0x430   : > { %v14559_v31 = vpop.f32.mrb[124].mxu0  ;;  %v6103_v35 = vpack.c.bf16 %v5851_v37, %v5845_v42  ;;  %v14570_v23 = vadd.f32 %v14180_v25, %v14091_v46  ;;  %v14574_v17 = vadd.f32 %v14185_v58, %v14102_v56  ;;  %v9427_v14 = vpop.eup %9426  ;;  %9434 = vtanh.f32 %v4699_v48 }
 0x431   : > { %v14566_v0 = vpop.f32.mrb[125].mxu0  ;;  %7455 = vmatprep.mubr.bf16.mxu1 %v6104_v44  ;;  %v14579_v43 = vmul.f32 0.5, %v14499_v30  ;;  %v4711_v19 = vmul.f32 %v4417_v20, %v14522_v27  ;;  %v3836_v7 = vmul.f32 %v14564_v12, %v14564_v12  ;;  %v14586_v25 = vpop.eup %9428  ;;  %9436 = vtanh.f32 %v4705_v28 }
 0x432   : > { %v14576_v47 = vpop.f32.mrb[126].mxu0  ;;  %v14589_v58 = vmul.f32 0.5, %v14518_v45  ;;  %7456 = vmatmul.mubr.bf16.gmra.mrb[124].mxu1 %v6103_v35  ;;  %v3841_v16 = vmul.f32 %v14570_v23, %v14570_v23  ;;  %v3842_v30 = vmul.f32 %v14574_v17, %v14574_v17  ;;  %9438 = vtanh.f32 %v4706_v32 }
 0x433   : > { %v14584_v33 = vpop.f32.mrb[127].mxu0  ;;  %v4712_v26 = vmul.f32 %v4418_v39, %v14531_v13  ;;  %v4423_v63 = vadd.f32 0.7978846, %v4129_v52  ;;  %v5564_v15 = vadd.f32 1.0, %v9423_v55  ;;  %v4130_v49 = vmul.f32 0.035677407, %v3836_v7 }
 0x434   : > { %v4135_v3 = vmul.f32 0.035677407, %v3841_v16  ;;  %v5570_v2 = vadd.f32 1.0, %v9427_v14  ;;  %v14598_v48 = vadd.f32 %v14206_v8, %v14091_v46  ;;  %9440 = vtanh.f32 %v4711_v19 }
 0x435   : > { %v14601_v45 = vmul.f32 0.5, %v14522_v27  ;;  %v14604_v20 = vmul.f32 0.5, %v14531_v13  ;;  %v5563_v11 = vadd.f32 1.0, %v9421_v61  ;;  %v4136_v28 = vmul.f32 0.035677407, %v3842_v30  ;;  %v9431_v8 = vpop.eup %9430 }
 0x436   : > { %v5858_v44 = vmul.f32 %v5564_v15, %v14476_v34  ;;  %v5864_v55 = vmul.f32 %v5570_v2, %v14485_v54  ;;  %v3847_v42 = vmul.f32 %v14598_v48, %v14598_v48  ;;  %9442 = vtanh.f32 %v4712_v26 }
 0x437   : > { %v14612_v32 = vmul.f32 0.5, %v3565_v18  ;;  %v14615_v27 = vmul.f32 0.5, %v14564_v12  ;;  %v5569_v13 = vadd.f32 1.0, %v9425_v59  ;;  %v4717_v61 = vmul.f32 %v4423_v63, %v3565_v18  ;;  %v15824_v63 = vld [vmem:[#allocation64_spill] sm:$0xff] }
 0x438   : > { %v14610_v37 = vpop.f32.mrb[128].mxu0  ;;  %v4424_v52 = vadd.f32 0.7978846, %v4130_v49  ;;  %v4429_v34 = vadd.f32 0.7978846, %v4135_v3  ;;  %v6110_v1 = vpack.c.bf16 %v5864_v55, %v5858_v44  ;;  %v5857_v35 = vmul.f32 %v5563_v11, %v14448_v6 }
 0x439   : > { %v14617_v39 = vpop.f32.mrb[129].mxu0  ;;  %v5863_v14 = vmul.f32 %v5569_v13, %v14482_v29  ;;  %v3577_v19 = vadd.f32 %v14210_v24, %v14102_v56  ;;  %v3579_v7 = vadd.f32 %v14217_v40, %v14091_v46  ;;  %v9433_v59 = vpop.eup %9432  ;;  %v14630_v18 = vmul.f32 0.5, %v14570_v23 }
 0x43a   : > { %v14619_v54 = vpop.f32.mrb[130].mxu0  ;;  %v4430_v30 = vadd.f32 0.7978846, %v4136_v28  ;;  %7465 = vmatprep.mubr.bf16.mxu1 %v6110_v1  ;;  %v4141_v26 = vmul.f32 0.035677407, %v3847_v42  ;;  %v14634_v6 = vadd.f32 %v15824_v63, %v14102_v56  ;;  %v9435_v29 = vpop.eup %9434  ;;  %v14637_v15 = vmul.f32 0.5, %v14574_v17 }
 0x43b   : > { %15822 = vst [vmem:[#allocation10_spill] sm:$0xff] %v14619_v54  ;;  %v14627_v16 = vpop.f32.mrb[131].mxu0  ;;  %v6109_v24 = vpack.c.bf16 %v5863_v14, %v5857_v35  ;;  %v3848_v49 = vmul.f32 %v3577_v19, %v3577_v19  ;;  %v5576_v40 = vadd.f32 1.0, %v9431_v8  ;;  %v14639_v3 = vpop.eup %9436  ;;  %9444 = vtanh.f32 %v4717_v61  ;;  %v15825_v61 = vld [vmem:[#allocation67_spill] sm:$0xff] }
 0x43c   : > { %15823 = vst [vmem:[#allocation11_spill] sm:$0xff] %v14627_v16  ;;  %v4718_v2 = vmul.f32 %v4424_v52, %v14564_v12  ;;  %v3853_v11 = vmul.f32 %v3579_v7, %v3579_v7  ;;  %v3854_v28 = vmul.f32 %v14634_v6, %v14634_v6  ;;  %v9439_v44 = vpop.eup %9438  ;;  %v4723_v55 = vmul.f32 %v4429_v34, %v14570_v23 }
 0x43d   : > { %v14646_v42 = vmul.f32 0.5, %v14598_v48  ;;  %7466 = vmatmul.mubr.bf16.gmra.mrb[128].mxu1 %v6109_v24  ;;  %v4142_v13 = vmul.f32 0.035677407, %v3848_v49  ;;  %v5582_v1 = vadd.f32 1.0, %v9433_v59  ;;  %v4724_v8 = vmul.f32 %v4430_v30, %v14574_v17 }
 0x43e   : > { %v4435_v35 = vadd.f32 0.7978846, %v4141_v26  ;;  %v4147_v14 = vmul.f32 0.035677407, %v3853_v11  ;;  %v3585_v12 = vadd.f32 %v15825_v61, %v14091_v46  ;;  %v9441_v63 = vpop.eup %9440  ;;  %v5870_v16 = vmul.f32 %v5576_v40, %v14512_v53 }
 0x43f   : > { %v5876_v23 = vmul.f32 %v5582_v1, %v14536_v9  ;;  %v5575_v34 = vadd.f32 1.0, %v14586_v25  ;;  %v5581_v54 = vadd.f32 1.0, %v9435_v29  ;;  %9446 = vtanh.f32 %v4718_v2  ;;  %v15829_v29 = vld [vmem:[#allocation66_spill] sm:$0xff] }
 0x440   : > { %v14651_v52 = vpop.f32.mrb[132].mxu0  ;;  %v4436_v59 = vadd.f32 0.7978846, %v4142_v13  ;;  %v4148_v17 = vmul.f32 0.035677407, %v3854_v28  ;;  %v3859_v30 = vmul.f32 %v3585_v12, %v3585_v12  ;;  %v9443_v49 = vpop.eup %9442  ;;  %9448 = vtanh.f32 %v4723_v55  ;;  %v15830_v13 = vld [vmem:[#allocation69_spill] sm:$0xff] }
 0x441   : > { %15826 = vst [vmem:[#allocation12_spill] sm:$0xff] %v14651_v52  ;;  %v14656_v24 = vpop.f32.mrb[133].mxu0  ;;  %v4441_v11 = vadd.f32 0.7978846, %v4147_v14  ;;  %v6116_v61 = vpack.c.bf16 %v5876_v23, %v5870_v16  ;;  %v5869_v52 = vmul.f32 %v5575_v34, %v14504_v22  ;;  %v5875_v53 = vmul.f32 %v5581_v54, %v14527_v4  ;;  %v15831_v22 = vld [vmem:[#allocation68_spill] sm:$0xff] }
 0x442   : > { %v14658_v26 = vpop.f32.mrb[134].mxu0  ;;  %v4729_v9 = vmul.f32 %v4435_v35, %v14598_v48  ;;  %v4153_v25 = vmul.f32 0.035677407, %v3859_v30  ;;  %v3587_v2 = vadd.f32 %v15829_v29, %v14102_v56  ;;  %9450 = vtanh.f32 %v4724_v8 }
 0x443   : > { %15827 = vst [vmem:[#allocation13_spill] sm:$0xff] %v14658_v26  ;;  %v14662_v40 = vpop.f32.mrb[135].mxu0  ;;  %7475 = vmatprep.mubr.bf16.mxu1 %v6116_v61  ;;  %v6115_v28 = vpack.c.bf16 %v5875_v53, %v5869_v52  ;;  %v14669_v1 = vadd.f32 %v15830_v13, %v14091_v46  ;;  %v3591_v16 = vadd.f32 %v15831_v22, %v14102_v56  ;;  %v14673_v54 = vmul.f32 0.5, %v3577_v19 }
 0x444   : > { %15828 = vst [vmem:[#allocation14_spill] sm:$0xff] %v14662_v40  ;;  %v4730_v4 = vmul.f32 %v4436_v59, %v3577_v19  ;;  %v4442_v55 = vadd.f32 0.7978846, %v4148_v17  ;;  %v3860_v14 = vmul.f32 %v3587_v2, %v3587_v2  ;;  %v4735_v48 = vmul.f32 %v4441_v11, %v3579_v7 }
 0x445   : > { %v14675_v35 = vmul.f32 0.5, %v3579_v7  ;;  %v14678_v23 = vmul.f32 0.5, %v14634_v6  ;;  %7476 = vmatmul.mubr.bf16.gmra.mrb[132].mxu1 %v6115_v28  ;;  %v3866_v8 = vmul.f32 %v3591_v16, %v3591_v16  ;;  %v14680_v52 = vpop.eup %9444  ;;  %9452 = vtanh.f32 %v4729_v9 }
 0x446   : > { %v4447_v34 = vadd.f32 0.7978846, %v4153_v25  ;;  %v3865_v30 = vmul.f32 %v14669_v1, %v14669_v1  ;;  %v5588_v59 = vadd.f32 1.0, %v9439_v44  ;;  %v4154_v17 = vmul.f32 0.035677407, %v3860_v14 }
 0x447   : > { %v4160_v61 = vmul.f32 0.035677407, %v3866_v8  ;;  %v5594_v11 = vadd.f32 1.0, %v9443_v49  ;;  %v14688_v7 = vadd.f32 %v14284_v41, %v14091_v46  ;;  %9454 = vtanh.f32 %v4730_v4 }
 0x448   : > { %v14684_v19 = vpop.f32.mrb[136].mxu0  ;;  %v4736_v29 = vmul.f32 %v4442_v55, %v14634_v6  ;;  %v14693_v9 = vmul.f32 0.5, %v3585_v12  ;;  %v5587_v25 = vadd.f32 1.0, %v14639_v3  ;;  %9456 = vtanh.f32 %v4735_v48 }
 0x449   : > { %15832 = vst [vmem:[#allocation15_spill] sm:$0xff] %v14684_v19  ;;  %v14690_v53 = vpop.f32.mrb[137].mxu0  ;;  %v5882_v44 = vmul.f32 %v5588_v59, %v14589_v58  ;;  %v5888_v49 = vmul.f32 %v5594_v11, %v14604_v20  ;;  %v3871_v41 = vmul.f32 %v14688_v7, %v14688_v7  ;;  %v9447_v22 = vpop.eup %9446  ;;  %v4741_v4 = vmul.f32 %v4447_v34, %v3585_v12  ;;  %v15836_v59 = vld [vmem:[#allocation71_spill] sm:$0xff]  ;;  %v15838_v34 = vld [vmem:[#allocation73_spill] sm:$0xff] }
 0x44a   : > { %15833 = vst [vmem:[#allocation16_spill] sm:$0xff] %v14690_v53  ;;  %v14696_v28 = vpop.f32.mrb[138].mxu0  ;;  %v14704_v14 = vmul.f32 0.5, %v3587_v2  ;;  %v4159_v6 = vmul.f32 0.035677407, %v3865_v30  ;;  %v5593_v55 = vadd.f32 1.0, %v9441_v63  ;;  %v5881_v48 = vmul.f32 %v5587_v25, %v14579_v43 }
 0x44b   : > { %15834 = vst [vmem:[#allocation17_spill] sm:$0xff] %v14696_v28  ;;  %v14702_v13 = vpop.f32.mrb[139].mxu0  ;;  %v4448_v8 = vadd.f32 0.7978846, %v4154_v17  ;;  %v4454_v3 = vadd.f32 0.7978846, %v4160_v61  ;;  %v6122_v53 = vpack.c.bf16 %v5888_v49, %v5882_v44  ;;  %v9449_v28 = vpop.eup %9448  ;;  %v3597_v11 = vadd.f32 %v15836_v59, %v14102_v56 }
 0x44c   : > { %15835 = vst [vmem:[#allocation18_spill] sm:$0xff] %v14702_v13  ;;  %v4165_v58 = vmul.f32 0.035677407, %v3871_v41  ;;  %v5887_v20 = vmul.f32 %v5593_v55, %v14601_v45  ;;  %v15837_v13 = vld [vmem:[#allocation70_spill] sm:$0xff]  ;;  %v9451_v12 = vpop.eup %9450  ;;  %9458 = vtanh.f32 %v4736_v29  ;;  %v14715_v63 = vmul.f32 0.5, %v14669_v1 }
 0x44d   : > { %v14712_v19 = vadd.f32 %v15837_v13, %v14091_v46  ;;  %7485 = vmatprep.mubr.bf16.mxu1 %v6122_v53  ;;  %v14719_v43 = vadd.f32 %v15838_v34, %v14102_v56  ;;  %v5600_v30 = vadd.f32 1.0, %v9447_v22  ;;  %9460 = vtanh.f32 %v4741_v4 }
 0x44e   : > { %v14721_v45 = vmul.f32 0.5, %v3591_v16  ;;  %v6121_v17 = vpack.c.bf16 %v5887_v20, %v5881_v48  ;;  %v3872_v61 = vmul.f32 %v3597_v11, %v3597_v11  ;;  %v4742_v44 = vmul.f32 %v4448_v8, %v3587_v2 }
 0x44f   : > { %v4453_v49 = vadd.f32 0.7978846, %v4159_v6  ;;  %v3877_v29 = vmul.f32 %v14712_v19, %v14712_v19  ;;  %v3878_v53 = vmul.f32 %v14719_v43, %v14719_v43  ;;  %v9453_v13 = vpop.eup %9452  ;;  %v4748_v55 = vmul.f32 %v4454_v3, %v3591_v16 }
 0x450   : > { %v14723_v25 = vpop.f32.mrb[140].mxu0  ;;  %v4459_v22 = vadd.f32 0.7978846, %v4165_v58  ;;  %7486 = vmatmul.mubr.bf16.gmra.mrb[136].mxu1 %v6121_v17  ;;  %v4166_v4 = vmul.f32 0.035677407, %v3872_v61  ;;  %v5606_v59 = vadd.f32 1.0, %v9451_v12  ;;  %v5894_v2 = vmul.f32 %v5600_v30, %v14615_v27 }
 0x451   : > { %15839 = vst [vmem:[#allocation32_spill] sm:$0xff] %v14723_v25  ;;  %v14729_v41 = vpop.f32.mrb[141].mxu0  ;;  %v4171_v20 = vmul.f32 0.035677407, %v3877_v29  ;;  %v4172_v34 = vmul.f32 0.035677407, %v3878_v53  ;;  %v3605_v6 = vadd.f32 %v14317_v50, %v14091_v46  ;;  %v9455_v25 = vpop.eup %9454  ;;  %9462 = vtanh.f32 %v4742_v44 }
 0x452   : > { %15840 = vst [vmem:[#allocation19_spill] sm:$0xff] %v14729_v41  ;;  %v3708_v48 = vpop.f32.mrb[142].mxu0  ;;  %v4460_v40 = vadd.f32 0.7978846, %v4166_v4  ;;  %v5900_v26 = vmul.f32 %v5606_v59, %v14637_v15  ;;  %v5599_v41 = vadd.f32 1.0, %v14680_v52  ;;  %v5605_v16 = vadd.f32 1.0, %v9449_v28  ;;  %v9457_v3 = vpop.eup %9456 }
 0x453   : > { %v3709_v8 = vpop.f32.mrb[143].mxu0  ;;  %v4747_v58 = vmul.f32 %v4453_v49, %v14669_v1  ;;  %v4465_v12 = vadd.f32 0.7978846, %v4171_v20  ;;  %v3883_v17 = vmul.f32 %v3605_v6, %v3605_v6  ;;  %v4753_v61 = vmul.f32 %v4459_v22, %v14688_v7  ;;  %v15841_v15 = vld [vmem:[#allocation72_spill] sm:$0xff]  ;;  %v15842_v1 = vld [vmem:[#allocation75_spill] sm:$0xff]  ;;  %v15843_v49 = vld [vmem:[#allocation74_spill] sm:$0xff] }
 0x454   : > { %v6128_v27 = vpack.c.bf16 %v5900_v26, %v5894_v2  ;;  %v5893_v30 = vmul.f32 %v5599_v41, %v14612_v32  ;;  %v5899_v50 = vmul.f32 %v5605_v16, %v14630_v18  ;;  %v4754_v29 = vmul.f32 %v4460_v40, %v3597_v11 }
 0x455   : > { %v4466_v53 = vadd.f32 0.7978846, %v4172_v34  ;;  %v4177_v4 = vmul.f32 0.035677407, %v3883_v17  ;;  %v3607_v52 = vadd.f32 %v15841_v15, %v14102_v56  ;;  %9464 = vtanh.f32 %v4748_v55 }
 0x456   : > { %7495 = vmatprep.mubr.bf16.mxu1 %v6128_v27  ;;  %v6127_v28 = vpack.c.bf16 %v5899_v50, %v5893_v30  ;;  %v3609_v44 = vadd.f32 %v15842_v1, %v14091_v46  ;;  %v14746_v22 = vadd.f32 %v15843_v49, %v14102_v56  ;;  %v9459_v26 = vpop.eup %9458  ;;  %9466 = vtanh.f32 %v4747_v58 }
 0x457   : > { %v14749_v32 = vmul.f32 0.5, %v14688_v7  ;;  %v4759_v18 = vmul.f32 %v4465_v12, %v14712_v19  ;;  %v3884_v40 = vmul.f32 %v3607_v52, %v3607_v52  ;;  %v14752_v41 = vpop.eup %9460  ;;  %9468 = vtanh.f32 %v4753_v61 }
 0x458   : > { %v14754_v55 = vmul.f32 0.5, %v3597_v11  ;;  %7496 = vmatmul.mubr.bf16.gmra.mrb[140].mxu1 %v6127_v28  ;;  %v3889_v59 = vmul.f32 %v3609_v44, %v3609_v44  ;;  %v3890_v48 = vmul.f32 %v14746_v22, %v14746_v22  ;;  %9470 = vtanh.f32 %v4754_v29 }
 0x459   : > { %v4760_v20 = vmul.f32 %v4466_v53, %v14719_v43  ;;  %v4471_v34 = vadd.f32 0.7978846, %v4177_v4  ;;  %v5612_v2 = vadd.f32 1.0, %v9455_v25  ;;  %v4178_v7 = vmul.f32 0.035677407, %v3884_v40 }
 0x45a   : > { %v4183_v8 = vmul.f32 0.035677407, %v3889_v59  ;;  %v5618_v16 = vadd.f32 1.0, %v9459_v26  ;;  %v14761_v58 = vadd.f32 %v14357_v5, %v14091_v46  ;;  %9472 = vtanh.f32 %v4759_v18 }
 0x45b   : > { %v14764_v11 = vmul.f32 0.5, %v14712_v19  ;;  %v14767_v12 = vmul.f32 0.5, %v14719_v43  ;;  %v5611_v17 = vadd.f32 1.0, %v9453_v13  ;;  %v4184_v61 = vmul.f32 0.035677407, %v3890_v48  ;;  %v9463_v50 = vpop.eup %9462 }
 0x45c   : > { %v5906_v27 = vmul.f32 %v5612_v2, %v14673_v54  ;;  %v5912_v25 = vmul.f32 %v5618_v16, %v14678_v23  ;;  %v3895_v30 = vmul.f32 %v14761_v58, %v14761_v58  ;;  %9474 = vtanh.f32 %v4760_v20 }
 0x45d   : > { %v14773_v5 = vmul.f32 0.5, %v3605_v6  ;;  %v14775_v29 = vmul.f32 0.5, %v3607_v52  ;;  %v5617_v19 = vadd.f32 1.0, %v9457_v3  ;;  %v4765_v53 = vmul.f32 %v4471_v34, %v3605_v6 }
 0x45e   : > { %v4472_v4 = vadd.f32 0.7978846, %v4178_v7  ;;  %v4477_v43 = vadd.f32 0.7978846, %v4183_v8  ;;  %v6134_v15 = vpack.c.bf16 %v5912_v25, %v5906_v27  ;;  %v5905_v13 = vmul.f32 %v5611_v17, %v14646_v42 }
 0x45f   : > { %v5911_v54 = vmul.f32 %v5617_v19, %v14675_v35  ;;  %v3617_v23 = vadd.f32 %v14364_v36, %v14102_v56  ;;  %v3619_v28 = vadd.f32 %v14366_v57, %v14091_v46  ;;  %v9465_v1 = vpop.eup %9464  ;;  %v14783_v49 = vmul.f32 0.5, %v3609_v44 }
 0x460   : > { %v4478_v26 = vadd.f32 0.7978846, %v4184_v61  ;;  %7505 = vmatprep.mubr.bf16.mxu1 %v6134_v15  ;;  %v4189_v3 = vmul.f32 0.035677407, %v3895_v30  ;;  %v14787_v6 = vadd.f32 %v14372_v38, %v14102_v56  ;;  %v9467_v18 = vpop.eup %9466  ;;  %v14790_v42 = vmul.f32 0.5, %v14746_v22 }
 0x461   : > { %v6133_v35 = vpack.c.bf16 %v5911_v54, %v5905_v13  ;;  %v3896_v40 = vmul.f32 %v3617_v23, %v3617_v23  ;;  %v5624_v36 = vadd.f32 1.0, %v9463_v50  ;;  %v9469_v59 = vpop.eup %9468  ;;  %9476 = vtanh.f32 %v4765_v53 }
 0x462   : > { %v4766_v57 = vmul.f32 %v4472_v4, %v3607_v52  ;;  %v3901_v48 = vmul.f32 %v3619_v28, %v3619_v28  ;;  %v3902_v20 = vmul.f32 %v14787_v6, %v14787_v6  ;;  %v9471_v34 = vpop.eup %9470  ;;  %v4771_v2 = vmul.f32 %v4477_v43, %v3609_v44 }
 0x463   : > { %v14795_v7 = vmul.f32 0.5, %v14761_v58  ;;  %7506 = vmatmul.mubr.bf16.gmra.mrb[144].mxu1 %v6133_v35  ;;  %v4190_v38 = vmul.f32 0.035677407, %v3896_v40  ;;  %v5630_v8 = vadd.f32 1.0, %v9465_v1  ;;  %v4772_v16 = vmul.f32 %v4478_v26, %v14746_v22  ;;  %v15844_v26 = vld [vmem:[#allocation77_spill] sm:$0xff] }
 0x464   : > { %v4483_v17 = vadd.f32 0.7978846, %v4189_v3  ;;  %v4195_v61 = vmul.f32 0.035677407, %v3901_v48  ;;  %v3625_v27 = vadd.f32 %v14398_v51, %v14091_v46  ;;  %v9473_v52 = vpop.eup %9472  ;;  %v5918_v25 = vmul.f32 %v5624_v36, %v14704_v14 }
 0x465   : > { %v5924_v30 = vmul.f32 %v5630_v8, %v14721_v45  ;;  %v5623_v44 = vadd.f32 1.0, %v14752_v41  ;;  %v5629_v50 = vadd.f32 1.0, %v9467_v18  ;;  %9478 = vtanh.f32 %v4766_v57  ;;  %v15845_v8 = vld [vmem:[#allocation76_spill] sm:$0xff] }
 0x466   : > { %v4484_v19 = vadd.f32 0.7978846, %v4190_v38  ;;  %v4196_v53 = vmul.f32 0.035677407, %v3902_v20  ;;  %v3907_v4 = vmul.f32 %v3625_v27, %v3625_v27  ;;  %v9475_v43 = vpop.eup %9474  ;;  %v4489_v15 = vadd.f32 0.7978846, %v4195_v61 }
 0x467   : > { %v6140_v22 = vpack.c.bf16 %v5924_v30, %v5918_v25  ;;  %v5917_v13 = vmul.f32 %v5623_v44, %v14693_v9  ;;  %v5923_v54 = vmul.f32 %v5629_v50, %v14715_v63  ;;  %9480 = vtanh.f32 %v4771_v2 }
 0x468   : > { %v4777_v51 = vmul.f32 %v4483_v17, %v14761_v58  ;;  %v4201_v14 = vmul.f32 0.035677407, %v3907_v4  ;;  %v3627_v45 = vadd.f32 %v14406_v10, %v14102_v56  ;;  %9482 = vtanh.f32 %v4772_v16 }
 0x469   : > { %7515 = vmatprep.mubr.bf16.mxu1 %v6140_v22  ;;  %v6139_v41 = vpack.c.bf16 %v5923_v54, %v5917_v13  ;;  %v14810_v1 = vadd.f32 %v14412_v21, %v14091_v46  ;;  %v3631_v3 = vadd.f32 %v15844_v26, %v14102_v56  ;;  %v4778_v9 = vmul.f32 %v4484_v19, %v3617_v23 }
 0x46a   : > { %v14814_v18 = vmul.f32 0.5, %v3617_v23  ;;  %v4490_v63 = vadd.f32 0.7978846, %v4196_v53  ;;  %v3908_v35 = vmul.f32 %v3627_v45, %v3627_v45  ;;  %v4783_v58 = vmul.f32 %v4489_v15, %v3619_v28 }
 0x46b   : > { %v14816_v40 = vmul.f32 0.5, %v3619_v28  ;;  %v14819_v10 = vmul.f32 0.5, %v14787_v6  ;;  %7516 = vmatmul.mubr.bf16.gmra.mrb[148].mxu1 %v6139_v41  ;;  %v3914_v36 = vmul.f32 %v3631_v3, %v3631_v3  ;;  %v9477_v57 = vpop.eup %9476  ;;  %9484 = vtanh.f32 %v4777_v51  ;;  %v15847_v51 = vld [vmem:[#allocation2_spill] sm:$0xff] }
 0x46c   : > { %v4495_v21 = vadd.f32 0.7978846, %v4201_v14  ;;  %v3913_v48 = vmul.f32 %v14810_v1, %v14810_v1  ;;  %v5636_v20 = vadd.f32 1.0, %v9471_v34  ;;  %v4202_v2 = vmul.f32 0.035677407, %v3908_v35 }
 0x46d   : > { %v4208_v23 = vmul.f32 0.035677407, %v3914_v36  ;;  %v5642_v38 = vadd.f32 1.0, %v9475_v43  ;;  %v14825_v16 = vadd.f32 %v15845_v8, %v14091_v46  ;;  %9486 = vtanh.f32 %v4778_v9 }
 0x46e   : > { %v4784_v28 = vmul.f32 %v4490_v63, %v14787_v6  ;;  %v14828_v17 = vmul.f32 0.5, %v3625_v27  ;;  %v5635_v61 = vadd.f32 1.0, %v9469_v59  ;;  %9488 = vtanh.f32 %v4783_v58 }
 0x46f   : > { %v5930_v25 = vmul.f32 %v5636_v20, %v14754_v55  ;;  %v5936_v30 = vmul.f32 %v5642_v38, %v14767_v12  ;;  %v3919_v34 = vmul.f32 %v14825_v16, %v14825_v16  ;;  %v9479_v44 = vpop.eup %9478  ;;  %v4789_v50 = vmul.f32 %v4495_v21, %v3625_v27  ;;  %v15846_v12 = vld [vmem:[#allocation78_spill] sm:$0xff] }
 0x470   : > { %v14834_v19 = vmul.f32 0.5, %v3627_v45  ;;  %v4207_v53 = vmul.f32 0.035677407, %v3913_v48  ;;  %v5641_v4 = vadd.f32 1.0, %v9473_v52  ;;  %v4496_v43 = vadd.f32 0.7978846, %v4202_v2 }
 0x471   : > { %v4502_v15 = vadd.f32 0.7978846, %v4208_v23  ;;  %v6146_v6 = vpack.c.bf16 %v5936_v30, %v5930_v25  ;;  %v5929_v22 = vmul.f32 %v5635_v61, %v14749_v32  ;;  %v9481_v59 = vpop.eup %9480  ;;  %v4213_v13 = vmul.f32 0.035677407, %v3919_v34 }
 0x472   : > { %v5935_v55 = vmul.f32 %v5641_v4, %v14764_v11  ;;  %v3637_v54 = vadd.f32 %v15846_v12, %v14102_v56  ;;  %v14842_v14 = vadd.f32 %v15847_v51, %v14091_v46  ;;  %v9483_v27 = vpop.eup %9482  ;;  %9490 = vtanh.f32 %v4784_v28 }
 0x473   : > { %v14845_v52 = vmul.f32 0.5, %v14810_v1  ;;  %7525 = vmatprep.mubr.bf16.mxu1 %v6146_v6  ;;  %v14849_v32 = vadd.f32 %v14459_v60, %v14102_v56  ;;  %v5648_v41 = vadd.f32 1.0, %v9479_v44  ;;  %9492 = vtanh.f32 %v4789_v50 }
 0x474   : > { %v14851_v11 = vmul.f32 0.5, %v3631_v3  ;;  %v6145_v26 = vpack.c.bf16 %v5935_v55, %v5929_v22  ;;  %v3920_v9 = vmul.f32 %v3637_v54, %v3637_v54  ;;  %v4790_v63 = vmul.f32 %v4496_v43, %v3627_v45  ;;  %v15850_v55 = vld [vmem:[#allocation4_spill] sm:$0xff] }
 0x475   : > { %v4501_v35 = vadd.f32 0.7978846, %v4207_v53  ;;  %v3925_v58 = vmul.f32 %v14842_v14, %v14842_v14  ;;  %v3926_v36 = vmul.f32 %v14849_v32, %v14849_v32  ;;  %v9485_v21 = vpop.eup %9484  ;;  %v4796_v48 = vmul.f32 %v4502_v15, %v3631_v3 }
 0x476   : > { %v4507_v20 = vadd.f32 0.7978846, %v4213_v13  ;;  %7526 = vmatmul.mubr.bf16.gmra.mrb[152].mxu1 %v6145_v26  ;;  %v4214_v60 = vmul.f32 0.035677407, %v3920_v9  ;;  %v5654_v2 = vadd.f32 1.0, %v9483_v27  ;;  %v5942_v8 = vmul.f32 %v5648_v41, %v14775_v29 }
 0x477   : > { %v4219_v23 = vmul.f32 0.035677407, %v3925_v58  ;;  %v4220_v38 = vmul.f32 0.035677407, %v3926_v36  ;;  %v3645_v45 = vadd.f32 %v14480_v62, %v14091_v46  ;;  %v9487_v28 = vpop.eup %9486  ;;  %v5647_v30 = vadd.f32 1.0, %v9477_v57 }
 0x478   : > { %v4508_v61 = vadd.f32 0.7978846, %v4214_v60  ;;  %v5948_v25 = vmul.f32 %v5654_v2, %v14790_v42  ;;  %v5653_v34 = vadd.f32 1.0, %v9481_v59  ;;  %v9489_v44 = vpop.eup %9488  ;;  %9494 = vtanh.f32 %v4790_v63  ;;  %v15848_v42 = vld [vmem:[#allocation3_spill] sm:$0xff]  ;;  %v15851_v60 = vld [vmem:[#allocation6_spill] sm:$0xff] }
 0x479   : > { %v4795_v3 = vmul.f32 %v4501_v35, %v14810_v1  ;;  %v4513_v50 = vadd.f32 0.7978846, %v4219_v23  ;;  %v3931_v53 = vmul.f32 %v3645_v45, %v3645_v45  ;;  %v4801_v4 = vmul.f32 %v4507_v20, %v14825_v16  ;;  %v15849_v1 = vld [vmem:[#allocation5_spill] sm:$0xff] }
 0x47a   : > { %v6152_v43 = vpack.c.bf16 %v5948_v25, %v5942_v8  ;;  %v5941_v29 = vmul.f32 %v5647_v30, %v14773_v5  ;;  %v5947_v15 = vmul.f32 %v5653_v34, %v14783_v49  ;;  %9496 = vtanh.f32 %v4796_v48 }
 0x47b   : > { %v4802_v62 = vmul.f32 %v4508_v61, %v3637_v54  ;;  %v4514_v6 = vadd.f32 0.7978846, %v4220_v38  ;;  %v3647_v57 = vadd.f32 %v15848_v42, %v14102_v56  ;;  %v4225_v22 = vmul.f32 0.035677407, %v3931_v53 }
 0x47c   : > { %7535 = vmatprep.mubr.bf16.mxu1 %v6152_v43  ;;  %v6151_v59 = vpack.c.bf16 %v5947_v15, %v5941_v29  ;;  %v3649_v13 = vadd.f32 %v15849_v1, %v14091_v46  ;;  %v14871_v12 = vadd.f32 %v15850_v55, %v14102_v56  ;;  %v9491_v51 = vpop.eup %9490  ;;  %9498 = vtanh.f32 %v4795_v3  ;;  %v15853_v15 = vld [vmem:[#allocation8_spill] sm:$0xff] }
 0x47d   : > { %v14874_v5 = vmul.f32 0.5, %v14825_v16  ;;  %v4807_v49 = vmul.f32 %v4513_v50, %v14842_v14  ;;  %v3932_v27 = vmul.f32 %v3647_v57, %v3647_v57  ;;  %v14877_v41 = vpop.eup %9492  ;;  %9500 = vtanh.f32 %v4801_v4 }
 0x47e   : > { %v14879_v26 = vmul.f32 0.5, %v3637_v54  ;;  %7536 = vmatmul.mubr.bf16.gmra.mrb[156].mxu1 %v6151_v59  ;;  %v3937_v9 = vmul.f32 %v3649_v13, %v3649_v13  ;;  %v3938_v63 = vmul.f32 %v14871_v12, %v14871_v12  ;;  %9502 = vtanh.f32 %v4802_v62 }
 0x47f   : > { %v4808_v35 = vmul.f32 %v4514_v6, %v14849_v32  ;;  %v4226_v58 = vmul.f32 0.035677407, %v3932_v27  ;;  %v5660_v36 = vadd.f32 1.0, %v9487_v28  ;;  %v4519_v16 = vadd.f32 0.7978846, %v4225_v22 }
 0x480   : > { %v4231_v48 = vmul.f32 0.035677407, %v3937_v9  ;;  %v5666_v20 = vadd.f32 1.0, %v9491_v51  ;;  %v14886_v2 = vadd.f32 %v15851_v60, %v14091_v46  ;;  %9504 = vtanh.f32 %v4807_v49 }
 0x481   : > { %v14889_v54 = vmul.f32 0.5, %v14842_v14  ;;  %v14892_v23 = vmul.f32 0.5, %v14849_v32  ;;  %v5659_v38 = vadd.f32 1.0, %v9485_v21  ;;  %v4520_v8 = vadd.f32 0.7978846, %v4226_v58 }
 0x482   : > { %v4232_v61 = vmul.f32 0.035677407, %v3938_v63  ;;  %v5954_v25 = vmul.f32 %v5660_v36, %v14814_v18  ;;  %v5960_v28 = vmul.f32 %v5666_v20, %v14819_v10  ;;  %v9495_v30 = vpop.eup %9494  ;;  %9506 = vtanh.f32 %v4808_v35  ;;  %v15852_v10 = vld [vmem:[#allocation7_spill] sm:$0xff] }
 0x483   : > { %v14896_v34 = vmul.f32 0.5, %v3645_v45  ;;  %v14898_v3 = vmul.f32 0.5, %v3647_v57  ;;  %v5665_v50 = vadd.f32 1.0, %v9489_v44  ;;  %v4813_v53 = vmul.f32 %v4519_v16, %v3645_v45  ;;  %v15854_v44 = vld [vmem:[#allocation9_spill] sm:$0xff] }
 0x484   : > { %v4525_v14 = vadd.f32 0.7978846, %v4231_v48  ;;  %v6158_v4 = vpack.c.bf16 %v5960_v28, %v5954_v25  ;;  %v3943_v32 = vmul.f32 %v14886_v2, %v14886_v2  ;;  %v9497_v21 = vpop.eup %9496  ;;  %v5953_v43 = vmul.f32 %v5659_v38, %v14795_v7 }
 0x485   : > { %v5959_v18 = vmul.f32 %v5665_v50, %v14816_v40  ;;  %v3657_v29 = vadd.f32 %v15852_v10, %v14102_v56  ;;  %v3659_v62 = vadd.f32 %v15853_v15, %v14091_v46  ;;  %v4814_v6 = vmul.f32 %v4520_v8, %v3647_v57 }
 0x486   : > { %v14908_v42 = vmul.f32 0.5, %v3649_v13  ;;  %v4526_v45 = vadd.f32 0.7978846, %v4232_v61  ;;  %7545 = vmatprep.mubr.bf16.mxu1 %v6158_v4  ;;  %v14912_v22 = vadd.f32 %v15854_v44, %v14102_v56  ;;  %v9499_v59 = vpop.eup %9498  ;;  %v14915_v7 = vmul.f32 0.5, %v14871_v12 }
 0x487   : > { %v6157_v40 = vpack.c.bf16 %v5959_v18, %v5953_v43  ;;  %v3944_v1 = vmul.f32 %v3657_v29, %v3657_v29  ;;  %v5672_v55 = vadd.f32 1.0, %v9495_v30  ;;  %v9501_v51 = vpop.eup %9500  ;;  %v4819_v49 = vmul.f32 %v4525_v14, %v3649_v13 }
 0x488   : > { %v4237_v27 = vmul.f32 0.035677407, %v3943_v32  ;;  %v3949_v9 = vmul.f32 %v3659_v62, %v3659_v62  ;;  %v3950_v57 = vmul.f32 %v14912_v22, %v14912_v22  ;;  %v9503_v63 = vpop.eup %9502  ;;  %9508 = vtanh.f32 %v4813_v53 }
 0x489   : > { %v14920_v35 = vmul.f32 0.5, %v14886_v2  ;;  %7546 = vmatmul.mubr.bf16.gmra.mrb[160].mxu1 %v6157_v40  ;;  %v4238_v58 = vmul.f32 0.035677407, %v3944_v1  ;;  %v5678_v36 = vadd.f32 1.0, %v9497_v21  ;;  %9510 = vtanh.f32 %v4814_v6 }
 0x48a   : > { %v4820_v16 = vmul.f32 %v4526_v45, %v14871_v12  ;;  %v4243_v48 = vmul.f32 0.035677407, %v3949_v9  ;;  %v14925_v13 = vadd.f32 %v14559_v31, %v14091_v46  ;;  %v9505_v20 = vpop.eup %9504  ;;  %v5966_v60 = vmul.f32 %v5672_v55, %v14834_v19 }
 0x48b   : > { %v5972_v38 = vmul.f32 %v5678_v36, %v14851_v11  ;;  %v5671_v8 = vadd.f32 1.0, %v14877_v41  ;;  %v5677_v61 = vadd.f32 1.0, %v9499_v59  ;;  %9512 = vtanh.f32 %v4819_v49 }
 0x48c   : > { %v4531_v25 = vadd.f32 0.7978846, %v4237_v27  ;;  %v4244_v28 = vmul.f32 0.035677407, %v3950_v57  ;;  %v3955_v30 = vmul.f32 %v14925_v13, %v14925_v13  ;;  %v9507_v12 = vpop.eup %9506  ;;  %v4532_v50 = vadd.f32 0.7978846, %v4238_v58 }
 0x48d   : > { %v6164_v53 = vpack.c.bf16 %v5972_v38, %v5966_v60  ;;  %v5965_v31 = vmul.f32 %v5671_v8, %v14828_v17  ;;  %v5971_v14 = vmul.f32 %v5677_v61, %v14845_v52  ;;  %9514 = vtanh.f32 %v4820_v16 }
 0x48e   : > { %v4537_v19 = vadd.f32 0.7978846, %v4243_v48  ;;  %v4249_v4 = vmul.f32 0.035677407, %v3955_v30  ;;  %v3667_v11 = vadd.f32 %v14566_v0, %v14102_v56  ;;  %v14936_v41 = vmul.f32 0.5, %v3657_v29  ;;  %v15856_v30 = vld [vmem:[#allocation11_spill] sm:$0xff] }
 0x48f   : > { %7555 = vmatprep.mubr.bf16.mxu1 %v6164_v53  ;;  %v6163_v32 = vpack.c.bf16 %v5971_v14, %v5965_v31  ;;  %v14940_v21 = vadd.f32 %v14576_v47, %v14091_v46  ;;  %v14944_v43 = vadd.f32 %v14584_v33, %v14102_v56  ;;  %v4825_v17 = vmul.f32 %v4531_v25, %v14886_v2  ;;  %v15855_v25 = vld [vmem:[#allocation10_spill] sm:$0xff] }
 0x490   : > { %v14947_v52 = vmul.f32 0.5, %v3659_v62  ;;  %v4538_v18 = vadd.f32 0.7978846, %v4244_v28  ;;  %v3956_v10 = vmul.f32 %v3667_v11, %v3667_v11  ;;  %v4826_v15 = vmul.f32 %v4532_v50, %v3657_v29 }
 0x491   : > { %v14950_v0 = vmul.f32 0.5, %v14912_v22  ;;  %7556 = vmatmul.mubr.bf16.gmra.mrb[164].mxu1 %v6163_v32  ;;  %v3961_v6 = vmul.f32 %v14940_v21, %v14940_v21  ;;  %v3962_v47 = vmul.f32 %v14944_v43, %v14944_v43  ;;  %v4831_v45 = vmul.f32 %v4537_v19, %v3659_v62 }
 0x492   : > { %v4543_v33 = vadd.f32 0.7978846, %v4249_v4  ;;  %v4250_v44 = vmul.f32 0.035677407, %v3956_v10  ;;  %v5684_v59 = vadd.f32 1.0, %v9503_v63  ;;  %v9509_v2 = vpop.eup %9508  ;;  %v5690_v55 = vadd.f32 1.0, %v9507_v12 }
 0x493   : > { %v4255_v40 = vmul.f32 0.035677407, %v3961_v6  ;;  %v4256_v1 = vmul.f32 0.035677407, %v3962_v47  ;;  %v14958_v29 = vadd.f32 %v14610_v37, %v14091_v46  ;;  %v9511_v49 = vpop.eup %9510  ;;  %9516 = vtanh.f32 %v4825_v17  ;;  %v15857_v10 = vld [vmem:[#allocation12_spill] sm:$0xff] }
 0x494   : > { %v4832_v27 = vmul.f32 %v4538_v18, %v14912_v22  ;;  %v4544_v9 = vadd.f32 0.7978846, %v4250_v44  ;;  %v5683_v57 = vadd.f32 1.0, %v9501_v51  ;;  %9518 = vtanh.f32 %v4826_v15 }
 0x495   : > { %v5978_v62 = vmul.f32 %v5684_v59, %v14879_v26  ;;  %v5984_v58 = vmul.f32 %v5690_v55, %v14892_v23  ;;  %v3967_v63 = vmul.f32 %v14958_v29, %v14958_v29  ;;  %v9513_v36 = vpop.eup %9512  ;;  %9520 = vtanh.f32 %v4831_v45 }
 0x496   : > { %v4837_v16 = vmul.f32 %v4543_v33, %v14925_v13  ;;  %v4549_v37 = vadd.f32 0.7978846, %v4255_v40  ;;  %v5689_v48 = vadd.f32 1.0, %v9505_v20  ;;  %v4838_v60 = vmul.f32 %v4544_v9, %v3667_v11 }
 0x497   : > { %v4550_v38 = vadd.f32 0.7978846, %v4256_v1  ;;  %v6170_v8 = vpack.c.bf16 %v5984_v58, %v5978_v62  ;;  %v4261_v22 = vmul.f32 0.035677407, %v3967_v63  ;;  %v9515_v61 = vpop.eup %9514  ;;  %v5977_v51 = vmul.f32 %v5683_v57, %v14874_v5 }
 0x498   : > { %v5983_v26 = vmul.f32 %v5689_v48, %v14889_v54  ;;  %v14970_v23 = vadd.f32 %v14617_v39, %v14102_v56  ;;  %v14974_v28 = vadd.f32 %v15855_v25, %v14091_v46  ;;  %9522 = vtanh.f32 %v4832_v27 }
 0x499   : > { %v14977_v20 = vmul.f32 0.5, %v14925_v13  ;;  %7565 = vmatprep.mubr.bf16.mxu1 %v6170_v8  ;;  %v14981_v12 = vadd.f32 %v15856_v30, %v14102_v56  ;;  %v5696_v5 = vadd.f32 1.0, %v9511_v49  ;;  %9524 = vtanh.f32 %v4837_v16 }
 0x49a   : > { %v14983_v54 = vmul.f32 0.5, %v3667_v11  ;;  %v6169_v50 = vpack.c.bf16 %v5983_v26, %v5977_v51  ;;  %v3968_v39 = vmul.f32 %v14970_v23, %v14970_v23  ;;  %v4843_v53 = vmul.f32 %v4549_v37, %v14940_v21  ;;  %v15859_v37 = vld [vmem:[#allocation14_spill] sm:$0xff] }
 0x49b   : > { %v4555_v31 = vadd.f32 0.7978846, %v4261_v22  ;;  %v3973_v13 = vmul.f32 %v14974_v28, %v14974_v28  ;;  %v3974_v14 = vmul.f32 %v14981_v12, %v14981_v12  ;;  %9526 = vtanh.f32 %v4838_v60 }
 0x49c   : > { %v4844_v19 = vmul.f32 %v4550_v38, %v14944_v43  ;;  %7566 = vmatmul.mubr.bf16.gmra.mrb[168].mxu1 %v6169_v50  ;;  %v4262_v4 = vmul.f32 0.035677407, %v3968_v39  ;;  %v5702_v11 = vadd.f32 1.0, %v9515_v61  ;;  %v5990_v18 = vmul.f32 %v5696_v5, %v14898_v3  ;;  %v15860_v39 = vld [vmem:[#allocation15_spill] sm:$0xff] }
 0x49d   : > { %v4267_v32 = vmul.f32 0.035677407, %v3973_v13  ;;  %v4268_v17 = vmul.f32 0.035677407, %v3974_v14  ;;  %v14996_v15 = vadd.f32 %v15857_v10, %v14091_v46  ;;  %v9517_v6 = vpop.eup %9516  ;;  %v5695_v33 = vadd.f32 1.0, %v9509_v2 }
 0x49e   : > { %v4556_v47 = vadd.f32 0.7978846, %v4262_v4  ;;  %v5996_v45 = vmul.f32 %v5702_v11, %v14915_v7  ;;  %v5701_v44 = vadd.f32 1.0, %v9513_v36  ;;  %v9519_v59 = vpop.eup %9518  ;;  %9528 = vtanh.f32 %v4843_v53  ;;  %v15858_v36 = vld [vmem:[#allocation13_spill] sm:$0xff] }
 0x49f   : > { %v4849_v40 = vmul.f32 %v4555_v31, %v14958_v29  ;;  %v4562_v1 = vadd.f32 0.7978846, %v4268_v17  ;;  %v3979_v55 = vmul.f32 %v14996_v15, %v14996_v15  ;;  %v9521_v49 = vpop.eup %9520  ;;  %v5989_v9 = vmul.f32 %v5695_v33, %v14896_v34 }
 0x4a0   : > { %v4850_v3 = vmul.f32 %v4556_v47, %v14970_v23  ;;  %v6176_v27 = vpack.c.bf16 %v5996_v45, %v5990_v18  ;;  %v5995_v57 = vmul.f32 %v5701_v44, %v14908_v42  ;;  %v4561_v62 = vadd.f32 0.7978846, %v4267_v32 }
 0x4a1   : > { %v4856_v7 = vmul.f32 %v4562_v1, %v14981_v12  ;;  %v4273_v2 = vmul.f32 0.035677407, %v3979_v55  ;;  %v15008_v58 = vadd.f32 %v14656_v24, %v14102_v56  ;;  %9530 = vtanh.f32 %v4844_v19 }
 0x4a2   : > { %7575 = vmatprep.mubr.bf16.mxu1 %v6176_v27  ;;  %v6175_v63 = vpack.c.bf16 %v5995_v57, %v5989_v9  ;;  %v15012_v16 = vadd.f32 %v15858_v36, %v14091_v46  ;;  %v15016_v34 = vadd.f32 %v15859_v37, %v14102_v56  ;;  %v9523_v42 = vpop.eup %9522  ;;  %v15019_v48 = vmul.f32 0.5, %v14940_v21 }
 0x4a3   : > { %9532 = vtanh.f32 %v4849_v40  ;;  %v4567_v60 = vadd.f32 0.7978846, %v4273_v2  ;;  %v3980_v24 = vmul.f32 %v15008_v58, %v15008_v58  ;;  %v15023_v38 = vpop.eup %9524  ;;  %v5432_v8 = vmul.f32 0.5, %v14944_v43  ;;  %v15862_v40 = vld [vmem:[#allocation17_spill] sm:$0xff] }
 0x4a4   : > { %9534 = vtanh.f32 %v4850_v3  ;;  %7576 = vmatmul.mubr.bf16.gmra.mrb[172].mxu1 %v6175_v63  ;;  %v3985_v22 = vmul.f32 %v15012_v16, %v15012_v16  ;;  %v3986_v61 = vmul.f32 %v15016_v34, %v15016_v34  ;;  %v4855_v21 = vmul.f32 %v4561_v62, %v14974_v28 }
 0x4a5   : > { %9536 = vtanh.f32 %v4856_v7  ;;  %v4274_v51 = vmul.f32 0.035677407, %v3980_v24  ;;  %v5708_v26 = vadd.f32 1.0, %v9519_v59  ;;  %v9527_v25 = vpop.eup %9526  ;;  %v5714_v50 = vadd.f32 1.0, %v9523_v42 }
 0x4a6   : > { %v4279_v30 = vmul.f32 0.035677407, %v3985_v22  ;;  %v4280_v5 = vmul.f32 0.035677407, %v3986_v61  ;;  %v15033_v43 = vadd.f32 %v15860_v39, %v14091_v46  ;;  %v4861_v53 = vmul.f32 %v4567_v60, %v14996_v15 }
 0x4a7   : > { %v4568_v31 = vadd.f32 0.7978846, %v4274_v51  ;;  %v6002_v13 = vmul.f32 %v5708_v26, %v14936_v41  ;;  %v5707_v14 = vadd.f32 1.0, %v9517_v6  ;;  %v6008_v11 = vmul.f32 %v5714_v50, %v14950_v0  ;;  %v15861_v0 = vld [vmem:[#allocation16_spill] sm:$0xff] }
 0x4a8   : > { %v4573_v19 = vadd.f32 0.7978846, %v4279_v30  ;;  %v4574_v4 = vadd.f32 0.7978846, %v4280_v5  ;;  %v3991_v32 = vmul.f32 %v15033_v43, %v15033_v43  ;;  %v9529_v17 = vpop.eup %9528  ;;  %9538 = vtanh.f32 %v4855_v21  ;;  %v15864_v51 = vld [vmem:[#allocation32_spill] sm:$0xff] }
 0x4a9   : > { %v4862_v18 = vmul.f32 %v4568_v31, %v15008_v58  ;;  %v5713_v10 = vadd.f32 1.0, %v9521_v49  ;;  %v6001_v47 = vmul.f32 %v5707_v14, %v14920_v35  ;;  %v6182_v41 = vpack.c.bf16 %v6008_v11, %v6002_v13  ;;  %v15863_v49 = vld [vmem:[#allocation18_spill] sm:$0xff] }
 0x4aa   : > { %v4867_v45 = vmul.f32 %v4573_v19, %v15012_v16  ;;  %v4868_v33 = vmul.f32 %v4574_v4, %v15016_v34  ;;  %v4285_v6 = vmul.f32 0.035677407, %v3991_v32  ;;  %v15047_v59 = vadd.f32 %v15861_v0, %v14102_v56  ;;  %v15865_v19 = vld [vmem:[#allocation19_spill] sm:$0xff] }
 0x4ab   : > { %9540 = vtanh.f32 %v4862_v18  ;;  %v6007_v44 = vmul.f32 %v5713_v10, %v14947_v52  ;;  %v15051_v1 = vadd.f32 %v15862_v40, %v14091_v46  ;;  %v9531_v55 = vpop.eup %9530  ;;  %7585 = vmatprep.mubr.bf16.mxu1 %v6182_v41  ;;  %v15055_v3 = vadd.f32 %v15863_v49, %v14102_v56 }
 0x4ac   : > { %9542 = vtanh.f32 %v4861_v53  ;;  %v4579_v35 = vadd.f32 0.7978846, %v4285_v6  ;;  %v5720_v27 = vadd.f32 1.0, %v9527_v25  ;;  %v15058_v52 = vmul.f32 0.5, %v14958_v29 }
 0x4ad   : > { %v9533_v9 = vpop.eup %9532  ;;  %9544 = vtanh.f32 %v4868_v33  ;;  %v6181_v57 = vpack.c.bf16 %v6007_v44, %v6001_v47  ;;  %v3992_v62 = vmul.f32 %v15047_v59, %v15047_v59  ;;  %v3997_v63 = vmul.f32 %v15051_v1, %v15051_v1 }
 0x4ae   : > { %v9535_v7 = vpop.eup %9534  ;;  %9546 = vtanh.f32 %v4867_v45  ;;  %v4873_v2 = vmul.f32 %v4579_v35, %v15033_v43  ;;  %v3998_v36 = vmul.f32 %v15055_v3, %v15055_v3  ;;  %v5438_v42 = vmul.f32 0.5, %v14970_v23 }
 0x4af   : > { %v9537_v37 = vpop.eup %9536  ;;  %v5444_v29 = vmul.f32 0.5, %v14981_v12  ;;  %7586 = vmatmul.mubr.bf16.gmra.mrb[176].mxu1 %v6181_v57  ;;  %v4286_v60 = vmul.f32 0.035677407, %v3992_v62  ;;  %v5726_v24 = vadd.f32 1.0, %v9531_v55  ;;  %v4291_v22 = vmul.f32 0.035677407, %v3997_v63 }
 0x4b0   : > { %v4292_v61 = vmul.f32 0.035677407, %v3998_v36  ;;  %v6014_v21 = vmul.f32 %v5720_v27, %v14983_v54  ;;  %v15072_v26 = vadd.f32 %v15864_v51, %v14091_v46  ;;  %v5719_v5 = vadd.f32 1.0, %v15023_v38 }
 0x4b1   : > { %v4580_v25 = vadd.f32 0.7978846, %v4286_v60  ;;  %v6020_v30 = vmul.f32 %v5726_v24, %v5432_v8  ;;  %v5725_v50 = vadd.f32 1.0, %v9529_v17  ;;  %9548 = vtanh.f32 %v4873_v2 }
 0x4b2   : > { %v4585_v23 = vadd.f32 0.7978846, %v4291_v22  ;;  %v4586_v39 = vadd.f32 0.7978846, %v4292_v61  ;;  %v4003_v12 = vmul.f32 %v15072_v26, %v15072_v26  ;;  %v9539_v53 = vpop.eup %9538  ;;  %v6013_v54 = vmul.f32 %v5719_v5, %v14977_v20 }
 0x4b3   : > { %v4874_v31 = vmul.f32 %v4580_v25, %v15047_v59  ;;  %v6188_v13 = vpack.c.bf16 %v6020_v30, %v6014_v21  ;;  %v6019_v46 = vmul.f32 %v5725_v50, %v15019_v48  ;;  %v15084_v4 = vadd.f32 %v15865_v19, %v14102_v56 }
 0x4b4   : > { %v4879_v14 = vmul.f32 %v4585_v23, %v15051_v1  ;;  %v4880_v8 = vmul.f32 %v4586_v39, %v15055_v3  ;;  %v4297_v38 = vmul.f32 0.035677407, %v4003_v12  ;;  %v5732_v17 = vadd.f32 1.0, %v9535_v7 }
 0x4b5   : > { %v9541_v11 = vpop.eup %9540  ;;  %9550 = vtanh.f32 %v4874_v31  ;;  %7595 = vmatprep.mubr.bf16.mxu1 %v6188_v13  ;;  %v6187_v32 = vpack.c.bf16 %v6019_v46, %v6013_v54  ;;  %v5738_v18 = vadd.f32 1.0, %v9537_v37  ;;  %v5443_v20 = vmul.f32 0.5, %v14974_v28 }
 0x4b6   : > { %v9543_v10 = vpop.eup %9542  ;;  %v5450_v48 = vmul.f32 0.5, %v15008_v58  ;;  %9552 = vtanh.f32 %v4879_v14  ;;  %v4004_v47 = vmul.f32 %v15084_v4, %v15084_v4  ;;  %v6026_v56 = vmul.f32 %v5732_v17, %v5438_v42 }
 0x4b7   : > { %v9545_v45 = vpop.eup %9544  ;;  %9554 = vtanh.f32 %v4880_v8  ;;  %7596 = vmatmul.mubr.bf16.gmra.mrb[180].mxu1 %v6187_v32  ;;  %v6032_v33 = vmul.f32 %v5738_v18, %v5444_v29  ;;  %v5731_v41 = vadd.f32 1.0, %v9533_v9  ;;  %v4591_v44 = vadd.f32 0.7978846, %v4297_v38  ;;  %v15866_v38 = vld [vmem:[#allocation33_spill] sm:$0xff] }
 0x4b8   : > { %v9547_v6 = vpop.eup %9546  ;;  %v4298_v0 = vmul.f32 0.035677407, %v4004_v47  ;;  %v5737_v40 = vadd.f32 1.0, %v9539_v53  ;;  %v5744_v55 = vadd.f32 1.0, %v9541_v11  ;;  %v5456_v35 = vmul.f32 0.5, %v15016_v34 }
 0x4b9   : > { %v6194_v28 = vpack.c.bf16 %v6032_v33, %v6026_v56  ;;  %v5750_v49 = vadd.f32 1.0, %v9545_v45  ;;  %v5743_v58 = vadd.f32 1.0, %v9543_v10  ;;  %v5449_v27 = vmul.f32 0.5, %v14996_v15 }
 0x4ba   : > { %v4592_v57 = vadd.f32 0.7978846, %v4298_v0  ;;  %v6025_v62 = vmul.f32 %v5731_v41, %v15058_v52  ;;  %v6031_v7 = vmul.f32 %v5737_v40, %v5443_v20  ;;  %v5455_v2 = vmul.f32 0.5, %v15012_v16 }
 0x4bb   : > { %7605 = vmatprep.mubr.bf16.mxu1 %v6194_v28  ;;  %v6038_v9 = vmul.f32 %v5744_v55, %v5450_v48  ;;  %v6044_v63 = vmul.f32 %v5750_v49, %v5456_v35  ;;  %v5749_v36 = vadd.f32 1.0, %v9547_v6  ;;  %v9549_v37 = vpop.eup %9548  ;;  %v4885_v42 = vmul.f32 %v4591_v44, %v15072_v26 }
 0x4bc   : > { %v4886_v34 = vmul.f32 %v4592_v57, %v15084_v4  ;;  %v6193_v29 = vpack.c.bf16 %v6031_v7, %v6025_v62  ;;  %v6037_v24 = vmul.f32 %v5743_v58, %v5449_v27  ;;  %v5755_v61 = vadd.f32 1.0, %v9549_v37 }
 0x4bd   : > { %v6200_v60 = vpack.c.bf16 %v6044_v63, %v6038_v9  ;;  %v6043_v22 = vmul.f32 %v5749_v36, %v5455_v2  ;;  %v5461_v25 = vmul.f32 0.5, %v15033_v43  ;;  %v5467_v30 = vmul.f32 0.5, %v15051_v1  ;;  %v6309_v43 = vld [vmem:[%s15372_s5] sm:$0x3] }
 0x4be   : > { %9556 = vtanh.f32 %v4886_v34  ;;  %v5462_v50 = vmul.f32 0.5, %v15047_v59  ;;  %v5468_v23 = vmul.f32 0.5, %v15055_v3  ;;  %v5474_v1 = vmul.f32 0.5, %v15084_v4 }
 0x4bf   : > { %v9551_v15 = vpop.eup %9550  ;;  %7606 = vmatmul.mubr.bf16.gmra.mrb[184].mxu1 %v6193_v29  ;;  %v6199_v52 = vpack.c.bf16 %v6043_v22, %v6037_v24  ;;  %9558 = vtanh.f32 %v4885_v42  ;;  %v6049_v12 = vmul.f32 %v5755_v61, %v5461_v25  ;;  %v15867_v19 = vsub.s32 0, %v15866_v38 }
 0x4c0   : > { %v9553_v21 = vpop.eup %9552  ;;  %7615 = vmatprep.mubr.bf16.mxu1 %v6200_v60  ;;  %v5756_v16 = vadd.f32 1.0, %v9551_v15  ;;  %v15868_v32 = vsub.s32 1, %v15866_v38  ;;  %v5473_v20 = vmul.f32 0.5, %v15072_v26 }
 0x4c1   : > { %v9555_v51 = vpop.eup %9554  ;;  %v5761_v5 = vadd.f32 1.0, %v9553_v21  ;;  %v15106_v11 = vrot.slane %v6309_v43, %v15867_v19 }
 0x4c2   : > { %v5762_v39 = vadd.f32 1.0, %v9555_v51  ;;  %v6050_v31 = vmul.f32 %v5756_v16, %v5462_v50  ;;  %v15110_v17 = vrot.slane %v6309_v43, %v15868_v32 }
 0x4c3   : > { %v6055_v53 = vmul.f32 %v5761_v5, %v5467_v30 }
 0x4c4   : > { %v6056_v13 = vmul.f32 %v5762_v39, %v5468_v23 }
 0x4c5   : > { %v6205_v54 = vpack.c.bf16 %v6055_v53, %v6049_v12 }
 0x4c6   : > { %v6206_v46 = vpack.c.bf16 %v6056_v13, %v6050_v31 }
 0x4c7   : > { %7616 = vmatmul.mubr.bf16.gmra.mrb[188].mxu1 %v6199_v52 }
 0x4c8   : > { %v9557_v14 = vpop.eup %9556  ;;  %7625 = vmatprep.mubr.bf16.mxu1 %v6206_v46 }
 0x4c9   : > { %v5768_v59 = vadd.f32 1.0, %v9557_v14  ;;  %v9559_v8 = vpop.eup %9558 }
 0x4ca   : > { %v5767_v10 = vadd.f32 1.0, %v9559_v8 }
 0x4cb   : > { %v6062_v3 = vmul.f32 %v5768_v59, %v5474_v1 }
 0x4cc   : > { %v6061_v33 = vmul.f32 %v5767_v10, %v5473_v20 }
 0x4cd   : > { %v6212_v18 = vpack.c.bf16 %v6062_v3, %v6062_v3 }
 0x4ce   : > { %v6211_v44 = vpack.c.bf16 %v6061_v33, %v6061_v33 }
 0x4cf   : > { %7626 = vmatmul.mubr.bf16.gmra.mrb[192].mxu1 %v6205_v54 }
 0x4d0   : > { %v7397_v4 = vpop.f32.mrb[100].mxu1  ;;  %7635 = vmatprep.mubr.bf16.mxu1 %v6212_v18 }
 0x4d1   : > { %v8217_v48 = vadd.f32 %v7397_v4, %v15106_v11  ;;  %v7399_v47 = vpop.f32.mrb[101].mxu1 }
 0x4d2   : > { %v8218_v45 = vadd.f32 %v7399_v47, %v15110_v17  ;;  %v7401_v56 = vpop.f32.mrb[102].mxu1 }
 0x4d3   : > { %7644 = vst [vmem:[%s15116_s27] sm:$0xff] %v8217_v48  ;;  %v8219_v41 = vadd.f32 %v7401_v56, %v15106_v11  ;;  %v7403_v6 = vpop.f32.mrb[103].mxu1 }
 0x4d4   : > { %7645 = vst.msk [vmem:[%s15116_s27 + $0x8] sm:$0xff] %vm580_vm0, %v8218_v45  ;;  %v8220_v26 = vadd.f32 %v7403_v6, %v15110_v17 }
 0x4d5   : > { %7646 = vst [vmem:[%s15116_s27 + $0x10] sm:$0xff] %v8219_v41 }
 0x4d6   : > { %7647 = vst.msk [vmem:[%s15116_s27 + $0x18] sm:$0xff] %vm580_vm0, %v8220_v26 }
 0x4d7   : > { %7636 = vmatmul.mubr.bf16.gmra.mrb[196].mxu1 %v6211_v44 }
 0x4d8   : > { %v7407_v0 = vpop.f32.mrb[104].mxu1 }
 0x4d9   : > { %v8221_v40 = vadd.f32 %v7407_v0, %v15106_v11  ;;  %v7409_v55 = vpop.f32.mrb[105].mxu1 }
 0x4da   : > { %v8222_v35 = vadd.f32 %v7409_v55, %v15110_v17  ;;  %v7411_v28 = vpop.f32.mrb[106].mxu1 }
 0x4db   : > { %7648 = vst [vmem:[%s15116_s27 + $0x20] sm:$0xff] %v8221_v40  ;;  %v8223_v49 = vadd.f32 %v7411_v28, %v15106_v11  ;;  %v7413_v58 = vpop.f32.mrb[107].mxu1 }
 0x4dc   : > { %7649 = vst.msk [vmem:[%s15116_s27 + $0x28] sm:$0xff] %vm580_vm0, %v8222_v35  ;;  %v8224_v27 = vadd.f32 %v7413_v58, %v15110_v17 }
 0x4dd   : > { %7650 = vst [vmem:[%s15116_s27 + $0x30] sm:$0xff] %v8223_v49 }
 0x4de   : > { %7651 = vst.msk [vmem:[%s15116_s27 + $0x38] sm:$0xff] %vm580_vm0, %v8224_v27 }
 0x4e1   : > { %v7417_v57 = vpop.f32.mrb[108].mxu1 }
 0x4e2   : > { %v8225_v62 = vadd.f32 %v7417_v57, %v15106_v11  ;;  %v7419_v7 = vpop.f32.mrb[109].mxu1 }
 0x4e3   : > { %v8226_v2 = vadd.f32 %v7419_v7, %v15110_v17  ;;  %v7421_v9 = vpop.f32.mrb[110].mxu1 }
 0x4e4   : > { %7652 = vst [vmem:[%s15116_s27 + $0x40] sm:$0xff] %v8225_v62  ;;  %v8227_v63 = vadd.f32 %v7421_v9, %v15106_v11  ;;  %v7423_v36 = vpop.f32.mrb[111].mxu1 }
 0x4e5   : > { %7653 = vst.msk [vmem:[%s15116_s27 + $0x48] sm:$0xff] %vm580_vm0, %v8226_v2  ;;  %v8228_v37 = vadd.f32 %v7423_v36, %v15110_v17 }
 0x4e6   : > { %7654 = vst [vmem:[%s15116_s27 + $0x50] sm:$0xff] %v8227_v63 }
 0x4e7   : > { %7655 = vst.msk [vmem:[%s15116_s27 + $0x58] sm:$0xff] %vm580_vm0, %v8228_v37 }
 0x4ea   : > { %v7427_v42 = vpop.f32.mrb[112].mxu1 }
 0x4eb   : > { %v8229_v34 = vadd.f32 %v7427_v42, %v15106_v11  ;;  %v7429_v29 = vpop.f32.mrb[113].mxu1 }
 0x4ec   : > { %v8230_v60 = vadd.f32 %v7429_v29, %v15110_v17  ;;  %v7431_v24 = vpop.f32.mrb[114].mxu1 }
 0x4ed   : > { %7656 = vst [vmem:[%s15116_s27 + $0x60] sm:$0xff] %v8229_v34  ;;  %v8231_v22 = vadd.f32 %v7431_v24, %v15106_v11  ;;  %v7433_v15 = vpop.f32.mrb[115].mxu1 }
 0x4ee   : > { %7657 = vst.msk [vmem:[%s15116_s27 + $0x68] sm:$0xff] %vm580_vm0, %v8230_v60  ;;  %v8232_v52 = vadd.f32 %v7433_v15, %v15110_v17 }
 0x4ef   : > { %7658 = vst [vmem:[%s15116_s27 + $0x70] sm:$0xff] %v8231_v22 }
 0x4f0   : > { %7659 = vst.msk [vmem:[%s15116_s27 + $0x78] sm:$0xff] %vm580_vm0, %v8232_v52 }
 0x4f2   : > { %v7437_v61 = vpop.f32.mrb[116].mxu1 }
 0x4f3   : > { %v8233_v21 = vadd.f32 %v7437_v61, %v15106_v11  ;;  %v7439_v16 = vpop.f32.mrb[117].mxu1 }
 0x4f4   : > { %v8234_v51 = vadd.f32 %v7439_v16, %v15110_v17  ;;  %v7441_v25 = vpop.f32.mrb[118].mxu1 }
 0x4f5   : > { %7660 = vst [vmem:[%s15116_s27 + $0x80] sm:$0xff] %v8233_v21  ;;  %v8235_v30 = vadd.f32 %v7441_v25, %v15106_v11  ;;  %v7443_v5 = vpop.f32.mrb[119].mxu1 }
 0x4f6   : > { %7661 = vst.msk [vmem:[%s15116_s27 + $0x88] sm:$0xff] %vm580_vm0, %v8234_v51  ;;  %v8236_v50 = vadd.f32 %v7443_v5, %v15110_v17 }
 0x4f7   : > { %7662 = vst [vmem:[%s15116_s27 + $0x90] sm:$0xff] %v8235_v30 }
 0x4f8   : > { %7663 = vst.msk [vmem:[%s15116_s27 + $0x98] sm:$0xff] %vm580_vm0, %v8236_v50 }
 0x4fd   : > { %v7447_v23 = vpop.f32.mrb[120].mxu1 }
 0x4fe   : > { %v8237_v39 = vadd.f32 %v7447_v23, %v15106_v11  ;;  %v7449_v12 = vpop.f32.mrb[121].mxu1 }
 0x4ff   : > { %v8238_v53 = vadd.f32 %v7449_v12, %v15110_v17  ;;  %v7451_v31 = vpop.f32.mrb[122].mxu1 }
 0x500   : > { %7664 = vst [vmem:[%s15116_s27 + $0xa0] sm:$0xff] %v8237_v39  ;;  %v8239_v13 = vadd.f32 %v7451_v31, %v15106_v11  ;;  %v7453_v54 = vpop.f32.mrb[123].mxu1 }
 0x501   : > { %7665 = vst.msk [vmem:[%s15116_s27 + $0xa8] sm:$0xff] %vm580_vm0, %v8238_v53  ;;  %v8240_v46 = vadd.f32 %v7453_v54, %v15110_v17 }
 0x502   : > { %7666 = vst [vmem:[%s15116_s27 + $0xb0] sm:$0xff] %v8239_v13 }
 0x503   : > { %7667 = vst.msk [vmem:[%s15116_s27 + $0xb8] sm:$0xff] %vm580_vm0, %v8240_v46 }
 0x505   : > { %v7457_v14 = vpop.f32.mrb[124].mxu1 }
 0x506   : > { %v8241_v43 = vadd.f32 %v7457_v14, %v15106_v11  ;;  %v7459_v1 = vpop.f32.mrb[125].mxu1 }
 0x507   : > { %v8242_v59 = vadd.f32 %v7459_v1, %v15110_v17  ;;  %v7461_v8 = vpop.f32.mrb[126].mxu1 }
 0x508   : > { %7668 = vst [vmem:[%s15116_s27 + $0xc0] sm:$0xff] %v8241_v43  ;;  %v8243_v3 = vadd.f32 %v7461_v8, %v15106_v11  ;;  %v7463_v38 = vpop.f32.mrb[127].mxu1 }
 0x509   : > { %7669 = vst.msk [vmem:[%s15116_s27 + $0xc8] sm:$0xff] %vm580_vm0, %v8242_v59  ;;  %v8244_v19 = vadd.f32 %v7463_v38, %v15110_v17 }
 0x50a   : > { %7670 = vst [vmem:[%s15116_s27 + $0xd0] sm:$0xff] %v8243_v3 }
 0x50b   : > { %7671 = vst.msk [vmem:[%s15116_s27 + $0xd8] sm:$0xff] %vm580_vm0, %v8244_v19 }
 0x510   : > { %v7467_v32 = vpop.f32.mrb[128].mxu1 }
 0x511   : > { %v8245_v18 = vadd.f32 %v7467_v32, %v15106_v11  ;;  %v7469_v10 = vpop.f32.mrb[129].mxu1 }
 0x512   : > { %v8246_v4 = vadd.f32 %v7469_v10, %v15110_v17  ;;  %v7471_v20 = vpop.f32.mrb[130].mxu1 }
 0x513   : > { %7672 = vst [vmem:[%s15116_s27 + $0xe0] sm:$0xff] %v8245_v18  ;;  %v8247_v48 = vadd.f32 %v7471_v20, %v15106_v11  ;;  %v7473_v47 = vpop.f32.mrb[131].mxu1 }
 0x514   : > { %7673 = vst.msk [vmem:[%s15116_s27 + $0xe8] sm:$0xff] %vm580_vm0, %v8246_v4  ;;  %v8248_v45 = vadd.f32 %v7473_v47, %v15110_v17 }
 0x515   : > { %7674 = vst [vmem:[%s15116_s27 + $0xf0] sm:$0xff] %v8247_v48 }
 0x516   : > { %7675 = vst.msk [vmem:[%s15116_s27 + $0xf8] sm:$0xff] %vm580_vm0, %v8248_v45 }
 0x518   : > { %v7477_v56 = vpop.f32.mrb[132].mxu1 }
 0x519   : > { %v8249_v33 = vadd.f32 %v7477_v56, %v15106_v11  ;;  %v7479_v41 = vpop.f32.mrb[133].mxu1 }
 0x51a   : > { %v8250_v6 = vadd.f32 %v7479_v41, %v15110_v17  ;;  %v7481_v26 = vpop.f32.mrb[134].mxu1 }
 0x51b   : > { %7676 = vst [vmem:[%s15116_s27 + $0x100] sm:$0xff] %v8249_v33  ;;  %v8251_v44 = vadd.f32 %v7481_v26, %v15106_v11  ;;  %v7483_v0 = vpop.f32.mrb[135].mxu1 }
 0x51c   : > { %7677 = vst.msk [vmem:[%s15116_s27 + $0x108] sm:$0xff] %vm580_vm0, %v8250_v6  ;;  %v8252_v40 = vadd.f32 %v7483_v0, %v15110_v17 }
 0x51d   : > { %7678 = vst [vmem:[%s15116_s27 + $0x110] sm:$0xff] %v8251_v44 }
 0x51e   : > { %7679 = vst.msk [vmem:[%s15116_s27 + $0x118] sm:$0xff] %vm580_vm0, %v8252_v40 }
 0x523   : > { %v7487_v55 = vpop.f32.mrb[136].mxu1 }
 0x524   : > { %v8253_v35 = vadd.f32 %v7487_v55, %v15106_v11  ;;  %v7489_v28 = vpop.f32.mrb[137].mxu1 }
 0x525   : > { %v8254_v49 = vadd.f32 %v7489_v28, %v15110_v17  ;;  %v7491_v58 = vpop.f32.mrb[138].mxu1 }
 0x526   : > { %7680 = vst [vmem:[%s15116_s27 + $0x120] sm:$0xff] %v8253_v35  ;;  %v8255_v27 = vadd.f32 %v7491_v58, %v15106_v11  ;;  %v7493_v57 = vpop.f32.mrb[139].mxu1 }
 0x527   : > { %7681 = vst.msk [vmem:[%s15116_s27 + $0x128] sm:$0xff] %vm580_vm0, %v8254_v49  ;;  %v8256_v62 = vadd.f32 %v7493_v57, %v15110_v17 }
 0x528   : > { %7682 = vst [vmem:[%s15116_s27 + $0x130] sm:$0xff] %v8255_v27 }
 0x529   : > { %7683 = vst.msk [vmem:[%s15116_s27 + $0x138] sm:$0xff] %vm580_vm0, %v8256_v62 }
 0x52b   : > { %v7497_v7 = vpop.f32.mrb[140].mxu1 }
 0x52c   : > { %v8257_v2 = vadd.f32 %v7497_v7, %v15106_v11  ;;  %v7499_v9 = vpop.f32.mrb[141].mxu1 }
 0x52d   : > { %v8258_v63 = vadd.f32 %v7499_v9, %v15110_v17  ;;  %v7501_v36 = vpop.f32.mrb[142].mxu1 }
 0x52e   : > { %7684 = vst [vmem:[%s15116_s27 + $0x140] sm:$0xff] %v8257_v2  ;;  %v8259_v37 = vadd.f32 %v7501_v36, %v15106_v11  ;;  %v7503_v42 = vpop.f32.mrb[143].mxu1 }
 0x52f   : > { %7685 = vst.msk [vmem:[%s15116_s27 + $0x148] sm:$0xff] %vm580_vm0, %v8258_v63  ;;  %v8260_v34 = vadd.f32 %v7503_v42, %v15110_v17 }
 0x530   : > { %7686 = vst [vmem:[%s15116_s27 + $0x150] sm:$0xff] %v8259_v37 }
 0x531   : > { %7687 = vst.msk [vmem:[%s15116_s27 + $0x158] sm:$0xff] %vm580_vm0, %v8260_v34 }
 0x536   : > { %v7507_v29 = vpop.f32.mrb[144].mxu1 }
 0x537   : > { %v8261_v60 = vadd.f32 %v7507_v29, %v15106_v11  ;;  %v7509_v24 = vpop.f32.mrb[145].mxu1 }
 0x538   : > { %v8262_v22 = vadd.f32 %v7509_v24, %v15110_v17  ;;  %v7511_v15 = vpop.f32.mrb[146].mxu1 }
 0x539   : > { %7688 = vst [vmem:[%s15116_s27 + $0x160] sm:$0xff] %v8261_v60  ;;  %v8263_v52 = vadd.f32 %v7511_v15, %v15106_v11  ;;  %v7513_v61 = vpop.f32.mrb[147].mxu1 }
 0x53a   : > { %7689 = vst.msk [vmem:[%s15116_s27 + $0x168] sm:$0xff] %vm580_vm0, %v8262_v22  ;;  %v8264_v21 = vadd.f32 %v7513_v61, %v15110_v17 }
 0x53b   : > { %7690 = vst [vmem:[%s15116_s27 + $0x170] sm:$0xff] %v8263_v52 }
 0x53c   : > { %7691 = vst.msk [vmem:[%s15116_s27 + $0x178] sm:$0xff] %vm580_vm0, %v8264_v21 }
 0x53e   : > { %v7517_v16 = vpop.f32.mrb[148].mxu1 }
 0x53f   : > { %v8265_v51 = vadd.f32 %v7517_v16, %v15106_v11  ;;  %v7519_v25 = vpop.f32.mrb[149].mxu1 }
 0x540   : > { %v8266_v30 = vadd.f32 %v7519_v25, %v15110_v17  ;;  %v7521_v5 = vpop.f32.mrb[150].mxu1 }
 0x541   : > { %7692 = vst [vmem:[%s15116_s27 + $0x180] sm:$0xff] %v8265_v51  ;;  %v8267_v50 = vadd.f32 %v7521_v5, %v15106_v11  ;;  %v7523_v23 = vpop.f32.mrb[151].mxu1 }
 0x542   : > { %7693 = vst.msk [vmem:[%s15116_s27 + $0x188] sm:$0xff] %vm580_vm0, %v8266_v30  ;;  %v8268_v39 = vadd.f32 %v7523_v23, %v15110_v17 }
 0x543   : > { %7694 = vst [vmem:[%s15116_s27 + $0x190] sm:$0xff] %v8267_v50 }
 0x544   : > { %7695 = vst.msk [vmem:[%s15116_s27 + $0x198] sm:$0xff] %vm580_vm0, %v8268_v39 }
 0x549   : > { %v7527_v12 = vpop.f32.mrb[152].mxu1 }
 0x54a   : > { %v8269_v53 = vadd.f32 %v7527_v12, %v15106_v11  ;;  %v7529_v31 = vpop.f32.mrb[153].mxu1 }
 0x54b   : > { %v8270_v13 = vadd.f32 %v7529_v31, %v15110_v17  ;;  %v7531_v54 = vpop.f32.mrb[154].mxu1 }
 0x54c   : > { %7696 = vst [vmem:[%s15116_s27 + $0x1a0] sm:$0xff] %v8269_v53  ;;  %v8271_v46 = vadd.f32 %v7531_v54, %v15106_v11  ;;  %v7533_v14 = vpop.f32.mrb[155].mxu1 }
 0x54d   : > { %7697 = vst.msk [vmem:[%s15116_s27 + $0x1a8] sm:$0xff] %vm580_vm0, %v8270_v13  ;;  %v8272_v43 = vadd.f32 %v7533_v14, %v15110_v17 }
 0x54e   : > { %7698 = vst [vmem:[%s15116_s27 + $0x1b0] sm:$0xff] %v8271_v46 }
 0x54f   : > { %7699 = vst.msk [vmem:[%s15116_s27 + $0x1b8] sm:$0xff] %vm580_vm0, %v8272_v43 }
 0x551   : > { %v7537_v1 = vpop.f32.mrb[156].mxu1 }
 0x552   : > { %v8273_v59 = vadd.f32 %v7537_v1, %v15106_v11  ;;  %v7539_v8 = vpop.f32.mrb[157].mxu1 }
 0x553   : > { %v8274_v3 = vadd.f32 %v7539_v8, %v15110_v17  ;;  %v7541_v38 = vpop.f32.mrb[158].mxu1 }
 0x554   : > { %7700 = vst [vmem:[%s15116_s27 + $0x1c0] sm:$0xff] %v8273_v59  ;;  %v8275_v19 = vadd.f32 %v7541_v38, %v15106_v11  ;;  %v7543_v32 = vpop.f32.mrb[159].mxu1 }
 0x555   : > { %7701 = vst.msk [vmem:[%s15116_s27 + $0x1c8] sm:$0xff] %vm580_vm0, %v8274_v3  ;;  %v8276_v18 = vadd.f32 %v7543_v32, %v15110_v17 }
 0x556   : > { %7702 = vst [vmem:[%s15116_s27 + $0x1d0] sm:$0xff] %v8275_v19 }
 0x557   : > { %7703 = vst.msk [vmem:[%s15116_s27 + $0x1d8] sm:$0xff] %vm580_vm0, %v8276_v18 }
 0x55c   : > { %v7547_v10 = vpop.f32.mrb[160].mxu1 }
 0x55d   : > { %v8277_v4 = vadd.f32 %v7547_v10, %v15106_v11  ;;  %v7549_v20 = vpop.f32.mrb[161].mxu1 }
 0x55e   : > { %v8278_v48 = vadd.f32 %v7549_v20, %v15110_v17  ;;  %v7551_v47 = vpop.f32.mrb[162].mxu1 }
 0x55f   : > { %7704 = vst [vmem:[%s15116_s27 + $0x1e0] sm:$0xff] %v8277_v4  ;;  %v8279_v45 = vadd.f32 %v7551_v47, %v15106_v11  ;;  %v7553_v56 = vpop.f32.mrb[163].mxu1 }
 0x560   : > { %7705 = vst.msk [vmem:[%s15116_s27 + $0x1e8] sm:$0xff] %vm580_vm0, %v8278_v48  ;;  %v8280_v33 = vadd.f32 %v7553_v56, %v15110_v17 }
 0x561   : > { %7706 = vst [vmem:[%s15116_s27 + $0x1f0] sm:$0xff] %v8279_v45 }
 0x562   : > { %7707 = vst.msk [vmem:[%s15116_s27 + $0x1f8] sm:$0xff] %vm580_vm0, %v8280_v33 }
 0x564   : > { %v7557_v41 = vpop.f32.mrb[164].mxu1 }
 0x565   : > { %v8281_v6 = vadd.f32 %v7557_v41, %v15106_v11  ;;  %v7559_v26 = vpop.f32.mrb[165].mxu1 }
 0x566   : > { %v8282_v44 = vadd.f32 %v7559_v26, %v15110_v17  ;;  %v7561_v0 = vpop.f32.mrb[166].mxu1 }
 0x567   : > { %7708 = vst [vmem:[%s15116_s27 + $0x200] sm:$0xff] %v8281_v6  ;;  %v8283_v40 = vadd.f32 %v7561_v0, %v15106_v11  ;;  %v7563_v55 = vpop.f32.mrb[167].mxu1 }
 0x568   : > { %7709 = vst.msk [vmem:[%s15116_s27 + $0x208] sm:$0xff] %vm580_vm0, %v8282_v44  ;;  %v8284_v35 = vadd.f32 %v7563_v55, %v15110_v17 }
 0x569   : > { %7710 = vst [vmem:[%s15116_s27 + $0x210] sm:$0xff] %v8283_v40 }
 0x56a   : > { %7711 = vst.msk [vmem:[%s15116_s27 + $0x218] sm:$0xff] %vm580_vm0, %v8284_v35 }
 0x56f   : > { %v7567_v28 = vpop.f32.mrb[168].mxu1 }
 0x570   : > { %v8285_v49 = vadd.f32 %v7567_v28, %v15106_v11  ;;  %v7569_v58 = vpop.f32.mrb[169].mxu1 }
 0x571   : > { %v8286_v27 = vadd.f32 %v7569_v58, %v15110_v17  ;;  %v7571_v57 = vpop.f32.mrb[170].mxu1 }
 0x572   : > { %7712 = vst [vmem:[%s15116_s27 + $0x220] sm:$0xff] %v8285_v49  ;;  %v8287_v62 = vadd.f32 %v7571_v57, %v15106_v11  ;;  %v7573_v7 = vpop.f32.mrb[171].mxu1 }
 0x573   : > { %7713 = vst.msk [vmem:[%s15116_s27 + $0x228] sm:$0xff] %vm580_vm0, %v8286_v27  ;;  %v8288_v2 = vadd.f32 %v7573_v7, %v15110_v17 }
 0x574   : > { %7714 = vst [vmem:[%s15116_s27 + $0x230] sm:$0xff] %v8287_v62 }
 0x575   : > { %7715 = vst.msk [vmem:[%s15116_s27 + $0x238] sm:$0xff] %vm580_vm0, %v8288_v2 }
 0x577   : > { %v7577_v9 = vpop.f32.mrb[172].mxu1 }
 0x578   : > { %v8289_v63 = vadd.f32 %v7577_v9, %v15106_v11  ;;  %v7579_v36 = vpop.f32.mrb[173].mxu1 }
 0x579   : > { %v8290_v37 = vadd.f32 %v7579_v36, %v15110_v17  ;;  %v7581_v42 = vpop.f32.mrb[174].mxu1 }
 0x57a   : > { %7716 = vst [vmem:[%s15116_s27 + $0x240] sm:$0xff] %v8289_v63  ;;  %v8291_v34 = vadd.f32 %v7581_v42, %v15106_v11  ;;  %v7583_v29 = vpop.f32.mrb[175].mxu1 }
 0x57b   : > { %7717 = vst.msk [vmem:[%s15116_s27 + $0x248] sm:$0xff] %vm580_vm0, %v8290_v37  ;;  %v8292_v60 = vadd.f32 %v7583_v29, %v15110_v17 }
 0x57c   : > { %7718 = vst [vmem:[%s15116_s27 + $0x250] sm:$0xff] %v8291_v34 }
 0x57d   : > { %7719 = vst.msk [vmem:[%s15116_s27 + $0x258] sm:$0xff] %vm580_vm0, %v8292_v60 }
 0x582   : > { %v7587_v24 = vpop.f32.mrb[176].mxu1 }
 0x583   : > { %v8293_v22 = vadd.f32 %v7587_v24, %v15106_v11  ;;  %v7589_v15 = vpop.f32.mrb[177].mxu1 }
 0x584   : > { %v8294_v52 = vadd.f32 %v7589_v15, %v15110_v17  ;;  %v7591_v61 = vpop.f32.mrb[178].mxu1 }
 0x585   : > { %7720 = vst [vmem:[%s15116_s27 + $0x260] sm:$0xff] %v8293_v22  ;;  %v8295_v21 = vadd.f32 %v7591_v61, %v15106_v11  ;;  %v7593_v16 = vpop.f32.mrb[179].mxu1 }
 0x586   : > { %7721 = vst.msk [vmem:[%s15116_s27 + $0x268] sm:$0xff] %vm580_vm0, %v8294_v52  ;;  %v8296_v51 = vadd.f32 %v7593_v16, %v15110_v17 }
 0x587   : > { %7722 = vst [vmem:[%s15116_s27 + $0x270] sm:$0xff] %v8295_v21 }
 0x588   : > { %7723 = vst.msk [vmem:[%s15116_s27 + $0x278] sm:$0xff] %vm580_vm0, %v8296_v51 }
 0x58a   : > { %v7597_v25 = vpop.f32.mrb[180].mxu1 }
 0x58b   : > { %v8297_v30 = vadd.f32 %v7597_v25, %v15106_v11  ;;  %v7599_v5 = vpop.f32.mrb[181].mxu1 }
 0x58c   : > { %v8298_v50 = vadd.f32 %v7599_v5, %v15110_v17  ;;  %v7601_v23 = vpop.f32.mrb[182].mxu1 }
 0x58d   : > { %7724 = vst [vmem:[%s15116_s27 + $0x280] sm:$0xff] %v8297_v30  ;;  %v8299_v39 = vadd.f32 %v7601_v23, %v15106_v11  ;;  %v7603_v12 = vpop.f32.mrb[183].mxu1 }
 0x58e   : > { %7725 = vst.msk [vmem:[%s15116_s27 + $0x288] sm:$0xff] %vm580_vm0, %v8298_v50  ;;  %v8300_v53 = vadd.f32 %v7603_v12, %v15110_v17 }
 0x58f   : > { %7726 = vst [vmem:[%s15116_s27 + $0x290] sm:$0xff] %v8299_v39 }
 0x590   : > { %7727 = vst.msk [vmem:[%s15116_s27 + $0x298] sm:$0xff] %vm580_vm0, %v8300_v53 }
 0x592   : > { %v7607_v31 = vpop.f32.mrb[184].mxu1 }
 0x593   : > { %v8301_v13 = vadd.f32 %v7607_v31, %v15106_v11  ;;  %v7609_v54 = vpop.f32.mrb[185].mxu1 }
 0x594   : > { %v8302_v46 = vadd.f32 %v7609_v54, %v15110_v17  ;;  %v7611_v14 = vpop.f32.mrb[186].mxu1 }
 0x595   : > { %7728 = vst [vmem:[%s15116_s27 + $0x2a0] sm:$0xff] %v8301_v13  ;;  %v8303_v43 = vadd.f32 %v7611_v14, %v15106_v11  ;;  %v7613_v1 = vpop.f32.mrb[187].mxu1 }
 0x596   : > { %7729 = vst.msk [vmem:[%s15116_s27 + $0x2a8] sm:$0xff] %vm580_vm0, %v8302_v46  ;;  %v8304_v59 = vadd.f32 %v7613_v1, %v15110_v17 }
 0x597   : > { %7730 = vst [vmem:[%s15116_s27 + $0x2b0] sm:$0xff] %v8303_v43 }
 0x598   : > { %7731 = vst.msk [vmem:[%s15116_s27 + $0x2b8] sm:$0xff] %vm580_vm0, %v8304_v59 }
 0x59a   : > { %v7617_v8 = vpop.f32.mrb[188].mxu1 }
 0x59b   : > { %v8305_v3 = vadd.f32 %v7617_v8, %v15106_v11  ;;  %v7619_v38 = vpop.f32.mrb[189].mxu1 }
 0x59c   : > { %v8306_v19 = vadd.f32 %v7619_v38, %v15110_v17  ;;  %v7621_v32 = vpop.f32.mrb[190].mxu1 }
 0x59d   : > { %7732 = vst [vmem:[%s15116_s27 + $0x2c0] sm:$0xff] %v8305_v3  ;;  %v8307_v18 = vadd.f32 %v7621_v32, %v15106_v11  ;;  %v7623_v10 = vpop.f32.mrb[191].mxu1 }
 0x59e   : > { %7733 = vst.msk [vmem:[%s15116_s27 + $0x2c8] sm:$0xff] %vm580_vm0, %v8306_v19  ;;  %v8308_v4 = vadd.f32 %v7623_v10, %v15110_v17 }
 0x59f   : > { %7734 = vst [vmem:[%s15116_s27 + $0x2d0] sm:$0xff] %v8307_v18 }
 0x5a0   : > { %7735 = vst.msk [vmem:[%s15116_s27 + $0x2d8] sm:$0xff] %vm580_vm0, %v8308_v4 }
 0x5a2   : > { %v7627_v20 = vpop.f32.mrb[192].mxu1 }
 0x5a3   : > { %v8309_v48 = vadd.f32 %v7627_v20, %v15106_v11  ;;  %v7629_v47 = vpop.f32.mrb[193].mxu1 }
 0x5a4   : > { %v8310_v45 = vadd.f32 %v7629_v47, %v15110_v17  ;;  %v7631_v56 = vpop.f32.mrb[194].mxu1 }
 0x5a5   : > { %7736 = vst [vmem:[%s15116_s27 + $0x2e0] sm:$0xff] %v8309_v48  ;;  %v8311_v33 = vadd.f32 %v7631_v56, %v15106_v11  ;;  %v7633_v41 = vpop.f32.mrb[195].mxu1 }
 0x5a6   : > { %7737 = vst.msk [vmem:[%s15116_s27 + $0x2e8] sm:$0xff] %vm580_vm0, %v8310_v45  ;;  %v8312_v6 = vadd.f32 %v7633_v41, %v15110_v17 }
 0x5a7   : > { %7738 = vst [vmem:[%s15116_s27 + $0x2f0] sm:$0xff] %v8311_v33 }
 0x5a8   : > { %7739 = vst.msk [vmem:[%s15116_s27 + $0x2f8] sm:$0xff] %vm580_vm0, %v8312_v6 }
 0x5aa   : > { %v7637_v26 = vpop.f32.mrb[196].mxu1 }
 0x5ab   : > { %v8313_v44 = vadd.f32 %v7637_v26, %v15106_v11  ;;  %v7639_v0 = vpop.f32.mrb[197].mxu1 }
 0x5ac   : > { %v8314_v40 = vadd.f32 %v7639_v0, %v15110_v17  ;;  %v7641_v55 = vpop.f32.mrb[198].mxu1 }
 0x5ad   : > { %7740 = vst [vmem:[%s15116_s27 + $0x300] sm:$0xff] %v8313_v44  ;;  %v7642_v35 = vpop.f32.mrb[199].mxu1 }
 0x5ae   : > { %7741 = vst.msk [vmem:[%s15116_s27 + $0x308] sm:$0xff] %vm580_vm0, %v8314_v40 }
 0x5af PF: > { %s16_s21 = sadd.s32 1, %s9568_s21  }
 0x5b0   : > { %p13_p4 = scmp.ge.s32.totalorder %s16_s21, 4  }
 0x5b2   :  { %15 = sbr.rel (!%p13_p4) target bundleno = 1 (0x1), region = 77 }

</bundles_post_ra>
